<compile_context>
chip_gen: v7x
topology: tpu7x:2x2x1
jax: 0.10.0
libtpu: 0.0.40
codegen_flags: <defaults>
</compile_context>

<pallas_src>
import numpy as np
import jax
import jax.numpy as jnp
from jax.experimental import pallas as pl
from jax.experimental.pallas import tpu as pltpu

# --- hyperparameters mirroring the PyTorch module's __init__ (args) ---
NODE_FEAT = 133          # fixed in Encoder: AttentiveFPGNN(133, 14, ...)
EDGE_FEAT = 14
RADIUS = 2               # args.radius  -> GetContext + (RADIUS-1) GNNLayers
HIDDEN = 32              # args.hidden_size
T_STEPS = 2              # args.T       -> readout GRU timesteps
L_GNN = RADIUS - 1
N_NODES = 8              # padded nodes per graph
BATCH = 8                # total graphs in the demo
B_TILE = 4               # graphs per grid step

H = HIDDEN
H3 = 3 * HIDDEN


# ----------------- parameter slab layouts (shared by wrapper & kernel) -----------------
def _build_layout(entries):
    layout, off = {}, 0
    for name, width in entries:
        layout[name] = (off, width)
        off += width
    return layout, off


_WH_ENTRIES = [("w_pe2_dst", 1), ("w_pe2_e1", 1), ("w_et", H),
               ("g1_wih", H3), ("g1_whh", H3)]
for _l in range(L_GNN):
    _WH_ENTRIES += [(f"w_pe_{_l}", 2), (f"w_pn2_{_l}", H),
                    (f"g2_wih_{_l}", H3), (f"g2_whh_{_l}", H3)]
for _t in range(T_STEPS):
    _WH_ENTRIES += [(f"w_cl_g_{_t}", 1), (f"w_cl_n_{_t}", 1), (f"w_prn_{_t}", H),
                    (f"gr_wih_{_t}", H3), (f"gr_whh_{_t}", H3)]
WH_LAYOUT, WH_COLS = _build_layout(_WH_ENTRIES)

_B_ENTRIES = [("b_pn", H), ("b_pe1", H), ("b_pe2", 1), ("b_et", H),
              ("g1_bih", H3), ("g1_bhh", H3)]
for _l in range(L_GNN):
    _B_ENTRIES += [(f"b_pe_{_l}", 1), (f"b_pn2_{_l}", H),
                   (f"g2_bih_{_l}", H3), (f"g2_bhh_{_l}", H3)]
for _t in range(T_STEPS):
    _B_ENTRIES += [(f"b_cl_{_t}", 1), (f"b_prn_{_t}", H),
                   (f"gr_bih_{_t}", H3), (f"gr_bhh_{_t}", H3)]
B_LAYOUT, B_COLS = _build_layout(_B_ENTRIES)


# ----------------- small math helpers (traced inside the kernel) -----------------
def _mm(a, b):
    return jnp.dot(a, b, preferred_element_type=jnp.float32)


def _leaky_relu(x):
    return jnp.where(x >= 0, x, 0.01 * x)


def _elu(x):
    return jnp.where(x > 0, x, jnp.exp(jnp.minimum(x, 0.0)) - 1.0)


def _gru_fused(x, hstate, wih, whh, bih, bhh):
    # PyTorch GRUCell semantics with fused gate matmuls.
    # wih/whh: [H_in, 3H] (used as x @ W, gate order r|z|n), bih/bhh: [1, 3H].
    gi = _mm(x, wih) + bih                    # [R, 3H]
    gh = _mm(hstate, whh) + bhh               # [R, 3H]
    r = jax.nn.sigmoid(gi[:, :H] + gh[:, :H])
    z = jax.nn.sigmoid(gi[:, H:2 * H] + gh[:, H:2 * H])
    n = jnp.tanh(gi[:, 2 * H:] + r * gh[:, 2 * H:])
    return (1.0 - z) * n + z * hstate


def _edge_softmax(logits, adj):
    # logits/adj: [M, N, 1]; DGL edge_softmax = softmax over incoming edges (axis=1 = src j)
    neg = jnp.float32(-1e30)
    lm = jnp.where(adj > 0, logits, neg)
    mx = jnp.max(lm, axis=1, keepdims=True)
    p = jnp.exp(lm - mx) * adj
    s = jnp.sum(p, axis=1, keepdims=True)
    return p / jnp.where(s > 0, s, 1.0)


# --------------------------------- the kernel ---------------------------------
def encoder_kernel(h_ref, e_ref, adj_ref, nm_ref,
                   w_in_ref, w_e_ref, w_h_ref, b_ref, out_ref):
    BT = nm_ref.shape[1]
    N = nm_ref.shape[2]

    def wcol(name):
        off, wd = WH_LAYOUT[name]
        return w_h_ref[:, off:off + wd]

    def bias(name):
        off, wd = B_LAYOUT[name]
        return b_ref[:, off:off + wd]

    h2 = h_ref[0]                                  # [BT*N, F]
    e2 = e_ref[0]                                  # [BT*N*N, E]
    adj_f = adj_ref[0]                             # [BT*N, N, 1]
    nm3 = nm_ref[0]                                # [BT, N, 1]

    # ---------------- AttentiveFPGNN: GetContext ----------------
    hv_src = _mm(h2, w_in_ref[...])                # [BT*N, 2H] (project_node | project_edge1-src)
    hv_new = _leaky_relu(hv_src[:, :H] + bias("b_pn"))        # [BT*N, H]
    src_p = hv_src[:, H:]                                     # [BT*N, H]
    e_p = _mm(e2, w_e_ref[...])                               # [BT*N*N, H]
    src_b = jnp.broadcast_to(src_p.reshape(BT, 1, N, H),
                             (BT, N, N, H)).reshape(BT * N * N, H)
    he1 = _leaky_relu(src_b + e_p + bias("b_pe1"))            # [BT*N*N, H]

    dst_sc = _mm(hv_new, wcol("w_pe2_dst"))[:, :, None]       # [BT*N, 1, 1]
    e1_sc = _mm(he1, wcol("w_pe2_e1")).reshape(BT * N, N, 1)  # [BT*N, N, 1]
    logits = _leaky_relu(dst_sc + e1_sc + bias("b_pe2"))      # [BT*N, N, 1]
    alpha = _edge_softmax(logits, adj_f)                      # [BT*N, N, 1]

    et = _mm(he1, wcol("w_et")) + bias("b_et")                # [BT*N*N, H]
    c = jnp.sum(alpha * et.reshape(BT * N, N, H), axis=1)     # [BT*N, H]
    node = jax.nn.relu(_gru_fused(_elu(c), hv_new,
                                  wcol("g1_wih"), wcol("g1_whh"),
                                  bias("g1_bih"), bias("g1_bhh")))

    # ---------------- AttentiveFPGNN: GNNLayer x (radius - 1) ----------------
    for l in range(L_GNN):
        sc = _mm(node, wcol(f"w_pe_{l}"))                     # [BT*N, 2]  (dst | src scores)
        dst_sc = sc[:, 0:1][:, :, None]                       # [BT*N, 1, 1]
        src_sc = sc[:, 1:2].reshape(BT, N, 1)                 # [BT, N, 1]
        src_b2 = jnp.broadcast_to(src_sc[:, None, :, :],
                                  (BT, N, N, 1)).reshape(BT * N, N, 1)
        logits = _leaky_relu(dst_sc + src_b2 + bias(f"b_pe_{l}"))
        alpha = _edge_softmax(logits, adj_f)                  # [BT*N, N, 1]
        hv_p = _mm(node, wcol(f"w_pn2_{l}")) + bias(f"b_pn2_{l}")     # [BT*N, H]
        hv_src2 = jnp.broadcast_to(hv_p.reshape(BT, 1, N, H),
                                   (BT, N, N, H)).reshape(BT * N, N, H)
        c = jnp.sum(alpha * hv_src2, axis=1)                  # [BT*N, H]
        node = jax.nn.relu(_gru_fused(_elu(c), node,
                                      wcol(f"g2_wih_{l}"), wcol(f"g2_whh_{l}"),
                                      bias(f"g2_bih_{l}"), bias(f"g2_bhh_{l}")))

    # Encoder.forward: h = relu(attfp(...)) (idempotent here, kept for fidelity)
    node = jax.nn.relu(node)
    node3 = node.reshape(BT, N, H)

    # ---------------- AttentiveFPReadout ----------------
    g_feats = jnp.sum(node3 * nm3, axis=1)                    # [BT, H] = dgl.sum_nodes
    for t in range(T_STEPS):
        gz = _mm(jax.nn.relu(g_feats), wcol(f"w_cl_g_{t}"))[:, :, None]   # [BT, 1, 1]
        nz = _mm(node, wcol(f"w_cl_n_{t}")).reshape(BT, N, 1)             # [BT, N, 1]
        z = _leaky_relu(gz + nz + bias(f"b_cl_{t}"))                      # [BT, N, 1]
        # dgl.softmax_nodes over valid nodes
        zm = jnp.where(nm3 > 0, z, jnp.float32(-1e30))
        zmax = jnp.max(zm, axis=1, keepdims=True)
        p = jnp.exp(zm - zmax) * nm3
        s = jnp.sum(p, axis=1, keepdims=True)
        a = p / jnp.where(s > 0, s, 1.0)                                  # [BT, N, 1]
        hv_p = (_mm(node, wcol(f"w_prn_{t}")) + bias(f"b_prn_{t}")).reshape(BT, N, H)
        g_repr = _elu(jnp.sum(a * hv_p, axis=1))                          # [BT, H]
        g_feats = _gru_fused(jax.nn.relu(g_repr), g_feats,
                             wcol(f"gr_wih_{t}"), wcol(f"gr_whh_{t}"),
                             bias(f"gr_bih_{t}"), bias(f"gr_bhh_{t}"))    # [BT, H]

    out_ref[0] = g_feats


# --------------------------------- wrapper ---------------------------------
def pack_params(params):
    """Pack the logical parameter dict into 4 slabs consumed by the kernel."""
    def col(x):
        return jnp.reshape(x, (H, 1))

    def gru_w(w):   # [3, Hin, H] -> [Hin, 3H] (gate order r|z|n preserved)
        return jnp.concatenate([w[0], w[1], w[2]], axis=1)

    def gru_b(b):   # [3, 1, H] -> [1, 3H]
        return jnp.concatenate([b[0], b[1], b[2]], axis=1)

    w_in = jnp.concatenate([params["w_pn"], params["w_pe1_src"]], axis=1)   # [F, 2H]
    w_e = params["w_pe1_e"]                                                 # [E, H]

    wh = {
        "w_pe2_dst": col(params["w_pe2_dst"]),
        "w_pe2_e1": col(params["w_pe2_e1"]),
        "w_et": params["w_et"],
        "g1_wih": gru_w(params["g1_wih"]),
        "g1_whh": gru_w(params["g1_whh"]),
    }
    bb = {
        "b_pn": params["b_pn"], "b_pe1": params["b_pe1"], "b_pe2": params["b_pe2"],
        "b_et": params["b_et"],
        "g1_bih": gru_b(params["g1_bih"]), "g1_bhh": gru_b(params["g1_bhh"]),
    }
    for l in range(L_GNN):
        wh[f"w_pe_{l}"] = jnp.concatenate(
            [col(params["w_pe_dst"][l]), col(params["w_pe_src"][l])], axis=1)
        wh[f"w_pn2_{l}"] = params["w_pn2"][l]
        wh[f"g2_wih_{l}"] = gru_w(params["g2_wih"][l])
        wh[f"g2_whh_{l}"] = gru_w(params["g2_whh"][l])
        bb[f"b_pe_{l}"] = params["b_pe"][l]
        bb[f"b_pn2_{l}"] = params["b_pn2"][l]
        bb[f"g2_bih_{l}"] = gru_b(params["g2_bih"][l])
        bb[f"g2_bhh_{l}"] = gru_b(params["g2_bhh"][l])
    for t in range(T_STEPS):
        wh[f"w_cl_g_{t}"] = col(params["w_cl_g"][t])
        wh[f"w_cl_n_{t}"] = col(params["w_cl_n"][t])
        wh[f"w_prn_{t}"] = params["w_prn"][t]
        wh[f"gr_wih_{t}"] = gru_w(params["gr_wih"][t])
        wh[f"gr_whh_{t}"] = gru_w(params["gr_whh"][t])
        bb[f"b_cl_{t}"] = params["b_cl"][t]
        bb[f"b_prn_{t}"] = params["b_prn"][t]
        bb[f"gr_bih_{t}"] = gru_b(params["gr_bih"][t])
        bb[f"gr_bhh_{t}"] = gru_b(params["gr_bhh"][t])

    w_h = jnp.concatenate([wh[name] for name, _ in _WH_ENTRIES], axis=1)   # [H, WH_COLS]
    b_all = jnp.concatenate([bb[name] for name, _ in _B_ENTRIES], axis=1)  # [1, B_COLS]
    return w_in, w_e, w_h, b_all


def encoder_forward(h, e_flat, adj, nmask, params, b_tile=B_TILE):
    B = h.shape[0]
    assert B % b_tile == 0, (B, b_tile)
    G = B // b_tile
    N, F, E, Hh = N_NODES, NODE_FEAT, EDGE_FEAT, HIDDEN
    NN = N * N

    w_in, w_e, w_h, b_all = pack_params(params)

    # Pre-fold the graph axis into the matmul row axis (done in XLA, free).
    h_r = h.reshape(G, b_tile * N, F)
    e_r = e_flat.reshape(G, b_tile * NN, E)
    adj_r = adj.reshape(G, b_tile * N, N, 1)
    nm_r = nmask.reshape(G, b_tile, N, 1)

    in_specs = [
        pl.BlockSpec((1, b_tile * N, F), lambda g: (g, 0, 0)),
        pl.BlockSpec((1, b_tile * NN, E), lambda g: (g, 0, 0)),
        pl.BlockSpec((1, b_tile * N, N, 1), lambda g: (g, 0, 0, 0)),
        pl.BlockSpec((1, b_tile, N, 1), lambda g: (g, 0, 0, 0)),
        pl.BlockSpec(w_in.shape, lambda g: (0, 0)),
        pl.BlockSpec(w_e.shape, lambda g: (0, 0)),
        pl.BlockSpec(w_h.shape, lambda g: (0, 0)),
        pl.BlockSpec(b_all.shape, lambda g: (0, 0)),
    ]

    out = pl.pallas_call(
        encoder_kernel,
        out_shape=jax.ShapeDtypeStruct((G, b_tile, Hh), jnp.float32),
        grid=(G,),
        in_specs=in_specs,
        out_specs=pl.BlockSpec((1, b_tile, Hh), lambda g: (g, 0, 0)),
        compiler_params=pltpu.CompilerParams(dimension_semantics=("parallel",)),
    )(h_r, e_r, adj_r, nm_r, w_in, w_e, w_h, b_all)
    return out.reshape(B, Hh)


def init_params(key):
    Hh, F, E, L, T = HIDDEN, NODE_FEAT, EDGE_FEAT, L_GNN, T_STEPS
    shapes = {
        # GetContext
        "w_pn": (F, Hh), "b_pn": (1, Hh),
        "w_pe1_src": (F, Hh), "w_pe1_e": (E, Hh), "b_pe1": (1, Hh),
        "w_pe2_dst": (1, Hh), "w_pe2_e1": (1, Hh), "b_pe2": (1, 1),
        "w_et": (Hh, Hh), "b_et": (1, Hh),
        "g1_wih": (3, Hh, Hh), "g1_whh": (3, Hh, Hh), "g1_bih": (3, 1, Hh), "g1_bhh": (3, 1, Hh),
        # GNN layers
        "w_pe_dst": (L, 1, Hh), "w_pe_src": (L, 1, Hh), "b_pe": (L, 1, 1),
        "w_pn2": (L, Hh, Hh), "b_pn2": (L, 1, Hh),
        "g2_wih": (L, 3, Hh, Hh), "g2_whh": (L, 3, Hh, Hh),
        "g2_bih": (L, 3, 1, Hh), "g2_bhh": (L, 3, 1, Hh),
        # Readout
        "w_cl_g": (T, 1, Hh), "w_cl_n": (T, 1, Hh), "b_cl": (T, 1, 1),
        "w_prn": (T, Hh, Hh), "b_prn": (T, 1, Hh),
        "gr_wih": (T, 3, Hh, Hh), "gr_whh": (T, 3, Hh, Hh),
        "gr_bih": (T, 3, 1, Hh), "gr_bhh": (T, 3, 1, Hh),
    }
    keys = jax.random.split(key, len(shapes))
    return {name: 0.1 * jax.random.normal(k, shp, dtype=jnp.float32)
            for (name, shp), k in zip(shapes.items(), keys)}


if __name__ == "__main__":
    key = jax.random.PRNGKey(0)
    kh, ke, kp = jax.random.split(key, 3)
    B, N = BATCH, N_NODES

    h = jax.random.normal(kh, (B, N, NODE_FEAT), dtype=jnp.float32)
    e = jax.random.normal(ke, (B, N * N, EDGE_FEAT), dtype=jnp.float32)

    # Deterministic graphs: bidirectional ring over the first n_valid nodes of each graph.
    n_valid = [N - (b % 3) for b in range(B)]
    adj_np = np.zeros((B, N, N, 1), dtype=np.float32)
    nmask_np = np.zeros((B, N, 1), dtype=np.float32)
    for b in range(B):
        nv = n_valid[b]
        nmask_np[b, :nv, 0] = 1.0
        for i in range(nv):
            adj_np[b, i, (i - 1) % nv, 0] = 1.0   # edge src (i-1) -> dst i
            adj_np[b, i, (i + 1) % nv, 0] = 1.0   # edge src (i+1) -> dst i
    adj = jnp.asarray(adj_np)
    nmask = jnp.asarray(nmask_np)

    params = init_params(kp)

    hg = encoder_forward(h, e, adj, nmask, params)
    hg = jax.block_until_ready(hg)
    assert hg.shape == (B, HIDDEN), hg.shape
    assert bool(jnp.all(jnp.isfinite(hg)))
    print("KERNEL_OK")
</pallas_src>

<mosaic_0001>
module attributes {stable_mosaic.version = 11 : i64} {
  func.func @encoder_kernel(%arg0: i32, %arg1: memref<1x32x133xf32, #tpu.memory_space<vmem>>, %arg2: memref<1x256x14xf32, #tpu.memory_space<vmem>>, %arg3: memref<1x32x8x1xf32, #tpu.memory_space<vmem>>, %arg4: memref<1x4x8x1xf32, #tpu.memory_space<vmem>>, %arg5: memref<133x64xf32, #tpu.memory_space<vmem>>, %arg6: memref<14x32xf32, #tpu.memory_space<vmem>>, %arg7: memref<32x904xf32, #tpu.memory_space<vmem>>, %arg8: memref<1x964xf32, #tpu.memory_space<vmem>>, %arg9: memref<1x4x32xf32, #tpu.memory_space<vmem>>) attributes {dimension_semantics = [#tpu.dimension_semantics<parallel>], iteration_bounds = array<i64: 2>, scalar_prefetch = 0 : i64, scratch_operands = 0 : i64, tpu.core_type = #tpu.core_type<tc>, window_params = [{transform_indices = @transform_0, window_bounds = array<i64: 1, 32, 133>}, {transform_indices = @transform_1, window_bounds = array<i64: 1, 256, 14>}, {transform_indices = @transform_2, window_bounds = array<i64: 1, 32, 8, 1>}, {transform_indices = @transform_3, window_bounds = array<i64: 1, 4, 8, 1>}, {pipeline_mode = #tpu.pipeline_mode<synchronous>, transform_indices = @transform_4, window_bounds = array<i64: 133, 64>}, {pipeline_mode = #tpu.pipeline_mode<synchronous>, transform_indices = @transform_5, window_bounds = array<i64: 14, 32>}, {pipeline_mode = #tpu.pipeline_mode<synchronous>, transform_indices = @transform_6, window_bounds = array<i64: 32, 904>}, {pipeline_mode = #tpu.pipeline_mode<synchronous>, transform_indices = @transform_7, window_bounds = array<i64: 1, 964>}, {transform_indices = @transform_8, window_bounds = array<i64: 1, 4, 32>}]} {
    %c0 = arith.constant 0 : index
    %c0_0 = arith.constant 0 : index
    %c0_1 = arith.constant 0 : index
    %0 = vector.load %arg1[%c0, %c0_0, %c0_1] : memref<1x32x133xf32, #tpu.memory_space<vmem>>, vector<1x32x133xf32>
    %1 = vector.shape_cast %0 : vector<1x32x133xf32> to vector<32x133xf32>
    %c0_2 = arith.constant 0 : index
    %c0_3 = arith.constant 0 : index
    %c0_4 = arith.constant 0 : index
    %2 = vector.load %arg2[%c0_2, %c0_3, %c0_4] : memref<1x256x14xf32, #tpu.memory_space<vmem>>, vector<1x256x14xf32>
    %3 = vector.shape_cast %2 : vector<1x256x14xf32> to vector<256x14xf32>
    %c0_5 = arith.constant 0 : index
    %c0_6 = arith.constant 0 : index
    %c0_7 = arith.constant 0 : index
    %c0_8 = arith.constant 0 : index
    %4 = vector.load %arg3[%c0_5, %c0_6, %c0_7, %c0_8] : memref<1x32x8x1xf32, #tpu.memory_space<vmem>>, vector<1x32x8x1xf32>
    %5 = vector.shape_cast %4 : vector<1x32x8x1xf32> to vector<32x8x1xf32>
    %c0_9 = arith.constant 0 : index
    %c0_10 = arith.constant 0 : index
    %c0_11 = arith.constant 0 : index
    %c0_12 = arith.constant 0 : index
    %6 = vector.load %arg4[%c0_9, %c0_10, %c0_11, %c0_12] : memref<1x4x8x1xf32, #tpu.memory_space<vmem>>, vector<1x4x8x1xf32>
    %7 = vector.shape_cast %6 : vector<1x4x8x1xf32> to vector<4x8x1xf32>
    %c0_13 = arith.constant 0 : index
    %c0_14 = arith.constant 0 : index
    %8 = vector.load %arg5[%c0_13, %c0_14] : memref<133x64xf32, #tpu.memory_space<vmem>>, vector<133x64xf32>
    %cst = arith.constant dense<0.000000e+00> : vector<32x64xf32>
    %9 = tpu.matmul %1, %8, %cst {dimension_numbers = #tpu.dot_dimension_numbers<[1], [0], [0], [1], [0, 0, 1, 1], [], []>} : vector<32x133xf32>, vector<133x64xf32>, vector<32x64xf32> -> vector<32x64xf32>
    %10 = vector.extract_strided_slice %9 {offsets = [0, 0], sizes = [32, 32], strides = [1, 1]} : vector<32x64xf32> to vector<32x32xf32>
    %c0_15 = arith.constant 0 : index
    %c0_16 = arith.constant 0 : index
    %11 = vector.load %arg8[%c0_15, %c0_16] : memref<1x964xf32, #tpu.memory_space<vmem>>, vector<1x32xf32>
    %12 = vector.broadcast %11 : vector<1x32xf32> to vector<32x32xf32>
    %13 = arith.addf %10, %12 : vector<32x32xf32>
    %cst_17 = arith.constant 0.000000e+00 : f32
    %14 = vector.broadcast %cst_17 : f32 to vector<32x32xf32>
    %15 = arith.cmpf oge, %13, %14 : vector<32x32xf32>
    %cst_18 = arith.constant 0.00999999977 : f32
    %16 = vector.broadcast %cst_18 : f32 to vector<32x32xf32>
    %17 = arith.mulf %16, %13 : vector<32x32xf32>
    %18 = arith.select %15, %13, %17 : vector<32x32xi1>, vector<32x32xf32>
    %19 = vector.extract_strided_slice %9 {offsets = [0, 32], sizes = [32, 32], strides = [1, 1]} : vector<32x64xf32> to vector<32x32xf32>
    %c0_19 = arith.constant 0 : index
    %c0_20 = arith.constant 0 : index
    %20 = vector.load %arg6[%c0_19, %c0_20] : memref<14x32xf32, #tpu.memory_space<vmem>>, vector<14x32xf32>
    %cst_21 = arith.constant dense<0.000000e+00> : vector<256x32xf32>
    %21 = tpu.matmul %3, %20, %cst_21 {dimension_numbers = #tpu.dot_dimension_numbers<[1], [0], [0], [1], [0, 0, 1, 1], [], []>} : vector<256x14xf32>, vector<14x32xf32>, vector<256x32xf32> -> vector<256x32xf32>
    %22 = vector.shape_cast %19 : vector<32x32xf32> to vector<4x1x8x32xf32>
    %23 = vector.shape_cast %22 : vector<4x1x8x32xf32> to vector<4x1x8x32xf32>
    %24 = vector.broadcast %23 : vector<4x1x8x32xf32> to vector<4x8x8x32xf32>
    %25 = vector.shape_cast %24 : vector<4x8x8x32xf32> to vector<256x32xf32>
    %26 = arith.addf %25, %21 : vector<256x32xf32>
    %c0_22 = arith.constant 0 : index
    %c32 = arith.constant 32 : index
    %27 = vector.load %arg8[%c0_22, %c32] : memref<1x964xf32, #tpu.memory_space<vmem>>, vector<1x32xf32>
    %28 = vector.broadcast %27 : vector<1x32xf32> to vector<256x32xf32>
    %29 = arith.addf %26, %28 : vector<256x32xf32>
    %cst_23 = arith.constant 0.000000e+00 : f32
    %30 = vector.broadcast %cst_23 : f32 to vector<256x32xf32>
    %31 = arith.cmpf oge, %29, %30 : vector<256x32xf32>
    %cst_24 = arith.constant 0.00999999977 : f32
    %32 = vector.broadcast %cst_24 : f32 to vector<256x32xf32>
    %33 = arith.mulf %32, %29 : vector<256x32xf32>
    %34 = arith.select %31, %29, %33 : vector<256x32xi1>, vector<256x32xf32>
    %c0_25 = arith.constant 0 : index
    %c0_26 = arith.constant 0 : index
    %35 = vector.load %arg7[%c0_25, %c0_26] : memref<32x904xf32, #tpu.memory_space<vmem>>, vector<32x1xf32>
    %cst_27 = arith.constant dense<0.000000e+00> : vector<32x1xf32>
    %36 = tpu.matmul %18, %35, %cst_27 {dimension_numbers = #tpu.dot_dimension_numbers<[1], [0], [0], [1], [0, 0, 1, 1], [], []>} : vector<32x32xf32>, vector<32x1xf32>, vector<32x1xf32> -> vector<32x1xf32>
    %37 = vector.shape_cast %36 : vector<32x1xf32> to vector<32x1x1xf32>
    %c0_28 = arith.constant 0 : index
    %c1 = arith.constant 1 : index
    %38 = vector.load %arg7[%c0_28, %c1] : memref<32x904xf32, #tpu.memory_space<vmem>>, vector<32x1xf32>
    %cst_29 = arith.constant dense<0.000000e+00> : vector<256x1xf32>
    %39 = tpu.matmul %34, %38, %cst_29 {dimension_numbers = #tpu.dot_dimension_numbers<[1], [0], [0], [1], [0, 0, 1, 1], [], []>} : vector<256x32xf32>, vector<32x1xf32>, vector<256x1xf32> -> vector<256x1xf32>
    %40 = vector.shape_cast %39 : vector<256x1xf32> to vector<32x8x1xf32>
    %41 = vector.broadcast %37 : vector<32x1x1xf32> to vector<32x8x1xf32>
    %42 = arith.addf %41, %40 : vector<32x8x1xf32>
    %c0_30 = arith.constant 0 : index
    %c64 = arith.constant 64 : index
    %43 = vector.load %arg8[%c0_30, %c64] : memref<1x964xf32, #tpu.memory_space<vmem>>, vector<1x1xf32>
    %44 = vector.shape_cast %43 : vector<1x1xf32> to vector<1x1x1xf32>
    %45 = vector.broadcast %44 : vector<1x1x1xf32> to vector<32x8x1xf32>
    %46 = arith.addf %42, %45 : vector<32x8x1xf32>
    %cst_31 = arith.constant 0.000000e+00 : f32
    %47 = vector.broadcast %cst_31 : f32 to vector<32x8x1xf32>
    %48 = arith.cmpf oge, %46, %47 : vector<32x8x1xf32>
    %cst_32 = arith.constant 0.00999999977 : f32
    %49 = vector.broadcast %cst_32 : f32 to vector<32x8x1xf32>
    %50 = arith.mulf %49, %46 : vector<32x8x1xf32>
    %51 = arith.select %48, %46, %50 : vector<32x8x1xi1>, vector<32x8x1xf32>
    %cst_33 = arith.constant 0.000000e+00 : f32
    %52 = vector.broadcast %cst_33 : f32 to vector<32x8x1xf32>
    %53 = arith.cmpf ogt, %5, %52 : vector<32x8x1xf32>
    %cst_34 = arith.constant -1.000000e+30 : f32
    %54 = vector.broadcast %cst_34 : f32 to vector<32x8x1xf32>
    %55 = arith.select %53, %51, %54 : vector<32x8x1xi1>, vector<32x8x1xf32>
    %cst_35 = arith.constant dense<0xFF800000> : vector<32x1xf32>
    %56 = vector.multi_reduction <maximumf>, %55, %cst_35 [1] : vector<32x8x1xf32> to vector<32x1xf32>
    %57 = vector.shape_cast %56 : vector<32x1xf32> to vector<32x1x1xf32>
    %58 = vector.broadcast %57 : vector<32x1x1xf32> to vector<32x8x1xf32>
    %59 = arith.subf %55, %58 : vector<32x8x1xf32>
    %60 = math.exp %59 : vector<32x8x1xf32>
    %61 = arith.mulf %60, %5 : vector<32x8x1xf32>
    %cst_36 = arith.constant dense<0.000000e+00> : vector<32x1xf32>
    %62 = vector.multi_reduction <add>, %61, %cst_36 [1] : vector<32x8x1xf32> to vector<32x1xf32>
    %63 = vector.shape_cast %62 : vector<32x1xf32> to vector<32x1x1xf32>
    %cst_37 = arith.constant 0.000000e+00 : f32
    %64 = vector.broadcast %cst_37 : f32 to vector<32x1x1xf32>
    %65 = arith.cmpf ogt, %63, %64 : vector<32x1x1xf32>
    %cst_38 = arith.constant 1.000000e+00 : f32
    %66 = vector.broadcast %cst_38 : f32 to vector<32x1x1xf32>
    %67 = arith.select %65, %63, %66 : vector<32x1x1xi1>, vector<32x1x1xf32>
    %68 = vector.broadcast %67 : vector<32x1x1xf32> to vector<32x8x1xf32>
    %69 = arith.divf %61, %68 : vector<32x8x1xf32>
    %c0_39 = arith.constant 0 : index
    %c2 = arith.constant 2 : index
    %70 = vector.load %arg7[%c0_39, %c2] : memref<32x904xf32, #tpu.memory_space<vmem>>, vector<32x32xf32>
    %cst_40 = arith.constant dense<0.000000e+00> : vector<256x32xf32>
    %71 = tpu.matmul %34, %70, %cst_40 {dimension_numbers = #tpu.dot_dimension_numbers<[1], [0], [0], [1], [0, 0, 1, 1], [], []>} : vector<256x32xf32>, vector<32x32xf32>, vector<256x32xf32> -> vector<256x32xf32>
    %c0_41 = arith.constant 0 : index
    %c65 = arith.constant 65 : index
    %72 = vector.load %arg8[%c0_41, %c65] : memref<1x964xf32, #tpu.memory_space<vmem>>, vector<1x32xf32>
    %73 = vector.broadcast %72 : vector<1x32xf32> to vector<256x32xf32>
    %74 = arith.addf %71, %73 : vector<256x32xf32>
    %75 = vector.shape_cast %74 : vector<256x32xf32> to vector<32x8x32xf32>
    %76 = vector.broadcast %69 : vector<32x8x1xf32> to vector<32x8x32xf32>
    %77 = arith.mulf %76, %75 : vector<32x8x32xf32>
    %cst_42 = arith.constant dense<0.000000e+00> : vector<32x32xf32>
    %78 = vector.multi_reduction <add>, %77, %cst_42 [1] : vector<32x8x32xf32> to vector<32x32xf32>
    %cst_43 = arith.constant 0.000000e+00 : f32
    %79 = vector.broadcast %cst_43 : f32 to vector<32x32xf32>
    %80 = arith.cmpf ogt, %78, %79 : vector<32x32xf32>
    %cst_44 = arith.constant 0.000000e+00 : f32
    %81 = vector.broadcast %cst_44 : f32 to vector<32x32xf32>
    %82 = arith.minimumf %78, %81 : vector<32x32xf32>
    %83 = math.exp %82 : vector<32x32xf32>
    %cst_45 = arith.constant 1.000000e+00 : f32
    %84 = vector.broadcast %cst_45 : f32 to vector<32x32xf32>
    %85 = arith.subf %83, %84 : vector<32x32xf32>
    %86 = arith.select %80, %78, %85 : vector<32x32xi1>, vector<32x32xf32>
    %c0_46 = arith.constant 0 : index
    %c34 = arith.constant 34 : index
    %87 = vector.load %arg7[%c0_46, %c34] : memref<32x904xf32, #tpu.memory_space<vmem>>, vector<32x96xf32>
    %c0_47 = arith.constant 0 : index
    %c130 = arith.constant 130 : index
    %88 = vector.load %arg7[%c0_47, %c130] : memref<32x904xf32, #tpu.memory_space<vmem>>, vector<32x96xf32>
    %c0_48 = arith.constant 0 : index
    %c97 = arith.constant 97 : index
    %89 = vector.load %arg8[%c0_48, %c97] : memref<1x964xf32, #tpu.memory_space<vmem>>, vector<1x96xf32>
    %c0_49 = arith.constant 0 : index
    %c193 = arith.constant 193 : index
    %90 = vector.load %arg8[%c0_49, %c193] : memref<1x964xf32, #tpu.memory_space<vmem>>, vector<1x96xf32>
    %cst_50 = arith.constant dense<0.000000e+00> : vector<32x96xf32>
    %91 = tpu.matmul %86, %87, %cst_50 {dimension_numbers = #tpu.dot_dimension_numbers<[1], [0], [0], [1], [0, 0, 1, 1], [], []>} : vector<32x32xf32>, vector<32x96xf32>, vector<32x96xf32> -> vector<32x96xf32>
    %92 = vector.broadcast %89 : vector<1x96xf32> to vector<32x96xf32>
    %93 = arith.addf %91, %92 : vector<32x96xf32>
    %cst_51 = arith.constant dense<0.000000e+00> : vector<32x96xf32>
    %94 = tpu.matmul %18, %88, %cst_51 {dimension_numbers = #tpu.dot_dimension_numbers<[1], [0], [0], [1], [0, 0, 1, 1], [], []>} : vector<32x32xf32>, vector<32x96xf32>, vector<32x96xf32> -> vector<32x96xf32>
    %95 = vector.broadcast %90 : vector<1x96xf32> to vector<32x96xf32>
    %96 = arith.addf %94, %95 : vector<32x96xf32>
    %97 = vector.extract_strided_slice %93 {offsets = [0, 0], sizes = [32, 32], strides = [1, 1]} : vector<32x96xf32> to vector<32x32xf32>
    %98 = vector.extract_strided_slice %96 {offsets = [0, 0], sizes = [32, 32], strides = [1, 1]} : vector<32x96xf32> to vector<32x32xf32>
    %99 = arith.addf %97, %98 : vector<32x32xf32>
    %100 = arith.negf %99 : vector<32x32xf32>
    %101 = math.exp %100 : vector<32x32xf32>
    %cst_52 = arith.constant 1.000000e+00 : f32
    %102 = vector.broadcast %cst_52 : f32 to vector<32x32xf32>
    %103 = arith.addf %102, %101 : vector<32x32xf32>
    %104 = arith.divf %102, %103 : vector<32x32xf32>
    %105 = vector.extract_strided_slice %93 {offsets = [0, 32], sizes = [32, 32], strides = [1, 1]} : vector<32x96xf32> to vector<32x32xf32>
    %106 = vector.extract_strided_slice %96 {offsets = [0, 32], sizes = [32, 32], strides = [1, 1]} : vector<32x96xf32> to vector<32x32xf32>
    %107 = arith.addf %105, %106 : vector<32x32xf32>
    %108 = arith.negf %107 : vector<32x32xf32>
    %109 = math.exp %108 : vector<32x32xf32>
    %cst_53 = arith.constant 1.000000e+00 : f32
    %110 = vector.broadcast %cst_53 : f32 to vector<32x32xf32>
    %111 = arith.addf %110, %109 : vector<32x32xf32>
    %112 = arith.divf %110, %111 : vector<32x32xf32>
    %113 = vector.extract_strided_slice %93 {offsets = [0, 64], sizes = [32, 32], strides = [1, 1]} : vector<32x96xf32> to vector<32x32xf32>
    %114 = vector.extract_strided_slice %96 {offsets = [0, 64], sizes = [32, 32], strides = [1, 1]} : vector<32x96xf32> to vector<32x32xf32>
    %115 = arith.mulf %104, %114 : vector<32x32xf32>
    %116 = arith.addf %113, %115 : vector<32x32xf32>
    %117 = math.tanh %116 : vector<32x32xf32>
    %cst_54 = arith.constant 1.000000e+00 : f32
    %118 = vector.broadcast %cst_54 : f32 to vector<32x32xf32>
    %119 = arith.subf %118, %112 : vector<32x32xf32>
    %120 = arith.mulf %119, %117 : vector<32x32xf32>
    %121 = arith.mulf %112, %18 : vector<32x32xf32>
    %122 = arith.addf %120, %121 : vector<32x32xf32>
    %cst_55 = arith.constant 0.000000e+00 : f32
    %123 = vector.broadcast %cst_55 : f32 to vector<32x32xf32>
    %124 = arith.maximumf %122, %123 : vector<32x32xf32>
    %c0_56 = arith.constant 0 : index
    %c226 = arith.constant 226 : index
    %125 = vector.load %arg7[%c0_56, %c226] : memref<32x904xf32, #tpu.memory_space<vmem>>, vector<32x2xf32>
    %cst_57 = arith.constant dense<0.000000e+00> : vector<32x2xf32>
    %126 = tpu.matmul %124, %125, %cst_57 {dimension_numbers = #tpu.dot_dimension_numbers<[1], [0], [0], [1], [0, 0, 1, 1], [], []>} : vector<32x32xf32>, vector<32x2xf32>, vector<32x2xf32> -> vector<32x2xf32>
    %127 = vector.extract_strided_slice %126 {offsets = [0, 0], sizes = [32, 1], strides = [1, 1]} : vector<32x2xf32> to vector<32x1xf32>
    %128 = vector.shape_cast %127 : vector<32x1xf32> to vector<32x1x1xf32>
    %129 = vector.extract_strided_slice %126 {offsets = [0, 1], sizes = [32, 1], strides = [1, 1]} : vector<32x2xf32> to vector<32x1xf32>
    %130 = vector.shape_cast %129 : vector<32x1xf32> to vector<4x8x1xf32>
    %131 = vector.shape_cast %130 : vector<4x8x1xf32> to vector<4x1x8x1xf32>
    %132 = vector.shape_cast %131 : vector<4x1x8x1xf32> to vector<4x1x8x1xf32>
    %133 = vector.broadcast %132 : vector<4x1x8x1xf32> to vector<4x8x8x1xf32>
    %134 = vector.shape_cast %133 : vector<4x8x8x1xf32> to vector<32x8x1xf32>
    %135 = vector.broadcast %128 : vector<32x1x1xf32> to vector<32x8x1xf32>
    %136 = arith.addf %135, %134 : vector<32x8x1xf32>
    %c0_58 = arith.constant 0 : index
    %c289 = arith.constant 289 : index
    %137 = vector.load %arg8[%c0_58, %c289] : memref<1x964xf32, #tpu.memory_space<vmem>>, vector<1x1xf32>
    %138 = vector.shape_cast %137 : vector<1x1xf32> to vector<1x1x1xf32>
    %139 = vector.broadcast %138 : vector<1x1x1xf32> to vector<32x8x1xf32>
    %140 = arith.addf %136, %139 : vector<32x8x1xf32>
    %cst_59 = arith.constant 0.000000e+00 : f32
    %141 = vector.broadcast %cst_59 : f32 to vector<32x8x1xf32>
    %142 = arith.cmpf oge, %140, %141 : vector<32x8x1xf32>
    %cst_60 = arith.constant 0.00999999977 : f32
    %143 = vector.broadcast %cst_60 : f32 to vector<32x8x1xf32>
    %144 = arith.mulf %143, %140 : vector<32x8x1xf32>
    %145 = arith.select %142, %140, %144 : vector<32x8x1xi1>, vector<32x8x1xf32>
    %cst_61 = arith.constant 0.000000e+00 : f32
    %146 = vector.broadcast %cst_61 : f32 to vector<32x8x1xf32>
    %147 = arith.cmpf ogt, %5, %146 : vector<32x8x1xf32>
    %cst_62 = arith.constant -1.000000e+30 : f32
    %148 = vector.broadcast %cst_62 : f32 to vector<32x8x1xf32>
    %149 = arith.select %147, %145, %148 : vector<32x8x1xi1>, vector<32x8x1xf32>
    %cst_63 = arith.constant dense<0xFF800000> : vector<32x1xf32>
    %150 = vector.multi_reduction <maximumf>, %149, %cst_63 [1] : vector<32x8x1xf32> to vector<32x1xf32>
    %151 = vector.shape_cast %150 : vector<32x1xf32> to vector<32x1x1xf32>
    %152 = vector.broadcast %151 : vector<32x1x1xf32> to vector<32x8x1xf32>
    %153 = arith.subf %149, %152 : vector<32x8x1xf32>
    %154 = math.exp %153 : vector<32x8x1xf32>
    %155 = arith.mulf %154, %5 : vector<32x8x1xf32>
    %cst_64 = arith.constant dense<0.000000e+00> : vector<32x1xf32>
    %156 = vector.multi_reduction <add>, %155, %cst_64 [1] : vector<32x8x1xf32> to vector<32x1xf32>
    %157 = vector.shape_cast %156 : vector<32x1xf32> to vector<32x1x1xf32>
    %cst_65 = arith.constant 0.000000e+00 : f32
    %158 = vector.broadcast %cst_65 : f32 to vector<32x1x1xf32>
    %159 = arith.cmpf ogt, %157, %158 : vector<32x1x1xf32>
    %cst_66 = arith.constant 1.000000e+00 : f32
    %160 = vector.broadcast %cst_66 : f32 to vector<32x1x1xf32>
    %161 = arith.select %159, %157, %160 : vector<32x1x1xi1>, vector<32x1x1xf32>
    %162 = vector.broadcast %161 : vector<32x1x1xf32> to vector<32x8x1xf32>
    %163 = arith.divf %155, %162 : vector<32x8x1xf32>
    %c0_67 = arith.constant 0 : index
    %c228 = arith.constant 228 : index
    %164 = vector.load %arg7[%c0_67, %c228] : memref<32x904xf32, #tpu.memory_space<vmem>>, vector<32x32xf32>
    %cst_68 = arith.constant dense<0.000000e+00> : vector<32x32xf32>
    %165 = tpu.matmul %124, %164, %cst_68 {dimension_numbers = #tpu.dot_dimension_numbers<[1], [0], [0], [1], [0, 0, 1, 1], [], []>} : vector<32x32xf32>, vector<32x32xf32>, vector<32x32xf32> -> vector<32x32xf32>
    %c0_69 = arith.constant 0 : index
    %c290 = arith.constant 290 : index
    %166 = vector.load %arg8[%c0_69, %c290] : memref<1x964xf32, #tpu.memory_space<vmem>>, vector<1x32xf32>
    %167 = vector.broadcast %166 : vector<1x32xf32> to vector<32x32xf32>
    %168 = arith.addf %165, %167 : vector<32x32xf32>
    %169 = vector.shape_cast %168 : vector<32x32xf32> to vector<4x1x8x32xf32>
    %170 = vector.shape_cast %169 : vector<4x1x8x32xf32> to vector<4x1x8x32xf32>
    %171 = vector.broadcast %170 : vector<4x1x8x32xf32> to vector<4x8x8x32xf32>
    %172 = vector.shape_cast %171 : vector<4x8x8x32xf32> to vector<32x8x32xf32>
    %173 = vector.broadcast %163 : vector<32x8x1xf32> to vector<32x8x32xf32>
    %174 = arith.mulf %173, %172 : vector<32x8x32xf32>
    %cst_70 = arith.constant dense<0.000000e+00> : vector<32x32xf32>
    %175 = vector.multi_reduction <add>, %174, %cst_70 [1] : vector<32x8x32xf32> to vector<32x32xf32>
    %cst_71 = arith.constant 0.000000e+00 : f32
    %176 = vector.broadcast %cst_71 : f32 to vector<32x32xf32>
    %177 = arith.cmpf ogt, %175, %176 : vector<32x32xf32>
    %cst_72 = arith.constant 0.000000e+00 : f32
    %178 = vector.broadcast %cst_72 : f32 to vector<32x32xf32>
    %179 = arith.minimumf %175, %178 : vector<32x32xf32>
    %180 = math.exp %179 : vector<32x32xf32>
    %cst_73 = arith.constant 1.000000e+00 : f32
    %181 = vector.broadcast %cst_73 : f32 to vector<32x32xf32>
    %182 = arith.subf %180, %181 : vector<32x32xf32>
    %183 = arith.select %177, %175, %182 : vector<32x32xi1>, vector<32x32xf32>
    %c0_74 = arith.constant 0 : index
    %c260 = arith.constant 260 : index
    %184 = vector.load %arg7[%c0_74, %c260] : memref<32x904xf32, #tpu.memory_space<vmem>>, vector<32x96xf32>
    %c0_75 = arith.constant 0 : index
    %c356 = arith.constant 356 : index
    %185 = vector.load %arg7[%c0_75, %c356] : memref<32x904xf32, #tpu.memory_space<vmem>>, vector<32x96xf32>
    %c0_76 = arith.constant 0 : index
    %c322 = arith.constant 322 : index
    %186 = vector.load %arg8[%c0_76, %c322] : memref<1x964xf32, #tpu.memory_space<vmem>>, vector<1x96xf32>
    %c0_77 = arith.constant 0 : index
    %c418 = arith.constant 418 : index
    %187 = vector.load %arg8[%c0_77, %c418] : memref<1x964xf32, #tpu.memory_space<vmem>>, vector<1x96xf32>
    %cst_78 = arith.constant dense<0.000000e+00> : vector<32x96xf32>
    %188 = tpu.matmul %183, %184, %cst_78 {dimension_numbers = #tpu.dot_dimension_numbers<[1], [0], [0], [1], [0, 0, 1, 1], [], []>} : vector<32x32xf32>, vector<32x96xf32>, vector<32x96xf32> -> vector<32x96xf32>
    %189 = vector.broadcast %186 : vector<1x96xf32> to vector<32x96xf32>
    %190 = arith.addf %188, %189 : vector<32x96xf32>
    %cst_79 = arith.constant dense<0.000000e+00> : vector<32x96xf32>
    %191 = tpu.matmul %124, %185, %cst_79 {dimension_numbers = #tpu.dot_dimension_numbers<[1], [0], [0], [1], [0, 0, 1, 1], [], []>} : vector<32x32xf32>, vector<32x96xf32>, vector<32x96xf32> -> vector<32x96xf32>
    %192 = vector.broadcast %187 : vector<1x96xf32> to vector<32x96xf32>
    %193 = arith.addf %191, %192 : vector<32x96xf32>
    %194 = vector.extract_strided_slice %190 {offsets = [0, 0], sizes = [32, 32], strides = [1, 1]} : vector<32x96xf32> to vector<32x32xf32>
    %195 = vector.extract_strided_slice %193 {offsets = [0, 0], sizes = [32, 32], strides = [1, 1]} : vector<32x96xf32> to vector<32x32xf32>
    %196 = arith.addf %194, %195 : vector<32x32xf32>
    %197 = arith.negf %196 : vector<32x32xf32>
    %198 = math.exp %197 : vector<32x32xf32>
    %cst_80 = arith.constant 1.000000e+00 : f32
    %199 = vector.broadcast %cst_80 : f32 to vector<32x32xf32>
    %200 = arith.addf %199, %198 : vector<32x32xf32>
    %201 = arith.divf %199, %200 : vector<32x32xf32>
    %202 = vector.extract_strided_slice %190 {offsets = [0, 32], sizes = [32, 32], strides = [1, 1]} : vector<32x96xf32> to vector<32x32xf32>
    %203 = vector.extract_strided_slice %193 {offsets = [0, 32], sizes = [32, 32], strides = [1, 1]} : vector<32x96xf32> to vector<32x32xf32>
    %204 = arith.addf %202, %203 : vector<32x32xf32>
    %205 = arith.negf %204 : vector<32x32xf32>
    %206 = math.exp %205 : vector<32x32xf32>
    %cst_81 = arith.constant 1.000000e+00 : f32
    %207 = vector.broadcast %cst_81 : f32 to vector<32x32xf32>
    %208 = arith.addf %207, %206 : vector<32x32xf32>
    %209 = arith.divf %207, %208 : vector<32x32xf32>
    %210 = vector.extract_strided_slice %190 {offsets = [0, 64], sizes = [32, 32], strides = [1, 1]} : vector<32x96xf32> to vector<32x32xf32>
    %211 = vector.extract_strided_slice %193 {offsets = [0, 64], sizes = [32, 32], strides = [1, 1]} : vector<32x96xf32> to vector<32x32xf32>
    %212 = arith.mulf %201, %211 : vector<32x32xf32>
    %213 = arith.addf %210, %212 : vector<32x32xf32>
    %214 = math.tanh %213 : vector<32x32xf32>
    %cst_82 = arith.constant 1.000000e+00 : f32
    %215 = vector.broadcast %cst_82 : f32 to vector<32x32xf32>
    %216 = arith.subf %215, %209 : vector<32x32xf32>
    %217 = arith.mulf %216, %214 : vector<32x32xf32>
    %218 = arith.mulf %209, %124 : vector<32x32xf32>
    %219 = arith.addf %217, %218 : vector<32x32xf32>
    %cst_83 = arith.constant 0.000000e+00 : f32
    %220 = vector.broadcast %cst_83 : f32 to vector<32x32xf32>
    %221 = arith.maximumf %219, %220 : vector<32x32xf32>
    %cst_84 = arith.constant 0.000000e+00 : f32
    %222 = vector.broadcast %cst_84 : f32 to vector<32x32xf32>
    %223 = arith.maximumf %221, %222 : vector<32x32xf32>
    %224 = vector.shape_cast %223 : vector<32x32xf32> to vector<4x8x32xf32>
    %225 = vector.broadcast %7 : vector<4x8x1xf32> to vector<4x8x32xf32>
    %226 = arith.mulf %224, %225 : vector<4x8x32xf32>
    %cst_85 = arith.constant dense<0.000000e+00> : vector<4x32xf32>
    %227 = vector.multi_reduction <add>, %226, %cst_85 [1] : vector<4x8x32xf32> to vector<4x32xf32>
    %cst_86 = arith.constant 0.000000e+00 : f32
    %228 = vector.broadcast %cst_86 : f32 to vector<4x32xf32>
    %229 = arith.maximumf %227, %228 : vector<4x32xf32>
    %c0_87 = arith.constant 0 : index
    %c452 = arith.constant 452 : index
    %230 = vector.load %arg7[%c0_87, %c452] : memref<32x904xf32, #tpu.memory_space<vmem>>, vector<32x1xf32>
    %cst_88 = arith.constant dense<0.000000e+00> : vector<4x1xf32>
    %231 = tpu.matmul %229, %230, %cst_88 {dimension_numbers = #tpu.dot_dimension_numbers<[1], [0], [0], [1], [0, 0, 1, 1], [], []>} : vector<4x32xf32>, vector<32x1xf32>, vector<4x1xf32> -> vector<4x1xf32>
    %232 = vector.shape_cast %231 : vector<4x1xf32> to vector<4x1x1xf32>
    %c0_89 = arith.constant 0 : index
    %c453 = arith.constant 453 : index
    %233 = vector.load %arg7[%c0_89, %c453] : memref<32x904xf32, #tpu.memory_space<vmem>>, vector<32x1xf32>
    %cst_90 = arith.constant dense<0.000000e+00> : vector<32x1xf32>
    %234 = tpu.matmul %223, %233, %cst_90 {dimension_numbers = #tpu.dot_dimension_numbers<[1], [0], [0], [1], [0, 0, 1, 1], [], []>} : vector<32x32xf32>, vector<32x1xf32>, vector<32x1xf32> -> vector<32x1xf32>
    %235 = vector.shape_cast %234 : vector<32x1xf32> to vector<4x8x1xf32>
    %236 = vector.broadcast %232 : vector<4x1x1xf32> to vector<4x8x1xf32>
    %237 = arith.addf %236, %235 : vector<4x8x1xf32>
    %c0_91 = arith.constant 0 : index
    %c514 = arith.constant 514 : index
    %238 = vector.load %arg8[%c0_91, %c514] : memref<1x964xf32, #tpu.memory_space<vmem>>, vector<1x1xf32>
    %239 = vector.shape_cast %238 : vector<1x1xf32> to vector<1x1x1xf32>
    %240 = vector.broadcast %239 : vector<1x1x1xf32> to vector<4x8x1xf32>
    %241 = arith.addf %237, %240 : vector<4x8x1xf32>
    %cst_92 = arith.constant 0.000000e+00 : f32
    %242 = vector.broadcast %cst_92 : f32 to vector<4x8x1xf32>
    %243 = arith.cmpf oge, %241, %242 : vector<4x8x1xf32>
    %cst_93 = arith.constant 0.00999999977 : f32
    %244 = vector.broadcast %cst_93 : f32 to vector<4x8x1xf32>
    %245 = arith.mulf %244, %241 : vector<4x8x1xf32>
    %246 = arith.select %243, %241, %245 : vector<4x8x1xi1>, vector<4x8x1xf32>
    %cst_94 = arith.constant 0.000000e+00 : f32
    %247 = vector.broadcast %cst_94 : f32 to vector<4x8x1xf32>
    %248 = arith.cmpf ogt, %7, %247 : vector<4x8x1xf32>
    %cst_95 = arith.constant -1.000000e+30 : f32
    %249 = vector.broadcast %cst_95 : f32 to vector<4x8x1xf32>
    %250 = arith.select %248, %246, %249 : vector<4x8x1xi1>, vector<4x8x1xf32>
    %cst_96 = arith.constant dense<0xFF800000> : vector<4x1xf32>
    %251 = vector.multi_reduction <maximumf>, %250, %cst_96 [1] : vector<4x8x1xf32> to vector<4x1xf32>
    %252 = vector.shape_cast %251 : vector<4x1xf32> to vector<4x1x1xf32>
    %253 = vector.broadcast %252 : vector<4x1x1xf32> to vector<4x8x1xf32>
    %254 = arith.subf %250, %253 : vector<4x8x1xf32>
    %255 = math.exp %254 : vector<4x8x1xf32>
    %256 = arith.mulf %255, %7 : vector<4x8x1xf32>
    %cst_97 = arith.constant dense<0.000000e+00> : vector<4x1xf32>
    %257 = vector.multi_reduction <add>, %256, %cst_97 [1] : vector<4x8x1xf32> to vector<4x1xf32>
    %258 = vector.shape_cast %257 : vector<4x1xf32> to vector<4x1x1xf32>
    %cst_98 = arith.constant 0.000000e+00 : f32
    %259 = vector.broadcast %cst_98 : f32 to vector<4x1x1xf32>
    %260 = arith.cmpf ogt, %258, %259 : vector<4x1x1xf32>
    %cst_99 = arith.constant 1.000000e+00 : f32
    %261 = vector.broadcast %cst_99 : f32 to vector<4x1x1xf32>
    %262 = arith.select %260, %258, %261 : vector<4x1x1xi1>, vector<4x1x1xf32>
    %263 = vector.broadcast %262 : vector<4x1x1xf32> to vector<4x8x1xf32>
    %264 = arith.divf %256, %263 : vector<4x8x1xf32>
    %c0_100 = arith.constant 0 : index
    %c454 = arith.constant 454 : index
    %265 = vector.load %arg7[%c0_100, %c454] : memref<32x904xf32, #tpu.memory_space<vmem>>, vector<32x32xf32>
    %cst_101 = arith.constant dense<0.000000e+00> : vector<32x32xf32>
    %266 = tpu.matmul %223, %265, %cst_101 {dimension_numbers = #tpu.dot_dimension_numbers<[1], [0], [0], [1], [0, 0, 1, 1], [], []>} : vector<32x32xf32>, vector<32x32xf32>, vector<32x32xf32> -> vector<32x32xf32>
    %c0_102 = arith.constant 0 : index
    %c515 = arith.constant 515 : index
    %267 = vector.load %arg8[%c0_102, %c515] : memref<1x964xf32, #tpu.memory_space<vmem>>, vector<1x32xf32>
    %268 = vector.broadcast %267 : vector<1x32xf32> to vector<32x32xf32>
    %269 = arith.addf %266, %268 : vector<32x32xf32>
    %270 = vector.shape_cast %269 : vector<32x32xf32> to vector<4x8x32xf32>
    %271 = vector.broadcast %264 : vector<4x8x1xf32> to vector<4x8x32xf32>
    %272 = arith.mulf %271, %270 : vector<4x8x32xf32>
    %cst_103 = arith.constant dense<0.000000e+00> : vector<4x32xf32>
    %273 = vector.multi_reduction <add>, %272, %cst_103 [1] : vector<4x8x32xf32> to vector<4x32xf32>
    %cst_104 = arith.constant 0.000000e+00 : f32
    %274 = vector.broadcast %cst_104 : f32 to vector<4x32xf32>
    %275 = arith.cmpf ogt, %273, %274 : vector<4x32xf32>
    %cst_105 = arith.constant 0.000000e+00 : f32
    %276 = vector.broadcast %cst_105 : f32 to vector<4x32xf32>
    %277 = arith.minimumf %273, %276 : vector<4x32xf32>
    %278 = math.exp %277 : vector<4x32xf32>
    %cst_106 = arith.constant 1.000000e+00 : f32
    %279 = vector.broadcast %cst_106 : f32 to vector<4x32xf32>
    %280 = arith.subf %278, %279 : vector<4x32xf32>
    %281 = arith.select %275, %273, %280 : vector<4x32xi1>, vector<4x32xf32>
    %cst_107 = arith.constant 0.000000e+00 : f32
    %282 = vector.broadcast %cst_107 : f32 to vector<4x32xf32>
    %283 = arith.maximumf %281, %282 : vector<4x32xf32>
    %c0_108 = arith.constant 0 : index
    %c486 = arith.constant 486 : index
    %284 = vector.load %arg7[%c0_108, %c486] : memref<32x904xf32, #tpu.memory_space<vmem>>, vector<32x96xf32>
    %c0_109 = arith.constant 0 : index
    %c582 = arith.constant 582 : index
    %285 = vector.load %arg7[%c0_109, %c582] : memref<32x904xf32, #tpu.memory_space<vmem>>, vector<32x96xf32>
    %c0_110 = arith.constant 0 : index
    %c547 = arith.constant 547 : index
    %286 = vector.load %arg8[%c0_110, %c547] : memref<1x964xf32, #tpu.memory_space<vmem>>, vector<1x96xf32>
    %c0_111 = arith.constant 0 : index
    %c643 = arith.constant 643 : index
    %287 = vector.load %arg8[%c0_111, %c643] : memref<1x964xf32, #tpu.memory_space<vmem>>, vector<1x96xf32>
    %cst_112 = arith.constant dense<0.000000e+00> : vector<4x96xf32>
    %288 = tpu.matmul %283, %284, %cst_112 {dimension_numbers = #tpu.dot_dimension_numbers<[1], [0], [0], [1], [0, 0, 1, 1], [], []>} : vector<4x32xf32>, vector<32x96xf32>, vector<4x96xf32> -> vector<4x96xf32>
    %289 = vector.broadcast %286 : vector<1x96xf32> to vector<4x96xf32>
    %290 = arith.addf %288, %289 : vector<4x96xf32>
    %cst_113 = arith.constant dense<0.000000e+00> : vector<4x96xf32>
    %291 = tpu.matmul %227, %285, %cst_113 {dimension_numbers = #tpu.dot_dimension_numbers<[1], [0], [0], [1], [0, 0, 1, 1], [], []>} : vector<4x32xf32>, vector<32x96xf32>, vector<4x96xf32> -> vector<4x96xf32>
    %292 = vector.broadcast %287 : vector<1x96xf32> to vector<4x96xf32>
    %293 = arith.addf %291, %292 : vector<4x96xf32>
    %294 = vector.extract_strided_slice %290 {offsets = [0, 0], sizes = [4, 32], strides = [1, 1]} : vector<4x96xf32> to vector<4x32xf32>
    %295 = vector.extract_strided_slice %293 {offsets = [0, 0], sizes = [4, 32], strides = [1, 1]} : vector<4x96xf32> to vector<4x32xf32>
    %296 = arith.addf %294, %295 : vector<4x32xf32>
    %297 = arith.negf %296 : vector<4x32xf32>
    %298 = math.exp %297 : vector<4x32xf32>
    %cst_114 = arith.constant 1.000000e+00 : f32
    %299 = vector.broadcast %cst_114 : f32 to vector<4x32xf32>
    %300 = arith.addf %299, %298 : vector<4x32xf32>
    %301 = arith.divf %299, %300 : vector<4x32xf32>
    %302 = vector.extract_strided_slice %290 {offsets = [0, 32], sizes = [4, 32], strides = [1, 1]} : vector<4x96xf32> to vector<4x32xf32>
    %303 = vector.extract_strided_slice %293 {offsets = [0, 32], sizes = [4, 32], strides = [1, 1]} : vector<4x96xf32> to vector<4x32xf32>
    %304 = arith.addf %302, %303 : vector<4x32xf32>
    %305 = arith.negf %304 : vector<4x32xf32>
    %306 = math.exp %305 : vector<4x32xf32>
    %cst_115 = arith.constant 1.000000e+00 : f32
    %307 = vector.broadcast %cst_115 : f32 to vector<4x32xf32>
    %308 = arith.addf %307, %306 : vector<4x32xf32>
    %309 = arith.divf %307, %308 : vector<4x32xf32>
    %310 = vector.extract_strided_slice %290 {offsets = [0, 64], sizes = [4, 32], strides = [1, 1]} : vector<4x96xf32> to vector<4x32xf32>
    %311 = vector.extract_strided_slice %293 {offsets = [0, 64], sizes = [4, 32], strides = [1, 1]} : vector<4x96xf32> to vector<4x32xf32>
    %312 = arith.mulf %301, %311 : vector<4x32xf32>
    %313 = arith.addf %310, %312 : vector<4x32xf32>
    %314 = math.tanh %313 : vector<4x32xf32>
    %cst_116 = arith.constant 1.000000e+00 : f32
    %315 = vector.broadcast %cst_116 : f32 to vector<4x32xf32>
    %316 = arith.subf %315, %309 : vector<4x32xf32>
    %317 = arith.mulf %316, %314 : vector<4x32xf32>
    %318 = arith.mulf %309, %227 : vector<4x32xf32>
    %319 = arith.addf %317, %318 : vector<4x32xf32>
    %cst_117 = arith.constant 0.000000e+00 : f32
    %320 = vector.broadcast %cst_117 : f32 to vector<4x32xf32>
    %321 = arith.maximumf %319, %320 : vector<4x32xf32>
    %c0_118 = arith.constant 0 : index
    %c678 = arith.constant 678 : index
    %322 = vector.load %arg7[%c0_118, %c678] : memref<32x904xf32, #tpu.memory_space<vmem>>, vector<32x1xf32>
    %cst_119 = arith.constant dense<0.000000e+00> : vector<4x1xf32>
    %323 = tpu.matmul %321, %322, %cst_119 {dimension_numbers = #tpu.dot_dimension_numbers<[1], [0], [0], [1], [0, 0, 1, 1], [], []>} : vector<4x32xf32>, vector<32x1xf32>, vector<4x1xf32> -> vector<4x1xf32>
    %324 = vector.shape_cast %323 : vector<4x1xf32> to vector<4x1x1xf32>
    %c0_120 = arith.constant 0 : index
    %c679 = arith.constant 679 : index
    %325 = vector.load %arg7[%c0_120, %c679] : memref<32x904xf32, #tpu.memory_space<vmem>>, vector<32x1xf32>
    %cst_121 = arith.constant dense<0.000000e+00> : vector<32x1xf32>
    %326 = tpu.matmul %223, %325, %cst_121 {dimension_numbers = #tpu.dot_dimension_numbers<[1], [0], [0], [1], [0, 0, 1, 1], [], []>} : vector<32x32xf32>, vector<32x1xf32>, vector<32x1xf32> -> vector<32x1xf32>
    %327 = vector.shape_cast %326 : vector<32x1xf32> to vector<4x8x1xf32>
    %328 = vector.broadcast %324 : vector<4x1x1xf32> to vector<4x8x1xf32>
    %329 = arith.addf %328, %327 : vector<4x8x1xf32>
    %c0_122 = arith.constant 0 : index
    %c739 = arith.constant 739 : index
    %330 = vector.load %arg8[%c0_122, %c739] : memref<1x964xf32, #tpu.memory_space<vmem>>, vector<1x1xf32>
    %331 = vector.shape_cast %330 : vector<1x1xf32> to vector<1x1x1xf32>
    %332 = vector.broadcast %331 : vector<1x1x1xf32> to vector<4x8x1xf32>
    %333 = arith.addf %329, %332 : vector<4x8x1xf32>
    %cst_123 = arith.constant 0.000000e+00 : f32
    %334 = vector.broadcast %cst_123 : f32 to vector<4x8x1xf32>
    %335 = arith.cmpf oge, %333, %334 : vector<4x8x1xf32>
    %cst_124 = arith.constant 0.00999999977 : f32
    %336 = vector.broadcast %cst_124 : f32 to vector<4x8x1xf32>
    %337 = arith.mulf %336, %333 : vector<4x8x1xf32>
    %338 = arith.select %335, %333, %337 : vector<4x8x1xi1>, vector<4x8x1xf32>
    %cst_125 = arith.constant 0.000000e+00 : f32
    %339 = vector.broadcast %cst_125 : f32 to vector<4x8x1xf32>
    %340 = arith.cmpf ogt, %7, %339 : vector<4x8x1xf32>
    %cst_126 = arith.constant -1.000000e+30 : f32
    %341 = vector.broadcast %cst_126 : f32 to vector<4x8x1xf32>
    %342 = arith.select %340, %338, %341 : vector<4x8x1xi1>, vector<4x8x1xf32>
    %cst_127 = arith.constant dense<0xFF800000> : vector<4x1xf32>
    %343 = vector.multi_reduction <maximumf>, %342, %cst_127 [1] : vector<4x8x1xf32> to vector<4x1xf32>
    %344 = vector.shape_cast %343 : vector<4x1xf32> to vector<4x1x1xf32>
    %345 = vector.broadcast %344 : vector<4x1x1xf32> to vector<4x8x1xf32>
    %346 = arith.subf %342, %345 : vector<4x8x1xf32>
    %347 = math.exp %346 : vector<4x8x1xf32>
    %348 = arith.mulf %347, %7 : vector<4x8x1xf32>
    %cst_128 = arith.constant dense<0.000000e+00> : vector<4x1xf32>
    %349 = vector.multi_reduction <add>, %348, %cst_128 [1] : vector<4x8x1xf32> to vector<4x1xf32>
    %350 = vector.shape_cast %349 : vector<4x1xf32> to vector<4x1x1xf32>
    %cst_129 = arith.constant 0.000000e+00 : f32
    %351 = vector.broadcast %cst_129 : f32 to vector<4x1x1xf32>
    %352 = arith.cmpf ogt, %350, %351 : vector<4x1x1xf32>
    %cst_130 = arith.constant 1.000000e+00 : f32
    %353 = vector.broadcast %cst_130 : f32 to vector<4x1x1xf32>
    %354 = arith.select %352, %350, %353 : vector<4x1x1xi1>, vector<4x1x1xf32>
    %355 = vector.broadcast %354 : vector<4x1x1xf32> to vector<4x8x1xf32>
    %356 = arith.divf %348, %355 : vector<4x8x1xf32>
    %c0_131 = arith.constant 0 : index
    %c680 = arith.constant 680 : index
    %357 = vector.load %arg7[%c0_131, %c680] : memref<32x904xf32, #tpu.memory_space<vmem>>, vector<32x32xf32>
    %cst_132 = arith.constant dense<0.000000e+00> : vector<32x32xf32>
    %358 = tpu.matmul %223, %357, %cst_132 {dimension_numbers = #tpu.dot_dimension_numbers<[1], [0], [0], [1], [0, 0, 1, 1], [], []>} : vector<32x32xf32>, vector<32x32xf32>, vector<32x32xf32> -> vector<32x32xf32>
    %c0_133 = arith.constant 0 : index
    %c740 = arith.constant 740 : index
    %359 = vector.load %arg8[%c0_133, %c740] : memref<1x964xf32, #tpu.memory_space<vmem>>, vector<1x32xf32>
    %360 = vector.broadcast %359 : vector<1x32xf32> to vector<32x32xf32>
    %361 = arith.addf %358, %360 : vector<32x32xf32>
    %362 = vector.shape_cast %361 : vector<32x32xf32> to vector<4x8x32xf32>
    %363 = vector.broadcast %356 : vector<4x8x1xf32> to vector<4x8x32xf32>
    %364 = arith.mulf %363, %362 : vector<4x8x32xf32>
    %cst_134 = arith.constant dense<0.000000e+00> : vector<4x32xf32>
    %365 = vector.multi_reduction <add>, %364, %cst_134 [1] : vector<4x8x32xf32> to vector<4x32xf32>
    %cst_135 = arith.constant 0.000000e+00 : f32
    %366 = vector.broadcast %cst_135 : f32 to vector<4x32xf32>
    %367 = arith.cmpf ogt, %365, %366 : vector<4x32xf32>
    %cst_136 = arith.constant 0.000000e+00 : f32
    %368 = vector.broadcast %cst_136 : f32 to vector<4x32xf32>
    %369 = arith.minimumf %365, %368 : vector<4x32xf32>
    %370 = math.exp %369 : vector<4x32xf32>
    %cst_137 = arith.constant 1.000000e+00 : f32
    %371 = vector.broadcast %cst_137 : f32 to vector<4x32xf32>
    %372 = arith.subf %370, %371 : vector<4x32xf32>
    %373 = arith.select %367, %365, %372 : vector<4x32xi1>, vector<4x32xf32>
    %cst_138 = arith.constant 0.000000e+00 : f32
    %374 = vector.broadcast %cst_138 : f32 to vector<4x32xf32>
    %375 = arith.maximumf %373, %374 : vector<4x32xf32>
    %c0_139 = arith.constant 0 : index
    %c712 = arith.constant 712 : index
    %376 = vector.load %arg7[%c0_139, %c712] : memref<32x904xf32, #tpu.memory_space<vmem>>, vector<32x96xf32>
    %c0_140 = arith.constant 0 : index
    %c808 = arith.constant 808 : index
    %377 = vector.load %arg7[%c0_140, %c808] : memref<32x904xf32, #tpu.memory_space<vmem>>, vector<32x96xf32>
    %c0_141 = arith.constant 0 : index
    %c772 = arith.constant 772 : index
    %378 = vector.load %arg8[%c0_141, %c772] : memref<1x964xf32, #tpu.memory_space<vmem>>, vector<1x96xf32>
    %c0_142 = arith.constant 0 : index
    %c868 = arith.constant 868 : index
    %379 = vector.load %arg8[%c0_142, %c868] : memref<1x964xf32, #tpu.memory_space<vmem>>, vector<1x96xf32>
    %cst_143 = arith.constant dense<0.000000e+00> : vector<4x96xf32>
    %380 = tpu.matmul %375, %376, %cst_143 {dimension_numbers = #tpu.dot_dimension_numbers<[1], [0], [0], [1], [0, 0, 1, 1], [], []>} : vector<4x32xf32>, vector<32x96xf32>, vector<4x96xf32> -> vector<4x96xf32>
    %381 = vector.broadcast %378 : vector<1x96xf32> to vector<4x96xf32>
    %382 = arith.addf %380, %381 : vector<4x96xf32>
    %cst_144 = arith.constant dense<0.000000e+00> : vector<4x96xf32>
    %383 = tpu.matmul %319, %377, %cst_144 {dimension_numbers = #tpu.dot_dimension_numbers<[1], [0], [0], [1], [0, 0, 1, 1], [], []>} : vector<4x32xf32>, vector<32x96xf32>, vector<4x96xf32> -> vector<4x96xf32>
    %384 = vector.broadcast %379 : vector<1x96xf32> to vector<4x96xf32>
    %385 = arith.addf %383, %384 : vector<4x96xf32>
    %386 = vector.extract_strided_slice %382 {offsets = [0, 0], sizes = [4, 32], strides = [1, 1]} : vector<4x96xf32> to vector<4x32xf32>
    %387 = vector.extract_strided_slice %385 {offsets = [0, 0], sizes = [4, 32], strides = [1, 1]} : vector<4x96xf32> to vector<4x32xf32>
    %388 = arith.addf %386, %387 : vector<4x32xf32>
    %389 = arith.negf %388 : vector<4x32xf32>
    %390 = math.exp %389 : vector<4x32xf32>
    %cst_145 = arith.constant 1.000000e+00 : f32
    %391 = vector.broadcast %cst_145 : f32 to vector<4x32xf32>
    %392 = arith.addf %391, %390 : vector<4x32xf32>
    %393 = arith.divf %391, %392 : vector<4x32xf32>
    %394 = vector.extract_strided_slice %382 {offsets = [0, 32], sizes = [4, 32], strides = [1, 1]} : vector<4x96xf32> to vector<4x32xf32>
    %395 = vector.extract_strided_slice %385 {offsets = [0, 32], sizes = [4, 32], strides = [1, 1]} : vector<4x96xf32> to vector<4x32xf32>
    %396 = arith.addf %394, %395 : vector<4x32xf32>
    %397 = arith.negf %396 : vector<4x32xf32>
    %398 = math.exp %397 : vector<4x32xf32>
    %cst_146 = arith.constant 1.000000e+00 : f32
    %399 = vector.broadcast %cst_146 : f32 to vector<4x32xf32>
    %400 = arith.addf %399, %398 : vector<4x32xf32>
    %401 = arith.divf %399, %400 : vector<4x32xf32>
    %402 = vector.extract_strided_slice %382 {offsets = [0, 64], sizes = [4, 32], strides = [1, 1]} : vector<4x96xf32> to vector<4x32xf32>
    %403 = vector.extract_strided_slice %385 {offsets = [0, 64], sizes = [4, 32], strides = [1, 1]} : vector<4x96xf32> to vector<4x32xf32>
    %404 = arith.mulf %393, %403 : vector<4x32xf32>
    %405 = arith.addf %402, %404 : vector<4x32xf32>
    %406 = math.tanh %405 : vector<4x32xf32>
    %cst_147 = arith.constant 1.000000e+00 : f32
    %407 = vector.broadcast %cst_147 : f32 to vector<4x32xf32>
    %408 = arith.subf %407, %401 : vector<4x32xf32>
    %409 = arith.mulf %408, %406 : vector<4x32xf32>
    %410 = arith.mulf %401, %319 : vector<4x32xf32>
    %411 = arith.addf %409, %410 : vector<4x32xf32>
    %c0_148 = arith.constant 0 : index
    %c0_149 = arith.constant 0 : index
    %c0_150 = arith.constant 0 : index
    %412 = vector.load %arg9[%c0_148, %c0_149, %c0_150] : memref<1x4x32xf32, #tpu.memory_space<vmem>>, vector<1x4x32xf32>
    %413 = vector.shape_cast %412 : vector<1x4x32xf32> to vector<4x32xf32>
    %414 = vector.shape_cast %411 : vector<4x32xf32> to vector<1x4x32xf32>
    tpu.vector_store %arg9[%c0_148, %c0_149, %c0_150], %414 {strides = array<i32>} : memref<1x4x32xf32, #tpu.memory_space<vmem>>, vector<1x4x32xf32>,
    return
  }
  func.func @transform_0(%arg0: i32) -> (i32, i32, i32) {
    %c0_i32 = arith.constant 0 : i32
    %c0_i32_0 = arith.constant 0 : i32
    %c0_i32_1 = arith.constant 0 : i32
    return %arg0, %c0_i32, %c0_i32_0 : i32, i32, i32
  }
  func.func @transform_1(%arg0: i32) -> (i32, i32, i32) {
    %c0_i32 = arith.constant 0 : i32
    %c0_i32_0 = arith.constant 0 : i32
    %c0_i32_1 = arith.constant 0 : i32
    return %arg0, %c0_i32, %c0_i32_0 : i32, i32, i32
  }
  func.func @transform_2(%arg0: i32) -> (i32, i32, i32, i32) {
    %c0_i32 = arith.constant 0 : i32
    %c0_i32_0 = arith.constant 0 : i32
    %c0_i32_1 = arith.constant 0 : i32
    %c0_i32_2 = arith.constant 0 : i32
    return %arg0, %c0_i32, %c0_i32_0, %c0_i32_1 : i32, i32, i32, i32
  }
  func.func @transform_3(%arg0: i32) -> (i32, i32, i32, i32) {
    %c0_i32 = arith.constant 0 : i32
    %c0_i32_0 = arith.constant 0 : i32
    %c0_i32_1 = arith.constant 0 : i32
    %c0_i32_2 = arith.constant 0 : i32
    return %arg0, %c0_i32, %c0_i32_0, %c0_i32_1 : i32, i32, i32, i32
  }
  func.func @transform_4(%arg0: i32) -> (i32, i32) {
    %c0_i32 = arith.constant 0 : i32
    %c0_i32_0 = arith.constant 0 : i32
    %c0_i32_1 = arith.constant 0 : i32
    return %c0_i32, %c0_i32_0 : i32, i32
  }
  func.func @transform_5(%arg0: i32) -> (i32, i32) {
    %c0_i32 = arith.constant 0 : i32
    %c0_i32_0 = arith.constant 0 : i32
    %c0_i32_1 = arith.constant 0 : i32
    return %c0_i32, %c0_i32_0 : i32, i32
  }
  func.func @transform_6(%arg0: i32) -> (i32, i32) {
    %c0_i32 = arith.constant 0 : i32
    %c0_i32_0 = arith.constant 0 : i32
    %c0_i32_1 = arith.constant 0 : i32
    return %c0_i32, %c0_i32_0 : i32, i32
  }
  func.func @transform_7(%arg0: i32) -> (i32, i32) {
    %c0_i32 = arith.constant 0 : i32
    %c0_i32_0 = arith.constant 0 : i32
    %c0_i32_1 = arith.constant 0 : i32
    return %c0_i32, %c0_i32_0 : i32, i32
  }
  func.func @transform_8(%arg0: i32) -> (i32, i32, i32) {
    %c0_i32 = arith.constant 0 : i32
    %c0_i32_0 = arith.constant 0 : i32
    %c0_i32_1 = arith.constant 0 : i32
    return %arg0, %c0_i32, %c0_i32_0 : i32, i32, i32
  }
}

</mosaic_0001>

<bundles_post_ra>
// kernel: tpu_custom_call.1
= control target key start
LH: loop header
LB: loop body
LE: loop exit
PB: predicated region body
PF: predicated region fallthrough
CT: control target
= control target key end

     0   :  { %s14666_s0 = inlined_call_operand.vmem [shape: f32[2,32,133], index: 0, kind: input, shape index: {}]   ;;  %s14667_s1 = inlined_call_operand.vmem [shape: f32[2,256,14], index: 1, kind: input, shape index: {}]   ;;  %s14668_s2 = inlined_call_operand.vmem [shape: f32[2,32,8,1], index: 2, kind: input, shape index: {}]   ;;  %s14669_s3 = inlined_call_operand.vmem [shape: f32[2,4,8,1], index: 3, kind: input, shape index: {}]   ;;  %s14670_s4 = inlined_call_operand.vmem [shape: f32[133,64], index: 4, kind: input, shape index: {}]   ;;  %s14671_s5 = inlined_call_operand.vmem [shape: f32[14,32], index: 5, kind: input, shape index: {}]   ;;  %s14672_s6 = inlined_call_operand.vmem [shape: f32[32,904], index: 6, kind: input, shape index: {}]   ;;  %s14673_s7 = inlined_call_operand.vmem [shape: f32[1,964], index: 7, kind: input, shape index: {}]   ;;  %s14674_s8 = inlined_call_operand.hbm [shape: f32[2,4,32], index: 8, kind: output, shape index: {}]  }
   0x1   :  { %14786 = sst [smem:[#allocation72_spill]] %s14666_s0 }
   0x2   :  { %13 = vsyncpa [#allocation3], 0 }
   0x3   :  { %15 = vsyncpa [#allocation3 + $0x1], 0  ;;  %s10797_s27 = smov 0   ;;  %s10799_s28 = smov 0  }
   0x4   :  { %s10801_s29 = smov 0   ;;  %s10803_s30 = smov 0  }
   0x5 LB: > { %s10818_s9 = sadd.s32 4294967295, %s10719_s30   ;;  %s8727_s10 = sadd.s32 4294967294, %s10719_s30   ;;  %s10719_s30 = sphi %s10803_s30, %s15107_s30   ;;  %s10715_s29 = sphi %s10801_s29, %s15106_s29   ;;  %s10711_s28 = sphi %s10799_s28, %s15105_s28   ;;  %s10707_s27 = sphi %s10797_s27, %s15104_s27  }
   0x6   : > { %s10822_s11 = sadd.s32 1, %s10719_s30   ;;  %s216_s12 = sadd.s32 1, %s10715_s29 }
   0x7   : > { %s213_s13 = ssub.s32 %s10719_s30, %s10822_s11  ;;  %p226_p0 = scmp.ne.s32.totalorder %s10715_s29, %s10711_s28 }
   0x8   : > { %p214_p1 = scmp.eq.s32.totalorder %s213_s13, 0  ;;  %p227_p2 = scmp.eq.s32.totalorder %s10818_s9, 1 }
   0x9   : > { %p232_p3 = scmp.ne.s32.totalorder %s10711_s28, %s10707_s27  ;;  %p233_p4 = scmp.eq.s32.totalorder %s8727_s10, 1 }
   0xa   : > { %s10833_s14 = scalar_select %p214_p1, %s10715_s29, %s216_s12  }
   0xb   : > { %p10835_p5 = por %p227_p2, %p226_p0  ;;  %p10839_p6 = por %p233_p4, %p232_p3 }
   0xc   : > { %p8730_p7 = scmp.ge.s32.totalorder %s10719_s30, 1  ;;  %p295_p8 = scmp.lt.s32.totalorder %s10719_s30, 3 }
   0xe   : > { %p296_p9 = pnand %p8730_p7, %p295_p8 }
  0x10   : > { %299 = sbr.rel (%p296_p9) target bundleno = 5588 (0x15d4), region = 52 }
  0x17   : > { %v582_v0 = vld [vmem:[%s14671_s5] sm:$0xff]  ;;  %v583_v1 = vld [vmem:[%s14671_s5 + $0x8] sm:$0x3f]  ;;  %vm681_vm0 = vcmask 1045504   ;;  %p344_p10 = scmp.lt.s32.totalorder %s10818_s9, 1  ;;  %vm10721_vm1 = vmmov 1  }
  0x18   : > { %v9621_v2 = vpack.c.bf16 %v583_v1, %v582_v0  ;;  %vm9622_vm2 = vmpackc.low %vm681_vm0, %vm10721_vm1  ;;  %v440_v3 = vld [vmem:[%s14670_s4] sm:$0xff]  ;;  %v441_v4 = vld [vmem:[%s14670_s4 + $0x8] sm:$0xff]  ;;  %v14677_v5 = vmov 0.0|0.0   ;;  %vm584_vm3 = vcmask 113664   ;;  %s14789_s0 = sld [smem:[#allocation72_spill]]  ;;  %vm457_vm4 = vcmask 39936  }
  0x19   : > { %s10859_s25 = scalar_select %p344_p10, %s10818_s9, 1  ;;  %9597 = vmatprep.subr.bf16.mxu0 %v14677_v5  ;;  %v9598_v6 = vpack.c.bf16 %v441_v4, %v440_v3  ;;  %v442_v7 = vld [vmem:[%s14670_s4 + $0x10] sm:$0xff]  ;;  %v443_v8 = vld [vmem:[%s14670_s4 + $0x18] sm:$0xff]  ;;  %v444_v10 = vld [vmem:[%s14670_s4 + $0x20] sm:$0xff]  ;;  %v14675_v45 = vmov 0.0   ;;  %vm470_vm5 = vcmask 1044480  }
  0x1a   : > { %9623 = vmatprep.subr.msk.bf16.mxu1 %vm9622_vm2, %v9621_v2  ;;  %v9601_v9 = vpack.c.bf16 %v443_v8, %v442_v7  ;;  %v445_v11 = vld [vmem:[%s14670_s4 + $0x28] sm:$0xff]  ;;  %v446_v17 = vld [vmem:[%s14670_s4 + $0x30] sm:$0xff]  ;;  %v447_v18 = vld [vmem:[%s14670_s4 + $0x38] sm:$0xff]  ;;  %vm1202_vm7 = vcmask 261120   ;;  %s14750_s22 = smov 96   ;;  %s14766_s23 = smov 126  }
  0x1b   : > { %9626 = vmatpush3.bf16.msk.msra.mxu1 %vm9622_vm2, %v9621_v2  ;;  %s8986_s17 = sshll.u32 %s10859_s25, 8  ;;  %9599 = vmatpush1.bf16.msra.mxu0 %v9598_v6  ;;  %v9604_v15 = vpack.c.bf16 %v445_v11, %v444_v10  ;;  %s8985_s18 = sshll.u32 %s10859_s25, 6  ;;  %v9607_v20 = vpack.c.bf16 %v447_v18, %v446_v17  ;;  %v448_v22 = vld [vmem:[%s14670_s4 + $0x40] sm:$0xff]  ;;  %v449_v23 = vld [vmem:[%s14670_s4 + $0x48] sm:$0xff]  ;;  %v450_v26 = vld [vmem:[%s14670_s4 + $0x50] sm:$0xff] }
  0x1c   : > { %s10874_s20 = scalar_lea.vmem %s14667_s1, %s8986_s17  ;;  %9600 = vmatprep.subr.bf16.mxu0 %v14677_v5  ;;  %v9610_v25 = vpack.c.bf16 %v449_v23, %v448_v22  ;;  %v451_v28 = vld [vmem:[%s14670_s4 + $0x58] sm:$0xff]  ;;  %v452_v33 = vld [vmem:[%s14670_s4 + $0x60] sm:$0xff]  ;;  %v453_v34 = vld [vmem:[%s14670_s4 + $0x68] sm:$0xff]  ;;  %s14754_s24 = smov 64  }
  0x1d   : > { %v372_v12 = vld [vmem:[%s10874_s20] sm:$0xff]  ;;  %v373_v13 = vld [vmem:[%s10874_s20 + $0x8] sm:$0xff]  ;;  %v374_v14 = vld [vmem:[%s10874_s20 + $0x10] sm:$0xff]  ;;  %v9613_v31 = vpack.c.bf16 %v451_v28, %v450_v26  ;;  %v9616_v36 = vpack.c.bf16 %v453_v34, %v452_v33  ;;  %s10729_s26 = smov 63   ;;  %s11453_s19 = scalar_lea.vmem %s14668_s2, %s8986_s17 }
  0x1e   : > { %9217 = vmatprep.mubr.msk.f32.mxu1 %vm584_vm3, %v372_v12  ;;  %v375_v16 = vld [vmem:[%s10874_s20 + $0x18] sm:$0xff]  ;;  %v376_v19 = vld [vmem:[%s10874_s20 + $0x20] sm:$0xff]  ;;  %v377_v21 = vld [vmem:[%s10874_s20 + $0x28] sm:$0xff]  ;;  %s10913_s10 = scalar_lea.vmem %s14789_s0, %s8985_s18  ;;  %s14748_s18 = smov 127  }
  0x1f   : > { %9218 = vmatmul.mubr.msk.f32.vlgmr.msra.gmra.mrb[0].mxu1 %vm584_vm3, %v373_v13  ;;  %9602 = vmatpush1.bf16.msra.mxu0 %v9601_v9  ;;  %v378_v24 = vld [vmem:[%s10874_s20 + $0x30] sm:$0xff]  ;;  %v379_v27 = vld [vmem:[%s10874_s20 + $0x38] sm:$0xff]  ;;  %v365_v29 = vld [vmem:[%s10913_s10 + $0x8] sm:$0xff]  ;;  %s10732_s17 = smov 94   ;;  %s14931_s12 = smov 96  }
  0x20   : > { %9220 = vmatprep.mubr.msk.f32.mxu1 %vm584_vm3, %v374_v14  ;;  %9603 = vmatprep.subr.bf16.mxu0 %v14677_v5  ;;  %v380_v30 = vld [vmem:[%s10874_s20 + $0x40] sm:$0xff]  ;;  %v381_v32 = vld [vmem:[%s10874_s20 + $0x48] sm:$0xff]  ;;  %v382_v35 = vld [vmem:[%s10874_s20 + $0x50] sm:$0xff]  ;;  %s14939_s21 = smov 127   ;;  %s8988_s13 = sshll.u32 %s10859_s25, 5 }
  0x21   : > { %8741 = vmatprep.mubr.msk.f32.mxu0 %vm457_vm4, %v365_v29  ;;  %v383_v37 = vld [vmem:[%s10874_s20 + $0x58] sm:$0xff]  ;;  %v454_v38 = vld [vmem:[%s14670_s4 + $0x70] sm:$0xff]  ;;  %v384_v40 = vld [vmem:[%s10874_s20 + $0x60] sm:$0xff]  ;;  %s10739_s25 = smov 59   ;;  %s10742_s0 = smov 58  }
  0x22   : > { %v455_v39 = vld [vmem:[%s14670_s4 + $0x78] sm:$0xff]  ;;  %v385_v42 = vld [vmem:[%s10874_s20 + $0x68] sm:$0xff]  ;;  %v386_v43 = vld [vmem:[%s10874_s20 + $0x70] sm:$0xff] }
  0x23   : > { %9221 = vmatmul.mubr.msk.f32.gmra.mrb[2].mxu1 %vm584_vm3, %v375_v16  ;;  %9605 = vmatpush1.bf16.msra.mxu0 %v9604_v15  ;;  %v9619_v41 = vpack.c.bf16 %v455_v39, %v454_v38  ;;  %v387_v44 = vld [vmem:[%s10874_s20 + $0x78] sm:$0xff]  ;;  %v456_v46 = vld [vmem:[%s14670_s4 + $0x80] sm:$0x1f]  ;;  %v389_v50 = vld [vmem:[%s10874_s20 + $0x88] sm:$0xff] }
  0x24   : > { %9223 = vmatprep.mubr.msk.f32.mxu1 %vm584_vm3, %v376_v19  ;;  %9606 = vmatprep.subr.bf16.mxu0 %v14677_v5  ;;  %v388_v47 = vld [vmem:[%s10874_s20 + $0x80] sm:$0xff]  ;;  %v367_v49 = vld [vmem:[%s10913_s10 + $0x18] sm:$0xff]  ;;  %v390_v51 = vld [vmem:[%s10874_s20 + $0x90] sm:$0xff] }
  0x25   : > { %v364_v48 = vld [vmem:[%s10913_s10] sm:$0xff]  ;;  %v366_v52 = vld [vmem:[%s10913_s10 + $0x10] sm:$0xff]  ;;  %v369_v53 = vld [vmem:[%s10913_s10 + $0x28] sm:$0xff] }
  0x26   : > { %v391_v54 = vld [vmem:[%s10874_s20 + $0x98] sm:$0xff]  ;;  %v392_v55 = vld [vmem:[%s10874_s20 + $0xa0] sm:$0xff]  ;;  %v393_v58 = vld [vmem:[%s10874_s20 + $0xa8] sm:$0xff] }
  0x27   : > { %9224 = vmatmul.mubr.msk.f32.gmra.mrb[4].mxu1 %vm584_vm3, %v377_v21  ;;  %9608 = vmatpush1.bf16.msra.mxu0 %v9607_v20  ;;  %v368_v56 = vld [vmem:[%s10913_s10 + $0x20] sm:$0xff]  ;;  %v371_v57 = vld [vmem:[%s10913_s10 + $0x38] sm:$0xff]  ;;  %v394_v59 = vld [vmem:[%s10874_s20 + $0xb0] sm:$0xff] }
  0x28   : > { %9226 = vmatprep.mubr.msk.f32.mxu1 %vm584_vm3, %v378_v24  ;;  %9609 = vmatprep.subr.bf16.mxu0 %v14677_v5  ;;  %v370_v60 = vld [vmem:[%s10913_s10 + $0x30] sm:$0xff]  ;;  %v395_v61 = vld [vmem:[%s10874_s20 + $0xb8] sm:$0xff]  ;;  %v396_v62 = vld [vmem:[%s10874_s20 + $0xc0] sm:$0xff]  ;;  %s10734_s10 = smov 30  }
  0x29   : > { %v397_v63 = vld [vmem:[%s10874_s20 + $0xc8] sm:$0xff]  ;;  %v398_v0 = vld [vmem:[%s10874_s20 + $0xd0] sm:$0xff]  ;;  %v399_v1 = vld [vmem:[%s10874_s20 + $0xd8] sm:$0xff] }
  0x2a   : > { %v400_v2 = vld [vmem:[%s10874_s20 + $0xe0] sm:$0xff]  ;;  %v401_v3 = vld [vmem:[%s10874_s20 + $0xe8] sm:$0xff]  ;;  %v402_v4 = vld [vmem:[%s10874_s20 + $0xf0] sm:$0xff] }
  0x2b   : > { %9227 = vmatmul.mubr.msk.f32.gmra.mrb[6].mxu1 %vm584_vm3, %v379_v27  ;;  %9611 = vmatpush1.bf16.msra.mxu0 %v9610_v25  ;;  %v403_v6 = vld [vmem:[%s10874_s20 + $0xf8] sm:$0xff]  ;;  %v1502_v7 = vld [vmem:[%s14672_s6 + $0x80] sm:$0xff]  ;;  %s14752_s20 = smov 32  }
  0x2c   : > { %9229 = vmatprep.mubr.msk.f32.mxu1 %vm584_vm3, %v380_v30  ;;  %9612 = vmatprep.subr.bf16.mxu0 %v14677_v5  ;;  %v1503_v8 = vld [vmem:[%s14672_s6 + $0xc0] sm:$0xff] }
  0x2d   : > { %v11011_v9 = vpack.i.bf16 %v1503_v8, %v1502_v7  ;;  %v1500_v10 = vld [vmem:[%s14672_s6] sm:$0xff]  ;;  %v9631_v13 = vpack.c.bf16 %v1503_v8, %v1502_v7 }
  0x2e   : > { %v1501_v11 = vld [vmem:[%s14672_s6 + $0x40] sm:$0xff] }
  0x2f   : > { %9230 = vmatmul.mubr.msk.f32.gmra.mrb[8].mxu1 %vm584_vm3, %v381_v32  ;;  %9614 = vmatpush1.bf16.msra.mxu0 %v9613_v31  ;;  %v9627_v12 = vpack.c.bf16 %v1501_v11, %v1500_v10  ;;  %v11023_v20 = vpack.i.bf16 %v1501_v11, %v1500_v10  ;;  %v11041_v32 = vld [vmem:[%s14673_s7] ss:$0 sm:$0xff] }
  0x30   : > { %9232 = vmatprep.mubr.msk.f32.mxu1 %vm584_vm3, %v382_v35  ;;  %9615 = vmatprep.subr.bf16.mxu0 %v14677_v5 }
  0x33   : > { %9233 = vmatmul.mubr.msk.f32.gmra.mrb[10].mxu1 %vm584_vm3, %v383_v37  ;;  %9617 = vmatpush1.bf16.msra.mxu0 %v9616_v36 }
  0x34   : > { %9235 = vmatprep.mubr.msk.f32.mxu1 %vm584_vm3, %v384_v40  ;;  %9618 = vmatprep.subr.bf16.mxu0 %v14677_v5 }
  0x37   : > { %9236 = vmatmul.mubr.msk.f32.gmra.mrb[12].mxu1 %vm584_vm3, %v385_v42  ;;  %9620 = vmatpush1.bf16.msra.mxu0 %v9619_v41 }
  0x38   : > { %9238 = vmatprep.mubr.msk.f32.mxu1 %vm584_vm3, %v386_v43  ;;  %506 = vmatprep.subr.mxu0 %v14675_v45 }
  0x3b   : > { %9239 = vmatmul.mubr.msk.f32.gmra.mrb[14].mxu1 %vm584_vm3, %v387_v44  ;;  %8740 = vmatpush1.msk.msra.mxu0 %vm470_vm5, %v456_v46 }
  0x3c   : > { %9241 = vmatprep.mubr.msk.f32.mxu1 %vm584_vm3, %v388_v47  ;;  %539 = vmatmul.mubr.f32.vlgmr.msra.gmra.mrb[0].mxu0 %v364_v48 }
  0x3d   : > { %8742 = vmatprep.mubr.msk.f32.mxu0 %vm457_vm4, %v367_v49  ;;  %9628 = vmatprep.subr.bf16.mxu0 %v9627_v12 }
  0x3e   : > { %9630 = vmatpush3.bf16.msra.mxu0 %v9627_v12 }
  0x3f   : > { %9242 = vmatmul.mubr.msk.f32.gmra.mrb[16].mxu1 %vm584_vm3, %v389_v50  ;;  %9632 = vmatprep.subr.bf16.mxu0 %v9631_v13 }
  0x40   : > { %9244 = vmatprep.mubr.msk.f32.mxu1 %vm584_vm3, %v390_v51  ;;  %544 = vmatmul.mubr.f32.gmra.mrb[2].mxu0 %v366_v52 }
  0x41   : > { %8743 = vmatprep.mubr.msk.f32.mxu0 %vm457_vm4, %v369_v53 }
  0x42   : > { %9634 = vmatpush3.bf16.msra.mxu0 %v9631_v13 }
  0x43   : > { %9245 = vmatmul.mubr.msk.f32.gmra.mrb[18].mxu1 %vm584_vm3, %v391_v54 }
  0x44   : > { %9247 = vmatprep.mubr.msk.f32.mxu1 %vm584_vm3, %v392_v55  ;;  %549 = vmatmul.mubr.f32.gmra.mrb[4].mxu0 %v368_v56 }
  0x45   : > { %8744 = vmatprep.mubr.msk.f32.mxu0 %vm457_vm4, %v371_v57 }
  0x47   : > { %9248 = vmatmul.mubr.msk.f32.gmra.mrb[20].mxu1 %vm584_vm3, %v393_v58 }
  0x48   : > { %9250 = vmatprep.mubr.msk.f32.mxu1 %vm584_vm3, %v394_v59  ;;  %554 = vmatmul.mubr.f32.gmra.mrb[6].mxu0 %v370_v60 }
  0x4b   : > { %9251 = vmatmul.mubr.msk.f32.gmra.mrb[22].mxu1 %vm584_vm3, %v395_v61 }
  0x4c   : > { %9253 = vmatprep.mubr.msk.f32.mxu1 %vm584_vm3, %v396_v62 }
  0x4f   : > { %9254 = vmatmul.mubr.msk.f32.gmra.mrb[24].mxu1 %vm584_vm3, %v397_v63 }
  0x50   : > { %9256 = vmatprep.mubr.msk.f32.mxu1 %vm584_vm3, %v398_v0 }
  0x53   : > { %9257 = vmatmul.mubr.msk.f32.gmra.mrb[26].mxu1 %vm584_vm3, %v399_v1 }
  0x54   : > { %9259 = vmatprep.mubr.msk.f32.mxu1 %vm584_vm3, %v400_v2 }
  0x57   : > { %9260 = vmatmul.mubr.msk.f32.gmra.mrb[28].mxu1 %vm584_vm3, %v401_v3 }
  0x58   : > { %9262 = vmatprep.mubr.msk.f32.mxu1 %vm584_vm3, %v402_v4 }
  0x5b   : > { %9263 = vmatmul.mubr.msk.f32.gmra.mrb[30].mxu1 %vm584_vm3, %v403_v6 }
  0xf2   : > { %v9219_v14 = vpop.f32.mrb[0].mxu1 }
  0xf3   : > { %944 = vrot.lane.b32.xlu0 %v9219_v14, %s14752_s20  ;;  %v751_v15 = vpop.f32.mrb[1].mxu1 }
  0xf6   : > { %v9222_v16 = vpop.f32.mrb[2].mxu1 }
  0xf7   : > { %942 = vrot.lane.b32.xlu0 %v751_v15, %s14752_s20  ;;  %948 = vrot.lane.b32.xlu1 %v9222_v16, %s14752_s20  ;;  %v761_v17 = vpop.f32.mrb[3].mxu1 }
  0xfa   : > { %v9225_v18 = vpop.f32.mrb[4].mxu1 }
  0xfb   : > { %946 = vrot.lane.b32.xlu1 %v761_v17, %s14752_s20  ;;  %v771_v19 = vpop.f32.mrb[5].mxu1 }
  0xfc   : > { %950 = vrot.lane.b32.xlu0 %v771_v19, %s14752_s20 }
  0xfe   : > { %v9228_v21 = vpop.f32.mrb[6].mxu1 }
  0xff   : > { %9837 = vrot.lane.b32.xlu1 %v11023_v20, %s14748_s18  ;;  %v781_v22 = vpop.f32.mrb[7].mxu1 }
 0x100   : > { %954 = vrot.lane.b32.xlu0 %v781_v22, %s14752_s20 }
 0x102   : > { %v9231_v23 = vpop.f32.mrb[8].mxu1 }
 0x103   : > { %952 = vrot.lane.b32.xlu1 %v9225_v18, %s14752_s20  ;;  %v791_v24 = vpop.f32.mrb[9].mxu1 }
 0x104   : > { %958 = vrot.lane.b32.xlu0 %v791_v24, %s14752_s20 }
 0x106   : > { %v9234_v25 = vpop.f32.mrb[10].mxu1 }
 0x107   : > { %956 = vrot.lane.b32.xlu1 %v9228_v21, %s14752_s20  ;;  %v801_v26 = vpop.f32.mrb[11].mxu1 }
 0x108   : > { %962 = vrot.lane.b32.xlu0 %v801_v26, %s14752_s20 }
 0x10a   : > { %v9237_v27 = vpop.f32.mrb[12].mxu1 }
 0x10b   : > { %960 = vrot.lane.b32.xlu1 %v9231_v23, %s14752_s20  ;;  %v811_v28 = vpop.f32.mrb[13].mxu1 }
 0x10c   : > { %966 = vrot.lane.b32.xlu0 %v811_v28, %s14752_s20 }
 0x10e   : > { %v9240_v29 = vpop.f32.mrb[14].mxu1 }
 0x10f   : > { %964 = vrot.lane.b32.xlu1 %v9234_v25, %s14752_s20  ;;  %v821_v30 = vpop.f32.mrb[15].mxu1  ;;  %v11036_v31 = vpop.f32.mrb[0].mxu0 }
 0x110   : > { %970 = vrot.lane.b32.xlu0 %v821_v30, %s14752_s20  ;;  %v542_v33 = vpop.f32.mrb[1].mxu0  ;;  %v566_v34 = vadd.f32 %v11041_v32, %v11036_v31 }
 0x112   : > { %v9243_v35 = vpop.f32.mrb[16].mxu1  ;;  %vm570_vm6 = vcmp.ge.f32.partialorder %v566_v34, 0.0  ;;  %v574_v36 = vmul.f32 0.01, %v566_v34 }
 0x113   : > { %968 = vrot.lane.b32.xlu1 %v9237_v27, %s14752_s20  ;;  %v831_v37 = vpop.f32.mrb[17].mxu1  ;;  %v11047_v38 = vpop.f32.mrb[2].mxu0 }
 0x114   : > { %974 = vrot.lane.b32.xlu0 %v831_v37, %s14752_s20  ;;  %v11050_v39 = vsel %vm570_vm6, %v566_v34, %v574_v36  ;;  %v567_v40 = vadd.f32 %v11041_v32, %v11047_v38  ;;  %v547_v41 = vpop.f32.mrb[3].mxu0 }
 0x115   : > { %14790 = vst [vmem:[#allocation5_spill] sm:$0xff] %v11050_v39  ;;  %9273 = vmatprep.mubr.msk.f32.mxu0 %vm1202_vm7, %v11050_v39 }
 0x116   : > { %v9246_v42 = vpop.f32.mrb[18].mxu1  ;;  %vm571_vm8 = vcmp.ge.f32.partialorder %v567_v40, 0.0  ;;  %v575_v43 = vmul.f32 0.01, %v567_v40 }
 0x117   : > { %972 = vrot.lane.b32.xlu1 %v9240_v29, %s14752_s20  ;;  %v841_v44 = vpop.f32.mrb[19].mxu1  ;;  %v11057_v46 = vpop.f32.mrb[4].mxu0 }
 0x118   : > { %978 = vrot.lane.b32.xlu0 %v841_v44, %s14752_s20  ;;  %v11060_v47 = vsel %vm571_vm8, %v567_v40, %v575_v43  ;;  %v552_v48 = vpop.f32.mrb[5].mxu0  ;;  %v568_v49 = vadd.f32 %v11041_v32, %v11057_v46 }
 0x119   : > { %14791 = vst [vmem:[#allocation6_spill] sm:$0xff] %v11060_v47  ;;  %9274 = vmatmul.mubr.msk.f32.vlgmr.msra.gmra.mrb[8].mxu0 %vm1202_vm7, %v11060_v47 }
 0x11a   : > { %v9249_v50 = vpop.f32.mrb[20].mxu1  ;;  %vm572_vm9 = vcmp.ge.f32.partialorder %v568_v49, 0.0  ;;  %v576_v51 = vmul.f32 0.01, %v568_v49 }
 0x11b   : > { %976 = vrot.lane.b32.xlu1 %v9243_v35, %s14752_s20  ;;  %v851_v52 = vpop.f32.mrb[21].mxu1  ;;  %v11067_v53 = vpop.f32.mrb[6].mxu0 }
 0x11c   : > { %982 = vrot.lane.b32.xlu0 %v851_v52, %s14752_s20  ;;  %v11070_v54 = vsel %vm572_vm9, %v568_v49, %v576_v51  ;;  %v557_v55 = vpop.f32.mrb[7].mxu0  ;;  %v569_v57 = vadd.f32 %v11041_v32, %v11067_v53 }
 0x11d   : > { %14792 = vst [vmem:[#allocation7_spill] sm:$0xff] %v11070_v54  ;;  %9276 = vmatprep.mubr.msk.f32.mxu0 %vm1202_vm7, %v11070_v54 }
 0x11e   : > { %v9252_v56 = vpop.f32.mrb[22].mxu1  ;;  %v577_v59 = vmul.f32 0.01, %v569_v57  ;;  %vm573_vm10 = vcmp.ge.f32.partialorder %v569_v57, 0.0 }
 0x11f   : > { %980 = vrot.lane.b32.xlu1 %v9246_v42, %s14752_s20  ;;  %v861_v58 = vpop.f32.mrb[23].mxu1 }
 0x120   : > { %986 = vrot.lane.b32.xlu0 %v861_v58, %s14752_s20  ;;  %v11078_v61 = vsel %vm573_vm10, %v569_v57, %v577_v59 }
 0x121   : > { %14793 = vst [vmem:[#allocation8_spill] sm:$0xff] %v11078_v61  ;;  %9277 = vmatmul.mubr.msk.f32.gmra.mrb[10].mxu0 %vm1202_vm7, %v11078_v61 }
 0x122   : > { %v9255_v60 = vpop.f32.mrb[24].mxu1 }
 0x123   : > { %984 = vrot.lane.b32.xlu1 %v9249_v50, %s14752_s20  ;;  %v871_v62 = vpop.f32.mrb[25].mxu1 }
 0x124   : > { %990 = vrot.lane.b32.xlu0 %v871_v62, %s14752_s20 }
 0x126   : > { %v9258_v63 = vpop.f32.mrb[26].mxu1 }
 0x127   : > { %988 = vrot.lane.b32.xlu1 %v9252_v56, %s14752_s20  ;;  %v881_v0 = vpop.f32.mrb[27].mxu1 }
 0x128   : > { %994 = vrot.lane.b32.xlu0 %v881_v0, %s14752_s20 }
 0x12a   : > { %v9261_v1 = vpop.f32.mrb[28].mxu1 }
 0x12b   : > { %992 = vrot.lane.b32.xlu1 %v9255_v60, %s14752_s20  ;;  %v891_v2 = vpop.f32.mrb[29].mxu1 }
 0x12c   : > { %1000 = vrot.lane.b32.xlu0 %v9261_v1, %s14752_s20 }
 0x12e   : > { %v9264_v3 = vpop.f32.mrb[30].mxu1 }
 0x12f   : > { %996 = vrot.lane.b32.xlu1 %v9258_v63, %s14752_s20  ;;  %v901_v4 = vpop.f32.mrb[31].mxu1 }
 0x130   : > { %998 = vrot.lane.b32.xlu0 %v891_v2, %s14752_s20 }
 0x133   : > { %1002 = vrot.lane.b32.xlu1 %v901_v4, %s14752_s20 }
 0x134   : > { %9842 = vrot.lane.b32.xlu0 %v11011_v9, %s14748_s18  ;;  %s14930_s18 = smov 32  }
 0x137   : > { %1004 = vrot.lane.b32.xlu1 %v9264_v3, %s14752_s20  ;;  %s10733_s20 = smov 31  }
 0x165   : > { %v945_v6 = vpop.permute.xlu0 %944 }
 0x166   : > { %v1039_v7 = vadd.f32 %v945_v6, %v11036_v31 }
 0x168   : > { %v1071_v8 = vadd.f32 %v11041_v32, %v1039_v7 }
 0x169   : > { %v943_v10 = vpop.permute.xlu0 %942  ;;  %v949_v11 = vpop.permute.xlu1 %948 }
 0x16a   : > { %v1038_v12 = vadd.f32 %v943_v10, %v11036_v31  ;;  %v1041_v13 = vadd.f32 %v949_v11, %v11036_v31  ;;  %vm1103_vm11 = vcmp.ge.f32.partialorder %v1071_v8, 0.0  ;;  %v1135_v14 = vmul.f32 0.01, %v1071_v8 }
 0x16c   : > { %v1070_v15 = vadd.f32 %v11041_v32, %v1038_v12  ;;  %v1073_v16 = vadd.f32 %v11041_v32, %v1041_v13  ;;  %v1167_v17 = vsel %vm1103_vm11, %v1071_v8, %v1135_v14 }
 0x16d   : > { %v947_v18 = vpop.permute.xlu1 %946  ;;  %1538 = vrot.lane.b32.xlu1 %v1167_v17, %s14750_s22 }
 0x16e   : > { %v1040_v19 = vadd.f32 %v947_v18, %v11036_v31  ;;  %v951_v21 = vpop.permute.xlu0 %950  ;;  %vm1105_vm12 = vcmp.ge.f32.partialorder %v1073_v16, 0.0  ;;  %v1137_v22 = vmul.f32 0.01, %v1073_v16  ;;  %vm1102_vm13 = vcmp.ge.f32.partialorder %v1070_v15, 0.0 }
 0x16f   : > { %v1042_v23 = vadd.f32 %v951_v21, %v11036_v31  ;;  %v1134_v24 = vmul.f32 0.01, %v1070_v15 }
 0x170   : > { %v1072_v25 = vadd.f32 %v11041_v32, %v1040_v19  ;;  %v1169_v26 = vsel %vm1105_vm12, %v1073_v16, %v1137_v22 }
 0x171   : > { %v1074_v27 = vadd.f32 %v11041_v32, %v1042_v23  ;;  %v9838_v28 = vpop.permute.xlu1 %9837  ;;  %1542 = vrot.lane.b32.xlu1 %v1169_v26, %s14750_s22  ;;  %v1166_v29 = vsel %vm1102_vm13, %v1070_v15, %v1134_v24 }
 0x172   : > { %v9840_v30 = vunpack.i.h.bf16 %v9838_v28  ;;  %v9839_v33 = vunpack.i.l.bf16 %v9838_v28  ;;  %1536 = vrot.lane.b32.xlu0 %v1166_v29, %s14750_s22  ;;  %v955_v34 = vpop.permute.xlu0 %954  ;;  %vm1104_vm14 = vcmp.ge.f32.partialorder %v1072_v25, 0.0  ;;  %v1136_v35 = vmul.f32 0.01, %v1072_v25 }
 0x173   : > { %v1044_v36 = vadd.f32 %v955_v34, %v11036_v31  ;;  %v1138_v43 = vmul.f32 0.01, %v1074_v27  ;;  %vm1106_vm15 = vcmp.ge.f32.partialorder %v1074_v27, 0.0 }
 0x174   : > { %v1168_v37 = vsel %vm1104_vm14, %v1072_v25, %v1136_v35  ;;  %v9635_v40 = vpack.c.bf16 %v9840_v30, %v9839_v33 }
 0x175   : > { %v1076_v41 = vadd.f32 %v11041_v32, %v1044_v36  ;;  %v953_v42 = vpop.permute.xlu1 %952  ;;  %v1170_v55 = vsel %vm1106_vm15, %v1074_v27, %v1138_v43 }
 0x176   : > { %v1043_v44 = vadd.f32 %v953_v42, %v11036_v31  ;;  %1540 = vrot.lane.b32.xlu0 %v1168_v37, %s14750_s22  ;;  %v959_v48 = vpop.permute.xlu0 %958  ;;  %9636 = vmatprep.subr.bf16.mxu0 %v9635_v40 }
 0x177   : > { %v1046_v49 = vadd.f32 %v959_v48, %v11047_v38  ;;  %9638 = vmatpush3.bf16.msra.mxu0 %v9635_v40  ;;  %v1140_v56 = vmul.f32 0.01, %v1076_v41  ;;  %vm1108_vm1 = vcmp.ge.f32.partialorder %v1076_v41, 0.0 }
 0x178   : > { %v1075_v50 = vadd.f32 %v11041_v32, %v1043_v44 }
 0x179   : > { %v1078_v51 = vadd.f32 %v11041_v32, %v1046_v49  ;;  %v957_v52 = vpop.permute.xlu1 %956  ;;  %v1172_v3 = vsel %vm1108_vm1, %v1076_v41, %v1140_v56 }
 0x17a   : > { %v1045_v57 = vadd.f32 %v957_v52, %v11036_v31  ;;  %1544 = vrot.lane.b32.xlu0 %v1170_v55, %s14750_s22  ;;  %v963_v58 = vpop.permute.xlu0 %962  ;;  %vm1107_vm0 = vcmp.ge.f32.partialorder %v1075_v50, 0.0  ;;  %v1139_v59 = vmul.f32 0.01, %v1075_v50 }
 0x17b   : > { %v1048_v60 = vadd.f32 %v963_v58, %v11047_v38  ;;  %v1142_v62 = vmul.f32 0.01, %v1078_v51  ;;  %vm1110_vm2 = vcmp.ge.f32.partialorder %v1078_v51, 0.0 }
 0x17c   : > { %v1077_v63 = vadd.f32 %v11041_v32, %v1045_v57  ;;  %v1171_v0 = vsel %vm1107_vm0, %v1075_v50, %v1139_v59 }
 0x17d   : > { %v1080_v1 = vadd.f32 %v11041_v32, %v1048_v60  ;;  %v961_v2 = vpop.permute.xlu1 %960  ;;  %1546 = vrot.lane.b32.xlu1 %v1171_v0, %s14750_s22  ;;  %v1174_v8 = vsel %vm1110_vm2, %v1078_v51, %v1142_v62 }
 0x17e   : > { %v1047_v31 = vadd.f32 %v961_v2, %v11047_v38  ;;  %1548 = vrot.lane.b32.xlu0 %v1172_v3, %s14750_s22  ;;  %v967_v4 = vpop.permute.xlu0 %966  ;;  %vm1109_vm3 = vcmp.ge.f32.partialorder %v1077_v63, 0.0  ;;  %v1141_v6 = vmul.f32 0.01, %v1077_v63 }
 0x17f   : > { %v1050_v7 = vadd.f32 %v967_v4, %v11047_v38  ;;  %v1144_v14 = vmul.f32 0.01, %v1080_v1  ;;  %vm1112_vm5 = vcmp.ge.f32.partialorder %v1080_v1, 0.0 }
 0x180   : > { %v1079_v10 = vadd.f32 %v11041_v32, %v1047_v31  ;;  %v1173_v11 = vsel %vm1109_vm3, %v1077_v63, %v1141_v6 }
 0x181   : > { %v1082_v12 = vadd.f32 %v11041_v32, %v1050_v7  ;;  %v965_v13 = vpop.permute.xlu1 %964  ;;  %1550 = vrot.lane.b32.xlu1 %v1173_v11, %s14750_s22  ;;  %v1176_v24 = vsel %vm1112_vm5, %v1080_v1, %v1144_v14 }
 0x182   : > { %v1049_v15 = vadd.f32 %v965_v13, %v11047_v38  ;;  %1552 = vrot.lane.b32.xlu0 %v1174_v8, %s14750_s22  ;;  %v971_v16 = vpop.permute.xlu0 %970  ;;  %vm1111_vm4 = vcmp.ge.f32.partialorder %v1079_v10, 0.0  ;;  %v1143_v17 = vmul.f32 0.01, %v1079_v10 }
 0x183   : > { %v1052_v18 = vadd.f32 %v971_v16, %v11047_v38  ;;  %v1146_v25 = vmul.f32 0.01, %v1082_v12  ;;  %vm1114_vm8 = vcmp.ge.f32.partialorder %v1082_v12, 0.0 }
 0x184   : > { %v1081_v19 = vadd.f32 %v11041_v32, %v1049_v15  ;;  %v1175_v21 = vsel %vm1111_vm4, %v1079_v10, %v1143_v17 }
 0x185   : > { %v1084_v22 = vadd.f32 %v11041_v32, %v1052_v18  ;;  %v969_v23 = vpop.permute.xlu1 %968  ;;  %1554 = vrot.lane.b32.xlu1 %v1175_v21, %s14750_s22  ;;  %v1178_v35 = vsel %vm1114_vm8, %v1082_v12, %v1146_v25 }
 0x186   : > { %v1051_v26 = vadd.f32 %v969_v23, %v11047_v38  ;;  %1556 = vrot.lane.b32.xlu0 %v1176_v24, %s14750_s22  ;;  %v975_v27 = vpop.permute.xlu0 %974  ;;  %vm1113_vm6 = vcmp.ge.f32.partialorder %v1081_v19, 0.0  ;;  %v1145_v28 = vmul.f32 0.01, %v1081_v19 }
 0x187   : > { %v1054_v29 = vadd.f32 %v975_v27, %v11057_v46  ;;  %v1148_v36 = vmul.f32 0.01, %v1084_v22  ;;  %vm1116_vm10 = vcmp.ge.f32.partialorder %v1084_v22, 0.0 }
 0x188   : > { %v1083_v30 = vadd.f32 %v11041_v32, %v1051_v26  ;;  %v1177_v33 = vsel %vm1113_vm6, %v1081_v19, %v1145_v28 }
 0x189   : > { %v973_v34 = vpop.permute.xlu1 %972  ;;  %1558 = vrot.lane.b32.xlu1 %v1177_v33, %s14750_s22  ;;  %v1086_v37 = vadd.f32 %v11041_v32, %v1054_v29  ;;  %v1180_v52 = vsel %vm1116_vm10, %v1084_v22, %v1148_v36 }
 0x18a   : > { %v1053_v40 = vadd.f32 %v973_v34, %v11047_v38  ;;  %1560 = vrot.lane.b32.xlu0 %v1178_v35, %s14750_s22  ;;  %v979_v41 = vpop.permute.xlu0 %978  ;;  %vm1115_vm9 = vcmp.ge.f32.partialorder %v1083_v30, 0.0  ;;  %v1147_v42 = vmul.f32 0.01, %v1083_v30 }
 0x18b   : > { %v1056_v43 = vadd.f32 %v979_v41, %v11057_v46  ;;  %v1150_v44 = vmul.f32 0.01, %v1086_v37  ;;  %vm1118_vm11 = vcmp.ge.f32.partialorder %v1086_v37, 0.0 }
 0x18c   : > { %v1085_v48 = vadd.f32 %v11041_v32, %v1053_v40  ;;  %v1179_v49 = vsel %vm1115_vm9, %v1083_v30, %v1147_v42 }
 0x18d   : > { %v1088_v50 = vadd.f32 %v11041_v32, %v1056_v43  ;;  %v977_v51 = vpop.permute.xlu1 %976  ;;  %1562 = vrot.lane.b32.xlu1 %v1179_v49, %s14750_s22  ;;  %v1182_v58 = vsel %vm1118_vm11, %v1086_v37, %v1150_v44 }
 0x18e   : > { %v1055_v38 = vadd.f32 %v977_v51, %v11057_v46  ;;  %1564 = vrot.lane.b32.xlu0 %v1180_v52, %s14750_s22  ;;  %v983_v55 = vpop.permute.xlu0 %982  ;;  %vm1117_vm12 = vcmp.ge.f32.partialorder %v1085_v48, 0.0  ;;  %v1149_v56 = vmul.f32 0.01, %v1085_v48 }
 0x18f   : > { %v1058_v57 = vadd.f32 %v983_v55, %v11057_v46  ;;  %v1152_v59 = vmul.f32 0.01, %v1088_v50  ;;  %vm1120_vm13 = vcmp.ge.f32.partialorder %v1088_v50, 0.0 }
 0x190   : > { %v1087_v60 = vadd.f32 %v11041_v32, %v1055_v38  ;;  %v1181_v62 = vsel %vm1117_vm12, %v1085_v48, %v1149_v56 }
 0x191   : > { %v1090_v63 = vadd.f32 %v11041_v32, %v1058_v57  ;;  %v981_v0 = vpop.permute.xlu1 %980  ;;  %1566 = vrot.lane.b32.xlu1 %v1181_v62, %s14750_s22  ;;  %v1184_v4 = vsel %vm1120_vm13, %v1088_v50, %v1152_v59 }
 0x192   : > { %v1057_v1 = vadd.f32 %v981_v0, %v11057_v46  ;;  %1568 = vrot.lane.b32.xlu0 %v1182_v58, %s14750_s22  ;;  %v987_v2 = vpop.permute.xlu0 %986  ;;  %vm1119_vm14 = vcmp.ge.f32.partialorder %v1087_v60, 0.0  ;;  %v1151_v3 = vmul.f32 0.01, %v1087_v60 }
 0x193   : > { %v1060_v31 = vadd.f32 %v987_v2, %v11057_v46  ;;  %v1154_v11 = vmul.f32 0.01, %v1090_v63  ;;  %vm1122_vm0 = vcmp.ge.f32.partialorder %v1090_v63, 0.0 }
 0x194   : > { %v1089_v6 = vadd.f32 %v11041_v32, %v1057_v1  ;;  %v1183_v7 = vsel %vm1119_vm14, %v1087_v60, %v1151_v3 }
 0x195   : > { %v1092_v8 = vadd.f32 %v11041_v32, %v1060_v31  ;;  %v985_v10 = vpop.permute.xlu1 %984  ;;  %1570 = vrot.lane.b32.xlu1 %v1183_v7, %s14750_s22  ;;  %v1186_v19 = vsel %vm1122_vm0, %v1090_v63, %v1154_v11 }
 0x196   : > { %v1059_v12 = vadd.f32 %v985_v10, %v11057_v46  ;;  %1572 = vrot.lane.b32.xlu0 %v1184_v4, %s14750_s22  ;;  %v991_v13 = vpop.permute.xlu0 %990  ;;  %vm1121_vm15 = vcmp.ge.f32.partialorder %v1089_v6, 0.0  ;;  %v1153_v14 = vmul.f32 0.01, %v1089_v6 }
 0x197   : > { %v1062_v15 = vadd.f32 %v991_v13, %v11067_v53  ;;  %v1156_v21 = vmul.f32 0.01, %v1092_v8  ;;  %vm1124_vm2 = vcmp.ge.f32.partialorder %v1092_v8, 0.0 }
 0x198   : > { %v1091_v16 = vadd.f32 %v11041_v32, %v1059_v12  ;;  %v1185_v17 = vsel %vm1121_vm15, %v1089_v6, %v1153_v14 }
 0x199   : > { %v989_v18 = vpop.permute.xlu1 %988  ;;  %1574 = vrot.lane.b32.xlu1 %v1185_v17, %s14750_s22  ;;  %v1094_v22 = vadd.f32 %v11041_v32, %v1062_v15  ;;  %v1188_v33 = vsel %vm1124_vm2, %v1092_v8, %v1156_v21 }
 0x19a   : > { %v1061_v23 = vadd.f32 %v989_v18, %v11057_v46  ;;  %1576 = vrot.lane.b32.xlu0 %v1186_v19, %s14750_s22  ;;  %v995_v24 = vpop.permute.xlu0 %994  ;;  %vm1123_vm1 = vcmp.ge.f32.partialorder %v1091_v16, 0.0  ;;  %v1155_v25 = vmul.f32 0.01, %v1091_v16 }
 0x19b   : > { %v1158_v26 = vmul.f32 0.01, %v1094_v22  ;;  %v1064_v27 = vadd.f32 %v995_v24, %v11067_v53  ;;  %vm1126_vm3 = vcmp.ge.f32.partialorder %v1094_v22, 0.0 }
 0x19c   : > { %v1093_v28 = vadd.f32 %v11041_v32, %v1061_v23  ;;  %v1187_v29 = vsel %vm1123_vm1, %v1091_v16, %v1155_v25  ;;  %vm14764_vm1 = vcmask 7168  }
 0x19d   : > { %v993_v30 = vpop.permute.xlu1 %992  ;;  %1578 = vrot.lane.b32.xlu1 %v1187_v29, %s14750_s22  ;;  %v1096_v34 = vadd.f32 %v11041_v32, %v1064_v27  ;;  %v1190_v37 = vsel %vm1126_vm3, %v1094_v22, %v1158_v26 }
 0x19e   : > { %v1063_v46 = vadd.f32 %v993_v30, %v11067_v53  ;;  %1580 = vrot.lane.b32.xlu0 %v1188_v33, %s14750_s22  ;;  %v1001_v35 = vpop.permute.xlu0 %1000  ;;  %vm1125_vm4 = vcmp.ge.f32.partialorder %v1093_v28, 0.0  ;;  %v1157_v36 = vmul.f32 0.01, %v1093_v28 }
 0x19f   : > { %v1160_v40 = vmul.f32 0.01, %v1096_v34  ;;  %v1067_v42 = vadd.f32 %v1001_v35, %v11067_v53  ;;  %vm1128_vm5 = vcmp.ge.f32.partialorder %v1096_v34, 0.0 }
 0x1a0   : > { %v1095_v41 = vadd.f32 %v11041_v32, %v1063_v46  ;;  %v1189_v43 = vsel %vm1125_vm4, %v1093_v28, %v1157_v36 }
 0x1a1   : > { %v997_v44 = vpop.permute.xlu1 %996  ;;  %1582 = vrot.lane.b32.xlu1 %v1189_v43, %s14750_s22  ;;  %v1192_v52 = vsel %vm1128_vm5, %v1096_v34, %v1160_v40  ;;  %v1099_v38 = vadd.f32 %v11041_v32, %v1067_v42 }
 0x1a2   : > { %v1065_v48 = vadd.f32 %v997_v44, %v11067_v53  ;;  %v999_v49 = vpop.permute.xlu0 %998  ;;  %1584 = vrot.lane.b32.xlu0 %v1190_v37, %s14750_s22  ;;  %vm1127_vm6 = vcmp.ge.f32.partialorder %v1095_v41, 0.0  ;;  %v1159_v50 = vmul.f32 0.01, %v1095_v41 }
 0x1a3   : > { %v1066_v51 = vadd.f32 %v999_v49, %v11067_v53  ;;  %v1163_v31 = vmul.f32 0.01, %v1099_v38  ;;  %vm1131_vm10 = vcmp.ge.f32.partialorder %v1099_v38, 0.0 }
 0x1a4   : > { %v1097_v55 = vadd.f32 %v11041_v32, %v1065_v48  ;;  %v1191_v56 = vsel %vm1127_vm6, %v1095_v41, %v1159_v50 }
 0x1a5   : > { %v1098_v57 = vadd.f32 %v11041_v32, %v1066_v51  ;;  %v1003_v58 = vpop.permute.xlu1 %1002  ;;  %1586 = vrot.lane.b32.xlu1 %v1191_v56, %s14750_s22  ;;  %v1195_v12 = vsel %vm1131_vm10, %v1099_v38, %v1163_v31 }
 0x1a6   : > { %v1068_v59 = vadd.f32 %v1003_v58, %v11067_v53  ;;  %1588 = vrot.lane.b32.xlu0 %v1192_v52, %s14750_s22  ;;  %vm1129_vm8 = vcmp.ge.f32.partialorder %v1097_v55, 0.0  ;;  %v1161_v60 = vmul.f32 0.01, %v1097_v55  ;;  %v9843_v62 = vpop.permute.xlu0 %9842 }
 0x1a7   : > { %vm1130_vm9 = vcmp.ge.f32.partialorder %v1098_v57, 0.0  ;;  %v1162_v63 = vmul.f32 0.01, %v1098_v57  ;;  %v9845_v0 = vunpack.i.h.bf16 %v9843_v62  ;;  %v9844_v1 = vunpack.i.l.bf16 %v9843_v62 }
 0x1a8   : > { %v1100_v2 = vadd.f32 %v11041_v32, %v1068_v59  ;;  %v1193_v3 = vsel %vm1129_vm8, %v1097_v55, %v1161_v60 }
 0x1a9   : > { %v1005_v4 = vpop.permute.xlu1 %1004  ;;  %1590 = vrot.lane.b32.xlu1 %v1193_v3, %s14750_s22  ;;  %v1194_v6 = vsel %vm1130_vm9, %v1098_v57, %v1162_v63  ;;  %v9639_v7 = vpack.c.bf16 %v9845_v0, %v9844_v1  ;;  %v10730_v1 = vmov 1966171168   ;;  %v1308_v3 = vlaneseq }
 0x1aa   : > { %v1069_v8 = vadd.f32 %v1005_v4, %v11067_v53  ;;  %1592 = vrot.lane.b32.xlu0 %v1194_v6, %s14750_s22  ;;  %vm1132_vm11 = vcmp.ge.f32.partialorder %v1100_v2, 0.0  ;;  %v1164_v10 = vmul.f32 0.01, %v1100_v2 }
 0x1ab   : > { %9640 = vmatprep.subr.bf16.mxu0 %v9639_v7  ;;  %v11318_v4 = vshrl.u32 %v1308_v3, 7 }
 0x1ac   : > { %v1101_v11 = vadd.f32 %v11041_v32, %v1069_v8  ;;  %v1196_v13 = vsel %vm1132_vm11, %v1100_v2, %v1164_v10  ;;  %9642 = vmatpush3.bf16.msra.mxu0 %v9639_v7  ;;  %v1306_v2 = vunpack.c.l.s4 %v10730_v1 }
 0x1ad   : > { %1594 = vrot.lane.b32.xlu1 %v1195_v12, %s14750_s22  ;;  %14794 = vst [vmem:[#allocation9_spill] sm:$0xff] %v11318_v4 }
 0x1ae   : > { %1596 = vrot.lane.b32.xlu0 %v1196_v13, %s14750_s22  ;;  %vm1133_vm12 = vcmp.ge.f32.partialorder %v1101_v11, 0.0  ;;  %v1165_v14 = vmul.f32 0.01, %v1101_v11  ;;  %v1307_v31 = vunpack.c.0.s8 %v1306_v2 }
 0x1b0   : > { %v1197_v15 = vsel %vm1133_vm12, %v1101_v11, %v1165_v14  ;;  %v11321_v6 = vsub.s32 %v1307_v31, %v11318_v4 }
 0x1b1   : > { %1598 = vrot.lane.b32.xlu1 %v1197_v15, %s14750_s22  ;;  %s10744_s22 = smov 26  }
 0x1b2   : > { %9847 = vrot.lane.b32.xlu0 %v11023_v20, %s14766_s23  ;;  %14795 = vst [vmem:[#allocation10_spill] sm:$0xff] %v11321_v6 }
 0x1b5   : > { %9852 = vrot.lane.b32.xlu1 %v11011_v9, %s14766_s23 }
 0x1b6   : > { %2103 = vrot.lane.b32.xlu0 %v11041_v32, %s14754_s24 }
 0x1b9   : > { %3015 = vrot.lane.b32.xlu1 %v11041_v32, %s10729_s26 }
 0x1df   : > { %v11196_v53 = vpop.permute.xlu1 %1538 }
 0x1e3   : > { %v11204_v20 = vpop.permute.xlu1 %1542 }
 0x1e4   : > { %v1537_v16 = vpop.permute.xlu0 %1536 }
 0x1e5   : > { %9287 = vmatprep.mubr.msk.f32.mxu0 %vm1202_vm7, %v1537_v16  ;;  %9343 = vmatprep.mubr.msk.f32.mxu1 %vm1202_vm7, %v1537_v16 }
 0x1e6   : > { %9288 = vmatmul.mubr.msk.f32.vlgmr.msra.gmra.mrb[12].mxu0 %vm1202_vm7, %v11196_v53 }
 0x1e8   : > { %v11202_v17 = vpop.permute.xlu0 %1540 }
 0x1e9   : > { %9290 = vmatprep.mubr.msk.f32.mxu0 %vm1202_vm7, %v11202_v17 }
 0x1ea   : > { %9291 = vmatmul.mubr.msk.f32.gmra.mrb[14].mxu0 %vm1202_vm7, %v11204_v20 }
 0x1ec   : > { %v11210_v9 = vpop.permute.xlu0 %1544  ;;  %v11212_v18 = vpop.f32.mrb[8].mxu0 }
 0x1ed   : > { %9293 = vmatprep.mubr.msk.f32.mxu0 %vm1202_vm7, %v11210_v9  ;;  %v11216_v19 = vpop.f32.mrb[9].mxu0  ;;  %v1360_v7 = vrot.slane %v11212_v18, %v11321_v6  ;;  %v1353_v11 = vcombine.high %v11212_v18, %v11212_v18  ;;  %v10731_v18 = vmov 0  }
 0x1ee   : > { %v1304_v8 = vcombine.high %v11216_v19, %v11216_v19  ;;  %v1311_v10 = vrot.slane %v11216_v19, %v11321_v6  ;;  %9856 = vset.pattern.permute.xlu0 %v10731_v18  ;;  %9857 = vset.pattern.permute.xlu1 %v10731_v18 }
 0x1ef   : > { %v11220_v21 = vpop.permute.xlu1 %1546  ;;  %v1368_v12 = vcombine.high %v1360_v7, %v1360_v7  ;;  %v1367_v15 = vrot.slane %v1353_v11, %v11321_v6  ;;  %v11336_v16 = vrot.slane %v1360_v7, %v11321_v6 }
 0x1f0   : > { %v11222_v22 = vpop.permute.xlu0 %1548  ;;  %9294 = vmatmul.mubr.msk.f32.gmra.mrb[16].mxu0 %vm1202_vm7, %v11220_v21  ;;  %v1318_v13 = vrot.slane %v1304_v8, %v11321_v6  ;;  %v1319_v14 = vcombine.high %v1311_v10, %v1311_v10 }
 0x1f1   : > { %9296 = vmatprep.mubr.msk.f32.mxu0 %vm1202_vm7, %v11222_v22 }
 0x1f2   : > { %v1320_v19 = vcombine.high %v1318_v13, %v1318_v13 }
 0x1f3   : > { %v11228_v23 = vpop.permute.xlu1 %1550 }
 0x1f4   : > { %v11230_v24 = vpop.permute.xlu0 %1552  ;;  %9297 = vmatmul.mubr.msk.f32.gmra.mrb[18].mxu0 %vm1202_vm7, %v11228_v23  ;;  %v11236_v32 = vpop.f32.mrb[10].mxu0 }
 0x1f5   : > { %9299 = vmatprep.mubr.msk.f32.mxu0 %vm1202_vm7, %v11230_v24  ;;  %v11240_v26 = vpop.f32.mrb[11].mxu0 }
 0x1f7   : > { %v11238_v25 = vpop.permute.xlu1 %1554 }
 0x1f8   : > { %v11242_v27 = vpop.permute.xlu0 %1556  ;;  %9300 = vmatmul.mubr.msk.f32.gmra.mrb[20].mxu0 %vm1202_vm7, %v11238_v25 }
 0x1f9   : > { %9302 = vmatprep.mubr.msk.f32.mxu0 %vm1202_vm7, %v11242_v27 }
 0x1fb   : > { %v11248_v28 = vpop.permute.xlu1 %1558 }
 0x1fc   : > { %v11250_v29 = vpop.permute.xlu0 %1560  ;;  %9303 = vmatmul.mubr.msk.f32.gmra.mrb[22].mxu0 %vm1202_vm7, %v11248_v28 }
 0x1fd   : > { %9305 = vmatprep.mubr.msk.f32.mxu0 %vm1202_vm7, %v11250_v29 }
 0x1ff   : > { %v1563_v30 = vpop.permute.xlu1 %1562 }
 0x200   : > { %v1565_v33 = vpop.permute.xlu0 %1564  ;;  %9306 = vmatmul.mubr.msk.f32.gmra.mrb[24].mxu0 %vm1202_vm7, %v1563_v30 }
 0x201   : > { %9308 = vmatprep.mubr.msk.f32.mxu0 %vm1202_vm7, %v1565_v33 }
 0x203   : > { %v1567_v34 = vpop.permute.xlu1 %1566 }
 0x204   : > { %v1569_v46 = vpop.permute.xlu0 %1568  ;;  %9309 = vmatmul.mubr.msk.f32.gmra.mrb[26].mxu0 %vm1202_vm7, %v1567_v34 }
 0x205   : > { %9311 = vmatprep.mubr.msk.f32.mxu0 %vm1202_vm7, %v1569_v46 }
 0x207   : > { %v1571_v35 = vpop.permute.xlu1 %1570 }
 0x208   : > { %v1573_v36 = vpop.permute.xlu0 %1572  ;;  %9312 = vmatmul.mubr.msk.f32.gmra.mrb[28].mxu0 %vm1202_vm7, %v1571_v35 }
 0x209   : > { %9314 = vmatprep.mubr.msk.f32.mxu0 %vm1202_vm7, %v1573_v36 }
 0x20b   : > { %v1575_v37 = vpop.permute.xlu1 %1574 }
 0x20c   : > { %v1577_v40 = vpop.permute.xlu0 %1576  ;;  %9315 = vmatmul.mubr.msk.f32.gmra.mrb[30].mxu0 %vm1202_vm7, %v1575_v37 }
 0x20d   : > { %9317 = vmatprep.mubr.msk.f32.mxu0 %vm1202_vm7, %v1577_v40 }
 0x20f   : > { %v1579_v41 = vpop.permute.xlu1 %1578 }
 0x210   : > { %v1581_v42 = vpop.permute.xlu0 %1580  ;;  %9318 = vmatmul.mubr.msk.f32.gmra.mrb[32].mxu0 %vm1202_vm7, %v1579_v41 }
 0x211   : > { %9320 = vmatprep.mubr.msk.f32.mxu0 %vm1202_vm7, %v1581_v42 }
 0x213   : > { %v1583_v43 = vpop.permute.xlu1 %1582 }
 0x214   : > { %v1585_v44 = vpop.permute.xlu0 %1584  ;;  %9321 = vmatmul.mubr.msk.f32.gmra.mrb[34].mxu0 %vm1202_vm7, %v1583_v43 }
 0x215   : > { %9323 = vmatprep.mubr.msk.f32.mxu0 %vm1202_vm7, %v1585_v44 }
 0x217   : > { %v1587_v48 = vpop.permute.xlu1 %1586 }
 0x218   : > { %v1589_v49 = vpop.permute.xlu0 %1588  ;;  %9324 = vmatmul.mubr.msk.f32.gmra.mrb[36].mxu0 %vm1202_vm7, %v1587_v48 }
 0x219   : > { %9326 = vmatprep.mubr.msk.f32.mxu0 %vm1202_vm7, %v1589_v49 }
 0x21b   : > { %v1591_v50 = vpop.permute.xlu1 %1590 }
 0x21c   : > { %v1593_v51 = vpop.permute.xlu0 %1592  ;;  %9327 = vmatmul.mubr.msk.f32.gmra.mrb[38].mxu0 %vm1202_vm7, %v1591_v50 }
 0x21d   : > { %9329 = vmatprep.mubr.msk.f32.mxu0 %vm1202_vm7, %v1593_v51 }
 0x21f   : > { %v1595_v52 = vpop.permute.xlu1 %1594 }
 0x220   : > { %v1597_v38 = vpop.permute.xlu0 %1596  ;;  %9330 = vmatmul.mubr.msk.f32.gmra.mrb[40].mxu0 %vm1202_vm7, %v1595_v52 }
 0x221   : > { %9332 = vmatprep.mubr.msk.f32.mxu0 %vm1202_vm7, %v1597_v38 }
 0x223   : > { %v1599_v55 = vpop.permute.xlu1 %1598 }
 0x224   : > { %v9848_v56 = vpop.permute.xlu0 %9847  ;;  %9333 = vmatmul.mubr.msk.f32.gmra.mrb[42].mxu0 %vm1202_vm7, %v1599_v55 }
 0x225   : > { %v9850_v57 = vunpack.i.h.bf16 %v9848_v56  ;;  %v9849_v58 = vunpack.i.l.bf16 %v9848_v56 }
 0x227   : > { %v9853_v59 = vpop.permute.xlu1 %9852  ;;  %v9643_v60 = vpack.c.bf16 %v9850_v57, %v9849_v58 }
 0x228   : > { %v9855_v62 = vunpack.i.h.bf16 %v9853_v59  ;;  %v9854_v63 = vunpack.i.l.bf16 %v9853_v59 }
 0x229   : > { %9644 = vmatprep.subr.bf16.mxu1 %v9643_v60 }
 0x22a   : > { %9646 = vmatpush3.bf16.msra.mxu1 %v9643_v60  ;;  %v9647_v0 = vpack.c.bf16 %v9855_v62, %v9854_v63 }
 0x22c   : > { %9648 = vmatprep.subr.bf16.mxu1 %v9647_v0 }
 0x22e   : > { %9650 = vmatpush3.bf16.msra.mxu1 %v9647_v0 }
 0x231   : > { %9344 = vmatmul.mubr.msk.f32.vlgmr.msra.gmra.mrb[32].mxu1 %vm1202_vm7, %v11196_v53  ;;  %v1402_v53 = vcombine.high %v11240_v26, %v11240_v26 }
 0x232   : > { %9346 = vmatprep.mubr.msk.f32.mxu1 %vm1202_vm7, %v11202_v17  ;;  %v1327_v17 = vrot.slane %v1311_v10, %v11321_v6 }
 0x235   : > { %9347 = vmatmul.mubr.msk.f32.gmra.mrb[34].mxu1 %vm1202_vm7, %v11204_v20  ;;  %v1409_v20 = vrot.slane %v11240_v26, %v11321_v6  ;;  %v11352_v26 = vrot.slane %v1318_v13, %v11321_v6 }
 0x236   : > { %9349 = vmatprep.mubr.msk.f32.mxu1 %vm1202_vm7, %v11210_v9  ;;  %v11342_v9 = vsub.s32 0, %v11318_v4 }
 0x238   : > { %14796 = vst [vmem:[#allocation11_spill] sm:$0xff] %v11342_v9 }
 0x239   : > { %9350 = vmatmul.mubr.msk.f32.gmra.mrb[36].mxu1 %vm1202_vm7, %v11220_v21  ;;  %v1341_v21 = vrot.slane %v1319_v14, %v11321_v6 }
 0x23a   : > { %9352 = vmatprep.mubr.msk.f32.mxu1 %vm1202_vm7, %v11222_v22  ;;  %v11346_v22 = vrot.slane %v1368_v12, %v11321_v6 }
 0x23d   : > { %9353 = vmatmul.mubr.msk.f32.gmra.mrb[38].mxu1 %vm1202_vm7, %v11228_v23  ;;  %v1369_v23 = vcombine.high %v1367_v15, %v1367_v15 }
 0x23e   : > { %9355 = vmatprep.mubr.msk.f32.mxu1 %vm1202_vm7, %v11230_v24  ;;  %v1416_v24 = vrot.slane %v1402_v53, %v11321_v6 }
 0x240   : > { %v11396_v57 = vrot.slane %v1416_v24, %v11321_v6 }
 0x241   : > { %9356 = vmatmul.mubr.msk.f32.gmra.mrb[40].mxu1 %vm1202_vm7, %v11238_v25  ;;  %v1458_v25 = vrot.slane %v11236_v32, %v11321_v6 }
 0x242   : > { %9358 = vmatprep.mubr.msk.f32.mxu1 %vm1202_vm7, %v11242_v27  ;;  %v1398_v27 = vcombine.high %v11336_v16, %v11336_v16 }
 0x243   : > { %v11407_v63 = vrot.slane %v1458_v25, %v11321_v6 }
 0x245   : > { %9359 = vmatmul.mubr.msk.f32.gmra.mrb[42].mxu1 %vm1202_vm7, %v11248_v28  ;;  %v1417_v28 = vcombine.high %v1409_v20, %v1409_v20 }
 0x246   : > { %9361 = vmatprep.mubr.msk.f32.mxu1 %vm1202_vm7, %v11250_v29  ;;  %v1908_v29 = vrot.slane %v1327_v17, %v11342_v9 }
 0x249   : > { %9362 = vmatmul.mubr.msk.f32.gmra.mrb[44].mxu1 %vm1202_vm7, %v1563_v30  ;;  %v1349_v30 = vcombine.high %v1327_v17, %v1327_v17 }
 0x24a   : > { %9364 = vmatprep.mubr.msk.f32.mxu1 %vm1202_vm7, %v1565_v33 }
 0x24d   : > { %9365 = vmatmul.mubr.msk.f32.gmra.mrb[46].mxu1 %vm1202_vm7, %v1567_v34  ;;  %v1351_v34 = vcombine.high %v1341_v21, %v1341_v21 }
 0x24e   : > { %9367 = vmatprep.mubr.msk.f32.mxu1 %vm1202_vm7, %v1569_v46  ;;  %v11360_v46 = vrot.slane %v1320_v19, %v11321_v6 }
 0x250   : > { %v1928_v1 = vrot.slane %v11360_v46, %v11342_v9 }
 0x251   : > { %9368 = vmatmul.mubr.msk.f32.gmra.mrb[48].mxu1 %vm1202_vm7, %v1571_v35  ;;  %v1944_v35 = vrot.slane %v11346_v22, %v11342_v9 }
 0x252   : > { %9370 = vmatprep.mubr.msk.f32.mxu1 %vm1202_vm7, %v1573_v36  ;;  %v1400_v36 = vcombine.high %v11346_v22, %v11346_v22 }
 0x254   : > { %v11393_v56 = vrot.slane %v1400_v36, %v11342_v9  ;;  %v11466_v36 = vld [vmem:[%s11453_s19 + $0x18] sm:$0xff] }
 0x255   : > { %9371 = vmatmul.mubr.msk.f32.gmra.mrb[50].mxu1 %vm1202_vm7, %v1575_v37  ;;  %v1451_v37 = vcombine.high %v11236_v32, %v11236_v32  ;;  %v1916_v32 = vrot.slane %v1349_v30, %v11342_v9  ;;  %14797 = vst [vmem:[#allocation12_spill] sm:$0xff] %v11466_v36  ;;  %vm14719_vm14 = vcmp.gt.f32.partialorder %v11466_v36, 0.0 }
 0x256   : > { %9373 = vmatprep.mubr.msk.f32.mxu1 %vm1202_vm7, %v1577_v40  ;;  %v1418_v40 = vcombine.high %v1416_v24, %v1416_v24 }
 0x257   : > { %v1465_v58 = vrot.slane %v1451_v37, %v11321_v6 }
 0x258   : > { %v11404_v62 = vrot.slane %v1418_v40, %v11321_v6 }
 0x259   : > { %9374 = vmatmul.mubr.msk.f32.gmra.mrb[52].mxu1 %vm1202_vm7, %v1579_v41  ;;  %v11369_v41 = vrot.slane %v1369_v23, %v11321_v6  ;;  %v1467_v53 = vcombine.high %v1465_v58, %v1465_v58  ;;  %v11533_v23 = vld [vmem:[%s11453_s19 + $0x38] sm:$0xff] }
 0x25a   : > { %9376 = vmatprep.mubr.msk.f32.mxu1 %vm1202_vm7, %v1581_v42  ;;  %v11372_v42 = vrot.slane %v1367_v15, %v11321_v6  ;;  %v1448_v15 = vcombine.high %v11396_v57, %v11396_v57  ;;  %v1450_v18 = vcombine.high %v11404_v62, %v11404_v62  ;;  %14805 = vst [vmem:[#allocation20_spill] sm:$0xff] %v11533_v23  ;;  %vm14703_vm10 = vcmp.gt.f32.partialorder %v11533_v23, 0.0 }
 0x25b   : > { %v1401_v59 = vcombine.high %v11369_v41, %v11369_v41 }
 0x25c   : > { %v1399_v60 = vcombine.high %v11372_v42, %v11372_v42 }
 0x25d   : > { %9377 = vmatmul.mubr.msk.f32.gmra.mrb[54].mxu1 %vm1202_vm7, %v1583_v43  ;;  %v1466_v43 = vcombine.high %v1458_v25, %v1458_v25  ;;  %v11433_v17 = vrot.slane %v1401_v59, %v11342_v9  ;;  %v1496_v25 = vcombine.high %v11407_v63, %v11407_v63 }
 0x25e   : > { %9379 = vmatprep.mubr.msk.f32.mxu1 %vm1202_vm7, %v1585_v44  ;;  %v1912_v44 = vrot.slane %v1341_v21, %v11342_v9 }
 0x25f   : > { %v11415_v3 = vrot.slane %v1466_v43, %v11321_v6  ;;  %v11471_v43 = vrot.slane %v1448_v15, %v11342_v9  ;;  %v11502_v15 = vld [vmem:[%s11453_s19 + $0x20] sm:$0xff] }
 0x260   : > { %14803 = vst [vmem:[#allocation18_spill] sm:$0xff] %v11502_v15  ;;  %vm14715_vm3 = vcmp.gt.f32.partialorder %v11502_v15, 0.0 }
 0x261   : > { %9380 = vmatmul.mubr.msk.f32.gmra.mrb[56].mxu1 %vm1202_vm7, %v1587_v48  ;;  %v1350_v48 = vcombine.high %v11352_v26, %v11352_v26  ;;  %v1498_v24 = vcombine.high %v11415_v3, %v11415_v3 }
 0x262   : > { %9382 = vmatprep.mubr.msk.f32.mxu1 %vm1202_vm7, %v1589_v49  ;;  %v11378_v49 = vrot.slane %v1398_v27, %v11342_v9 }
 0x263   : > { %v11412_v2 = vrot.slane %v1350_v48, %v11342_v9 }
 0x265   : > { %9383 = vmatmul.mubr.msk.f32.gmra.mrb[58].mxu1 %vm1202_vm7, %v1591_v50  ;;  %v11381_v50 = vrot.slane %v1409_v20, %v11321_v6  ;;  %v11436_v20 = vrot.slane %v1399_v60, %v11342_v9 }
 0x266   : > { %9385 = vmatprep.mubr.msk.f32.mxu1 %vm1202_vm7, %v1593_v51  ;;  %v1924_v51 = vrot.slane %v11352_v26, %v11342_v9 }
 0x267   : > { %v1447_v11 = vcombine.high %v11381_v50, %v11381_v50 }
 0x269   : > { %9386 = vmatmul.mubr.msk.f32.gmra.mrb[60].mxu1 %vm1202_vm7, %v1595_v52  ;;  %v11387_v52 = vrot.slane %v1417_v28, %v11321_v6  ;;  %v11459_v30 = vrot.slane %v1447_v11, %v11342_v9 }
 0x26a   : > { %9388 = vmatprep.mubr.msk.f32.mxu1 %vm1202_vm7, %v1597_v38  ;;  %v1920_v38 = vrot.slane %v1351_v34, %v11342_v9 }
 0x26b   : > { %v1449_v10 = vcombine.high %v11387_v52, %v11387_v52 }
 0x26d   : > { %9389 = vmatmul.mubr.msk.f32.gmra.mrb[62].mxu1 %vm1202_vm7, %v1599_v55  ;;  %v1352_v55 = vcombine.high %v11360_v46, %v11360_v46  ;;  %v11463_v46 = vpop.permute.xlu0 %2103 }
 0x26f   : > { %v11426_v13 = vrot.slane %v1352_v55, %v11342_v9  ;;  %v11481_v55 = vrot.slane %v1450_v18, %v11342_v9 }
 0x2b9   : > { %v9289_v0 = vpop.f32.mrb[12].mxu0 }
 0x2ba   : > { %v2066_v31 = vadd.f32 %v9289_v0, %v1912_v44  ;;  %v1746_v7 = vpop.f32.mrb[13].mxu0  ;;  %v11474_v44 = vrot.slane %v1465_v58, %v11321_v6  ;;  %v11489_v0 = vld [vmem:[%s11453_s19 + $0x28] sm:$0xff]  ;;  %v11492_v58 = vrot.slane %v1498_v24, %v11342_v9 }
 0x2bb   : > { %v11423_v12 = vadd.f32 %v1908_v29, %v1746_v7  ;;  %v11456_v29 = vrot.slane %v1449_v10, %v11342_v9  ;;  %14800 = vst [vmem:[#allocation15_spill] sm:$0xff] %v11489_v0  ;;  %v11495_v7 = vrot.slane %v1496_v25, %v11342_v9  ;;  %v11498_v10 = vrot.slane %v1467_v53, %v11321_v6 }
 0x2bc   : > { %14798 = vst [vmem:[#allocation13_spill] sm:$0xff] %v11474_v44  ;;  %v2107_v18 = vadd.f32 %v11463_v46, %v2066_v31  ;;  %vm14710_vm2 = vcmp.gt.f32.partialorder %v11489_v0, 0.0 }
 0x2bd   : > { %v9292_v19 = vpop.f32.mrb[14].mxu0  ;;  %14801 = vst [vmem:[#allocation16_spill] sm:$0xff] %v11495_v7  ;;  %14802 = vst [vmem:[#allocation17_spill] sm:$0xff] %v11498_v10 }
 0x2be   : > { %v2068_v27 = vadd.f32 %v9292_v19, %v1920_v38  ;;  %v1756_v28 = vpop.f32.mrb[15].mxu0  ;;  %v11478_v38 = vld [vmem:[%s11453_s19 + $0x10] sm:$0xff]  ;;  %vm2139_vm4 = vcmp.ge.f32.partialorder %v2107_v18, 0.0 }
 0x2bf   : > { %v2067_v37 = vadd.f32 %v1916_v32, %v1756_v28  ;;  %14799 = vst [vmem:[#allocation14_spill] sm:$0xff] %v11478_v38  ;;  %vm14706_vm0 = vcmp.gt.f32.partialorder %v11478_v38, 0.0 }
 0x2c0   : > { %v2109_v48 = vadd.f32 %v11463_v46, %v2068_v27 }
 0x2c1   : > { %v2108_v60 = vadd.f32 %v11463_v46, %v2067_v37 }
 0x2c2   : > { %vm2141_vm13 = vcmp.ge.f32.partialorder %v2109_v48, 0.0  ;;  %v2173_v11 = vmul.f32 0.01, %v2109_v48 }
 0x2c3   : > { %vm2140_vm15 = vcmp.ge.f32.partialorder %v2108_v60, 0.0  ;;  %v2172_v19 = vmul.f32 0.01, %v2108_v60  ;;  %v9295_v24 = vpop.f32.mrb[16].mxu0 }
 0x2c4   : > { %v2205_v27 = vsel %vm2141_vm13, %v2109_v48, %v2173_v11  ;;  %v2070_v53 = vadd.f32 %v9295_v24, %v1928_v1  ;;  %v1766_v28 = vpop.f32.mrb[17].mxu0  ;;  %v2171_v24 = vmul.f32 0.01, %v2107_v18 }
 0x2c5   : > { %v11511_v37 = vsel %vm14719_vm14, %v2205_v27, -1e+30  ;;  %v2204_v31 = vsel %vm2140_vm15, %v2108_v60, %v2172_v19  ;;  %v2069_v45 = vadd.f32 %v1924_v51, %v1766_v28  ;;  %v11528_v19 = vld [vmem:[%s11453_s19 + $0x8] sm:$0xff] }
 0x2c6   : > { %v2320_v48 = vsel %vm14764_vm1, %v11511_v37, -inf  ;;  %v11521_v1 = vsel %vm14706_vm0, %v2204_v31, -1e+30  ;;  %v2111_v11 = vadd.f32 %v11463_v46, %v2070_v53  ;;  %14804 = vst [vmem:[#allocation19_spill] sm:$0xff] %v11528_v19  ;;  %v2203_v21 = vsel %vm2139_vm4, %v2107_v18, %v2171_v24 }
 0x2c7   : > { %v2321_v5 = vrot.slane %v2320_v48, 4  ;;  %v2313_v60 = vsel %vm14764_vm1, %v11521_v1, -inf  ;;  %v2110_v26 = vadd.f32 %v11463_v46, %v2069_v45  ;;  %v9298_v51 = vpop.f32.mrb[18].mxu0  ;;  %vm14725_vm8 = vcmp.gt.f32.partialorder %v11528_v19, 0.0 }
 0x2c8   : > { %v2314_v27 = vrot.slane %v2313_v60, 4  ;;  %vm2143_vm5 = vcmp.ge.f32.partialorder %v2111_v11, 0.0  ;;  %v2175_v28 = vmul.f32 0.01, %v2111_v11  ;;  %v2072_v31 = vadd.f32 %v9298_v51, %v11426_v13  ;;  %v1776_v59 = vpop.f32.mrb[19].mxu0 }
 0x2c9   : > { %v2322_v32 = vmax.f32 %v2320_v48, %v2321_v5  ;;  %vm2142_vm6 = vcmp.ge.f32.partialorder %v2110_v26, 0.0  ;;  %v2174_v53 = vmul.f32 0.01, %v2110_v26  ;;  %v2071_v34 = vadd.f32 %v11412_v2, %v1776_v59 }
 0x2ca   : > { %v2207_v40 = vsel %vm2143_vm5, %v2111_v11, %v2175_v28  ;;  %v2113_v45 = vadd.f32 %v11463_v46, %v2072_v31  ;;  %v2315_v14 = vmax.f32 %v2313_v60, %v2314_v27  ;;  %v11558_v27 = vsel %vm14725_vm8, %v2203_v21, -1e+30  ;;  %v11569_v21 = vld [vmem:[%s11453_s19 + $0x48] sm:$0xff] }
 0x2cb   : > { %v11539_v8 = vsel %vm14710_vm2, %v2207_v40, -1e+30  ;;  %v2206_v13 = vsel %vm2142_vm6, %v2110_v26, %v2174_v53  ;;  %v2112_v5 = vadd.f32 %v11463_v46, %v2071_v34  ;;  %v9301_v48 = vpop.f32.mrb[20].mxu0  ;;  %v2323_v51 = vrot.slane %v2322_v32, 2  ;;  %v11552_v40 = vld [vmem:[%s11453_s19 + $0x30] sm:$0xff]  ;;  %14807 = vst [vmem:[#allocation22_spill] sm:$0xff] %v11558_v27 }
 0x2cc   : > { %v2334_v2 = vsel %vm14764_vm1, %v11539_v8, -inf  ;;  %v11546_v59 = vsel %vm14715_vm3, %v2206_v13, -1e+30  ;;  %vm2145_vm9 = vcmp.ge.f32.partialorder %v2113_v45, 0.0  ;;  %v1786_v18 = vpop.f32.mrb[21].mxu0  ;;  %14806 = vst [vmem:[#allocation21_spill] sm:$0xff] %v11552_v40  ;;  %v2106_v34 = vadd.f32 %v11463_v46, %v11423_v12 }
 0x2cd   : > { %v2327_v11 = vsel %vm14764_vm1, %v11546_v59, -inf  ;;  %v2177_v24 = vmul.f32 0.01, %v2113_v45  ;;  %v2335_v60 = vrot.slane %v2334_v2, 4  ;;  %vm2144_vm11 = vcmp.ge.f32.partialorder %v2112_v5, 0.0  ;;  %14808 = vst [vmem:[#allocation23_spill] sm:$0xff] %v11569_v21 }
 0x2ce   : > { %v2176_v26 = vmul.f32 0.01, %v2112_v5  ;;  %v2316_v28 = vrot.slane %v2315_v14, 2  ;;  %v2328_v31 = vrot.slane %v2327_v11, 4  ;;  %v2074_v13 = vadd.f32 %v9301_v48, %v1944_v35 }
 0x2cf   : > { %v2209_v53 = vsel %vm2145_vm9, %v2113_v45, %v2177_v24  ;;  %v9304_v25 = vpop.f32.mrb[22].mxu0  ;;  %v2324_v33 = vmax.f32 %v2322_v32, %v2323_v51  ;;  %vm14700_vm12 = vcmp.gt.f32.partialorder %v11552_v40, 0.0  ;;  %v1499_v35 = vcombine.high %v11498_v10, %v11498_v10  ;;  %v11582_v24 = vld [vmem:[%s11453_s19] sm:$0xff] }
 0x2d0   : > { %v11565_v12 = vsel %vm14703_vm10, %v2209_v53, -1e+30  ;;  %v2208_v38 = vsel %vm2144_vm11, %v2112_v5, %v2176_v26  ;;  %v1796_v0 = vpop.f32.mrb[23].mxu0  ;;  %v2170_v32 = vmul.f32 0.01, %v2106_v34  ;;  %v2336_v48 = vmax.f32 %v2334_v2, %v2335_v60  ;;  %14809 = vst [vmem:[#allocation24_spill] sm:$0xff] %v11582_v24 }
 0x2d1   : > { %v2348_v51 = vsel %vm14764_vm1, %v11565_v12, -inf  ;;  %v2306_v5 = vsel %vm14764_vm1, %v11558_v27, -inf  ;;  %vm2138_vm13 = vcmp.ge.f32.partialorder %v2106_v34, 0.0  ;;  %v2317_v26 = vmax.f32 %v2315_v14, %v2316_v28  ;;  %v11604_v28 = vld [vmem:[%s11453_s19 + $0x40] sm:$0xff]  ;;  %v11627_v27 = vld [vmem:[%s11453_s19 + $0x58] sm:$0xff] }
 0x2d2   : > { %v2329_v53 = vmax.f32 %v2327_v11, %v2328_v31  ;;  %v11586_v22 = vsel %vm14700_vm12, %v2208_v38, -1e+30  ;;  %v2115_v45 = vadd.f32 %v11463_v46, %v2074_v13  ;;  %v2325_v2 = vrot.slane %v2324_v33, 1  ;;  %14813 = vst [vmem:[#allocation26_spill] sm:$0xff] %v11604_v28  ;;  %14816 = vst [vmem:[#allocation29_spill] sm:$0xff] %v11627_v27 }
 0x2d3   : > { %v11589_v23 = vpop.f32.mrb[24].mxu0  ;;  %vm2243_vm15 = vcmp.gt.f32.partialorder %v11569_v21, 0.0  ;;  %v14810_v60 = vrot.slane %v11336_v16, %v11342_v9  ;;  %v14811_v14 = vcombine.high %v11474_v44, %v11474_v44  ;;  %v2349_v38 = vrot.slane %v2348_v51, 4 }
 0x2d4   : > { %v11595_v36 = vpop.f32.mrb[25].mxu0  ;;  %vm2147_vm4 = vcmp.ge.f32.partialorder %v2115_v45, 0.0  ;;  %v2202_v31 = vsel %vm2138_vm13, %v2106_v34, %v2170_v32  ;;  %vm14712_vm5 = vcmp.gt.f32.partialorder %v11582_v24, 0.0  ;;  %v2337_v13 = vrot.slane %v2336_v48, 2 }
 0x2d5   : > { %v2073_v15 = vadd.f32 %v14810_v60, %v1786_v18  ;;  %v11601_v11 = vrot.slane %v14811_v14, %v11342_v9  ;;  %v2341_v16 = vsel %vm14764_vm1, %v11586_v22, -inf  ;;  %v2179_v18 = vmul.f32 0.01, %v2115_v45 }
 0x2d6   : > { %v2307_v60 = vrot.slane %v2306_v5, 4  ;;  %v2318_v40 = vrot.slane %v2317_v26, 1  ;;  %v2330_v19 = vrot.slane %v2329_v53, 2  ;;  %v11613_v61 = vrot.slane %v1499_v35, %v11342_v9  ;;  %v11630_v35 = vld [vmem:[%s11453_s19 + $0x50] sm:$0xff] }
 0x2d7   : > { %14812 = vst [vmem:[#allocation25_spill] sm:$0xff] %v11601_v11  ;;  %v2114_v14 = vadd.f32 %v11463_v46, %v2073_v15  ;;  %v11610_v6 = vpop.f32.mrb[26].mxu0  ;;  %v2326_v34 = vmax.f32 %v2324_v33, %v2325_v2  ;;  %v2211_v32 = vsel %vm2147_vm4, %v2115_v45, %v2179_v18  ;;  %vm2242_vm6 = vcmp.gt.f32.partialorder %v11604_v28, 0.0  ;;  %14817 = vst [vmem:[#allocation30_spill] sm:$0xff] %v11630_v35  ;;  %v11635_v18 = vld [vmem:[%s11453_s19 + $0x68] sm:$0xff] }
 0x2d8   : > { %14814 = vst [vmem:[#allocation27_spill] sm:$0xff] %v11613_v61  ;;  %v11616_v54 = vpop.f32.mrb[27].mxu0  ;;  %v11620_v47 = vsel %vm14712_vm5, %v2202_v31, -1e+30  ;;  %v2350_v39 = vmax.f32 %v2348_v51, %v2349_v38  ;;  %v2342_v4 = vrot.slane %v2341_v16, 4  ;;  %v2338_v33 = vmax.f32 %v2336_v48, %v2337_v13  ;;  %14818 = vst [vmem:[#allocation31_spill] sm:$0xff] %v11635_v18 }
 0x2d9   : > { %14815 = vst [vmem:[#allocation28_spill] sm:$0xff] %v11620_v47  ;;  %v11624_v15 = vsel %vm2243_vm15, %v2211_v32, -1e+30  ;;  %vm2146_vm9 = vcmp.ge.f32.partialorder %v2114_v14, 0.0  ;;  %v2178_v2 = vmul.f32 0.01, %v2114_v14  ;;  %v11637_v31 = vmax.f32 %v2306_v5, %v2307_v60 }
 0x2da   : > { %v2362_v45 = vsel %vm14764_vm1, %v11624_v15, -inf  ;;  %v2319_v51 = vmax.f32 %v2317_v26, %v2318_v40  ;;  %v2331_v38 = vmax.f32 %v2329_v53, %v2330_v19  ;;  %v2076_v32 = vadd.f32 %v9304_v25, %v11393_v56  ;;  %v11677_v61 = vld [vmem:[%s11453_s19 + $0x78] sm:$0xff] }
 0x2db   : > { %v2363_v24 = vrot.slane %v2362_v45, 4  ;;  %v11640_v21 = vpop.f32.mrb[28].mxu0  ;;  %v2210_v11 = vsel %vm2146_vm9, %v2114_v14, %v2178_v2  ;;  %vm14760_vm11 = vcmp.gt.f32.partialorder %v11627_v27, 0.0  ;;  %v2075_v48 = vadd.f32 %v11378_v49, %v1796_v0  ;;  %14822 = vst [vmem:[#allocation34_spill] sm:$0xff] %v11677_v61 }
 0x2dc   : > { %vm14762_vm13 = vcmp.gt.f32.partialorder %v11630_v35, 0.0  ;;  %v11645_v13 = vpop.f32.mrb[29].mxu0  ;;  %v2526_v5 = vsub.f32 %v11511_v37, %v2326_v34  ;;  %v2351_v60 = vrot.slane %v2350_v39, 2  ;;  %v2343_v40 = vmax.f32 %v2341_v16, %v2342_v4  ;;  %v11662_v16 = vld [vmem:[%s11453_s19 + $0x60] sm:$0xff] }
 0x2dd   : > { %v11650_v19 = vsel %vm2242_vm6, %v2210_v11, -1e+30  ;;  %vm14763_vm4 = vcmp.gt.f32.partialorder %v11635_v18, 0.0  ;;  %v2339_v56 = vrot.slane %v2338_v33, 1  ;;  %v2117_v25 = vadd.f32 %v11463_v46, %v2076_v32  ;;  %14820 = vst [vmem:[#allocation33_spill] sm:$0xff] %v11662_v16 }
 0x2de   : > { %v11657_v0 = vsel %vm14764_vm1, %v11620_v47, -inf  ;;  %v2525_v26 = vsub.f32 %v11521_v1, %v2319_v51  ;;  %v2332_v37 = vrot.slane %v2331_v38, 1  ;;  %v2364_v53 = vmax.f32 %v2362_v45, %v2363_v24 }
 0x2df   : > { %14819 = vst [vmem:[#allocation32_spill] sm:$0xff] %v11657_v0  ;;  %v2116_v4 = vadd.f32 %v11463_v46, %v2075_v48  ;;  %v11664_v11 = vpop.f32.mrb[30].mxu0  ;;  %v2355_v14 = vsel %vm14764_vm1, %v11650_v19, -inf  ;;  %vm2149_vm9 = vcmp.ge.f32.partialorder %v2117_v25, 0.0  ;;  %v2181_v34 = vmul.f32 0.01, %v2117_v25 }
 0x2e0   : > { %v14821_v2 = vrot.slane %v11369_v41, %v11342_v9  ;;  %v11672_v1 = vpop.f32.mrb[31].mxu0  ;;  %v2561_v24 = vmul.f32 1.442695, %v2526_v5  ;;  %v2352_v45 = vmax.f32 %v2350_v39, %v2351_v60  ;;  %v2344_v51 = vrot.slane %v2343_v40, 2 }
 0x2e1   : > { %vm2148_vm12 = vcmp.ge.f32.partialorder %v2116_v4, 0.0  ;;  %v2340_v48 = vmax.f32 %v2338_v33, %v2339_v56  ;;  %v2213_v49 = vsel %vm2149_vm9, %v2117_v25, %v2181_v34  ;;  %v2180_v28 = vmul.f32 0.01, %v2116_v4 }
 0x2e2   : > { %v2078_v32 = vadd.f32 %v11589_v23, %v14821_v2  ;;  %vm14724_vm10 = vcmp.gt.f32.partialorder %v11662_v16, 0.0  ;;  %v2333_v44 = vmax.f32 %v2331_v38, %v2332_v37  ;;  %v2365_v41 = vrot.slane %v2364_v53, 2 }
 0x2e3   : > { %v2356_v10 = vrot.slane %v2355_v14, 4  ;;  %v11681_v23 = vsel %vm14760_vm11, %v2213_v49, -1e+30  ;;  %v11683_v39 = vpop.f32.mrb[32].mxu0  ;;  %v2212_v5 = vsel %vm2148_vm12, %v2116_v4, %v2180_v28  ;;  %v2353_v25 = vrot.slane %v2352_v45, 1  ;;  %v11695_v49 = vld [vmem:[%s11453_s19 + $0x70] sm:$0xff] }
 0x2e4   : > { %v2119_v47 = vadd.f32 %v11463_v46, %v2078_v32  ;;  %v2376_v33 = vsel %vm14764_vm1, %v11681_v23, -inf  ;;  %v11687_v56 = vpop.f32.mrb[33].mxu0  ;;  %v2345_v34 = vmax.f32 %v2343_v40, %v2344_v51  ;;  %v11691_v38 = vsel %vm14762_vm13, %v2212_v5, -1e+30  ;;  %14823 = vst [vmem:[#allocation35_spill] sm:$0xff] %v11695_v49 }
 0x2e5   : > { %v2377_v2 = vrot.slane %v2376_v33, 4  ;;  %vm14761_vm0 = vcmp.gt.f32.partialorder %v11677_v61, 0.0  ;;  %v2369_v37 = vsel %vm14764_vm1, %v11691_v38, -inf  ;;  %v14824_v28 = vrot.slane %v11372_v42, %v11342_v9 }
 0x2e6   : > { %vm2151_vm9 = vcmp.ge.f32.partialorder %v2119_v47, 0.0  ;;  %v2183_v60 = vmul.f32 0.01, %v2119_v47  ;;  %v2080_v40 = vadd.f32 %v11610_v6, %v11433_v17  ;;  %v2559_v51 = vmul.f32 1.442695, %v2525_v26 }
 0x2e7   : > { %v2077_v4 = vadd.f32 %v14824_v28, %v11595_v36  ;;  %v2366_v27 = vmax.f32 %v2364_v53, %v2365_v41  ;;  %v2357_v5 = vmax.f32 %v2355_v14, %v2356_v10  ;;  %v2370_v35 = vrot.slane %v2369_v37, 4  ;;  %v11705_v7 = vpop.f32.mrb[34].mxu0 }
 0x2e8   : > { %v2215_v32 = vsel %vm2151_vm9, %v2119_v47, %v2183_v60  ;;  %v2121_v60 = vadd.f32 %v11463_v46, %v2080_v40  ;;  %v2079_v42 = vadd.f32 %v11436_v20, %v11616_v54  ;;  %vm14717_vm12 = vcmp.gt.f32.partialorder %v11695_v49, 0.0  ;;  %v11716_v6 = vpop.f32.mrb[35].mxu0  ;;  %v11723_v54 = vld [vmem:[%s11453_s19 + $0x88] sm:$0xff] }
 0x2e9   : > { %v11709_v0 = vsel %vm14763_vm4, %v2215_v32, -1e+30  ;;  %v2118_v47 = vadd.f32 %v11463_v46, %v2077_v4  ;;  %v2528_v17 = vsub.f32 %v11539_v8, %v2340_v48  ;;  %v2527_v36 = vsub.f32 %v11546_v59, %v2333_v44  ;;  %14825 = vst [vmem:[#allocation36_spill] sm:$0xff] %v11723_v54 }
 0x2ea   : > { %v2346_v10 = vrot.slane %v2345_v34, 1  ;;  %v2378_v26 = vmax.f32 %v2376_v33, %v2377_v2  ;;  %v2354_v53 = vmax.f32 %v2352_v45, %v2353_v25  ;;  %v2390_v14 = vsel %vm14764_vm1, %v11709_v0, -inf }
 0x2eb   : > { %vm2150_vm9 = vcmp.ge.f32.partialorder %v2118_v47, 0.0  ;;  %v2182_v41 = vmul.f32 0.01, %v2118_v47  ;;  %v2367_v32 = vrot.slane %v2366_v27, 1  ;;  %v2358_v28 = vrot.slane %v2357_v5, 2  ;;  %v11725_v20 = vpop.f32.mrb[36].mxu0 }
 0x2ec   : > { %v2371_v4 = vmax.f32 %v2369_v37, %v2370_v35  ;;  %vm2153_vm2 = vcmp.ge.f32.partialorder %v2121_v60, 0.0  ;;  %10088 = vpow2.f32 %v2561_v24  ;;  %v2185_v48 = vmul.f32 0.01, %v2121_v60  ;;  %v11728_v59 = vpop.f32.mrb[37].mxu0 }
 0x2ed   : > { %v2214_v8 = vsel %vm2150_vm9, %v2118_v47, %v2182_v41  ;;  %v2120_v44 = vadd.f32 %v11463_v46, %v2079_v42  ;;  %v2347_v45 = vmax.f32 %v2345_v34, %v2346_v10  ;;  %v2379_v33 = vrot.slane %v2378_v26, 2  ;;  %v11737_v42 = vld [vmem:[%s11453_s19 + $0x80] sm:$0xff] }
 0x2ee   : > { %v2391_v25 = vrot.slane %v2390_v14, 4  ;;  %v11732_v2 = vsel %vm14724_vm10, %v2214_v8, -1e+30  ;;  %v2565_v35 = vmul.f32 1.442695, %v2528_v17  ;;  %v2530_v40 = vsub.f32 %v11565_v12, %v2354_v53  ;;  %14826 = vst [vmem:[#allocation37_spill] sm:$0xff] %v11737_v42 }
 0x2ef   : > { %v2563_v37 = vmul.f32 1.442695, %v2527_v36  ;;  %v2217_v18 = vsel %vm2153_vm2, %v2121_v60, %v2185_v48  ;;  %vm14718_vm9 = vcmp.gt.f32.partialorder %v11723_v54, 0.0  ;;  %v2368_v24 = vmax.f32 %v2366_v27, %v2367_v32  ;;  %v11739_v34 = vpop.f32.mrb[38].mxu0  ;;  %v11928_v54 = vld [vmem:[%s11453_s19 + $0xd8] sm:$0xff] }
 0x2f0   : > { %v2359_v47 = vmax.f32 %v2357_v5, %v2358_v28  ;;  %v2372_v41 = vrot.slane %v2371_v4, 2  ;;  %vm2152_vm5 = vcmp.ge.f32.partialorder %v2120_v44, 0.0  ;;  %v2383_v10 = vsel %vm14764_vm1, %v11732_v2, -inf  ;;  %v11751_v5 = vpop.f32.mrb[39].mxu0  ;;  %14849 = vst [vmem:[#allocation54_spill] sm:$0xff] %v11928_v54 }
 0x2f1   : > { %v11745_v17 = vsel %vm14761_vm0, %v2217_v18, -1e+30  ;;  %v2184_v12 = vmul.f32 0.01, %v2120_v44  ;;  %v14827_v60 = vrot.slane %v11387_v52, %v11342_v9  ;;  %10090 = vpow2.f32 %v2559_v51  ;;  %v11756_v18 = vld [vmem:[%s11453_s19 + $0x98] sm:$0xff] }
 0x2f2   : > { %v2529_v36 = vsub.f32 %v11586_v22, %v2347_v45  ;;  %v2380_v53 = vmax.f32 %v2378_v26, %v2379_v33  ;;  %v2392_v32 = vmax.f32 %v2390_v14, %v2391_v25  ;;  %10092 = vpow2.f32 %v2565_v35  ;;  %14828 = vst [vmem:[#allocation38_spill] sm:$0xff] %v11756_v18 }
 0x2f3   : > { %v2082_v27 = vadd.f32 %v11640_v21, %v14827_v60  ;;  %v2569_v28 = vmul.f32 1.442695, %v2530_v40  ;;  %v2216_v8 = vsel %vm2152_vm5, %v2120_v44, %v2184_v12  ;;  %v2373_v16 = vmax.f32 %v2371_v4, %v2372_v41  ;;  %v11765_v22 = vpop.f32.mrb[40].mxu0 }
 0x2f4   : > { %v2384_v61 = vrot.slane %v2383_v10, 4  ;;  %v2404_v52 = vsel %vm14764_vm1, %v11745_v17, -inf  ;;  %v11762_v21 = vsel %vm14717_vm12, %v2216_v8, -1e+30  ;;  %vm14721_vm2 = vcmp.gt.f32.partialorder %v11737_v42, 0.0  ;;  %v11770_v4 = vpop.f32.mrb[41].mxu0 }
 0x2f5   : > { %v2123_v48 = vadd.f32 %v11463_v46, %v2082_v27  ;;  %10094 = vpow2.f32 %v2563_v37  ;;  %v2532_v51 = vsub.f32 %v11624_v15, %v2368_v24  ;;  %v2360_v26 = vrot.slane %v2359_v47, 1  ;;  %14829 = vst [vmem:[#allocation39_spill] sm:$0xff] %v11770_v4 }
 0x2f6   : > { %v2397_v14 = vsel %vm14764_vm1, %v11762_v21, -inf  ;;  %v2567_v44 = vmul.f32 1.442695, %v2529_v36  ;;  %v2381_v45 = vrot.slane %v2380_v53, 1  ;;  %v2393_v33 = vrot.slane %v2392_v32, 2  ;;  %v11773_v25 = vpop.eup %10088 }
 0x2f7   : > { %vm2155_vm5 = vcmp.ge.f32.partialorder %v2123_v48, 0.0  ;;  %vm14720_vm3 = vcmp.gt.f32.partialorder %v11756_v18, 0.0  ;;  %14830 = vst [vmem:[#allocation40_spill] sm:$0xff] %v11773_v25  ;;  %10096 = vpow2.f32 %v2569_v28  ;;  %v2405_v35 = vrot.slane %v2404_v52, 4  ;;  %v11781_v27 = vpop.f32.mrb[42].mxu0 }
 0x2f8   : > { %v2187_v40 = vmul.f32 0.01, %v2123_v48  ;;  %v14831_v15 = vrot.slane %v11381_v50, %v11342_v9  ;;  %v2374_v24 = vrot.slane %v2373_v16, 1  ;;  %v2385_v41 = vmax.f32 %v2383_v10, %v2384_v61  ;;  %v11784_v25 = vpop.f32.mrb[43].mxu0 }
 0x2f9   : > { %v2398_v12 = vrot.slane %v2397_v14, 4  ;;  %v2084_v60 = vadd.f32 %v11664_v11, %v11456_v29  ;;  %v2573_v36 = vmul.f32 1.442695, %v2532_v51  ;;  %v2361_v8 = vmax.f32 %v2359_v47, %v2360_v26  ;;  %v11794_v47 = vld [vmem:[%s11453_s19 + $0x90] sm:$0xff]  ;;  %v11799_v26 = vld [vmem:[%s11453_s19 + $0xa8] sm:$0xff] }
 0x2fa   : > { %v2081_v37 = vadd.f32 %v14831_v15, %v11645_v13  ;;  %v2219_v49 = vsel %vm2155_vm5, %v2123_v48, %v2187_v40  ;;  %v2382_v4 = vmax.f32 %v2380_v53, %v2381_v45  ;;  %v2394_v50 = vmax.f32 %v2392_v32, %v2393_v33  ;;  %14832 = vst [vmem:[#allocation41_spill] sm:$0xff] %v11794_v47 }
 0x2fb   : > { %v11788_v61 = vsel %vm14718_vm9, %v2219_v49, -1e+30  ;;  %v2125_v13 = vadd.f32 %v11463_v46, %v2084_v60  ;;  %10098 = vpow2.f32 %v2567_v44  ;;  %v2406_v29 = vmax.f32 %v2404_v52, %v2405_v35  ;;  %v11796_v10 = vpop.eup %10090  ;;  %14833 = vst [vmem:[#allocation42_spill] sm:$0xff] %v11799_v26 }
 0x2fc   : > { %v2122_v28 = vadd.f32 %v11463_v46, %v2081_v37  ;;  %v2418_v11 = vsel %vm14764_vm1, %v11788_v61, -inf  ;;  %v2375_v48 = vmax.f32 %v2373_v16, %v2374_v24  ;;  %v2386_v51 = vrot.slane %v2385_v41, 2  ;;  %v11801_v49 = vpop.eup %10092 }
 0x2fd   : > { %v2399_v53 = vmax.f32 %v2397_v14, %v2398_v12  ;;  %10100 = vpow2.f32 %v2573_v36  ;;  %v2419_v45 = vrot.slane %v2418_v11, 4  ;;  %vm2157_vm5 = vcmp.ge.f32.partialorder %v2125_v13, 0.0 }
 0x2fe   : > { %vm2154_vm12 = vcmp.ge.f32.partialorder %v2122_v28, 0.0  ;;  %v2186_v32 = vmul.f32 0.01, %v2122_v28  ;;  %v2189_v52 = vmul.f32 0.01, %v2125_v13  ;;  %v2531_v44 = vsub.f32 %v11650_v19, %v2361_v8 }
 0x2ff   : > { %v2534_v33 = vsub.f32 %v11681_v23, %v2382_v4  ;;  %v2395_v35 = vrot.slane %v2394_v50, 1  ;;  %vm14741_vm9 = vcmp.gt.f32.partialorder %v11794_v47, 0.0  ;;  %v11807_v16 = vpop.eup %10094  ;;  %v2407_v14 = vrot.slane %v2406_v29, 2 }
 0x300   : > { %v2218_v40 = vsel %vm2154_vm12, %v2122_v28, %v2186_v32  ;;  %v2221_v37 = vsel %vm2157_vm5, %v2125_v13, %v2189_v52  ;;  %v2083_v24 = vadd.f32 %v11459_v30, %v11672_v1  ;;  %vm14734_vm14 = vcmp.gt.f32.partialorder %v11799_v26, 0.0  ;;  %v11827_v1 = vld [vmem:[%s11453_s19 + $0xa0] sm:$0xff] }
 0x301   : > { %v11811_v15 = vsel %vm14721_vm2, %v2218_v40, -1e+30  ;;  %v2533_v19 = vsub.f32 %v11691_v38, %v2375_v48  ;;  %v2387_v23 = vmax.f32 %v2385_v41, %v2386_v51  ;;  %v2400_v4 = vrot.slane %v2399_v53, 2  ;;  %v11819_v60 = vpop.eup %10096  ;;  %14834 = vst [vmem:[#allocation43_spill] sm:$0xff] %v11827_v1  ;;  %v11834_v51 = vld [vmem:[%s11453_s19 + $0xb8] sm:$0xff] }
 0x302   : > { %v2411_v12 = vsel %vm14764_vm1, %v11811_v15, -inf  ;;  %v2420_v36 = vmax.f32 %v2418_v11, %v2419_v45  ;;  %v11823_v28 = vsel %vm14720_vm3, %v2221_v37, -1e+30  ;;  %v2124_v30 = vadd.f32 %v11463_v46, %v2083_v24  ;;  %14836 = vst [vmem:[#allocation44_spill] sm:$0xff] %v11834_v51 }
 0x303   : > { %v2412_v8 = vrot.slane %v2411_v12, 4  ;;  %v2571_v13 = vmul.f32 1.442695, %v2531_v44  ;;  %v2577_v32 = vmul.f32 1.442695, %v2534_v33  ;;  %v2396_v38 = vmax.f32 %v2394_v50, %v2395_v35 }
 0x304   : > { %v14835_v41 = vrot.slane %v11404_v62, %v11342_v9  ;;  %v2408_v11 = vmax.f32 %v2406_v29, %v2407_v14  ;;  %v2432_v52 = vsel %vm14764_vm1, %v11823_v28, -inf  ;;  %vm2156_vm12 = vcmp.ge.f32.partialorder %v2124_v30, 0.0  ;;  %v11849_v14 = vpop.f32.mrb[32].mxu1 }
 0x305   : > { %v2413_v45 = vmax.f32 %v2411_v12, %v2412_v8  ;;  %v2575_v40 = vmul.f32 1.442695, %v2533_v19  ;;  %v2388_v37 = vrot.slane %v2387_v23, 1  ;;  %v2188_v24 = vmul.f32 0.01, %v2124_v30  ;;  %v11840_v50 = vpop.eup %10098 }
 0x306   : > { %v2086_v48 = vadd.f32 %v11683_v39, %v14835_v41  ;;  %vm14736_vm5 = vcmp.gt.f32.partialorder %v11827_v1, 0.0  ;;  %v2401_v62 = vmax.f32 %v2399_v53, %v2400_v4  ;;  %v2421_v39 = vrot.slane %v2420_v36, 2  ;;  %v11852_v53 = vpop.f32.mrb[33].mxu1 }
 0x307   : > { %v14837_v29 = vrot.slane %v11396_v57, %v11342_v9  ;;  %v2088_v35 = vadd.f32 %v11705_v7, %v11481_v55  ;;  %vm14731_vm3 = vcmp.gt.f32.partialorder %v11834_v51, 0.0  ;;  %v2536_v19 = vsub.f32 %v11709_v0, %v2396_v38  ;;  %14838 = vst [vmem:[#allocation45_spill] sm:$0xff] %v11852_v53  ;;  %v11854_v4 = vpop.eup %10100 }
 0x308   : > { %v2127_v44 = vadd.f32 %v11463_v46, %v2086_v48  ;;  %v2433_v12 = vrot.slane %v2432_v52, 4  ;;  %v2220_v8 = vsel %vm2156_vm12, %v2124_v30, %v2188_v24  ;;  %10102 = vpow2.f32 %v2571_v13  ;;  %v11857_v48 = vld [vmem:[%s11453_s19 + $0xb0] sm:$0xff]  ;;  %v11865_v13 = vpop.f32.mrb[34].mxu1 }
 0x309   : > { %v2085_v33 = vadd.f32 %v14837_v29, %v11687_v56  ;;  %v2409_v41 = vrot.slane %v2408_v11, 1  ;;  %v2414_v57 = vrot.slane %v2413_v45, 2  ;;  %14839 = vst [vmem:[#allocation46_spill] sm:$0xff] %v11857_v48  ;;  %10104 = vpow2.f32 %v2577_v32  ;;  %14840 = vst [vmem:[#allocation47_spill] sm:$0xff] %v11865_v13 }
 0x30a   : > { %vm2159_vm2 = vcmp.ge.f32.partialorder %v2127_v44, 0.0  ;;  %v2191_v56 = vmul.f32 0.01, %v2127_v44  ;;  %v2389_v55 = vmax.f32 %v2387_v23, %v2388_v37  ;;  %v2129_v0 = vadd.f32 %v11463_v46, %v2088_v35 }
 0x30b   : > { %v2126_v7 = vadd.f32 %v11463_v46, %v2085_v33  ;;  %v2402_v38 = vrot.slane %v2401_v62, 1  ;;  %v2422_v30 = vmax.f32 %v2420_v36, %v2421_v39  ;;  %v11863_v24 = vsel %vm14741_vm9, %v2220_v8, -1e+30  ;;  %v11873_v36 = vld [vmem:[%s11453_s19 + $0xc8] sm:$0xff]  ;;  %v11875_v39 = vpop.f32.mrb[35].mxu1 }
 0x30c   : > { %v2223_v29 = vsel %vm2159_vm2, %v2127_v44, %v2191_v56  ;;  %10106 = vpow2.f32 %v2575_v40  ;;  %v2581_v18 = vmul.f32 1.442695, %v2536_v19  ;;  %v2434_v42 = vmax.f32 %v2432_v52, %v2433_v12  ;;  %14841 = vst [vmem:[#allocation48_spill] sm:$0xff] %v11873_v36  ;;  %14842 = vst [vmem:[#allocation49_spill] sm:$0xff] %v11875_v39 }
 0x30d   : > { %v11869_v23 = vsel %vm14734_vm14, %v2223_v29, -1e+30  ;;  %vm14733_vm12 = vcmp.gt.f32.partialorder %v11857_v48, 0.0  ;;  %v2410_v32 = vmax.f32 %v2408_v11, %v2409_v41  ;;  %v2415_v37 = vmax.f32 %v2413_v45, %v2414_v57  ;;  %v11884_v45 = vpop.f32.mrb[36].mxu1 }
 0x30e   : > { %vm2158_vm10 = vcmp.ge.f32.partialorder %v2126_v7, 0.0  ;;  %vm2161_vm8 = vcmp.ge.f32.partialorder %v2129_v0, 0.0  ;;  %v2425_v44 = vsel %vm14764_vm1, %v11863_v24, -inf  ;;  %v2446_v52 = vsel %vm14764_vm1, %v11869_v23, -inf  ;;  %14843 = vst [vmem:[#allocation50_spill] sm:$0xff] %v11884_v45  ;;  %v11890_v26 = vpop.f32.mrb[37].mxu1 }
 0x30f   : > { %v2190_v40 = vmul.f32 0.01, %v2126_v7  ;;  %v2193_v33 = vmul.f32 0.01, %v2129_v0  ;;  %v2535_v35 = vsub.f32 %v11732_v2, %v2389_v55  ;;  %v2403_v19 = vmax.f32 %v2401_v62, %v2402_v38  ;;  %14845 = vst [vmem:[#allocation51_spill] sm:$0xff] %v11890_v26 }
 0x310   : > { %v2423_v12 = vrot.slane %v2422_v30, 1  ;;  %v2087_v11 = vadd.f32 %v11471_v43, %v11716_v6  ;;  %v2435_v8 = vrot.slane %v2434_v42, 2  ;;  %v14844_v56 = vrot.slane %v11415_v3, %v11342_v9 }
 0x311   : > { %v2222_v41 = vsel %vm2158_vm10, %v2126_v7, %v2190_v40  ;;  %v2225_v57 = vsel %vm2161_vm8, %v2129_v0, %v2193_v33  ;;  %v2416_v47 = vrot.slane %v2415_v37, 1  ;;  %v2426_v2 = vrot.slane %v2425_v44, 4  ;;  %v11909_v33 = vld [vmem:[%s11453_s19 + $0xc0] sm:$0xff] }
 0x312   : > { %v2090_v29 = vadd.f32 %v11725_v20, %v14844_v56  ;;  %v2447_v62 = vrot.slane %v2446_v52, 4  ;;  %v11894_v55 = vsel %vm14736_vm5, %v2222_v41, -1e+30  ;;  %vm14758_vm2 = vcmp.gt.f32.partialorder %v11873_v36, 0.0  ;;  %v11905_v7 = vpop.eup %10102  ;;  %v11911_v41 = vpop.f32.mrb[38].mxu1 }
 0x313   : > { %v2538_v43 = vsub.f32 %v11745_v17, %v2410_v32  ;;  %v2439_v6 = vsel %vm14764_vm1, %v11894_v55, -inf  ;;  %v11902_v3 = vsel %vm14731_vm3, %v2225_v57, -1e+30  ;;  %v2128_v20 = vadd.f32 %v11463_v46, %v2087_v11  ;;  %14846 = vst [vmem:[#allocation52_spill] sm:$0xff] %v11911_v41  ;;  %v11913_v17 = vpop.eup %10104  ;;  %v11917_v56 = vpop.f32.mrb[39].mxu1 }
 0x314   : > { %10108 = vpow2.f32 %v2581_v18  ;;  %v2579_v0 = vmul.f32 1.442695, %v2535_v35  ;;  %v2537_v38 = vsub.f32 %v11762_v21, %v2403_v19  ;;  %v2424_v40 = vmax.f32 %v2422_v30, %v2423_v12  ;;  %14847 = vst [vmem:[#allocation53_spill] sm:$0xff] %v11917_v56 }
 0x315   : > { %v2436_v32 = vmax.f32 %v2434_v42, %v2435_v8  ;;  %v2460_v57 = vsel %vm14764_vm1, %v11902_v3, -inf  ;;  %vm2160_vm8 = vcmp.ge.f32.partialorder %v2128_v20, 0.0  ;;  %v2192_v11 = vmul.f32 0.01, %v2128_v20 }
 0x316   : > { %v2417_v18 = vmax.f32 %v2415_v37, %v2416_v47  ;;  %v2427_v35 = vmax.f32 %v2425_v44, %v2426_v2  ;;  %v2448_v51 = vmax.f32 %v2446_v52, %v2447_v62  ;;  %v2440_v21 = vrot.slane %v2439_v6, 4  ;;  %v11919_v30 = vpop.eup %10106  ;;  %v11934_v52 = vpop.f32.mrb[40].mxu1 }
 0x317   : > { %v2585_v19 = vmul.f32 1.442695, %v2538_v43  ;;  %v2224_v12 = vsel %vm2160_vm8, %v2128_v20, %v2192_v11  ;;  %v2131_v1 = vadd.f32 %v11463_v46, %v2090_v29  ;;  %v14848_v42 = vrot.slane %v11407_v63, %v11342_v9  ;;  %14850 = vst [vmem:[#allocation55_spill] sm:$0xff] %v11934_v52 }
 0x318   : > { %vm14759_vm10 = vcmp.gt.f32.partialorder %v11909_v33, 0.0  ;;  %10110 = vpow2.f32 %v2579_v0  ;;  %v2583_v47 = vmul.f32 1.442695, %v2537_v38  ;;  %v2461_v37 = vrot.slane %v2460_v57, 4  ;;  %v11942_v38 = vld [vmem:[%s11453_s19 + $0xd0] sm:$0xff] }
 0x319   : > { %v2089_v8 = vadd.f32 %v14848_v42, %v11728_v59  ;;  %v11932_v44 = vsel %vm14733_vm12, %v2224_v12, -1e+30  ;;  %v2540_v29 = vsub.f32 %v11788_v61, %v2424_v40  ;;  %v2437_v2 = vrot.slane %v2436_v32, 1  ;;  %v11937_v59 = vpop.f32.mrb[41].mxu1  ;;  %14852 = vst [vmem:[#allocation57_spill] sm:$0xff] %v11942_v38 }
 0x31a   : > { %vm2163_vm8 = vcmp.ge.f32.partialorder %v2131_v1, 0.0  ;;  %v2195_v63 = vmul.f32 0.01, %v2131_v1  ;;  %14851 = vst [vmem:[#allocation56_spill] sm:$0xff] %v11937_v59  ;;  %v2539_v62 = vsub.f32 %v11811_v15, %v2417_v18  ;;  %v2428_v43 = vrot.slane %v2427_v35, 2  ;;  %v11955_v48 = vpop.f32.mrb[42].mxu1 }
 0x31b   : > { %v2449_v20 = vrot.slane %v2448_v51, 2  ;;  %v2441_v0 = vmax.f32 %v2439_v6, %v2440_v21  ;;  %vm14757_vm3 = vcmp.gt.f32.partialorder %v11928_v54, 0.0  ;;  %v2453_v11 = vsel %vm14764_vm1, %v11932_v44, -inf  ;;  %v14854_v6 = vld [vmem:[#allocation32_spill] sm:$0xff] }
 0x31c   : > { %v2227_v12 = vsel %vm2163_vm8, %v2131_v1, %v2195_v63  ;;  %v2130_v61 = vadd.f32 %v11463_v46, %v2089_v8  ;;  %v2092_v40 = vadd.f32 %v11739_v34, %v11492_v58  ;;  %10112 = vpow2.f32 %v2585_v19  ;;  %14855 = vst [vmem:[#allocation32_spill] sm:$0xff] %v11955_v48  ;;  %v11963_v34 = vpop.f32.mrb[43].mxu1 }
 0x31d   : > { %v2462_v42 = vmax.f32 %v2460_v57, %v2461_v37  ;;  %v14853_v15 = vrot.slane %v11637_v31, 2  ;;  %v2589_v59 = vmul.f32 1.442695, %v2540_v29  ;;  %v2438_v41 = vmax.f32 %v2436_v32, %v2437_v2  ;;  %14856 = vst [vmem:[#allocation58_spill] sm:$0xff] %v11963_v34  ;;  %v11968_v2 = vld [vmem:[%s11453_s19 + $0xe8] sm:$0xff] }
 0x31e   : > { %v11959_v1 = vsel %vm14758_vm2, %v2227_v12, -1e+30  ;;  %v2133_v58 = vadd.f32 %v11463_v46, %v2092_v40  ;;  %vm14756_vm8 = vcmp.gt.f32.partialorder %v11942_v38, 0.0  ;;  %v11965_v57 = vpop.eup %10108  ;;  %v2450_v19 = vmax.f32 %v2448_v51, %v2449_v20 }
 0x31f   : > { %v11952_v18 = vmax.f32 %v11637_v31, %v14853_v15  ;;  %v2429_v31 = vmax.f32 %v2427_v35, %v2428_v43  ;;  %v2454_v8 = vrot.slane %v2453_v11, 4  ;;  %vm2162_vm12 = vcmp.ge.f32.partialorder %v2130_v61, 0.0  ;;  %v11972_v15 = vpop.f32.mrb[44].mxu1  ;;  %v14858_v43 = vld [vmem:[#allocation16_spill] sm:$0xff] }
 0x320   : > { %10114 = vpow2.f32 %v2583_v47  ;;  %v2587_v37 = vmul.f32 1.442695, %v2539_v62  ;;  %v2442_v29 = vrot.slane %v2441_v0, 2  ;;  %v2194_v32 = vmul.f32 0.01, %v2130_v61  ;;  %14857 = vst [vmem:[#allocation59_spill] sm:$0xff] %v11972_v15 }
 0x321   : > { %v2463_v63 = vrot.slane %v2462_v42, 2  ;;  %v2474_v12 = vsel %vm14764_vm1, %v11959_v1, -inf  ;;  %vm2165_vm14 = vcmp.ge.f32.partialorder %v2133_v58, 0.0  ;;  %v2197_v40 = vmul.f32 0.01, %v2133_v58  ;;  %v14859_v62 = vld [vmem:[#allocation17_spill] sm:$0xff] }
 0x322   : > { %v2542_v35 = vsub.f32 %v11823_v28, %v2438_v41  ;;  %v2226_v51 = vsel %vm2162_vm12, %v2130_v61, %v2194_v32  ;;  %v2091_v47 = vadd.f32 %v14858_v43, %v11751_v5  ;;  %v14860_v20 = vrot.slane %v14859_v62, %v11342_v9  ;;  %v11981_v36 = vpop.f32.mrb[45].mxu1  ;;  %v11983_v34 = vpop.eup %10110  ;;  %v11995_v61 = vld [vmem:[%s11453_s19 + $0xe0] sm:$0xff] }
 0x323   : > { %14861 = vst [vmem:[#allocation16_spill] sm:$0xff] %v11981_v36  ;;  %v2430_v48 = vrot.slane %v2429_v31, 1  ;;  %v2451_v26 = vrot.slane %v2450_v19, 1  ;;  %v2455_v45 = vmax.f32 %v2453_v11, %v2454_v8  ;;  %v11987_v15 = vsel %vm14759_vm10, %v2226_v51, -1e+30  ;;  %14862 = vst [vmem:[#allocation17_spill] sm:$0xff] %v11995_v61 }
 0x324   : > { %v2094_v21 = vadd.f32 %v11765_v22, %v14860_v20  ;;  %vm14742_vm12 = vcmp.gt.f32.partialorder %v11968_v2, 0.0  ;;  %v2475_v28 = vrot.slane %v2474_v12, 4  ;;  %v2467_v5 = vsel %vm14764_vm1, %v11987_v15, -inf  ;;  %v11997_v8 = vpop.f32.mrb[46].mxu1 }
 0x325   : > { %v2229_v41 = vsel %vm2165_vm14, %v2133_v58, %v2197_v40  ;;  %v2132_v22 = vadd.f32 %v11463_v46, %v2091_v47  ;;  %10116 = vpow2.f32 %v2589_v59  ;;  %v2443_v32 = vmax.f32 %v2441_v0, %v2442_v29  ;;  %14863 = vst [vmem:[#allocation60_spill] sm:$0xff] %v11997_v8  ;;  %v12003_v20 = vpop.f32.mrb[47].mxu1 }
 0x326   : > { %v2464_v43 = vmax.f32 %v2462_v42, %v2463_v63  ;;  %v2468_v11 = vrot.slane %v2467_v5, 4  ;;  %10118 = vpow2.f32 %v2587_v37  ;;  %v12001_v51 = vsel %vm14757_vm3, %v2229_v41, -1e+30  ;;  %14864 = vst [vmem:[#allocation61_spill] sm:$0xff] %v12003_v20  ;;  %v12005_v58 = vpop.eup %10112  ;;  %v14865_v20 = vld [vmem:[#allocation39_spill] sm:$0xff] }
 0x327   : > { %vm2164_vm5 = vcmp.ge.f32.partialorder %v2132_v22, 0.0  ;;  %v2196_v62 = vmul.f32 0.01, %v2132_v22  ;;  %v2431_v40 = vmax.f32 %v2429_v31, %v2430_v48  ;;  %v2452_v47 = vmax.f32 %v2450_v19, %v2451_v26  ;;  %v14866_v48 = vld [vmem:[#allocation13_spill] sm:$0xff]  ;;  %v12019_v19 = vpop.f32.mrb[48].mxu1 }
 0x328   : > { %v2456_v36 = vrot.slane %v2455_v45, 2  ;;  %v2488_v59 = vsel %vm14764_vm1, %v12001_v51, -inf  ;;  %vm14743_vm14 = vcmp.gt.f32.partialorder %v11995_v61, 0.0  ;;  %v2593_v0 = vmul.f32 1.442695, %v2542_v35  ;;  %14868 = vst [vmem:[#allocation39_spill] sm:$0xff] %v12019_v19 }
 0x329   : > { %v2476_v42 = vmax.f32 %v2474_v12, %v2475_v28  ;;  %v2228_v37 = vsel %vm2164_vm5, %v2132_v22, %v2196_v62  ;;  %v2135_v29 = vadd.f32 %v11463_v46, %v2094_v21  ;;  %v2444_v63 = vrot.slane %v2443_v32, 1  ;;  %v12025_v28 = vpop.f32.mrb[49].mxu1 }
 0x32a   : > { %v2465_v41 = vrot.slane %v2464_v43, 1  ;;  %v12013_v54 = vsel %vm14756_vm8, %v2228_v37, -1e+30  ;;  %v14867_v26 = vrot.slane %v14866_v48, %v11342_v9  ;;  %v12021_v8 = vpop.eup %10114  ;;  %v2469_v12 = vmax.f32 %v2467_v5, %v2468_v11  ;;  %14869 = vst [vmem:[#allocation13_spill] sm:$0xff] %v12025_v28  ;;  %v12031_v9 = vld [vmem:[%s11453_s19 + $0xf8] sm:$0xff]  ;;  %v14872_v28 = vld [vmem:[#allocation25_spill] sm:$0xff] }
 0x32b   : > { %v2489_v35 = vrot.slane %v2488_v59, 4  ;;  %v2481_v21 = vsel %vm14764_vm1, %v12013_v54, -inf  ;;  %vm2167_vm5 = vcmp.ge.f32.partialorder %v2135_v29, 0.0  ;;  %v2541_v22 = vsub.f32 %v11863_v24, %v2431_v40  ;;  %14870 = vst [vmem:[#allocation62_spill] sm:$0xff] %v12031_v9  ;;  %v14871_v5 = vld [vmem:[#allocation27_spill] sm:$0xff]  ;;  %v12037_v24 = vpop.f32.mrb[50].mxu1 }
 0x32c   : > { %v2093_v31 = vadd.f32 %v14867_v26, %v14865_v20  ;;  %v2544_v62 = vsub.f32 %v11869_v23, %v2452_v47  ;;  %v2457_v37 = vmax.f32 %v2455_v45, %v2456_v36  ;;  %v2199_v48 = vmul.f32 0.01, %v2135_v29  ;;  %14873 = vst [vmem:[#allocation27_spill] sm:$0xff] %v12037_v24  ;;  %v12043_v40 = vpop.f32.mrb[51].mxu1 }
 0x32d   : > { %v2477_v38 = vrot.slane %v2476_v42, 2  ;;  %v2482_v20 = vrot.slane %v2481_v21, 4  ;;  %v2096_v11 = vadd.f32 %v11781_v27, %v14871_v5  ;;  %v2445_v19 = vmax.f32 %v2443_v32, %v2444_v63  ;;  %14874 = vst [vmem:[#allocation25_spill] sm:$0xff] %v12043_v40  ;;  %v12059_v5 = vpop.f32.mrb[52].mxu1 }
 0x32e   : > { %v2134_v26 = vadd.f32 %v11463_v46, %v2093_v31  ;;  %v2466_v39 = vmax.f32 %v2464_v43, %v2465_v41  ;;  %v2231_v52 = vsel %vm2167_vm5, %v2135_v29, %v2199_v48  ;;  %v2095_v13 = vadd.f32 %v14872_v28, %v11784_v25  ;;  %v12054_v31 = vld [vmem:[%s11453_s19 + $0xf0] sm:$0xff]  ;;  %14875 = vst [vmem:[#allocation63_spill] sm:$0xff] %v12059_v5 }
 0x32f   : > { %v2470_v23 = vrot.slane %v2469_v12, 2  ;;  %v2490_v36 = vmax.f32 %v2488_v59, %v2489_v35  ;;  %v12041_v45 = vsel %vm14742_vm12, %v2231_v52, -1e+30  ;;  %v12045_v47 = vpop.eup %10116  ;;  %v2591_v27 = vmul.f32 1.442695, %v2541_v22 }
 0x330   : > { %vm2166_vm9 = vcmp.ge.f32.partialorder %v2134_v26, 0.0  ;;  %v2458_v32 = vrot.slane %v2457_v37, 1  ;;  %v2502_v43 = vsel %vm14764_vm1, %v12041_v45, -inf  ;;  %v2198_v25 = vmul.f32 0.01, %v2134_v26  ;;  %v12050_v29 = vpop.eup %10118 }
 0x331   : > { %vm14747_vm5 = vcmp.gt.f32.partialorder %v12031_v9, 0.0  ;;  %v2478_v59 = vmax.f32 %v2476_v42, %v2477_v38  ;;  %v2483_v63 = vmax.f32 %v2481_v21, %v2482_v20  ;;  %v2503_v41 = vrot.slane %v2502_v43, 4  ;;  %v12065_v42 = vpop.f32.mrb[53].mxu1 }
 0x332   : > { %v2137_v52 = vadd.f32 %v11463_v46, %v2096_v11  ;;  %v2597_v35 = vmul.f32 1.442695, %v2544_v62  ;;  %v2543_v28 = vsub.f32 %v11894_v55, %v2445_v19  ;;  %v2546_v22 = vsub.f32 %v11902_v3, %v2466_v39  ;;  %14876 = vst [vmem:[#allocation64_spill] sm:$0xff] %v12065_v42 }
 0x333   : > { %v2230_v48 = vsel %vm2166_vm9, %v2134_v26, %v2198_v25  ;;  %v2471_v40 = vmax.f32 %v2469_v12, %v2470_v23  ;;  %v2491_v24 = vrot.slane %v2490_v36, 2  ;;  %v2504_v53 = vmax.f32 %v2502_v43, %v2503_v41 }
 0x334   : > { %v12063_v38 = vsel %vm14743_vm14, %v2230_v48, -1e+30  ;;  %10120 = vpow2.f32 %v2593_v0  ;;  %v2459_v21 = vmax.f32 %v2457_v37, %v2458_v32  ;;  %v2201_v62 = vmul.f32 0.01, %v2137_v52  ;;  %v12074_v0 = vpop.f32.mrb[54].mxu1 }
 0x335   : > { %v2136_v55 = vadd.f32 %v11463_v46, %v2095_v13  ;;  %vm14746_vm12 = vcmp.gt.f32.partialorder %v12054_v31, 0.0  ;;  %v2479_v39 = vrot.slane %v2478_v59, 1  ;;  %v2484_v3 = vrot.slane %v2483_v63, 2  ;;  %14878 = vst [vmem:[#allocation65_spill] sm:$0xff] %v12074_v0  ;;  %v12076_v23 = vpop.f32.mrb[55].mxu1 }
 0x336   : > { %v2495_v19 = vsel %vm14764_vm1, %v12063_v38, -inf  ;;  %vm2169_vm9 = vcmp.ge.f32.partialorder %v2137_v52, 0.0  ;;  %10122 = vpow2.f32 %v2591_v27  ;;  %v2595_v12 = vmul.f32 1.442695, %v2543_v28  ;;  %14879 = vst [vmem:[#allocation66_spill] sm:$0xff] %v12076_v23 }
 0x337   : > { %v2505_v20 = vrot.slane %v2504_v53, 2  ;;  %v14877_v26 = vrot.slane %v14854_v6, 4  ;;  %10124 = vpow2.f32 %v2597_v35  ;;  %v2601_v37 = vmul.f32 1.442695, %v2546_v22 }
 0x338   : > { %v2472_v46 = vrot.slane %v2471_v40, 1  ;;  %v2492_v13 = vmax.f32 %v2490_v36, %v2491_v24  ;;  %v2496_v32 = vrot.slane %v2495_v19, 4  ;;  %v2233_v43 = vsel %vm2169_vm9, %v2137_v52, %v2201_v62 }
 0x339   : > { %v2301_v11 = vmax.f32 %v14854_v6, %v14877_v26  ;;  %v2200_v25 = vmul.f32 0.01, %v2136_v55  ;;  %v2311_v41 = vrot.slane %v11952_v18, 1  ;;  %v2545_v27 = vsub.f32 %v11932_v44, %v2459_v21  ;;  %v12081_v26 = vpop.f32.mrb[56].mxu1 }
 0x33a   : > { %v2480_v28 = vmax.f32 %v2478_v59, %v2479_v39  ;;  %v2485_v48 = vmax.f32 %v2483_v63, %v2484_v3  ;;  %vm2168_vm14 = vcmp.ge.f32.partialorder %v2136_v55, 0.0  ;;  %10126 = vpow2.f32 %v2595_v12  ;;  %14880 = vst [vmem:[#allocation67_spill] sm:$0xff] %v12081_v26  ;;  %v12087_v62 = vpop.f32.mrb[57].mxu1  ;;  %v14882_v63 = vld [vmem:[#allocation22_spill] sm:$0xff]  ;;  %v10580_v12 = vld [vmem:[%s11453_s19 + $0x18] sm:$0xff] }
 0x33b   : > { %v2506_v6 = vmax.f32 %v2504_v53, %v2505_v20  ;;  %v2312_v35 = vmax.f32 %v11952_v18, %v2311_v41  ;;  %v2302_v22 = vrot.slane %v2301_v11, 2  ;;  %10128 = vpow2.f32 %v2601_v37  ;;  %14881 = vst [vmem:[#allocation68_spill] sm:$0xff] %v12087_v62  ;;  %v14883_v20 = vld [vmem:[#allocation40_spill] sm:$0xff] }
 0x33c   : > { %v2473_v24 = vmax.f32 %v2471_v40, %v2472_v46  ;;  %v2493_v36 = vrot.slane %v2492_v13, 1  ;;  %v12085_v52 = vsel %vm14747_vm5, %v2233_v43, -1e+30  ;;  %v2497_v44 = vmax.f32 %v2495_v19, %v2496_v32 }
 0x33d   : > { %v2232_v59 = vsel %vm2168_vm14, %v2136_v55, %v2200_v25  ;;  %v2524_v21 = vsub.f32 %v14882_v63, %v2312_v35  ;;  %v2303_v53 = vmax.f32 %v2301_v11, %v2302_v22  ;;  %v2599_v39 = vmul.f32 1.442695, %v2545_v27  ;;  %v12099_v55 = vpop.f32.mrb[58].mxu1 }
 0x33e   : > { %v2548_v18 = vsub.f32 %v11959_v1, %v2480_v28  ;;  %v2486_v3 = vrot.slane %v2485_v48, 1  ;;  %v12093_v37 = vmul.f32 %v10580_v12, %v14883_v20  ;;  %v12095_v40 = vpop.eup %10120  ;;  %v2507_v46 = vrot.slane %v2506_v6, 1  ;;  %14884 = vst [vmem:[#allocation22_spill] sm:$0xff] %v12099_v55  ;;  %v12108_v27 = vpop.f32.mrb[59].mxu1  ;;  %v14886_v20 = vld [vmem:[#allocation28_spill] sm:$0xff] }
 0x33f   : > { %v2516_v43 = vsel %vm14764_vm1, %v12085_v52, -inf  ;;  %v2557_v41 = vmul.f32 1.442695, %v2524_v21  ;;  %v2304_v19 = vrot.slane %v2303_v53, 1  ;;  %v2547_v11 = vsub.f32 %v11987_v15, %v2473_v24  ;;  %14885 = vst [vmem:[#allocation40_spill] sm:$0xff] %v12108_v27  ;;  %v10581_v24 = vld [vmem:[%s11453_s19 + $0x10] sm:$0xff] }
 0x340   : > { %v2494_v32 = vmax.f32 %v2492_v13, %v2493_v36  ;;  %v12104_v1 = vsel %vm14746_vm12, %v2232_v59, -1e+30  ;;  %v2672_v25 = vsel %vm14764_vm1, %v12093_v37, 0.0  ;;  %v12110_v28 = vpop.eup %10122  ;;  %v2498_v35 = vrot.slane %v2497_v44, 2 }
 0x341   : > { %10130 = vpow2.f32 %v2557_v41  ;;  %v2305_v22 = vmax.f32 %v2303_v53, %v2304_v19  ;;  %v2673_v63 = vrot.slane %v2672_v25, 4  ;;  %v12112_v21 = vpop.eup %10124  ;;  %v2487_v15 = vmax.f32 %v2485_v48, %v2486_v3  ;;  %v12121_v41 = vpop.f32.mrb[60].mxu1 }
 0x342   : > { %10132 = vpow2.f32 %v2599_v39  ;;  %v2517_v13 = vrot.slane %v2516_v43, 4  ;;  %v12116_v36 = vmul.f32 %v10581_v24, %v11796_v10  ;;  %v2508_v59 = vmax.f32 %v2506_v6, %v2507_v46  ;;  %14887 = vst [vmem:[#allocation28_spill] sm:$0xff] %v12121_v41  ;;  %v12126_v3 = vpop.f32.mrb[61].mxu1 }
 0x343   : > { %v2509_v12 = vsel %vm14764_vm1, %v12104_v1, -inf  ;;  %v2523_v9 = vsub.f32 %v14886_v20, %v2305_v22  ;;  %v2674_v61 = vadd.f32 %v2673_v63, %v2672_v25  ;;  %v2605_v53 = vmul.f32 1.442695, %v2548_v18  ;;  %14888 = vst [vmem:[#allocation69_spill] sm:$0xff] %v12126_v3  ;;  %v10582_v20 = vld [vmem:[%s11453_s19 + $0x28] sm:$0xff] }
 0x344   : > { %v2603_v19 = vmul.f32 1.442695, %v2547_v11  ;;  %v2550_v39 = vsub.f32 %v12001_v51, %v2494_v32  ;;  %v2665_v48 = vsel %vm14764_vm1, %v12116_v36, 0.0  ;;  %v12128_v10 = vpop.eup %10126  ;;  %v2499_v6 = vmax.f32 %v2497_v44, %v2498_v35 }
 0x345   : > { %v2555_v46 = vmul.f32 1.442695, %v2523_v9  ;;  %v2675_v24 = vrot.slane %v2674_v61, 2  ;;  %v2666_v22 = vrot.slane %v2665_v48, 4  ;;  %v12130_v25 = vpop.eup %10128  ;;  %v2549_v63 = vsub.f32 %v12013_v54, %v2487_v15  ;;  %v12138_v9 = vpop.f32.mrb[62].mxu1  ;;  %v10583_v54 = vld [vmem:[%s11453_s19 + $0x30] sm:$0xff] }
 0x346   : > { %v2518_v18 = vmax.f32 %v2516_v43, %v2517_v13  ;;  %v2510_v11 = vrot.slane %v2509_v12, 4  ;;  %v12135_v51 = vmul.f32 %v10582_v20, %v11801_v49  ;;  %v2552_v32 = vsub.f32 %v12041_v45, %v2508_v59  ;;  %14889 = vst [vmem:[#allocation70_spill] sm:$0xff] %v12138_v9  ;;  %v12146_v15 = vpop.f32.mrb[63].mxu1 }
 0x347   : > { %10134 = vpow2.f32 %v2555_v46  ;;  %v2676_v3 = vadd.f32 %v2675_v24, %v2674_v61  ;;  %v2667_v44 = vadd.f32 %v2666_v22, %v2665_v48  ;;  %v2609_v35 = vmul.f32 1.442695, %v2550_v39  ;;  %14890 = vst [vmem:[#allocation71_spill] sm:$0xff] %v12146_v15  ;;  %v10584_v39 = vld [vmem:[%s11453_s19 + $0x20] sm:$0xff]  ;;  %v10585_v15 = vld [vmem:[%s11453_s19 + $0x8] sm:$0xff] }
 0x348   : > { %10136 = vpow2.f32 %v2605_v53  ;;  %v2686_v41 = vsel %vm14764_vm1, %v12135_v51, 0.0  ;;  %v12144_v43 = vmul.f32 %v10583_v54, %v11840_v50  ;;  %v2500_v49 = vrot.slane %v2499_v6, 1 }
 0x349   : > { %v2677_v45 = vrot.slane %v2676_v3, 1  ;;  %v2668_v13 = vrot.slane %v2667_v44, 2  ;;  %v2687_v61 = vrot.slane %v2686_v41, 4  ;;  %10138 = vpow2.f32 %v2603_v19 }
 0x34a   : > { %v2607_v59 = vmul.f32 1.442695, %v2549_v63  ;;  %v2693_v53 = vsel %vm14764_vm1, %v12144_v43, 0.0  ;;  %v12152_v48 = vmul.f32 %v10584_v39, %v11807_v16  ;;  %v2613_v50 = vmul.f32 1.442695, %v2552_v32  ;;  %v10586_v63 = vld [vmem:[%s11453_s19 + $0x48] sm:$0xff] }
 0x34b   : > { %v10131_v46 = vpop.eup %10130  ;;  %v2519_v24 = vrot.slane %v2518_v18, 2  ;;  %v2511_v22 = vmax.f32 %v2509_v12, %v2510_v11  ;;  %v2688_v20 = vadd.f32 %v2687_v61, %v2686_v41  ;;  %v2694_v27 = vrot.slane %v2693_v53, 4 }
 0x34c   : > { %v12154_v54 = vpop.eup %10132  ;;  %v12157_v9 = vmul.f32 %v10585_v15, %v10131_v46  ;;  %v2679_v19 = vsel %vm14764_vm1, %v12152_v48, 0.0  ;;  %v12163_v55 = vmul.f32 %v10586_v63, %v11854_v4  ;;  %10140 = vpow2.f32 %v2609_v35 }
 0x34d   : > { %v2501_v16 = vmax.f32 %v2499_v6, %v2500_v49  ;;  %v2678_v39 = vadd.f32 %v2677_v45, %v2676_v3  ;;  %v2669_v32 = vadd.f32 %v2668_v13, %v2667_v44  ;;  %v2689_v41 = vrot.slane %v2688_v20, 2  ;;  %v10587_v49 = vld [vmem:[%s11453_s19] sm:$0xff] }
 0x34e   : > { %v2658_v12 = vsel %vm14764_vm1, %v12157_v9, 0.0  ;;  %v2695_v11 = vadd.f32 %v2694_v27, %v2693_v53  ;;  %v2680_v15 = vrot.slane %v2679_v19, 4  ;;  %10142 = vpow2.f32 %v2607_v59 }
 0x34f   : > { %v2520_v61 = vmax.f32 %v2518_v18, %v2519_v24  ;;  %v2512_v46 = vrot.slane %v2511_v22, 2  ;;  %v2659_v62 = vrot.slane %v2658_v12, 4  ;;  %10144 = vpow2.f32 %v2613_v50 }
 0x350   : > { %v2696_v26 = vrot.slane %v2695_v11, 2  ;;  %v2681_v23 = vadd.f32 %v2680_v15, %v2679_v19  ;;  %v2714_v4 = vsel %vm14764_vm1, %v12163_v55, 0.0  ;;  %v2551_v3 = vsub.f32 %v12063_v38, %v2501_v16  ;;  %v10588_v16 = vld [vmem:[%s11453_s19 + $0x38] sm:$0xff] }
 0x351   : > { %v10135_v6 = vpop.eup %10134  ;;  %v2660_v44 = vadd.f32 %v2659_v62, %v2658_v12  ;;  %vm2878_vm14 = vcmp.gt.f32.partialorder %v2678_v39, 0.0  ;;  %v2715_v35 = vrot.slane %v2714_v4, 4  ;;  %v2670_v18 = vrot.slane %v2669_v32, 1 }
 0x352   : > { %v12170_v27 = vpop.eup %10136  ;;  %v12173_v45 = vmul.f32 %v10587_v49, %v10135_v6  ;;  %v2690_v13 = vadd.f32 %v2689_v41, %v2688_v20  ;;  %v2697_v59 = vadd.f32 %v2696_v26, %v2695_v11  ;;  %v2521_v53 = vrot.slane %v2520_v61, 1 }
 0x353   : > { %v2661_v50 = vrot.slane %v2660_v44, 2  ;;  %v2682_v24 = vrot.slane %v2681_v23, 2  ;;  %v2716_v19 = vadd.f32 %v2715_v35, %v2714_v4  ;;  %v12175_v63 = vpop.eup %10138  ;;  %v12177_v15 = vmax.f32 %v2511_v22, %v2512_v46 }
 0x354   : > { %v2651_v38 = vsel %vm14764_vm1, %v12173_v45, 0.0  ;;  %v2698_v62 = vrot.slane %v2697_v59, 1  ;;  %v12183_v12 = vmul.f32 %v10588_v16, %v11819_v60  ;;  %v2910_v26 = vsel %vm2878_vm14, %v2678_v39, 1.0 }
 0x355   : > { %v2662_v6 = vadd.f32 %v2661_v50, %v2660_v44  ;;  %v2652_v49 = vrot.slane %v2651_v38, 4  ;;  %v2717_v20 = vrot.slane %v2716_v19, 2  ;;  %v2671_v41 = vadd.f32 %v2670_v18, %v2669_v32 }
 0x356   : > { %v2691_v11 = vrot.slane %v2690_v13, 1  ;;  %v2699_v4 = vadd.f32 %v2698_v62, %v2697_v59  ;;  %v2700_v22 = vsel %vm14764_vm1, %v12183_v12, 0.0  ;;  %v12188_v46 = vpop.eup %10140  ;;  %v2683_v42 = vadd.f32 %v2682_v24, %v2681_v23 }
 0x357   : > { %v2663_v35 = vrot.slane %v2662_v6, 1  ;;  %v2653_v0 = vadd.f32 %v2652_v49, %v2651_v38  ;;  %v2718_v5 = vadd.f32 %v2717_v20, %v2716_v19  ;;  %v2611_v56 = vmul.f32 1.442695, %v2551_v3  ;;  %v10589_v19 = vld [vmem:[%s11453_s19 + $0x58] sm:$0xff] }
 0x358   : > { %v12190_v60 = vmax.f32 %v2520_v61, %v2521_v53  ;;  %vm2881_vm9 = vcmp.gt.f32.partialorder %v2699_v4, 0.0  ;;  %v2701_v44 = vrot.slane %v2700_v22, 4  ;;  %v12192_v50 = vpop.eup %10142  ;;  %10146 = vrcp.f32 %v2910_v26 }
 0x359   : > { %v2664_v39 = vadd.f32 %v2663_v35, %v2662_v6  ;;  %v2654_v32 = vrot.slane %v2653_v0, 2  ;;  %v2913_v18 = vsel %vm2881_vm9, %v2699_v4, 1.0  ;;  %v2719_v59 = vrot.slane %v2718_v5, 1  ;;  %v12194_v62 = vpop.eup %10144 }
 0x35a   : > { %vm2877_vm14 = vcmp.gt.f32.partialorder %v2671_v41, 0.0  ;;  %v2692_v16 = vadd.f32 %v2691_v11, %v2690_v13  ;;  %v2702_v38 = vadd.f32 %v2701_v44, %v2700_v22  ;;  %v2684_v3 = vrot.slane %v2683_v42, 1  ;;  %v10590_v22 = vld [vmem:[%s11453_s19 + $0x40] sm:$0xff] }
 0x35b   : > { %vm2876_vm12 = vcmp.gt.f32.partialorder %v2664_v39, 0.0  ;;  %v2655_v23 = vadd.f32 %v2654_v32, %v2653_v0  ;;  %v2720_v61 = vadd.f32 %v2719_v59, %v2718_v5  ;;  %10148 = vrcp.f32 %v2913_v18  ;;  %v10592_v59 = vld [vmem:[%s11453_s19 + $0x68] sm:$0xff] }
 0x35c   : > { %v2908_v53 = vsel %vm2876_vm12, %v2664_v39, 1.0  ;;  %v2703_v24 = vrot.slane %v2702_v38, 2  ;;  %v12198_v6 = vmul.f32 %v10589_v19, %v11913_v17  ;;  %v2514_v49 = vrot.slane %v12177_v15, 1  ;;  %v10591_v39 = vld [vmem:[%s11453_s19 + $0x50] sm:$0xff] }
 0x35d   : > { %10150 = vrcp.f32 %v2908_v53  ;;  %v2656_v26 = vrot.slane %v2655_v23, 1  ;;  %vm2884_vm9 = vcmp.gt.f32.partialorder %v2720_v61, 0.0  ;;  %v2909_v13 = vsel %vm2877_vm14, %v2671_v41, 1.0 }
 0x35e   : > { %v2916_v20 = vsel %vm2884_vm9, %v2720_v61, 1.0  ;;  %v2704_v0 = vadd.f32 %v2703_v24, %v2702_v38  ;;  %v2728_v5 = vsel %vm14764_vm1, %v12198_v6, 0.0  ;;  %vm2880_vm12 = vcmp.gt.f32.partialorder %v2692_v16, 0.0 }
 0x35f   : > { %v2657_v11 = vadd.f32 %v2656_v26, %v2655_v23  ;;  %v2729_v4 = vrot.slane %v2728_v5, 4  ;;  %v12206_v17 = vmul.f32 %v10590_v22, %v11905_v7  ;;  %v2685_v35 = vadd.f32 %v2684_v3, %v2683_v42 }
 0x360   : > { %10152 = vrcp.f32 %v2916_v20  ;;  %v2705_v44 = vrot.slane %v2704_v0, 1  ;;  %v12210_v32 = vmul.f32 %v10591_v39, %v11919_v30  ;;  %v12216_v38 = vmul.f32 %v10592_v59, %v11965_v57 }
 0x361   : > { %vm2875_vm14 = vcmp.gt.f32.partialorder %v2657_v11, 0.0  ;;  %v2730_v41 = vadd.f32 %v2729_v4, %v2728_v5  ;;  %v2707_v18 = vsel %vm14764_vm1, %v12206_v17, 0.0  ;;  %10154 = vrcp.f32 %v2909_v13 }
 0x362   : > { %v2907_v23 = vsel %vm2875_vm14, %v2657_v11, 1.0  ;;  %v2912_v7 = vsel %vm2880_vm12, %v2692_v16, 1.0  ;;  %v2708_v42 = vrot.slane %v2707_v18, 4  ;;  %v2721_v30 = vsel %vm14764_vm1, %v12210_v32, 0.0  ;;  %v10147_v53 = vpop.eup %10146 }
 0x363   : > { %10156 = vrcp.f32 %v2907_v23  ;;  %v2731_v3 = vrot.slane %v2730_v41, 2  ;;  %v2742_v61 = vsel %vm14764_vm1, %v12216_v38, 0.0  ;;  %vm2879_vm9 = vcmp.gt.f32.partialorder %v2685_v35, 0.0  ;;  %v10593_v23 = vld [vmem:[%s11453_s19 + $0x60] sm:$0xff] }
 0x364   : > { %v2709_v24 = vadd.f32 %v2708_v42, %v2707_v18  ;;  %v2722_v19 = vrot.slane %v2721_v30, 4  ;;  %v2743_v57 = vrot.slane %v2742_v61, 4  ;;  %10158 = vpow2.f32 %v2611_v56 }
 0x365   : > { %v2554_v26 = vsub.f32 %v12085_v52, %v12190_v60  ;;  %v2706_v16 = vadd.f32 %v2705_v44, %v2704_v0  ;;  %v2732_v13 = vadd.f32 %v2731_v3, %v2730_v41  ;;  %v10149_v20 = vpop.eup %10148  ;;  %v12226_v5 = vmax.f32 %v12177_v15, %v2514_v49  ;;  %v10594_v3 = vld [vmem:[%s11453_s19 + $0x78] sm:$0xff] }
 0x366   : > { %v2710_v11 = vrot.slane %v2709_v24, 2  ;;  %v2723_v4 = vadd.f32 %v2722_v19, %v2721_v30  ;;  %v2744_v22 = vadd.f32 %v2743_v57, %v2742_v61  ;;  %10160 = vrcp.f32 %v2912_v7  ;;  %v10595_v57 = vld [vmem:[%s11453_s19 + $0x70] sm:$0xff] }
 0x367   : > { %v10151_v39 = vpop.eup %10150  ;;  %v2911_v18 = vsel %vm2879_vm9, %v2685_v35, 1.0  ;;  %v2733_v59 = vrot.slane %v2732_v13, 1  ;;  %v12230_v56 = vmul.f32 %v10593_v23, %v11983_v34  ;;  %vm2882_vm12 = vcmp.gt.f32.partialorder %v2706_v16, 0.0 }
 0x368   : > { %v2942_v42 = vmul.f32 %v10151_v39, %v12157_v9  ;;  %v2711_v0 = vadd.f32 %v2710_v11, %v2709_v24  ;;  %v2724_v44 = vrot.slane %v2723_v4, 2  ;;  %v2745_v41 = vrot.slane %v2744_v22, 2 }
 0x369   : > { %v2734_v15 = vadd.f32 %v2733_v59, %v2732_v13  ;;  %v2735_v49 = vsel %vm14764_vm1, %v12230_v56, 0.0  ;;  %v12237_v7 = vmul.f32 %v10594_v3, %v12005_v58  ;;  %v2952_v34 = vmul.f32 %v10149_v20, %v12144_v43 }
 0x36a   : > { %v10153_v35 = vpop.eup %10152  ;;  %3250 = vperm.xlu0 %9856, %v2942_v42   ;;  %v2712_v30 = vrot.slane %v2711_v0, 1  ;;  %v2725_v61 = vadd.f32 %v2724_v44, %v2723_v4  ;;  %v2746_v9 = vadd.f32 %v2745_v41, %v2744_v22  ;;  %v2736_v24 = vrot.slane %v2735_v49, 4 }
 0x36b   : > { %vm2886_vm14 = vcmp.gt.f32.partialorder %v2734_v15, 0.0  ;;  %v2756_v19 = vsel %vm14764_vm1, %v12237_v7, 0.0  ;;  %v12244_v13 = vmul.f32 %v10595_v57, %v12021_v8  ;;  %v10155_v11 = vpop.eup %10154  ;;  %v2958_v44 = vmul.f32 %v10153_v35, %v12163_v55  ;;  %v10596_v57 = vld [vmem:[%s11453_s19 + $0x80] sm:$0xff] }
 0x36c   : > { %v2918_v39 = vsel %vm2886_vm14, %v2734_v15, 1.0  ;;  %v2713_v58 = vadd.f32 %v2712_v30, %v2711_v0  ;;  %v2726_v59 = vrot.slane %v2725_v61, 1  ;;  %v2747_v23 = vrot.slane %v2746_v9, 1 }
 0x36d   : > { %v10157_v42 = vpop.eup %10156  ;;  %10162 = vrcp.f32 %v2918_v39  ;;  %v2737_v43 = vadd.f32 %v2736_v24, %v2735_v49  ;;  %v2757_v20 = vrot.slane %v2756_v19, 4  ;;  %v2749_v4 = vsel %vm14764_vm1, %v12244_v13, 0.0 }
 0x36e   : > { %v2940_v22 = vmul.f32 %v10157_v42, %v12173_v45  ;;  %3275 = vperm.xlu0 %9856, %v2952_v34   ;;  %vm2883_vm9 = vcmp.gt.f32.partialorder %v2713_v58, 0.0  ;;  %v2727_v8 = vadd.f32 %v2726_v59, %v2725_v61  ;;  %v12250_v41 = vpop.eup %10158  ;;  %v2748_v15 = vadd.f32 %v2747_v23, %v2746_v9  ;;  %v10598_v23 = vld [vmem:[%s11453_s19 + $0x98] sm:$0xff] }
 0x36f   : > { %v2738_v0 = vrot.slane %v2737_v43, 2  ;;  %v2758_v3 = vadd.f32 %v2757_v20, %v2756_v19  ;;  %v2750_v30 = vrot.slane %v2749_v4, 4  ;;  %v2946_v49 = vmul.f32 %v10147_v53, %v12093_v37  ;;  %v10597_v53 = vld [vmem:[%s11453_s19 + $0x88] sm:$0xff] }
 0x370   : > { %3245 = vperm.xlu1 %9857, %v2940_v22   ;;  %10164 = vrcp.f32 %v2911_v18  ;;  %v2914_v24 = vsel %vm2882_vm12, %v2706_v16, 1.0  ;;  %vm2885_vm14 = vcmp.gt.f32.partialorder %v2727_v8, 0.0  ;;  %v10161_v45 = vpop.eup %10160  ;;  %v2944_v55 = vmul.f32 %v10155_v11, %v12116_v36 }
 0x371   : > { %v2915_v35 = vsel %vm2883_vm9, %v2713_v58, 1.0  ;;  %v2917_v34 = vsel %vm2885_vm14, %v2727_v8, 1.0  ;;  %v2739_v61 = vadd.f32 %v2738_v0, %v2737_v43  ;;  %v2759_v9 = vrot.slane %v2758_v3, 2  ;;  %v10599_v0 = vld [vmem:[%s11453_s19 + $0x90] sm:$0xff] }
 0x372   : > { %3290 = vperm.xlu0 %9856, %v2958_v44   ;;  %10166 = vrcp.f32 %v2917_v34  ;;  %v2751_v19 = vadd.f32 %v2750_v30, %v2749_v4  ;;  %v12257_v39 = vmul.f32 %v10596_v57, %v12050_v29  ;;  %vm2888_vm5 = vcmp.gt.f32.partialorder %v2748_v15, 0.0 }
 0x373   : > { %10168 = vrcp.f32 %v2914_v24  ;;  %v2740_v37 = vrot.slane %v2739_v61, 1  ;;  %v12261_v16 = vmul.f32 %v10597_v53, %v12045_v47  ;;  %v2760_v36 = vadd.f32 %v2759_v9, %v2758_v3 }
 0x374   : > { %3260 = vperm.xlu1 %9857, %v2946_v49   ;;  %10170 = vrcp.f32 %v2915_v35  ;;  %v2752_v18 = vrot.slane %v2751_v19, 2  ;;  %v2763_v11 = vsel %vm14764_vm1, %v12257_v39, 0.0  ;;  %v12269_v42 = vmul.f32 %v10598_v23, %v12095_v40 }
 0x375   : > { %v2741_v58 = vadd.f32 %v2740_v37, %v2739_v61  ;;  %v2764_v59 = vrot.slane %v2763_v11, 4  ;;  %v2770_v29 = vsel %vm14764_vm1, %v12261_v16, 0.0  ;;  %v2920_v43 = vsel %vm2888_vm5, %v2748_v15, 1.0 }
 0x376   : > { %v2761_v47 = vrot.slane %v2760_v36, 1  ;;  %v2753_v20 = vadd.f32 %v2752_v18, %v2751_v19  ;;  %v2771_v4 = vrot.slane %v2770_v29, 4  ;;  %v2784_v8 = vsel %vm14764_vm1, %v12269_v42, 0.0 }
 0x377   : > { %v10163_v22 = vpop.eup %10162  ;;  %vm2887_vm12 = vcmp.gt.f32.partialorder %v2741_v58, 0.0  ;;  %v2765_v44 = vadd.f32 %v2764_v59, %v2763_v11  ;;  %v12275_v3 = vmul.f32 %v10599_v0, %v12110_v28  ;;  %v2785_v34 = vrot.slane %v2784_v8, 4 }
 0x378   : > { %3255 = vperm.xlu1 %9857, %v2944_v55   ;;  %v2962_v30 = vmul.f32 %v10163_v22, %v12198_v6  ;;  %v2919_v49 = vsel %vm2887_vm12, %v2741_v58, 1.0  ;;  %v2762_v40 = vadd.f32 %v2761_v47, %v2760_v36  ;;  %v2754_v24 = vrot.slane %v2753_v20, 1  ;;  %v10600_v22 = vld [vmem:[%s11453_s19 + $0xa8] sm:$0xff] }
 0x379   : > { %10172 = vrcp.f32 %v2919_v49  ;;  %v2766_v15 = vrot.slane %v2765_v44, 2  ;;  %v2772_v35 = vadd.f32 %v2771_v4, %v2770_v29  ;;  %v2950_v9 = vmul.f32 %v10161_v45, %v12135_v51 }
 0x37a   : > { %v10165_v61 = vpop.eup %10164  ;;  %3300 = vperm.xlu0 %9856, %v2962_v30   ;;  %vm2890_vm5 = vcmp.gt.f32.partialorder %v2762_v40, 0.0  ;;  %v2755_v19 = vadd.f32 %v2754_v24, %v2753_v20  ;;  %v2777_v28 = vsel %vm14764_vm1, %v12275_v3, 0.0  ;;  %10174 = vrcp.f32 %v2920_v43 }
 0x37b   : > { %v2922_v55 = vsel %vm2890_vm5, %v2762_v40, 1.0  ;;  %v2767_v57 = vadd.f32 %v2766_v15, %v2765_v44  ;;  %v2773_v6 = vrot.slane %v2772_v35, 2  ;;  %v2786_v53 = vadd.f32 %v2785_v34, %v2784_v8 }
 0x37c   : > { %v10167_v37 = vpop.eup %10166  ;;  %3270 = vperm.xlu1 %9857, %v2950_v9   ;;  %10176 = vrcp.f32 %v2922_v55  ;;  %vm2889_vm9 = vcmp.gt.f32.partialorder %v2755_v19, 0.0  ;;  %v2778_v36 = vrot.slane %v2777_v28, 4  ;;  %v2948_v29 = vmul.f32 %v10165_v61, %v12152_v48 }
 0x37d   : > { %v10169_v18 = vpop.eup %10168  ;;  %v2960_v51 = vmul.f32 %v10167_v37, %v12210_v32  ;;  %v2921_v45 = vsel %vm2889_vm9, %v2755_v19, 1.0  ;;  %v2768_v11 = vrot.slane %v2767_v57, 1  ;;  %v2774_v58 = vadd.f32 %v2773_v6, %v2772_v35 }
 0x37e   : > { %v10171_v59 = vpop.eup %10170  ;;  %10178 = vrcp.f32 %v2921_v45  ;;  %v2787_v23 = vrot.slane %v2786_v53, 2  ;;  %v2779_v43 = vadd.f32 %v2778_v36, %v2777_v28  ;;  %v12286_v47 = vmul.f32 1.442695, %v2554_v26 }
 0x37f   : > { %3295 = vperm.xlu0 %9856, %v2960_v51   ;;  %v2769_v20 = vadd.f32 %v2768_v11, %v2767_v57  ;;  %v2775_v4 = vrot.slane %v2774_v58, 1  ;;  %v12290_v32 = vmul.f32 %v10600_v22, %v12112_v21  ;;  %v2553_v44 = vsub.f32 %v12104_v1, %v12226_v5  ;;  %v10601_v5 = vld [vmem:[%s11453_s19 + $0xa0] sm:$0xff] }
 0x380   : > { %3265 = vperm.xlu1 %9857, %v2948_v29   ;;  %v2954_v48 = vmul.f32 %v10169_v18, %v12183_v12  ;;  %v2788_v8 = vadd.f32 %v2787_v23, %v2786_v53  ;;  %v2780_v0 = vrot.slane %v2779_v43, 2  ;;  %v12299_v26 = vmul.f32 %v12175_v63, %v11909_v33  ;;  %v10602_v23 = vld [vmem:[%s11453_s19 + $0xd8] sm:$0xff] }
 0x381   : > { %vm2891_vm14 = vcmp.gt.f32.partialorder %v2769_v20, 0.0  ;;  %v2776_v52 = vadd.f32 %v2775_v4, %v2774_v58  ;;  %v2798_v60 = vsel %vm14764_vm1, %v12290_v32, 0.0  ;;  %v12305_v24 = vmul.f32 %v10601_v5, %v12128_v10 }
 0x382   : > { %v2923_v21 = vsel %vm2891_vm14, %v2769_v20, 1.0  ;;  %v2789_v30 = vrot.slane %v2788_v8, 1  ;;  %v2781_v49 = vadd.f32 %v2780_v0, %v2779_v43  ;;  %v2799_v40 = vrot.slane %v2798_v60, 4  ;;  %v10603_v20 = vld [vmem:[%s11453_s19 + $0xb0] sm:$0xff] }
 0x383   : > { %v10173_v1 = vpop.eup %10172  ;;  %10180 = vrcp.f32 %v2923_v21  ;;  %vm2892_vm12 = vcmp.gt.f32.partialorder %v2776_v52, 0.0  ;;  %v2819_v12 = vsel %vm14764_vm1, %v12299_v26, 0.0  ;;  %v2791_v28 = vsel %vm14764_vm1, %v12305_v24, 0.0 }
 0x384   : > { %3280 = vperm.xlu1 %9857, %v2954_v48   ;;  %v2964_v15 = vmul.f32 %v10173_v1, %v12230_v56  ;;  %v2924_v35 = vsel %vm2892_vm12, %v2776_v52, 1.0  ;;  %v2790_v63 = vadd.f32 %v2789_v30, %v2788_v8  ;;  %v2782_v34 = vrot.slane %v2781_v49, 1  ;;  %v10175_v61 = vpop.eup %10174 }
 0x385   : > { %10182 = vrcp.f32 %v2924_v35  ;;  %v2800_v9 = vadd.f32 %v2799_v40, %v2798_v60  ;;  %v2820_v19 = vrot.slane %v2819_v12, 4  ;;  %v2956_v57 = vmul.f32 %v10171_v59, %v12206_v17  ;;  %v10604_v40 = vld [vmem:[%s11453_s19 + $0xc8] sm:$0xff] }
 0x386   : > { %v10177_v55 = vpop.eup %10176  ;;  %3305 = vperm.xlu0 %9856, %v2964_v15   ;;  %vm2894_vm5 = vcmp.gt.f32.partialorder %v2790_v63, 0.0  ;;  %v2783_v10 = vadd.f32 %v2782_v34, %v2781_v49  ;;  %v2792_v6 = vrot.slane %v2791_v28, 4  ;;  %v2615_v37 = vmul.f32 1.442695, %v2553_v44 }
 0x387   : > { %v2926_v56 = vsel %vm2894_vm5, %v2790_v63, 1.0  ;;  %v2801_v53 = vrot.slane %v2800_v9, 2  ;;  %v2821_v36 = vadd.f32 %v2820_v19, %v2819_v12  ;;  %v2966_v51 = vmul.f32 %v10175_v61, %v12216_v38 }
 0x388   : > { %v10179_v18 = vpop.eup %10178  ;;  %3285 = vperm.xlu1 %9857, %v2956_v57   ;;  %10184 = vrcp.f32 %v2926_v56  ;;  %vm2893_vm9 = vcmp.gt.f32.partialorder %v2783_v10, 0.0  ;;  %v2793_v45 = vadd.f32 %v2792_v6, %v2791_v28  ;;  %v12315_v43 = vmul.f32 %v10602_v23, %v12188_v46  ;;  %v10606_v23 = vld [vmem:[%s11453_s19 + $0xd0] sm:$0xff] }
 0x389   : > { %v2968_v11 = vmul.f32 %v10179_v18, %v12244_v13  ;;  %v2925_v17 = vsel %vm2893_vm9, %v2783_v10, 1.0  ;;  %v2802_v58 = vadd.f32 %v2801_v53, %v2800_v9  ;;  %v2822_v59 = vrot.slane %v2821_v36, 2 }
 0x38a   : > { %10186 = vrcp.f32 %v2925_v17  ;;  %v2794_v29 = vrot.slane %v2793_v45, 2  ;;  %v12319_v4 = vmul.f32 %v10603_v20, %v12154_v54  ;;  %v2970_v38 = vmul.f32 %v10177_v55, %v12237_v7 }
 0x38b   : > { %10188 = vpow2.f32 %v2615_v37  ;;  %3315 = vperm.xlu0 %9856, %v2968_v11   ;;  %v2803_v22 = vrot.slane %v2802_v58, 1  ;;  %v2823_v13 = vadd.f32 %v2822_v59, %v2821_v36  ;;  %v2840_v48 = vsel %vm14764_vm1, %v12315_v43, 0.0 }
 0x38c   : > { %3310 = vperm.xlu1 %9857, %v2966_v51   ;;  %v2795_v44 = vadd.f32 %v2794_v29, %v2793_v45  ;;  %v2805_v46 = vsel %vm14764_vm1, %v12319_v4, 0.0  ;;  %v12328_v8 = vmul.f32 %v12194_v62, %v11968_v2  ;;  %v2841_v7 = vrot.slane %v2840_v48, 4 }
 0x38d   : > { %v10181_v54 = vpop.eup %10180  ;;  %v2804_v0 = vadd.f32 %v2803_v22, %v2802_v58  ;;  %v2824_v52 = vrot.slane %v2823_v13, 1  ;;  %v2806_v60 = vrot.slane %v2805_v46, 4  ;;  %v12335_v1 = vmul.f32 %v10604_v40, %v12170_v27  ;;  %v10605_v58 = vld [vmem:[%s11453_s19 + $0xe0] sm:$0xff] }
 0x38e   : > { %v2972_v21 = vmul.f32 %v10181_v54, %v12257_v39  ;;  %v2796_v30 = vrot.slane %v2795_v44, 1  ;;  %v2854_v49 = vsel %vm14764_vm1, %v12328_v8, 0.0  ;;  %v2842_v62 = vadd.f32 %v2841_v7, %v2840_v48 }
 0x38f   : > { %v10183_v12 = vpop.eup %10182  ;;  %vm2896_vm14 = vcmp.gt.f32.partialorder %v2804_v0, 0.0  ;;  %v2825_v5 = vadd.f32 %v2824_v52, %v2823_v13  ;;  %v2807_v15 = vadd.f32 %v2806_v60, %v2805_v46  ;;  %v2855_v61 = vrot.slane %v2854_v49, 4 }
 0x390   : > { %3320 = vperm.xlu1 %9857, %v2970_v38   ;;  %v2974_v35 = vmul.f32 %v10183_v12, %v12261_v16  ;;  %v2928_v63 = vsel %vm2896_vm14, %v2804_v0, 1.0  ;;  %v2797_v34 = vadd.f32 %v2796_v30, %v2795_v44  ;;  %v2843_v39 = vrot.slane %v2842_v62, 2 }
 0x391   : > { %10190 = vrcp.f32 %v2928_v63  ;;  %vm2899_vm12 = vcmp.gt.f32.partialorder %v2825_v5, 0.0  ;;  %v2808_v9 = vrot.slane %v2807_v15, 2  ;;  %v2856_v27 = vadd.f32 %v2855_v61, %v2854_v49  ;;  %v10607_v61 = vld [vmem:[%s11453_s19 + $0xb8] sm:$0xff] }
 0x392   : > { %v10185_v19 = vpop.eup %10184  ;;  %3330 = vperm.xlu0 %9856, %v2974_v35   ;;  %v2931_v28 = vsel %vm2899_vm12, %v2825_v5, 1.0  ;;  %vm2895_vm5 = vcmp.gt.f32.partialorder %v2797_v34, 0.0  ;;  %v2826_v55 = vsel %vm14764_vm1, %v12335_v1, 0.0  ;;  %v2844_v10 = vadd.f32 %v2843_v39, %v2842_v62 }
 0x393   : > { %10192 = vrcp.f32 %v2931_v28  ;;  %v2927_v57 = vsel %vm2895_vm5, %v2797_v34, 1.0  ;;  %v2809_v6 = vadd.f32 %v2808_v9, %v2807_v15  ;;  %v2857_v37 = vrot.slane %v2856_v27, 2 }
 0x394   : > { %v10187_v16 = vpop.eup %10186  ;;  %3325 = vperm.xlu1 %9857, %v2972_v21   ;;  %10194 = vrcp.f32 %v2927_v57  ;;  %v2827_v56 = vrot.slane %v2826_v55, 4  ;;  %v2978_v36 = vmul.f32 %v10185_v19, %v12269_v42  ;;  %v2845_v51 = vrot.slane %v2844_v10, 1 }
 0x395   : > { %v10189_v53 = vpop.eup %10188  ;;  %10196 = vpow2.f32 %v12286_v47  ;;  %v2976_v18 = vmul.f32 %v10187_v16, %v12275_v3  ;;  %v2810_v45 = vrot.slane %v2809_v6, 1  ;;  %v2858_v11 = vadd.f32 %v2857_v37, %v2856_v27  ;;  %v10608_v16 = vld [vmem:[%s11453_s19 + $0xf8] sm:$0xff] }
 0x396   : > { %v2828_v17 = vadd.f32 %v2827_v56, %v2826_v55  ;;  %v12345_v59 = vmul.f32 %v10605_v58, %v12250_v41  ;;  %v2846_v29 = vadd.f32 %v2845_v51, %v2844_v10  ;;  %v12349_v20 = vmul.f32 %v10606_v23, %v12192_v50 }
 0x397   : > { %3335 = vperm.xlu0 %9856, %v2976_v18   ;;  %v2811_v47 = vadd.f32 %v2810_v45, %v2809_v6  ;;  %v2859_v38 = vrot.slane %v2858_v11, 1  ;;  %v12356_v41 = vmul.f32 %v10189_v53, %v12054_v31  ;;  %v12364_v39 = vmul.f32 %v10607_v61, %v12130_v25 }
 0x398   : > { %3340 = vperm.xlu1 %9857, %v2978_v36   ;;  %v2829_v42 = vrot.slane %v2828_v17, 2  ;;  %v2847_v3 = vsel %vm14764_vm1, %v12345_v59, 0.0  ;;  %vm2902_vm9 = vcmp.gt.f32.partialorder %v2846_v29, 0.0  ;;  %v2833_v13 = vsel %vm14764_vm1, %v12349_v20, 0.0 }
 0x399   : > { %v2848_v22 = vrot.slane %v2847_v3, 4  ;;  %v2934_v44 = vsel %vm2902_vm9, %v2846_v29, 1.0  ;;  %vm2897_vm14 = vcmp.gt.f32.partialorder %v2811_v47, 0.0  ;;  %v2860_v48 = vadd.f32 %v2859_v38, %v2858_v11 }
 0x39a   : > { %v2830_v50 = vadd.f32 %v2829_v42, %v2828_v17  ;;  %10198 = vrcp.f32 %v2934_v44  ;;  %v2929_v54 = vsel %vm2897_vm14, %v2811_v47, 1.0  ;;  %v2834_v52 = vrot.slane %v2833_v13, 4 }
 0x39b   : > { %v10191_v46 = vpop.eup %10190  ;;  %v2849_v0 = vadd.f32 %v2848_v22, %v2847_v3  ;;  %10200 = vrcp.f32 %v2929_v54  ;;  %vm2904_vm12 = vcmp.gt.f32.partialorder %v2860_v48, 0.0  ;;  %v2861_v12 = vsel %vm14764_vm1, %v12356_v41, 0.0 }
 0x39c   : > { %v2982_v7 = vmul.f32 %v10191_v46, %v12290_v32  ;;  %v2831_v60 = vrot.slane %v2830_v50, 1  ;;  %v2936_v30 = vsel %vm2904_vm12, %v2860_v48, 1.0  ;;  %v2835_v40 = vadd.f32 %v2834_v52, %v2833_v13 }
 0x39d   : > { %v10193_v21 = vpop.eup %10192  ;;  %v2850_v49 = vrot.slane %v2849_v0, 2  ;;  %10202 = vrcp.f32 %v2936_v30  ;;  %v2862_v35 = vrot.slane %v2861_v12, 4  ;;  %vm3910_vm10 = vcmask 1045509  }
 0x39e   : > { %v10195_v5 = vpop.eup %10194  ;;  %3350 = vperm.xlu0 %9856, %v2982_v7   ;;  %v2988_v62 = vmul.f32 %v10193_v21, %v12299_v26  ;;  %v2832_v15 = vadd.f32 %v2831_v60, %v2830_v50  ;;  %v2836_v34 = vrot.slane %v2835_v40, 2  ;;  %v2812_v26 = vsel %vm14764_vm1, %v12364_v39, 0.0 }
 0x39f   : > { %v10197_v63 = vpop.eup %10196  ;;  %v2851_v32 = vadd.f32 %v2850_v49, %v2849_v0  ;;  %v2980_v9 = vmul.f32 %v10195_v5, %v12305_v24  ;;  %v2863_v19 = vadd.f32 %v2862_v35, %v2861_v12  ;;  %v2813_v10 = vrot.slane %v2812_v26, 4  ;;  %v3852_v12 = vld [vmem:[%s14672_s6 + $0x8] sm:$0xff] }
 0x3a0   : > { %3365 = vperm.xlu1 %9857, %v2988_v62   ;;  %vm2900_vm5 = vcmp.gt.f32.partialorder %v2832_v15, 0.0  ;;  %v2837_v55 = vadd.f32 %v2836_v34, %v2835_v40  ;;  %v12370_v6 = vmul.f32 %v10608_v16, %v10197_v63  ;;  %v3854_v34 = vld [vmem:[%s14672_s6 + $0x48] sm:$0xff]  ;;  %vm3912_vm0 = vcmask 1046534  }
 0x3a1   : > { %v2932_v28 = vsel %vm2900_vm5, %v2832_v15, 1.0  ;;  %v2852_v27 = vrot.slane %v2851_v32, 1  ;;  %v2864_v57 = vrot.slane %v2863_v19, 2  ;;  %v2814_v53 = vadd.f32 %v2813_v10, %v2812_v26  ;;  %v3855_v15 = vld [vmem:[%s14672_s6 + $0x80] sm:$0xff]  ;;  %v12413_v26 = vpop.permute.xlu1 %3015 }
 0x3a2   : > { %3345 = vperm.xlu0 %9856, %v2980_v9   ;;  %10204 = vrcp.f32 %v2932_v28  ;;  %v2838_v37 = vrot.slane %v2837_v55, 1  ;;  %v2868_v24 = vsel %vm14764_vm1, %v12370_v6, 0.0  ;;  %v3858_v28 = vld [vmem:[%s14672_s6 + $0xc8] sm:$0xff] }
 0x3a3   : > { %v2853_v25 = vadd.f32 %v2852_v27, %v2851_v32  ;;  %v2865_v56 = vadd.f32 %v2864_v57, %v2863_v19  ;;  %v2869_v51 = vrot.slane %v2868_v24, 4  ;;  %v2815_v29 = vrot.slane %v2814_v53, 2  ;;  %v3857_v19 = vld [vmem:[%s14672_s6 + $0xc0] sm:$0xff] }
 0x3a4   : > { %v10199_v36 = vpop.eup %10198  ;;  %v2839_v18 = vadd.f32 %v2838_v37, %v2837_v55  ;;  %v9873_v27 = vpack.i.bf16 %v3858_v28, %v3857_v19  ;;  %v3090_v57 = vadd.f32 %v11849_v14, %v12413_v26  ;;  %v14894_v14 = vld [vmem:[#allocation55_spill] sm:$0xff] }
 0x3a5   : > { %vm2903_vm9 = vcmp.gt.f32.partialorder %v2853_v25, 0.0  ;;  %v10201_v45 = vpop.eup %10200  ;;  %v2994_v11 = vmul.f32 %v10199_v36, %v12315_v43  ;;  %v2866_v58 = vrot.slane %v2865_v56, 1  ;;  %v2870_v47 = vadd.f32 %v2869_v51, %v2868_v24  ;;  %v14892_v24 = vld [vmem:[#allocation45_spill] sm:$0xff] }
 0x3a6   : > { %v2935_v17 = vsel %vm2903_vm9, %v2853_v25, 1.0  ;;  %v2984_v23 = vmul.f32 %v10201_v45, %v12319_v4  ;;  %vm2901_vm14 = vcmp.gt.f32.partialorder %v2839_v18, 0.0  ;;  %v2816_v22 = vadd.f32 %v2815_v29, %v2814_v53 }
 0x3a7   : > { %10206 = vrcp.f32 %v2935_v17  ;;  %v10203_v38 = vpop.eup %10202  ;;  %3380 = vperm.xlu1 %9857, %v2994_v11   ;;  %v2933_v42 = vsel %vm2901_vm14, %v2839_v18, 1.0  ;;  %v2867_v3 = vadd.f32 %v2866_v58, %v2865_v56  ;;  %v2871_v44 = vrot.slane %v2870_v47, 2  ;;  %v14893_v11 = vld [vmem:[#allocation47_spill] sm:$0xff] }
 0x3a8   : > { %3355 = vperm.xlu0 %9856, %v2984_v23   ;;  %v2998_v13 = vmul.f32 %v10203_v38, %v12328_v8  ;;  %10208 = vrcp.f32 %v2933_v42  ;;  %v2817_v43 = vrot.slane %v2816_v22, 1  ;;  %v3085_v36 = vadd.f32 %v14892_v24, %v12413_v26  ;;  %v14896_v42 = vld [vmem:[#allocation50_spill] sm:$0xff] }
 0x3a9   : > { %vm2905_vm12 = vcmp.gt.f32.partialorder %v2867_v3, 0.0  ;;  %v2872_v50 = vadd.f32 %v2871_v44, %v2870_v47  ;;  %v3100_v17 = vadd.f32 %v14893_v11, %v12413_v26  ;;  %v3130_v58 = vadd.f32 %v14894_v14, %v12413_v26  ;;  %v14895_v47 = vld [vmem:[#allocation49_spill] sm:$0xff] }
 0x3aa   : > { %v2937_v48 = vsel %vm2905_vm12, %v2867_v3, 1.0  ;;  %v2818_v4 = vadd.f32 %v2817_v43, %v2816_v22  ;;  %v3095_v38 = vadd.f32 %v14895_v47, %v12413_v26  ;;  %v3110_v3 = vadd.f32 %v14896_v42, %v12413_v26  ;;  %v14897_v43 = vld [vmem:[#allocation51_spill] sm:$0xff] }
 0x3ab   : > { %3390 = vperm.xlu1 %9857, %v2998_v13   ;;  %10210 = vrcp.f32 %v2937_v48  ;;  %v2873_v0 = vrot.slane %v2872_v50, 1  ;;  %v12433_v48 = vadd.f32 %v14897_v43, %v12413_v26  ;;  %vm3902_vm14 = vcmask 1041409  }
 0x3ac   : > { %v10205_v46 = vpop.eup %10204  ;;  %vm2898_vm5 = vcmp.gt.f32.partialorder %v2818_v4, 0.0 }
 0x3ad   : > { %v2990_v54 = vmul.f32 %v10205_v46, %v12335_v1  ;;  %v2930_v52 = vsel %vm2898_vm5, %v2818_v4, 1.0  ;;  %v2874_v7 = vadd.f32 %v2873_v0, %v2872_v50  ;;  %v3851_v1 = vld [vmem:[%s14672_s6] sm:$0xff] }
 0x3ae   : > { %10212 = vrcp.f32 %v2930_v52  ;;  %v14898_v50 = vld [vmem:[#allocation52_spill] sm:$0xff] }
 0x3af   : > { %3370 = vperm.xlu0 %9856, %v2990_v54   ;;  %vm2906_vm9 = vcmp.gt.f32.partialorder %v2874_v7, 0.0  ;;  %v12437_v46 = vadd.f32 %v14898_v50, %v12413_v26  ;;  %v14899_v0 = vld [vmem:[#allocation56_spill] sm:$0xff] }
 0x3b0   : > { %v2938_v21 = vsel %vm2906_vm9, %v2874_v7, 1.0  ;;  %v12442_v52 = vadd.f32 %v14899_v0, %v12413_v26 }
 0x3b1   : > { %v10207_v60 = vpop.eup %10206  ;;  %10214 = vrcp.f32 %v2938_v21 }
 0x3b2   : > { %v2996_v8 = vmul.f32 %v10207_v60, %v12345_v59  ;;  %v10209_v30 = vpop.eup %10208  ;;  %v9858_v59 = vpack.i.bf16 %v3852_v12, %v3851_v1 }
 0x3b3   : > { %v2992_v49 = vmul.f32 %v10209_v30, %v12349_v20  ;;  %v3856_v20 = vld [vmem:[%s14672_s6 + $0x88] sm:$0xff]  ;;  %v14900_v30 = vld [vmem:[#allocation32_spill] sm:$0xff] }
 0x3b4   : > { %3385 = vperm.xlu1 %9857, %v2996_v8   ;;  %v9868_v32 = vpack.i.bf16 %v3856_v20, %v3855_v15  ;;  %v9883_v55 = vpack.i.bf16 %v3858_v28, %v3856_v20 }
 0x3b5   : > { %v10211_v40 = vpop.eup %10210  ;;  %3375 = vperm.xlu0 %9856, %v2992_v49   ;;  %v3140_v49 = vadd.f32 %v14900_v30, %v12413_v26 }
 0x3b6   : > { %v3000_v5 = vmul.f32 %v10211_v40, %v12356_v41  ;;  %v3853_v41 = vld [vmem:[%s14672_s6 + $0x40] sm:$0xff]  ;;  %v14901_v40 = vld [vmem:[#allocation58_spill] sm:$0xff] }
 0x3b7   : > { %v9863_v9 = vpack.i.bf16 %v3854_v34, %v3853_v41  ;;  %v12448_v1 = vadd.f32 %v14901_v40, %v12413_v26  ;;  %v14904_v41 = vld [vmem:[#allocation60_spill] sm:$0xff] }
 0x3b8   : > { %3395 = vperm.xlu1 %9857, %v3000_v5   ;;  %v10213_v62 = vpop.eup %10212 }
 0x3b9   : > { %v2986_v35 = vmul.f32 %v10213_v62, %v12364_v39  ;;  %v9878_v39 = vpack.i.bf16 %v3854_v34, %v3852_v12  ;;  %v12461_v34 = vadd.f32 %v14904_v41, %v12413_v26 }
 0x3bb   : > { %v10215_v63 = vpop.eup %10214  ;;  %3360 = vperm.xlu0 %9856, %v2986_v35  }
 0x3bc   : > { %9859 = vrot.lane.b32.xlu1 %v9858_v59, %s10732_s17  ;;  %v3002_v61 = vmul.f32 %v10215_v63, %v12370_v6  ;;  %v14891_v6 = vld [vmem:[#allocation53_spill] sm:$0xff]  ;;  %v14902_v59 = vld [vmem:[#allocation59_spill] sm:$0xff]  ;;  %v14903_v63 = vld [vmem:[#allocation16_spill] sm:$0xff] }
 0x3bd   : > { %v3115_v25 = vadd.f32 %v14891_v6, %v12413_v26  ;;  %v12453_v62 = vadd.f32 %v14902_v59, %v12413_v26  ;;  %v14907_v6 = vld [vmem:[#allocation13_spill] sm:$0xff]  ;;  %v14911_v59 = vld [vmem:[#allocation64_spill] sm:$0xff] }
 0x3bf   : > { %3400 = vperm.xlu0 %9856, %v3002_v61  }
 0x3c0   : > { %9869 = vrot.lane.b32.xlu1 %v9868_v32, %s10732_s17  ;;  %v12457_v32 = vadd.f32 %v14903_v63, %v12413_v26 }
 0x3c3   : > { %9864 = vrot.lane.b32.xlu0 %v9863_v9, %s10732_s17 }
 0x3c4   : > { %9879 = vrot.lane.b32.xlu1 %v9878_v39, %s14766_s23  ;;  %v14905_v39 = vld [vmem:[#allocation61_spill] sm:$0xff] }
 0x3c5   : > { %v12466_v19 = vadd.f32 %v14905_v39, %v12413_v26 }
 0x3c7   : > { %9874 = vrot.lane.b32.xlu0 %v9873_v27, %s10732_s17 }
 0x3cb   : > { %9884 = vrot.lane.b32.xlu0 %v9883_v55, %s14766_s23  ;;  %s10736_s23 = smov 95  }
 0x3e9   : > { %v3251_v10 = vpop.permute.xlu0 %3250 }
 0x3ea   : > { %v3404_v16 = vmul.f32 %v3251_v10, %v3090_v57  ;;  %v14906_v10 = vld [vmem:[#allocation39_spill] sm:$0xff] }
 0x3ec   : > { %v3442_v37 = vsel %vm1202_vm7, %v3404_v16, 0.0  ;;  %v12472_v16 = vadd.f32 %v14906_v10, %v12413_v26  ;;  %v14914_v10 = vld [vmem:[#allocation67_spill] sm:$0xff] }
 0x3ed   : > { %v3443_v56 = vrot.slane %v3442_v37, 4  ;;  %v3276_v53 = vpop.permute.xlu0 %3275 }
 0x3ee   : > { %v3409_v18 = vmul.f32 %v3276_v53, %v3115_v25  ;;  %v12476_v25 = vadd.f32 %v14907_v6, %v12413_v26  ;;  %v14908_v53 = vld [vmem:[#allocation27_spill] sm:$0xff]  ;;  %v12514_v6 = vadd.f32 %v14914_v10, %v12413_v26 }
 0x3ef   : > { %v3444_v51 = vadd.f32 %v3443_v56, %v3442_v37  ;;  %v3246_v45 = vpop.permute.xlu1 %3245  ;;  %v12480_v24 = vadd.f32 %v14908_v53, %v12413_v26 }
 0x3f0   : > { %v3403_v29 = vmul.f32 %v3246_v45, %v3085_v36  ;;  %v3477_v23 = vsel %vm1202_vm7, %v3409_v18, 0.0 }
 0x3f1   : > { %v3445_v22 = vrot.slane %v3444_v51, 2  ;;  %v3478_v13 = vrot.slane %v3477_v23, 4  ;;  %v3291_v44 = vpop.permute.xlu0 %3290 }
 0x3f2   : > { %v3435_v4 = vsel %vm1202_vm7, %v3403_v29, 0.0  ;;  %v3412_v54 = vmul.f32 %v3291_v44, %v3130_v58 }
 0x3f3   : > { %v3446_v7 = vadd.f32 %v3445_v22, %v3444_v51  ;;  %v3436_v60 = vrot.slane %v3435_v4, 4  ;;  %v3261_v8 = vpop.permute.xlu1 %3260  ;;  %v3479_v21 = vadd.f32 %v3478_v13, %v3477_v23  ;;  %v14909_v22 = vld [vmem:[#allocation25_spill] sm:$0xff] }
 0x3f4   : > { %v3406_v12 = vmul.f32 %v3261_v8, %v3100_v17  ;;  %v3498_v5 = vsel %vm1202_vm7, %v3412_v54, 0.0  ;;  %v12486_v13 = vadd.f32 %v14909_v22, %v12413_v26 }
 0x3f5   : > { %v3447_v15 = vrot.slane %v3446_v7, 1  ;;  %v3437_v20 = vadd.f32 %v3436_v60, %v3435_v4  ;;  %v3499_v35 = vrot.slane %v3498_v5, 4  ;;  %v3480_v9 = vrot.slane %v3479_v21, 2 }
 0x3f6   : > { %v3456_v61 = vsel %vm1202_vm7, %v3406_v12, 0.0 }
 0x3f7   : > { %v12468_v28 = vadd.f32 %v3447_v15, %v3446_v7  ;;  %v3438_v27 = vrot.slane %v3437_v20, 2  ;;  %v3457_v55 = vrot.slane %v3456_v61, 4  ;;  %v3256_v57 = vpop.permute.xlu1 %3255  ;;  %v3500_v56 = vadd.f32 %v3499_v35, %v3498_v5  ;;  %v14910_v7 = vld [vmem:[#allocation63_spill] sm:$0xff] }
 0x3f8   : > { %v3405_v37 = vmul.f32 %v3256_v57, %v3095_v38  ;;  %v3481_v17 = vadd.f32 %v3480_v9, %v3479_v21  ;;  %v12493_v60 = vadd.f32 %v14910_v7, %v12413_v26  ;;  %v12499_v15 = vadd.f32 %v14911_v59, %v12413_v26 }
 0x3f9   : > { %v3692_v36 = vmin.f32 %v12468_v28, 0.0  ;;  %v3439_v18 = vadd.f32 %v3438_v27, %v3437_v20  ;;  %v3458_v51 = vadd.f32 %v3457_v55, %v3456_v61  ;;  %v3301_v45 = vpop.permute.xlu0 %3300  ;;  %v3501_v14 = vrot.slane %v3500_v56, 2  ;;  %v14912_v20 = vld [vmem:[#allocation65_spill] sm:$0xff]  ;;  %v14913_v55 = vld [vmem:[#allocation66_spill] sm:$0xff] }
 0x3fa   : > { %v3449_v11 = vsel %vm1202_vm7, %v3405_v37, 0.0  ;;  %v3414_v58 = vmul.f32 %v3301_v45, %v3140_v49  ;;  %v3482_v21 = vrot.slane %v3481_v17, 1  ;;  %v12503_v35 = vadd.f32 %v14912_v20, %v12413_v26 }
 0x3fb   : > { %v3725_v29 = vmul.f32 1.442695, %v3692_v36  ;;  %v3440_v23 = vrot.slane %v3439_v18, 1  ;;  %v3459_v47 = vrot.slane %v3458_v51, 2  ;;  %v3450_v42 = vrot.slane %v3449_v11, 4  ;;  %v3271_v38 = vpop.permute.xlu1 %3270 }
 0x3fc   : > { %v3408_v44 = vmul.f32 %v3271_v38, %v3110_v3  ;;  %v3502_v43 = vadd.f32 %v3501_v14, %v3500_v56  ;;  %v3512_v50 = vsel %vm1202_vm7, %v3414_v58, 0.0  ;;  %v12510_v57 = vadd.f32 %v14913_v55, %v12413_v26 }
 0x3fd   : > { %10216 = vpow2.f32 %v3725_v29  ;;  %v12489_v4 = vadd.f32 %v3440_v23, %v3439_v18  ;;  %v3460_v54 = vadd.f32 %v3459_v47, %v3458_v51  ;;  %v3451_v0 = vadd.f32 %v3450_v42, %v3449_v11  ;;  %v14915_v29 = vld [vmem:[#allocation68_spill] sm:$0xff]  ;;  %v14916_v47 = vld [vmem:[#allocation22_spill] sm:$0xff] }
 0x3fe   : > { %v3470_v8 = vsel %vm1202_vm7, %v3408_v44, 0.0  ;;  %v3513_v30 = vrot.slane %v3512_v50, 4  ;;  %v3503_v5 = vrot.slane %v3502_v43, 1  ;;  %v12517_v36 = vadd.f32 %v3482_v21, %v3481_v17  ;;  %v3296_v51 = vpop.permute.xlu0 %3295  ;;  %v14917_v17 = vld [vmem:[#allocation40_spill] sm:$0xff] }
 0x3ff   : > { %v3691_v49 = vmin.f32 %v12489_v4, 0.0  ;;  %v3461_v40 = vrot.slane %v3460_v54, 1  ;;  %v3452_v3 = vrot.slane %v3451_v0, 2  ;;  %v3266_v12 = vpop.permute.xlu1 %3265  ;;  %v3471_v63 = vrot.slane %v3470_v8, 4 }
 0x400   : > { %v3407_v41 = vmul.f32 %v3266_v12, %v12433_v48  ;;  %v3514_v27 = vadd.f32 %v3513_v30, %v3512_v50  ;;  %v12519_v48 = vadd.f32 %v3503_v5, %v3502_v43  ;;  %v12525_v23 = vadd.f32 %v14915_v29, %v12413_v26 }
 0x401   : > { %v3723_v61 = vmul.f32 1.442695, %v3691_v49  ;;  %v12506_v9 = vadd.f32 %v3461_v40, %v3460_v54  ;;  %v3453_v39 = vadd.f32 %v3452_v3, %v3451_v0  ;;  %v3472_v37 = vadd.f32 %v3471_v63, %v3470_v8  ;;  %v14918_v0 = vld [vmem:[#allocation28_spill] sm:$0xff] }
 0x402   : > { %v3463_v56 = vsel %vm1202_vm7, %v3407_v41, 0.0  ;;  %v12529_v42 = vadd.f32 %v14916_v47, %v12413_v26  ;;  %v12533_v38 = vadd.f32 %v14917_v17, %v12413_v26  ;;  %v3515_v22 = vrot.slane %v3514_v27, 2 }
 0x403   : > { %10218 = vpow2.f32 %v3723_v61  ;;  %v3454_v53 = vrot.slane %v3453_v39, 1  ;;  %v3281_v18 = vpop.permute.xlu1 %3280  ;;  %v3694_v45 = vmin.f32 %v12506_v9, 0.0  ;;  %v3473_v11 = vrot.slane %v3472_v37, 2 }
 0x404   : > { %v3464_v14 = vrot.slane %v3463_v56, 4  ;;  %v3410_v58 = vmul.f32 %v3281_v18, %v12437_v46  ;;  %v3413_v54 = vmul.f32 %v3296_v51, %v12448_v1  ;;  %v12539_v7 = vadd.f32 %v14918_v0, %v12413_v26 }
 0x405   : > { %v3474_v44 = vadd.f32 %v3473_v11, %v3472_v37  ;;  %v12541_v8 = vadd.f32 %v3454_v53, %v3453_v39  ;;  %v3697_v21 = vmin.f32 %v12517_v36, 0.0  ;;  %v3729_v40 = vmul.f32 1.442695, %v3694_v45  ;;  %v3306_v45 = vpop.permute.xlu0 %3305 }
 0x406   : > { %v3465_v43 = vadd.f32 %v3464_v14, %v3463_v56  ;;  %v3484_v50 = vsel %vm1202_vm7, %v3410_v58, 0.0  ;;  %v3700_v5 = vmin.f32 %v12519_v48, 0.0  ;;  %v3516_v63 = vadd.f32 %v3515_v22, %v3514_v27 }
 0x407   : > { %v10217_v46 = vpop.eup %10216  ;;  %v3485_v30 = vrot.slane %v3484_v50, 4  ;;  %v3286_v49 = vpop.permute.xlu1 %3285  ;;  %v3475_v3 = vrot.slane %v3474_v44, 1  ;;  %v3505_v39 = vsel %vm1202_vm7, %v3413_v54, 0.0  ;;  %vm3660_vm12 = vcmp.gt.f32.partialorder %v12468_v28, 0.0 }
 0x408   : > { %v3466_v12 = vrot.slane %v3465_v43, 2  ;;  %v8849_v59 = vadd.f32 -1.0, %v10217_v46  ;;  %v3411_v1 = vmul.f32 %v3286_v49, %v12442_v52  ;;  %v3693_v55 = vmin.f32 %v12541_v8, 0.0 }
 0x409   : > { %v3486_v20 = vadd.f32 %v3485_v30, %v3484_v50  ;;  %v12546_v41 = vadd.f32 %v3475_v3, %v3474_v44  ;;  %v3735_v10 = vmul.f32 1.442695, %v3697_v21  ;;  %v3517_v18 = vrot.slane %v3516_v63, 1  ;;  %v14919_v44 = vld [vmem:[#allocation69_spill] sm:$0xff] }
 0x40a   : > { %v3467_v61 = vadd.f32 %v3466_v12, %v3465_v43  ;;  %v3491_v37 = vsel %vm1202_vm7, %v3411_v1, 0.0  ;;  %v3506_v27 = vrot.slane %v3505_v39, 4  ;;  %v3820_v11 = vsel %vm3660_vm12, %v12468_v28, %v8849_v59  ;;  %v3316_v59 = vpop.permute.xlu0 %3315 }
 0x40b   : > { %v3311_v56 = vpop.permute.xlu1 %3310  ;;  %v3487_v53 = vrot.slane %v3486_v20, 2  ;;  %v3492_v51 = vrot.slane %v3491_v37, 4  ;;  %10220 = vpow2.f32 %v3729_v40  ;;  %v3696_v14 = vmin.f32 %v12546_v41, 0.0 }
 0x40c   : > { %v3741_v58 = vmul.f32 1.442695, %v3700_v5  ;;  %v3468_v47 = vrot.slane %v3467_v61, 1  ;;  %v3416_v22 = vmul.f32 %v3311_v56, %v12453_v62  ;;  %v12557_v43 = vadd.f32 %v14919_v44, %v12413_v26 }
 0x40d   : > { %v10219_v52 = vpop.eup %10218  ;;  %v3493_v17 = vadd.f32 %v3492_v51, %v3491_v37  ;;  %vm3659_vm5 = vcmp.gt.f32.partialorder %v12489_v4, 0.0  ;;  %v3727_v50 = vmul.f32 1.442695, %v3693_v55  ;;  %v3507_v54 = vadd.f32 %v3506_v27, %v3505_v39 }
 0x40e   : > { %v8848_v29 = vadd.f32 -1.0, %v10219_v52  ;;  %10222 = vpow2.f32 %v3735_v10  ;;  %v3488_v0 = vadd.f32 %v3487_v53, %v3486_v20  ;;  %v12561_v21 = vadd.f32 %v3517_v18, %v3516_v63  ;;  %v14921_v20 = vld [vmem:[#allocation71_spill] sm:$0xff] }
 0x40f   : > { %v3321_v46 = vpop.permute.xlu1 %3320  ;;  %v3733_v49 = vmul.f32 1.442695, %v3696_v14  ;;  %v3494_v62 = vrot.slane %v3493_v17, 2  ;;  %v3415_v40 = vmul.f32 %v3306_v45, %v12457_v32  ;;  %v12567_v3 = vadd.f32 %v3468_v47, %v3467_v61 }
 0x410   : > { %v3819_v28 = vsel %vm3659_vm5, %v12489_v4, %v8848_v29  ;;  %10224 = vpow2.f32 %v3741_v58  ;;  %v3508_v12 = vrot.slane %v3507_v54, 2  ;;  %v3526_v5 = vsel %vm1202_vm7, %v3416_v22, 0.0  ;;  %v14920_v4 = vld [vmem:[#allocation70_spill] sm:$0xff] }
 0x411   : > { %v12564_v30 = vsel %vm3902_vm14, %v3820_v11, %v3819_v28  ;;  %v12572_v1 = vadd.f32 %v14920_v4, %v12413_v26  ;;  %v12576_v63 = vadd.f32 %v14921_v20, %v12413_v26  ;;  %10226 = vpow2.f32 %v3727_v50  ;;  %v3331_v44 = vpop.permute.xlu0 %3330 }
 0x412   : > { %v3495_v39 = vadd.f32 %v3494_v62, %v3493_v17  ;;  %v3489_v55 = vrot.slane %v3488_v0, 1  ;;  %v3702_v32 = vmin.f32 %v12561_v21, 0.0  ;;  %v3509_v61 = vadd.f32 %v3508_v12, %v3507_v54 }
 0x413   : > { %v3527_v10 = vrot.slane %v3526_v5, 4  ;;  %v3326_v37 = vpop.permute.xlu1 %3325  ;;  %10228 = vpow2.f32 %v3733_v49  ;;  %v3519_v53 = vsel %vm1202_vm7, %v3415_v40, 0.0  ;;  %v3418_v18 = vmul.f32 %v3321_v46, %v12461_v34 }
 0x414   : > { %v3496_v56 = vrot.slane %v3495_v39, 1  ;;  %v3695_v51 = vmin.f32 %v12567_v3, 0.0  ;;  %v3510_v27 = vrot.slane %v3509_v61, 1  ;;  %v3520_v26 = vrot.slane %v3519_v53, 4 }
 0x415   : > { %v3528_v45 = vadd.f32 %v3527_v10, %v3526_v5  ;;  %v10221_v52 = vpop.eup %10220  ;;  %v3540_v14 = vsel %vm1202_vm7, %v3418_v18, 0.0  ;;  %v3417_v58 = vmul.f32 %v3316_v59, %v12466_v19  ;;  %v3419_v29 = vmul.f32 %v3326_v37, %v12476_v25 }
 0x416   : > { %v12582_v11 = vadd.f32 %v3496_v56, %v3495_v39  ;;  %v12587_v47 = vadd.f32 %v3489_v55, %v3488_v0  ;;  %v12589_v17 = vadd.f32 %v3510_v27, %v3509_v61  ;;  %v3521_v34 = vadd.f32 %v3520_v26, %v3519_v53 }
 0x417   : > { %v3529_v22 = vrot.slane %v3528_v45, 2  ;;  %v3745_v50 = vmul.f32 1.442695, %v3702_v32  ;;  %v3541_v46 = vrot.slane %v3540_v14, 4  ;;  %v3533_v28 = vsel %vm1202_vm7, %v3417_v58, 0.0 }
 0x418   : > { %v3699_v54 = vmin.f32 %v12582_v11, 0.0  ;;  %v12593_v49 = vpop.eup %10222  ;;  %vm3662_vm9 = vcmp.gt.f32.partialorder %v12506_v9, 0.0  ;;  %v8851_v19 = vadd.f32 -1.0, %v10221_v52  ;;  %v3701_v25 = vmin.f32 %v12589_v17, 0.0 }
 0x419   : > { %v3530_v0 = vadd.f32 %v3529_v22, %v3528_v45  ;;  %v3522_v62 = vrot.slane %v3521_v34, 2  ;;  %v3542_v12 = vadd.f32 %v3541_v46, %v3540_v14  ;;  %v3534_v5 = vrot.slane %v3533_v28, 4  ;;  %v3336_v45 = vpop.permute.xlu0 %3335  ;;  %v3341_v22 = vpop.permute.xlu1 %3340 }
 0x41a   : > { %v3739_v40 = vmul.f32 1.442695, %v3699_v54  ;;  %v3547_v59 = vsel %vm1202_vm7, %v3419_v29, 0.0  ;;  %v10225_v4 = vpop.eup %10224  ;;  %v3743_v20 = vmul.f32 1.442695, %v3701_v25  ;;  %vm3668_vm12 = vcmp.gt.f32.partialorder %v12519_v48, 0.0 }
 0x41b   : > { %v3531_v39 = vrot.slane %v3530_v0, 1  ;;  %v3523_v55 = vadd.f32 %v3522_v62, %v3521_v34  ;;  %v3548_v32 = vrot.slane %v3547_v59, 4  ;;  %v10227_v61 = vpop.eup %10226  ;;  %v3543_v10 = vrot.slane %v3542_v12, 2 }
 0x41c   : > { %10230 = vpow2.f32 %v3739_v40  ;;  %v3535_v37 = vadd.f32 %v3534_v5, %v3533_v28  ;;  %v3420_v56 = vmul.f32 %v3331_v44, %v12472_v16  ;;  %v3731_v53 = vmul.f32 1.442695, %v3695_v51 }
 0x41d   : > { %10232 = vpow2.f32 %v3743_v20  ;;  %v12600_v18 = vadd.f32 %v3531_v39, %v3530_v0  ;;  %v3524_v27 = vrot.slane %v3523_v55, 1  ;;  %v12602_v26 = vpop.eup %10228  ;;  %v3544_v52 = vadd.f32 %v3543_v10, %v3542_v12 }
 0x41e   : > { %v3536_v14 = vrot.slane %v3535_v37, 2  ;;  %v3549_v58 = vadd.f32 %v3548_v32, %v3547_v59  ;;  %v3554_v29 = vsel %vm1202_vm7, %v3420_v56, 0.0  ;;  %v8857_v34 = vadd.f32 -1.0, %v10225_v4 }
 0x41f   : > { %10234 = vpow2.f32 %v3745_v50  ;;  %v3704_v54 = vmin.f32 %v12600_v18, 0.0  ;;  %v12606_v46 = vadd.f32 %v3524_v27, %v3523_v55  ;;  %v3545_v16 = vrot.slane %v3544_v52, 1  ;;  %v3351_v55 = vpop.permute.xlu0 %3350 }
 0x420   : > { %v3537_v51 = vadd.f32 %v3536_v14, %v3535_v37  ;;  %v3550_v44 = vrot.slane %v3549_v58, 2  ;;  %v3555_v28 = vrot.slane %v3554_v29, 4  ;;  %v3698_v25 = vmin.f32 %v12587_v47, 0.0 }
 0x421   : > { %v3749_v0 = vmul.f32 1.442695, %v3704_v54  ;;  %v3703_v62 = vmin.f32 %v12606_v46, 0.0  ;;  %v3422_v40 = vmul.f32 %v3341_v22, %v12480_v24  ;;  %v12614_v12 = vsel %vm3662_vm9, %v12506_v9, %v8851_v19 }
 0x422   : > { %vm3904_vm5 = vcmask 1042434   ;;  %v3538_v50 = vrot.slane %v3537_v51, 1  ;;  %v3551_v5 = vadd.f32 %v3550_v44, %v3549_v58  ;;  %v3556_v59 = vadd.f32 %v3555_v28, %v3554_v29  ;;  %v3366_v28 = vpop.permute.xlu1 %3365 }
 0x423   : > { %10236 = vpow2.f32 %v3731_v53  ;;  %v12616_v4 = vadd.f32 %v3545_v16, %v3544_v52  ;;  %v3568_v20 = vsel %vm1202_vm7, %v3422_v40, 0.0  ;;  %v3421_v39 = vmul.f32 %v3336_v45, %v12486_v13 }
 0x424   : > { %10238 = vpow2.f32 %v3749_v0  ;;  %v3747_v32 = vmul.f32 1.442695, %v3703_v62  ;;  %v3552_v24 = vrot.slane %v3551_v5, 1  ;;  %v3557_v10 = vrot.slane %v3556_v59, 2  ;;  %v3346_v0 = vpop.permute.xlu0 %3345 }
 0x425   : > { %v8850_v37 = vadd.f32 -1.0, %v10227_v61  ;;  %v3828_v9 = vsel %vm3668_vm12, %v12519_v48, %v8857_v34  ;;  %v3569_v19 = vrot.slane %v3568_v20, 4  ;;  %v3561_v56 = vsel %vm1202_vm7, %v3421_v39, 0.0 }
 0x426   : > { %v10231_v53 = vpop.eup %10230  ;;  %vm3667_vm9 = vcmp.gt.f32.partialorder %v12582_v11, 0.0  ;;  %vm3669_vm8 = vcmp.gt.f32.partialorder %v12589_v17, 0.0  ;;  %v12626_v27 = vadd.f32 %v3538_v50, %v3537_v51  ;;  %v12628_v13 = vadd.f32 %v3552_v24, %v3551_v5 }
 0x427   : > { %v10233_v45 = vpop.eup %10232  ;;  %vm3661_vm3 = vcmp.gt.f32.partialorder %v12541_v8, 0.0  ;;  %v8856_v61 = vadd.f32 -1.0, %v10231_v53  ;;  %v3558_v52 = vadd.f32 %v3557_v10, %v3556_v59  ;;  %v3570_v14 = vadd.f32 %v3569_v19, %v3568_v20 }
 0x428   : > { %v3562_v58 = vrot.slane %v3561_v56, 4  ;;  %v8858_v48 = vadd.f32 -1.0, %v10233_v45  ;;  %10240 = vpow2.f32 %v3747_v32  ;;  %v3706_v29 = vmin.f32 %v12616_v4, 0.0 }
 0x429   : > { %v3424_v22 = vmul.f32 %v3351_v55, %v12493_v60  ;;  %v10235_v34 = vpop.eup %10234  ;;  %vm3670_vm12 = vcmp.gt.f32.partialorder %v12561_v21, 0.0  ;;  %v3827_v54 = vsel %vm3667_vm9, %v12582_v11, %v8856_v61  ;;  %v3707_v16 = vmin.f32 %v12628_v13, 0.0 }
 0x42a   : > { %v3559_v51 = vrot.slane %v3558_v52, 1  ;;  %v3571_v44 = vrot.slane %v3570_v14, 2  ;;  %v3916_v62 = vsel %vm3902_vm14, %v3828_v9, %v3827_v54  ;;  %v3829_v40 = vsel %vm3669_vm8, %v12589_v17, %v8858_v48 }
 0x42b   : > { %v3705_v60 = vmin.f32 %v12626_v27, 0.0  ;;  %v3563_v50 = vadd.f32 %v3562_v58, %v3561_v56  ;;  %v12644_v5 = vsel %vm3904_vm5, %v3829_v40, %v3916_v62  ;;  %v3755_v59 = vmul.f32 1.442695, %v3707_v16 }
 0x42c   : > { %v12646_v11 = vadd.f32 %v3559_v51, %v3558_v52  ;;  %v3572_v20 = vadd.f32 %v3571_v44, %v3570_v14  ;;  %v3582_v55 = vsel %vm1202_vm7, %v3424_v22, 0.0  ;;  %v3427_v32 = vmul.f32 %v3366_v28, %v12525_v23 }
 0x42d   : > { %v3564_v39 = vrot.slane %v3563_v50, 2  ;;  %v3423_v24 = vmul.f32 %v3346_v0, %v12499_v15  ;;  %v10237_v10 = vpop.eup %10236  ;;  %v8859_v9 = vadd.f32 -1.0, %v10235_v34  ;;  %10242 = vpow2.f32 %v3755_v59 }
 0x42e   : > { %v3708_v17 = vmin.f32 %v12646_v11, 0.0  ;;  %v3573_v19 = vrot.slane %v3572_v20, 1  ;;  %v10239_v56 = vpop.eup %10238  ;;  %v3751_v53 = vmul.f32 1.442695, %v3705_v60  ;;  %v3583_v61 = vrot.slane %v3582_v55, 4 }
 0x42f   : > { %v3565_v45 = vadd.f32 %v3564_v39, %v3563_v50  ;;  %v3603_v52 = vsel %vm1202_vm7, %v3427_v32, 0.0  ;;  %v3575_v23 = vsel %vm1202_vm7, %v3423_v24, 0.0  ;;  %v3821_v15 = vsel %vm3661_vm3, %v12541_v8, %v8850_v37  ;;  %v3381_v50 = vpop.permute.xlu1 %3380 }
 0x430   : > { %v3757_v14 = vmul.f32 1.442695, %v3708_v17  ;;  %v12653_v58 = vadd.f32 %v3573_v19, %v3572_v20  ;;  %v3604_v48 = vrot.slane %v3603_v52, 4  ;;  %v3753_v22 = vmul.f32 1.442695, %v3706_v29  ;;  %v3356_v29 = vpop.permute.xlu0 %3355 }
 0x431   : > { %v3566_v34 = vrot.slane %v3565_v45, 1  ;;  %v3584_v54 = vadd.f32 %v3583_v61, %v3582_v55  ;;  %vm3663_vm8 = vcmp.gt.f32.partialorder %v12567_v3, 0.0  ;;  %v8861_v16 = vadd.f32 -1.0, %v10239_v56 }
 0x432   : > { %10244 = vpow2.f32 %v3757_v14  ;;  %v3710_v51 = vmin.f32 %v12653_v58, 0.0  ;;  %v3605_v44 = vadd.f32 %v3604_v48, %v3603_v52  ;;  %vm3906_vm9 = vcmask 1043459   ;;  %v10241_v28 = vpop.eup %10240 }
 0x433   : > { %v12664_v0 = vsel %vm3670_vm12, %v12561_v21, %v8859_v9  ;;  %v12666_v62 = vadd.f32 %v3566_v34, %v3565_v45  ;;  %v3585_v8 = vrot.slane %v3584_v54, 2  ;;  %v3576_v37 = vrot.slane %v3575_v23, 4 }
 0x434   : > { %vm3908_vm3 = vcmask 1044484   ;;  %vm3672_vm2 = vcmp.gt.f32.partialorder %v12600_v18, 0.0  ;;  %10246 = vpow2.f32 %v3751_v53  ;;  %v3761_v40 = vmul.f32 1.442695, %v3710_v51  ;;  %v3371_v48 = vpop.permute.xlu0 %3370 }
 0x435   : > { %v3606_v60 = vrot.slane %v3605_v44, 2  ;;  %10248 = vpow2.f32 %v3753_v22  ;;  %v3709_v59 = vmin.f32 %v12666_v62, 0.0  ;;  %v3586_v20 = vadd.f32 %v3585_v8, %v3584_v54 }
 0x436   : > { %v3577_v39 = vadd.f32 %v3576_v37, %v3575_v23  ;;  %v12671_v21 = vsel %vm3672_vm2, %v12600_v18, %v8861_v16  ;;  %vm3675_vm12 = vcmp.gt.f32.partialorder %v12628_v13, 0.0  ;;  %vm3676_vm11 = vcmp.gt.f32.partialorder %v12646_v11, 0.0 }
 0x437   : > { %v3607_v55 = vadd.f32 %v3606_v60, %v3605_v44  ;;  %v8860_v32 = vadd.f32 -1.0, %v10241_v28  ;;  %v3587_v24 = vrot.slane %v3586_v20, 1  ;;  %v3737_v17 = vmul.f32 1.442695, %v3698_v25  ;;  %v10243_v19 = vpop.eup %10242  ;;  %v3391_v25 = vpop.permute.xlu1 %3390 }
 0x438   : > { %v3578_v9 = vrot.slane %v3577_v39, 2  ;;  %vm3671_vm13 = vcmp.gt.f32.partialorder %v12606_v46, 0.0  ;;  %10250 = vpow2.f32 %v3761_v40  ;;  %v3759_v56 = vmul.f32 1.442695, %v3709_v59 }
 0x439   : > { %v3608_v53 = vrot.slane %v3607_v55, 1  ;;  %v8852_v18 = vadd.f32 -1.0, %v10237_v10  ;;  %v8864_v45 = vadd.f32 -1.0, %v10243_v19  ;;  %v12678_v61 = vadd.f32 %v3587_v24, %v3586_v20 }
 0x43a   : > { %v3579_v52 = vadd.f32 %v3578_v9, %v3577_v39  ;;  %v8853_v14 = vadd.f32 -1.0, %v12602_v26  ;;  %vm3664_vm2 = vcmp.gt.f32.partialorder %v12546_v41, 0.0  ;;  %vm3665_vm4 = vcmp.gt.f32.partialorder %v12517_v36, 0.0 }
 0x43b   : > { %v12681_v23 = vadd.f32 %v3608_v53, %v3607_v55  ;;  %10252 = vpow2.f32 %v3737_v17  ;;  %v3712_v22 = vmin.f32 %v12678_v61, 0.0  ;;  %v8854_v10 = vadd.f32 -1.0, %v12593_v49  ;;  %v3386_v39 = vpop.permute.xlu1 %3385 }
 0x43c   : > { %v3580_v34 = vrot.slane %v3579_v52, 1  ;;  %v3823_v54 = vsel %vm3663_vm8, %v12567_v3, %v8852_v18  ;;  %v10245_v16 = vpop.eup %10244  ;;  %10254 = vpow2.f32 %v3759_v56  ;;  %v3905_v51 = vsel %vm3904_vm5, %v3821_v15, %v12564_v30 }
 0x43d   : > { %v3715_v26 = vmin.f32 %v12681_v23, 0.0  ;;  %v3430_v44 = vmul.f32 %v3381_v50, %v12529_v42  ;;  %v3835_v28 = vsel %vm3675_vm12, %v12628_v13, %v8864_v45  ;;  %v8865_v8 = vadd.f32 -1.0, %v10245_v16  ;;  %v3376_v50 = vpop.permute.xlu0 %3375 }
 0x43e   : > { %v3824_v49 = vsel %vm3664_vm2, %v12546_v41, %v8853_v14  ;;  %v3907_v37 = vsel %vm3906_vm9, %v12614_v12, %v3905_v51  ;;  %vm14775_vm8 = vcmask 1047559   ;;  %v10247_v3 = vpop.eup %10246  ;;  %v3425_v30 = vmul.f32 %v3356_v29, %v12510_v57 }
 0x43f   : > { %v3771_v40 = vmul.f32 1.442695, %v3715_v26  ;;  %v3909_v60 = vsel %vm3908_vm3, %v3823_v54, %v3907_v37  ;;  %v3624_v59 = vsel %vm1202_vm7, %v3430_v44, 0.0  ;;  %v12703_v42 = vpop.eup %10248  ;;  %v3836_v13 = vsel %vm3676_vm11, %v12646_v11, %v8865_v8  ;;  %v3396_v8 = vpop.permute.xlu1 %3395 }
 0x440   : > { %v3765_v15 = vmul.f32 1.442695, %v3712_v22  ;;  %v12708_v41 = vadd.f32 %v3580_v34, %v3579_v52  ;;  %v3825_v12 = vsel %vm3665_vm4, %v12517_v36, %v8854_v10  ;;  %v12714_v20 = vsel %vm3902_vm14, %v3836_v13, %v3835_v28 }
 0x441   : > { %10256 = vpow2.f32 %v3771_v40  ;;  %v3911_v57 = vsel %vm3910_vm10, %v3824_v49, %v3909_v60  ;;  %v3625_v29 = vrot.slane %v3624_v59, 4  ;;  %v12720_v11 = vsel %vm3671_vm13, %v12606_v46, %v8860_v32 }
 0x442   : > { %v12722_v55 = vadd.f32 -1.0, %v10247_v3  ;;  %v3913_v24 = vsel %vm3912_vm0, %v3825_v12, %v3911_v57  ;;  %v3589_v36 = vsel %vm1202_vm7, %v3425_v30, 0.0  ;;  %v10251_v9 = vpop.eup %10250  ;;  %v3432_v56 = vmul.f32 %v3391_v25, %v12539_v7 }
 0x443   : > { %v3626_v17 = vadd.f32 %v3625_v29, %v3624_v59  ;;  %v3590_v19 = vrot.slane %v3589_v36, 4  ;;  %v3428_v53 = vmul.f32 %v3371_v48, %v12514_v6  ;;  %10258 = vpow2.f32 %v3765_v15  ;;  %v3361_v48 = vpop.permute.xlu0 %3360 }
 0x444   : > { %vm3666_vm11 = vcmp.gt.f32.partialorder %v12587_v47, 0.0  ;;  %v3431_v18 = vmul.f32 %v3386_v39, %v12557_v43  ;;  %v3429_v46 = vmul.f32 %v3376_v50, %v12533_v38  ;;  %v3711_v45 = vmin.f32 %v12708_v41, 0.0 }
 0x445   : > { %v10253_v32 = vpop.eup %10252  ;;  %v3627_v52 = vrot.slane %v3626_v17, 2  ;;  %v3591_v14 = vadd.f32 %v3590_v19, %v3589_v36  ;;  %v3638_v22 = vsel %vm1202_vm7, %v3432_v56, 0.0  ;;  %v3610_v7 = vsel %vm1202_vm7, %v3428_v53, 0.0 }
 0x446   : > { %v8855_v34 = vadd.f32 -1.0, %v10253_v32  ;;  %v3639_v10 = vrot.slane %v3638_v22, 4  ;;  %v3631_v6 = vsel %vm1202_vm7, %v3431_v18, 0.0  ;;  %v10255_v25 = vpop.eup %10254  ;;  %v8867_v54 = vadd.f32 -1.0, %v10251_v9 }
 0x447   : > { %v3628_v16 = vadd.f32 %v3627_v52, %v3626_v17  ;;  %v3592_v43 = vrot.slane %v3591_v14, 2  ;;  %v3611_v26 = vrot.slane %v3610_v7, 4  ;;  %v3632_v44 = vrot.slane %v3631_v6, 4  ;;  %v3401_v9 = vpop.permute.xlu0 %3400 }
 0x448   : > { %v3826_v38 = vsel %vm3666_vm11, %v12587_v47, %v8855_v34  ;;  %v3640_v51 = vadd.f32 %v3639_v10, %v3638_v22  ;;  %v3617_v28 = vsel %vm1202_vm7, %v3429_v46, 0.0  ;;  %vm3678_vm13 = vcmp.gt.f32.partialorder %v12653_v58, 0.0 }
 0x449   : > { %v3915_v49 = vsel %vm14775_vm8, %v3826_v38, %v3913_v24  ;;  %v3629_v37 = vrot.slane %v3628_v16, 1  ;;  %v3593_v3 = vadd.f32 %v3592_v43, %v3591_v14  ;;  %v3612_v40 = vadd.f32 %v3611_v26, %v3610_v7  ;;  %v9860_v43 = vpop.permute.xlu1 %9859 }
 0x44a   : > { %v3763_v60 = vmul.f32 1.442695, %v3711_v45  ;;  %9399 = vmatprep.mubr.msk.f32.mxu0 %vm1202_vm7, %v3915_v49  ;;  %v3641_v59 = vrot.slane %v3640_v51, 2  ;;  %v3633_v30 = vadd.f32 %v3632_v44, %v3631_v6  ;;  %v3618_v13 = vrot.slane %v3617_v28, 4 }
 0x44b   : > { %v10257_v15 = vpop.eup %10256  ;;  %v12742_v47 = vadd.f32 %v3629_v37, %v3628_v16  ;;  %v3594_v12 = vrot.slane %v3593_v3, 1  ;;  %v3613_v50 = vrot.slane %v3612_v40, 2  ;;  %v3433_v57 = vmul.f32 %v3396_v8, %v12576_v63 }
 0x44c   : > { %v8866_v29 = vadd.f32 -1.0, %v10255_v25  ;;  %v3642_v39 = vadd.f32 %v3641_v59, %v3640_v51  ;;  %v3634_v24 = vrot.slane %v3633_v30, 2  ;;  %v3619_v36 = vadd.f32 %v3618_v13, %v3617_v28  ;;  %v9865_v28 = vpop.permute.xlu0 %9864 }
 0x44d   : > { %vm3677_vm4 = vcmp.gt.f32.partialorder %v12666_v62, 0.0  ;;  %vm3683_vm12 = vcmp.gt.f32.partialorder %v12681_v23, 0.0  ;;  %v3718_v17 = vmin.f32 %v12742_v47, 0.0  ;;  %v12748_v19 = vadd.f32 %v3594_v12, %v3593_v3  ;;  %v12751_v18 = vpop.eup %10258 }
 0x44e   : > { %v3614_v56 = vadd.f32 %v3613_v50, %v3612_v40  ;;  %v3426_v53 = vmul.f32 %v3361_v48, %v12503_v35  ;;  %v8872_v46 = vadd.f32 -1.0, %v10257_v15  ;;  %v3643_v63 = vrot.slane %v3642_v39, 1 }
 0x44f   : > { %v3635_v32 = vadd.f32 %v3634_v24, %v3633_v30  ;;  %v3620_v45 = vrot.slane %v3619_v36, 2  ;;  %v3777_v52 = vmul.f32 1.442695, %v3718_v17  ;;  %v3713_v14 = vmin.f32 %v12748_v19, 0.0 }
 0x450   : > { %v3615_v22 = vrot.slane %v3614_v56, 1  ;;  %v3645_v34 = vsel %vm1202_vm7, %v3433_v57, 0.0  ;;  %v12755_v10 = vadd.f32 %v3643_v63, %v3642_v39  ;;  %v3596_v48 = vsel %vm1202_vm7, %v3426_v53, 0.0  ;;  %v9870_v39 = vpop.permute.xlu1 %9869 }
 0x451   : > { %v3636_v7 = vrot.slane %v3635_v32, 1  ;;  %v3621_v6 = vadd.f32 %v3620_v45, %v3619_v36  ;;  %v3646_v25 = vrot.slane %v3645_v34, 4  ;;  %10260 = vpow2.f32 %v3777_v52 }
 0x452   : > { %v3767_v16 = vmul.f32 1.442695, %v3713_v14  ;;  %v12757_v35 = vadd.f32 %v3615_v22, %v3614_v56  ;;  %vm14765_vm2 = vcmask 769024   ;;  %v3720_v26 = vmin.f32 %v12755_v10, 0.0 }
 0x453   : > { %v12761_v38 = vadd.f32 %v3636_v7, %v3635_v32  ;;  %v3622_v51 = vrot.slane %v3621_v6, 1  ;;  %v3647_v44 = vadd.f32 %v3646_v25, %v3645_v34  ;;  %v12766_v8 = vsel %vm3678_vm13, %v12653_v58, %v8867_v54 }
 0x454   : > { %10262 = vpow2.f32 %v3763_v60  ;;  %v3716_v49 = vmin.f32 %v12757_v35, 0.0  ;;  %v3597_v37 = vrot.slane %v3596_v48, 4  ;;  %v3781_v3 = vmul.f32 1.442695, %v3720_v26 }
 0x455   : > { %10264 = vpow2.f32 %v3767_v16  ;;  %v3719_v40 = vmin.f32 %v12761_v38, 0.0  ;;  %v12770_v59 = vadd.f32 %v3622_v51, %v3621_v6  ;;  %v3648_v13 = vrot.slane %v3647_v44, 2 }
 0x456   : > { %v3773_v30 = vmul.f32 1.442695, %v3716_v49  ;;  %v3598_v15 = vadd.f32 %v3597_v37, %v3596_v48  ;;  %v3434_v12 = vmul.f32 %v3401_v9, %v12572_v1  ;;  %v12776_v58 = vsel %vm3677_vm4, %v12666_v62, %v8866_v29  ;;  %v9875_v9 = vpop.permute.xlu0 %9874 }
 0x457   : > { %v12781_v54 = vsel %vm3683_vm12, %v12681_v23, %v8872_v46  ;;  %10266 = vpow2.f32 %v3781_v3  ;;  %v3717_v60 = vmin.f32 %v12770_v59, 0.0  ;;  %vm3673_vm11 = vcmp.gt.f32.partialorder %v12626_v27, 0.0 }
 0x458   : > { %10268 = vpow2.f32 %v3773_v30  ;;  %v3649_v50 = vadd.f32 %v3648_v13, %v3647_v44  ;;  %v3599_v57 = vrot.slane %v3598_v15, 2  ;;  %v3652_v1 = vsel %vm1202_vm7, %v3434_v12, 0.0  ;;  %v9880_v13 = vpop.permute.xlu1 %9879 }
 0x459   : > { %v3779_v24 = vmul.f32 1.442695, %v3719_v40  ;;  %v3775_v36 = vmul.f32 1.442695, %v3717_v60  ;;  %v3653_v62 = vrot.slane %v3652_v1, 4  ;;  %v9862_v29 = vunpack.i.h.bf16 %v9860_v43 }
 0x45a   : > { %v3650_v17 = vrot.slane %v3649_v50, 1  ;;  %v3600_v56 = vadd.f32 %v3599_v57, %v3598_v15  ;;  %v9861_v23 = vunpack.i.l.bf16 %v9860_v43  ;;  %v9867_v53 = vunpack.i.h.bf16 %v9865_v28 }
 0x45b   : > { %10270 = vpow2.f32 %v3775_v36  ;;  %v3654_v46 = vadd.f32 %v3653_v62, %v3652_v1  ;;  %v9866_v63 = vunpack.i.l.bf16 %v9865_v28  ;;  %v9872_v32 = vunpack.i.h.bf16 %v9870_v39  ;;  %v10261_v45 = vpop.eup %10260  ;;  %v9885_v1 = vpop.permute.xlu0 %9884 }
 0x45c   : > { %v12786_v52 = vadd.f32 %v3650_v17, %v3649_v50  ;;  %v3601_v14 = vrot.slane %v3600_v56, 1  ;;  %v9871_v22 = vunpack.i.l.bf16 %v9870_v39  ;;  %v9877_v34 = vunpack.i.h.bf16 %v9875_v9 }
 0x45d   : > { %10272 = vpow2.f32 %v3779_v24  ;;  %v3655_v7 = vrot.slane %v3654_v46, 2  ;;  %v9876_v6 = vunpack.i.l.bf16 %v9875_v9  ;;  %v3962_v25 = vsel %vm14765_vm2, %v9861_v23, %v9862_v29 }
 0x45e   : > { %v10263_v16 = vpop.eup %10262  ;;  %v3721_v48 = vmin.f32 %v12786_v52, 0.0  ;;  %v12790_v43 = vadd.f32 %v3601_v14, %v3600_v56  ;;  %v3963_v26 = vsel %vm14765_vm2, %v9866_v63, %v9867_v53  ;;  %v3964_v51 = vsel %vm14765_vm2, %v9871_v22, %v9872_v32 }
 0x45f   : > { %v10265_v44 = vpop.eup %10264  ;;  %vm3684_vm13 = vcmp.gt.f32.partialorder %v12757_v35, 0.0  ;;  %v3656_v28 = vadd.f32 %v3655_v7, %v3654_v46  ;;  %v9651_v49 = vpack.c.bf16 %v3963_v26, %v3962_v25  ;;  %v3965_v37 = vsel %vm14765_vm2, %v9876_v6, %v9877_v34  ;;  %v3860_v6 = vld [vmem:[%s14673_s7 + $0x1] sm:$0x3] }
 0x460   : > { %vm3679_vm4 = vcmp.gt.f32.partialorder %v12708_v41, 0.0  ;;  %v8875_v3 = vadd.f32 -1.0, %v10261_v45  ;;  %vm3685_vm12 = vcmp.gt.f32.partialorder %v12770_v59, 0.0  ;;  %v3783_v40 = vmul.f32 1.442695, %v3721_v48 }
 0x461   : > { %v9655_v30 = vpack.c.bf16 %v3965_v37, %v3964_v51  ;;  %v10267_v15 = vpop.eup %10266  ;;  %vm3686_vm1 = vcmp.gt.f32.partialorder %v12742_v47, 0.0  ;;  %v3657_v12 = vrot.slane %v3656_v28, 1  ;;  %9652 = vmatprep.subr.bf16.mxu0 %v9651_v49  ;;  %v8863_v60 = vadd.f32 -1.0, %v12703_v42  ;;  %v3859_v51 = vld [vmem:[%s14673_s7] sm:$0x3] }
 0x462   : > { %v3833_v50 = vsel %vm3673_vm11, %v12626_v27, %v12722_v55  ;;  %v3918_v57 = vsel %vm3906_vm9, %v12664_v0, %v12644_v5  ;;  %v10269_v39 = vpop.eup %10268  ;;  %10274 = vpow2.f32 %v3783_v40  ;;  %v3714_v24 = vmin.f32 %v12790_v43, 0.0  ;;  %9654 = vmatpush3.bf16.msra.mxu0 %v9651_v49  ;;  %v14922_v49 = vld [vmem:[#allocation11_spill] sm:$0xff] }
 0x463   : > { %vm3674_vm2 = vcmp.gt.f32.partialorder %v12616_v4, 0.0  ;;  %v3919_v42 = vsel %vm3908_vm3, %v12720_v11, %v3918_v57  ;;  %v8873_v36 = vadd.f32 -1.0, %v10269_v39  ;;  %v12811_v62 = vadd.f32 %v3657_v12, %v3656_v28  ;;  %9656 = vmatprep.subr.bf16.mxu0 %v9655_v30 }
 0x464   : > { %v3920_v27 = vsel %vm3910_vm10, %v12671_v21, %v3919_v42  ;;  %v9882_v55 = vunpack.i.h.bf16 %v9880_v13  ;;  %v3834_v5 = vsel %vm3674_vm2, %v12616_v4, %v8863_v60  ;;  %v9881_v29 = vunpack.i.l.bf16 %v9880_v13 }
 0x465   : > { %v3921_v0 = vsel %vm3912_vm0, %v3833_v50, %v3920_v27  ;;  %v9887_v9 = vunpack.i.h.bf16 %v9885_v1  ;;  %v10271_v17 = vpop.eup %10270  ;;  %v3844_v56 = vsel %vm3684_vm13, %v12757_v35, %v8873_v36  ;;  %v3722_v11 = vmin.f32 %v12811_v62, 0.0 }
 0x466   : > { %v3922_v23 = vsel %vm14775_vm8, %v3834_v5, %v3921_v0  ;;  %v9886_v53 = vunpack.i.l.bf16 %v9885_v1  ;;  %v3930_v21 = vsel %vm3902_vm14, %v3844_v56, %v12781_v54  ;;  %v8874_v46 = vadd.f32 -1.0, %v10271_v17  ;;  %9658 = vmatpush3.bf16.msra.mxu0 %v9655_v30  ;;  %v14923_v30 = vld [vmem:[#allocation9_spill] sm:$0xff]  ;;  %v14926_v5 = vld [vmem:[#allocation6_spill] sm:$0xff]  ;;  %v14928_v0 = vld [vmem:[#allocation8_spill] sm:$0xff] }
 0x467   : > { %vm3681_vm2 = vcmp.gt.f32.partialorder %v12748_v19, 0.0  ;;  %v3769_v4 = vmul.f32 1.442695, %v3714_v24  ;;  %v10273_v63 = vpop.eup %10272  ;;  %v8868_v32 = vadd.f32 -1.0, %v10263_v16  ;;  %v8869_v45 = vadd.f32 -1.0, %v12751_v18 }
 0x468   : > { %v8870_v14 = vadd.f32 -1.0, %v10265_v44  ;;  %v3924_v35 = vsel %vm3904_vm5, %v12776_v58, %v12714_v20  ;;  %v3845_v22 = vsel %vm3685_vm12, %v12770_v59, %v8874_v46  ;;  %v9659_v34 = vpack.c.bf16 %v9882_v55, %v9881_v29  ;;  %v14925_v55 = vld [vmem:[#allocation5_spill] sm:$0xff] }
 0x469   : > { %10276 = vpow2.f32 %v3769_v4  ;;  %v3925_v54 = vsel %vm3906_vm9, %v12766_v8, %v3924_v35  ;;  %vm3687_vm11 = vcmp.gt.f32.partialorder %v12761_v38, 0.0  ;;  %9400 = vmatmul.mubr.msk.f32.vlgmr.msra.gmra.mrb[44].mxu0 %vm1202_vm7, %v3922_v23  ;;  %vm3680_vm13 = vcmp.gt.f32.partialorder %v12678_v61, 0.0 }
 0x46a   : > { %v3839_v18 = vsel %vm3679_vm4, %v12708_v41, %v8868_v32  ;;  %v3841_v20 = vsel %vm3681_vm2, %v12748_v19, %v8870_v14  ;;  %v3846_v59 = vsel %vm3686_vm1, %v12742_v47, %v8875_v3  ;;  %v3840_v58 = vsel %vm3680_vm13, %v12678_v61, %v8869_v45  ;;  %9660 = vmatprep.subr.bf16.mxu0 %v9659_v34 }
 0x46b   : > { %v3926_v8 = vsel %vm3908_vm3, %v3839_v18, %v3925_v54  ;;  %v3785_v7 = vmul.f32 1.442695, %v3722_v11  ;;  %9662 = vmatpush3.bf16.msra.mxu0 %v9659_v34  ;;  %v8876_v41 = vadd.f32 -1.0, %v10273_v63  ;;  %v8877_v16 = vadd.f32 -1.0, %v10267_v15 }
 0x46c   : > { %v3927_v25 = vsel %vm3910_vm10, %v3840_v58, %v3926_v8  ;;  %v3931_v19 = vsel %vm3904_vm5, %v3845_v22, %v3930_v21  ;;  %v10275_v48 = vpop.eup %10274  ;;  %v9663_v26 = vpack.c.bf16 %v9887_v9, %v9886_v53  ;;  %vm3688_vm1 = vcmp.gt.f32.partialorder %v12755_v10, 0.0 }
 0x46d   : > { %v3928_v47 = vsel %vm3912_vm0, %v3841_v20, %v3927_v25  ;;  %10278 = vpow2.f32 %v3785_v7  ;;  %v3932_v61 = vsel %vm3906_vm9, %v3846_v59, %v3931_v19  ;;  %v8878_v44 = vadd.f32 -1.0, %v10275_v48 }
 0x46e   : > { %v3847_v28 = vsel %vm3687_vm11, %v12761_v38, %v8876_v41  ;;  %v4074_v37 = vrot.slane %v3860_v6, %v14922_v49  ;;  %vm3689_vm4 = vcmp.gt.f32.partialorder %v12786_v52, 0.0  ;;  %v3848_v3 = vsel %vm3688_vm1, %v12755_v10, %v8877_v16  ;;  %9664 = vmatprep.subr.bf16.mxu0 %v9663_v26 }
 0x46f   : > { %v3933_v40 = vsel %vm3908_vm3, %v3847_v28, %v3932_v61  ;;  %v12865_v13 = vsub.s32 1, %v14923_v30  ;;  %v3849_v15 = vsel %vm3689_vm4, %v12786_v52, %v8878_v44  ;;  %9666 = vmatpush3.bf16.msra.mxu0 %v9663_v26  ;;  %v3865_v38 = vrot.slane %v3859_v51, %v14922_v49 }
 0x470   : > { %v3934_v12 = vsel %vm3910_vm10, %v3848_v3, %v3933_v40  ;;  %4091 = vrot.lane.b32.xlu1 %v4074_v37, %s10729_s26  ;;  %vm3682_vm12 = vcmp.gt.f32.partialorder %v12790_v43, 0.0  ;;  %vm3690_vm2 = vcmp.gt.f32.partialorder %v12811_v62, 0.0  ;;  %vm4095_vm11 = vcmask 515072  }
 0x471   : > { %14924 = vst [vmem:[#allocation53_spill] sm:$0xff] %v12865_v13  ;;  %v3935_v60 = vsel %vm3912_vm0, %v3849_v15, %v3934_v12  ;;  %v4078_v50 = vrot.slane %v3860_v6, %v12865_v13  ;;  %v3869_v57 = vrot.slane %v3859_v51, %v12865_v13  ;;  %vm3974_vm13 = vcmask 252928  }
 0x472   : > { %vm5729_vm1 = vcmask 228352  }
 0x473   : > { %v10277_v10 = vpop.eup %10276  ;;  %4093 = vrot.lane.b32.xlu0 %v4078_v50, %s10729_s26  ;;  %s14929_s26 = smov 64  }
 0x474   : > { %v8871_v1 = vadd.f32 -1.0, %v10277_v10  ;;  %3970 = vrot.lane.b32.xlu1 %v3865_v38, %s10733_s20 }
 0x476   : > { %v3842_v52 = vsel %vm3682_vm12, %v12790_v43, %v8871_v1  ;;  %v14927_v43 = vld [vmem:[#allocation7_spill] sm:$0xff] }
 0x477   : > { %v10279_v39 = vpop.eup %10278  ;;  %v3929_v24 = vsel %vm14775_vm8, %v3842_v52, %v3928_v47  ;;  %3972 = vrot.lane.b32.xlu0 %v3869_v57, %s10733_s20  ;;  %s15085_s20 = smov 126  }
 0x478   : > { %9402 = vmatprep.mubr.msk.f32.mxu0 %vm1202_vm7, %v3929_v24  ;;  %v8879_v42 = vadd.f32 -1.0, %v10279_v39 }
 0x47a   : > { %v3850_v36 = vsel %vm3690_vm2, %v12811_v62, %v8879_v42 }
 0x47b   : > { %v3936_v27 = vsel %vm14775_vm8, %v3850_v36, %v3935_v60  ;;  %vm14947_vm8 = vcmask 7168  }
 0x47c   : > { %9403 = vmatmul.mubr.msk.f32.gmra.mrb[46].mxu0 %vm1202_vm7, %v3936_v27 }
 0x47d   : > { %9413 = vmatprep.mubr.msk.f32.mxu0 %vm1202_vm7, %v14925_v55 }
 0x480   : > { %9414 = vmatmul.mubr.msk.f32.vlgmr.msra.gmra.mrb[48].mxu0 %vm1202_vm7, %v14926_v5 }
 0x481   : > { %9416 = vmatprep.mubr.msk.f32.mxu0 %vm1202_vm7, %v14927_v43 }
 0x484   : > { %9417 = vmatmul.mubr.msk.f32.gmra.mrb[50].mxu0 %vm1202_vm7, %v14928_v0 }
 0x4e2   : > { %v4092_v62 = vpop.permute.xlu1 %4091 }
 0x4e5   : > { %v4094_v56 = vpop.permute.xlu0 %4093 }
 0x4e6   : > { %v4096_v23 = vsel %vm4095_vm11, %v4092_v62, %v4094_v56  ;;  %v3971_v35 = vpop.permute.xlu1 %3970 }
 0x4e9   : > { %v3973_v22 = vpop.permute.xlu0 %3972 }
 0x4ea   : > { %v3975_v54 = vsel %vm3974_vm13, %v3971_v35, %v3973_v22 }
 0x53c   : > { %v9401_v29 = vpop.f32.mrb[44].mxu0 }
 0x53d   : > { %v4051_v9 = vpop.f32.mrb[45].mxu0  ;;  %v4057_v34 = vadd.f32 %v9401_v29, %v3975_v54  ;;  %v10609_v29 = vld [vmem:[%s14672_s6 + $0x88] sm:$0xff] }
 0x53e   : > { %v4052_v18 = vadd.f32 %v4051_v9, %v3975_v54 }
 0x54f   : > { %v9404_v17 = vpop.f32.mrb[46].mxu0 }
 0x550   : > { %v4061_v11 = vpop.f32.mrb[47].mxu0  ;;  %v4067_v58 = vadd.f32 %v9404_v17, %v3975_v54 }
 0x551   : > { %v4062_v8 = vadd.f32 %v4061_v11, %v3975_v54 }
 0x553   : > { %v9415_v53 = vpop.f32.mrb[48].mxu0 }
 0x554   : > { %v4170_v21 = vadd.f32 %v9415_v53, %v4096_v23  ;;  %v4164_v46 = vpop.f32.mrb[49].mxu0  ;;  %v10612_v53 = vld [vmem:[%s14672_s6 + $0x48] sm:$0xff] }
 0x555   : > { %v4165_v4 = vadd.f32 %v4164_v46, %v4096_v23 }
 0x556   : > { %4217 = vrot.lane.b32.xlu0 %v4170_v21, %s14929_s26  ;;  %v4184_v20 = vadd.f32 %v4170_v21, %v4057_v34 }
 0x557   : > { %v9418_v63 = vpop.f32.mrb[50].mxu0  ;;  %4215 = vrot.lane.b32.xlu1 %v4165_v4, %s14929_s26  ;;  %v4183_v59 = vadd.f32 %v4165_v4, %v4052_v18 }
 0x558   : > { %v4180_v32 = vadd.f32 %v9418_v63, %v4096_v23  ;;  %v4174_v45 = vpop.f32.mrb[51].mxu0  ;;  %v8889_v7 = vmul.f32 -1.442695, %v4184_v20 }
 0x559   : > { %v4175_v14 = vadd.f32 %v4174_v45, %v4096_v23  ;;  %v8888_v25 = vmul.f32 -1.442695, %v4183_v59  ;;  %v10611_v23 = vld [vmem:[%s14672_s6 + $0x8] sm:$0xff] }
 0x55a   : > { %4221 = vrot.lane.b32.xlu0 %v4180_v32, %s14929_s26  ;;  %v4186_v6 = vadd.f32 %v4180_v32, %v4067_v58  ;;  %10280 = vpow2.f32 %v8889_v7  ;;  %v9888_v21 = vpack.i.bf16 %v10612_v53, %v10611_v23 }
 0x55b   : > { %4219 = vrot.lane.b32.xlu1 %v4175_v14, %s14929_s26  ;;  %v4185_v41 = vadd.f32 %v4175_v14, %v4062_v8  ;;  %10282 = vpow2.f32 %v8888_v25 }
 0x55c   : > { %v8891_v16 = vmul.f32 -1.442695, %v4186_v6 }
 0x55d   : > { %v8890_v19 = vmul.f32 -1.442695, %v4185_v41 }
 0x55e   : > { %10284 = vpow2.f32 %v8891_v16 }
 0x55f   : > { %10286 = vpow2.f32 %v8890_v19 }
 0x564   : > { %v10281_v48 = vpop.eup %10280 }
 0x565   : > { %v10283_v47 = vpop.eup %10282  ;;  %v4200_v61 = vadd.f32 1.0, %v10281_v48 }
 0x566   : > { %v4199_v51 = vadd.f32 1.0, %v10283_v47 }
 0x567   : > { %10288 = vrcp.f32 %v4200_v61  ;;  %v5697_v61 = vld [vmem:[%s14672_s6 + $0x8] sm:$0xff] }
 0x568   : > { %v10285_v26 = vpop.eup %10284  ;;  %10290 = vrcp.f32 %v4199_v51 }
 0x569   : > { %v10287_v44 = vpop.eup %10286  ;;  %v4202_v28 = vadd.f32 1.0, %v10285_v26  ;;  %v12947_v26 = vld [vmem:[%s14672_s6 + $0x10] sm:$0xff] }
 0x56a   : > { %v4201_v37 = vadd.f32 1.0, %v10287_v44 }
 0x56b   : > { %10292 = vrcp.f32 %v4202_v28 }
 0x56c   : > { %10294 = vrcp.f32 %v4201_v37 }
 0x571   : > { %v10289_v3 = vpop.eup %10288 }
 0x572   : > { %v10291_v30 = vpop.eup %10290  ;;  %v4256_v63 = vsub.f32 1.0, %v10289_v3 }
 0x573   : > { %v4255_v54 = vsub.f32 1.0, %v10291_v30 }
 0x575   : > { %v12896_v60 = vpop.eup %10292 }
 0x576   : > { %v10295_v10 = vpop.eup %10294  ;;  %v4258_v48 = vsub.f32 1.0, %v12896_v60 }
 0x5c8   : > { %v4218_v40 = vpop.permute.xlu0 %4217 }
 0x5c9   : > { %v4228_v15 = vmul.f32 %v10289_v3, %v4218_v40  ;;  %v4216_v12 = vpop.permute.xlu1 %4215  ;;  %v9898_v40 = vpack.i.bf16 %v12947_v26, %v5697_v61 }
 0x5ca   : > { %v4227_v38 = vmul.f32 %v10291_v30, %v4216_v12  ;;  %v5701_v12 = vld [vmem:[%s14672_s6 + $0x88] sm:$0xff] }
 0x5cb   : > { %4237 = vrot.lane.b32.xlu0 %v4228_v15, %s14929_s26  ;;  %v12963_v15 = vld [vmem:[%s14672_s6 + $0x50] sm:$0xff] }
 0x5cc   : > { %v4222_v50 = vpop.permute.xlu0 %4221  ;;  %4235 = vrot.lane.b32.xlu1 %v4227_v38, %s14929_s26  ;;  %v5702_v38 = vld [vmem:[%s14672_s6 + $0x90] sm:$0xff] }
 0x5cd   : > { %v4230_v57 = vmul.f32 %v12896_v60, %v4222_v50  ;;  %v4220_v1 = vpop.permute.xlu1 %4219 }
 0x5ce   : > { %v4229_v52 = vmul.f32 %v10295_v10, %v4220_v1 }
 0x5cf   : > { %4241 = vrot.lane.b32.xlu0 %v4230_v57, %s14929_s26 }
 0x5d0   : > { %4239 = vrot.lane.b32.xlu1 %v4229_v52, %s14929_s26 }
 0x5d3   : > { %4279 = vrot.lane.b32.xlu0 %v14925_v55, %s14930_s18  ;;  %v10610_v55 = vld [vmem:[%s14672_s6 + $0xc8] sm:$0xff] }
 0x5d7   : > { %4281 = vrot.lane.b32.xlu0 %v14926_v5, %s14930_s18  ;;  %v9893_v5 = vpack.i.bf16 %v10610_v55, %v10609_v29 }
 0x5db   : > { %4283 = vrot.lane.b32.xlu0 %v14927_v43, %s14930_s18 }
 0x5df   : > { %4285 = vrot.lane.b32.xlu0 %v14928_v0, %s14930_s18  ;;  %s14767_s18 = smov 28  }
 0x5e3   : > { %9894 = vrot.lane.b32.xlu0 %v9893_v5, %s10734_s10 }
 0x63d   : > { %v4238_v39 = vpop.permute.xlu0 %4237 }
 0x63e   : > { %v4248_v24 = vadd.f32 %v4238_v39, %v4057_v34  ;;  %v4236_v42 = vpop.permute.xlu1 %4235 }
 0x63f   : > { %v4247_v36 = vadd.f32 %v4236_v42, %v4052_v18 }
 0x640   : > { %10296 = vtanh.f32 %v4248_v24  ;;  %v9908_v24 = vpack.i.bf16 %v5702_v38, %v5701_v12  ;;  %v14944_v38 = vld [vmem:[#allocation10_spill] sm:$0xff] }
 0x641   : > { %10298 = vtanh.f32 %v4247_v36  ;;  %v4242_v0 = vpop.permute.xlu0 %4241  ;;  %v5703_v36 = vld [vmem:[%s14672_s6 + $0xc8] sm:$0xff] }
 0x642   : > { %v4240_v27 = vpop.permute.xlu1 %4239  ;;  %v4250_v9 = vadd.f32 %v4242_v0, %v4067_v58 }
 0x643   : > { %v4249_v43 = vadd.f32 %v4240_v27, %v4062_v8  ;;  %v4257_v8 = vsub.f32 1.0, %v10295_v10  ;;  %v5704_v27 = vld [vmem:[%s14672_s6 + $0xd0] sm:$0xff] }
 0x644   : > { %v9913_v55 = vpack.i.bf16 %v5704_v27, %v5703_v36 }
 0x645   : > { %10300 = vtanh.f32 %v4249_v43  ;;  %v4280_v46 = vpop.permute.xlu0 %4279 }
 0x646   : > { %10302 = vtanh.f32 %v4250_v9  ;;  %v4291_v18 = vmul.f32 %v10291_v30, %v4280_v46  ;;  %v5699_v30 = vld [vmem:[%s14672_s6 + $0x48] sm:$0xff] }
 0x647   : > { %v9903_v39 = vpack.i.bf16 %v12963_v15, %v5699_v30 }
 0x649   : > { %v4282_v4 = vpop.permute.xlu0 %4281 }
 0x64a   : > { %v10297_v62 = vpop.eup %10296  ;;  %v4292_v45 = vmul.f32 %v10289_v3, %v4282_v4 }
 0x64b   : > { %4265 = vrot.lane.b32.xlu1 %v10297_v62, %s14931_s12  ;;  %v10299_v17 = vpop.eup %10298 }
 0x64d   : > { %v4284_v35 = vpop.permute.xlu0 %4283 }
 0x64e   : > { %v4293_v6 = vmul.f32 %v10295_v10, %v4284_v35 }
 0x64f   : > { %4263 = vrot.lane.b32.xlu1 %v10299_v17, %s14931_s12  ;;  %v10301_v56 = vpop.eup %10300 }
 0x650   : > { %v10303_v11 = vpop.eup %10302 }
 0x651   : > { %v4286_v25 = vpop.permute.xlu0 %4285 }
 0x652   : > { %v4294_v51 = vmul.f32 %v12896_v60, %v4286_v25 }
 0x653   : > { %4267 = vrot.lane.b32.xlu1 %v10301_v56, %s14931_s12 }
 0x655   : > { %v9895_v37 = vpop.permute.xlu0 %9894 }
 0x656   : > { %v9897_v50 = vunpack.i.h.bf16 %v9895_v37  ;;  %v9896_v10 = vunpack.i.l.bf16 %v9895_v37 }
 0x657   : > { %4269 = vrot.lane.b32.xlu1 %v10303_v11, %s14931_s12 }
 0x658   : > { %v9671_v29 = vpack.c.bf16 %v9897_v50, %v9896_v10 }
 0x65b   : > { %9889 = vrot.lane.b32.xlu1 %v9888_v21, %s10734_s10  ;;  %s14940_s10 = smov 28  }
 0x6bd   : > { %v4266_v32 = vpop.permute.xlu1 %4265 }
 0x6be   : > { %v4276_v14 = vmul.f32 %v4266_v32, %v4256_v63 }
 0x6c0   : > { %v12926_v22 = vadd.f32 %v4292_v45, %v4276_v14 }
 0x6c1   : > { %v4264_v34 = vpop.permute.xlu1 %4263 }
 0x6c2   : > { %14932 = vst [vmem:[#allocation45_spill] sm:$0xff] %v12926_v22  ;;  %v14772_v20 = vmax.f32 %v12926_v22, 0.0  ;;  %v4275_v59 = vmul.f32 %v4264_v34, %v4255_v54 }
 0x6c4   : > { %v12929_v58 = vadd.f32 %v4291_v18, %v4275_v59  ;;  %4309 = vrot.lane.b32.xlu0 %v14772_v20, %s14931_s12 }
 0x6c5   : > { %v4268_v7 = vpop.permute.xlu1 %4267 }
 0x6c6   : > { %14933 = vst [vmem:[#allocation47_spill] sm:$0xff] %v12929_v58  ;;  %v14771_v41 = vmax.f32 %v12929_v58, 0.0  ;;  %v4277_v16 = vmul.f32 %v4268_v7, %v4257_v8 }
 0x6c8   : > { %v12935_v19 = vadd.f32 %v4293_v6, %v4277_v16  ;;  %4307 = vrot.lane.b32.xlu1 %v14771_v41, %s14931_s12  ;;  %v8896_v6 = vld [vmem:[%s14673_s7 + $0x2] ss:$0 sm:$0xff] }
 0x6c9   : > { %v4270_v47 = vpop.permute.xlu1 %4269 }
 0x6ca   : > { %14934 = vst [vmem:[#allocation55_spill] sm:$0xff] %v12935_v19  ;;  %v14770_v44 = vmax.f32 %v12935_v19, 0.0  ;;  %v4278_v28 = vmul.f32 %v4270_v47, %v4258_v48  ;;  %v6437_v48 = vld [vmem:[%s14672_s6 + $0x58] sm:$0xff] }
 0x6cb   : > { %v6435_v47 = vld [vmem:[%s14672_s6 + $0x18] sm:$0xff]  ;;  %v9923_v61 = vpack.i.bf16 %v6437_v48, %v12963_v15 }
 0x6cc   : > { %v12951_v3 = vadd.f32 %v4294_v51, %v4278_v28  ;;  %4311 = vrot.lane.b32.xlu1 %v14770_v44, %s14931_s12  ;;  %v9918_v51 = vpack.i.bf16 %v6435_v47, %v12947_v26 }
 0x6cd   : > { %v9890_v60 = vpop.permute.xlu1 %9889 }
 0x6ce   : > { %14935 = vst [vmem:[#allocation49_spill] sm:$0xff] %v12951_v3  ;;  %v14769_v57 = vmax.f32 %v12951_v3, 0.0  ;;  %v9892_v1 = vunpack.i.h.bf16 %v9890_v60  ;;  %v9891_v52 = vunpack.i.l.bf16 %v9890_v60 }
 0x6d0   : > { %4313 = vrot.lane.b32.xlu0 %v14769_v57, %s14931_s12  ;;  %9899 = vrot.lane.b32.xlu1 %v9898_v40, %s14767_s18  ;;  %v9667_v42 = vpack.c.bf16 %v9892_v1, %v9891_v52 }
 0x6d2   : > { %9668 = vmatprep.subr.bf16.mxu1 %v9667_v42 }
 0x6d3   : > { %9670 = vmatpush3.bf16.msra.mxu1 %v9667_v42 }
 0x6d4   : > { %9904 = vrot.lane.b32.xlu0 %v9903_v39, %s14767_s18  ;;  %9909 = vrot.lane.b32.xlu1 %v9908_v24, %s14767_s18 }
 0x6d5   : > { %9672 = vmatprep.subr.bf16.mxu1 %v9671_v29 }
 0x6d7   : > { %9674 = vmatpush3.bf16.msra.mxu1 %v9671_v29 }
 0x6d8   : > { %9914 = vrot.lane.b32.xlu0 %v9913_v55, %s14767_s18  ;;  %s14785_s18 = smov 124  }
 0x736   : > { %v12986_v43 = vpop.permute.xlu0 %4309 }
 0x737   : > { %14936 = vst [vmem:[#allocation50_spill] sm:$0xff] %v12986_v43 }
 0x73a   : > { %v4308_v5 = vpop.permute.xlu1 %4307 }
 0x73b   : > { %9427 = vmatprep.mubr.msk.f32.mxu1 %vm1202_vm7, %v4308_v5  ;;  %9441 = vmatprep.mubr.msk.f32.mxu0 %vm1202_vm7, %v4308_v5 }
 0x73c   : > { %9428 = vmatmul.mubr.msk.f32.vlgmr.msra.gmra.mrb[64].mxu1 %vm1202_vm7, %v12986_v43 }
 0x73e   : > { %v12992_v0 = vpop.permute.xlu1 %4311 }
 0x73f   : > { %14937 = vst [vmem:[#allocation51_spill] sm:$0xff] %v12992_v0  ;;  %9430 = vmatprep.mubr.msk.f32.mxu1 %vm1202_vm7, %v12992_v0 }
 0x742   : > { %v12996_v9 = vpop.permute.xlu0 %4313  ;;  %v9900_v62 = vpop.permute.xlu1 %9899 }
 0x743   : > { %14938 = vst [vmem:[#allocation52_spill] sm:$0xff] %v12996_v9  ;;  %9431 = vmatmul.mubr.msk.f32.gmra.mrb[66].mxu1 %vm1202_vm7, %v12996_v9  ;;  %v9902_v17 = vunpack.i.h.bf16 %v9900_v62  ;;  %v9901_v56 = vunpack.i.l.bf16 %v9900_v62 }
 0x745   : > { %v5730_v53 = vsel %vm5729_vm1, %v9901_v56, %v9902_v17 }
 0x746   : > { %v9905_v11 = vpop.permute.xlu0 %9904  ;;  %v9910_v23 = vpop.permute.xlu1 %9909 }
 0x747   : > { %v9907_v21 = vunpack.i.h.bf16 %v9905_v11  ;;  %v9906_v46 = vunpack.i.l.bf16 %v9905_v11  ;;  %v9912_v4 = vunpack.i.h.bf16 %v9910_v23  ;;  %v9911_v63 = vunpack.i.l.bf16 %v9910_v23 }
 0x749   : > { %v5731_v32 = vsel %vm5729_vm1, %v9906_v46, %v9907_v21  ;;  %v5732_v34 = vsel %vm5729_vm1, %v9911_v63, %v9912_v4 }
 0x74a   : > { %v9915_v45 = vpop.permute.xlu0 %9914  ;;  %v9675_v14 = vpack.c.bf16 %v5731_v32, %v5730_v53 }
 0x74b   : > { %v9917_v35 = vunpack.i.h.bf16 %v9915_v45  ;;  %v9916_v54 = vunpack.i.l.bf16 %v9915_v45 }
 0x74c   : > { %9676 = vmatprep.subr.bf16.mxu0 %v9675_v14 }
 0x74d   : > { %9678 = vmatpush3.bf16.msra.mxu0 %v9675_v14  ;;  %v5733_v18 = vsel %vm5729_vm1, %v9916_v54, %v9917_v35 }
 0x74e   : > { %v9679_v59 = vpack.c.bf16 %v5733_v18, %v5732_v34 }
 0x750   : > { %9680 = vmatprep.subr.bf16.mxu0 %v9679_v59 }
 0x751   : > { %9682 = vmatpush3.bf16.msra.mxu0 %v9679_v59 }
 0x754   : > { %9442 = vmatmul.mubr.msk.f32.vlgmr.msra.gmra.mrb[52].mxu0 %vm1202_vm7, %v12986_v43 }
 0x755   : > { %9444 = vmatprep.mubr.msk.f32.mxu0 %vm1202_vm7, %v12992_v0 }
 0x758   : > { %9445 = vmatmul.mubr.msk.f32.gmra.mrb[54].mxu0 %vm1202_vm7, %v12996_v9 }
 0x759   : > { %9469 = vmatprep.mubr.msk.f32.mxu0 %vm1202_vm7, %v4308_v5 }
 0x80f   : > { %v9429_v8 = vpop.f32.mrb[64].mxu1 }
 0x810   : > { %4782 = vrot.lane.b32.xlu0 %v9429_v8, %s14939_s21  ;;  %v4401_v7 = vpop.f32.mrb[65].mxu1  ;;  %v4473_v12 = vcombine.high %v9429_v8, %v9429_v8  ;;  %v4480_v60 = vrot.slane %v9429_v8, %v14944_v38 }
 0x811   : > { %4780 = vrot.lane.b32.xlu1 %v4401_v7, %s14939_s21  ;;  %v4424_v50 = vcombine.high %v4401_v7, %v4401_v7  ;;  %v4431_v26 = vrot.slane %v4401_v7, %v14944_v38 }
 0x812   : > { %v4487_v15 = vrot.slane %v4473_v12, %v14944_v38  ;;  %v4488_v10 = vcombine.high %v4480_v60, %v4480_v60  ;;  %v13041_v1 = vrot.slane %v4480_v60, %v14944_v38 }
 0x813   : > { %v4438_v52 = vrot.slane %v4424_v50, %v14944_v38  ;;  %v4439_v29 = vcombine.high %v4431_v26, %v4431_v26  ;;  %v13055_v56 = vrot.slane %v4431_v26, %v14944_v38 }
 0x814   : > { %v4489_v42 = vcombine.high %v4487_v15, %v4487_v15  ;;  %v13045_v36 = vrot.slane %v4488_v10, %v14944_v38  ;;  %v13048_v27 = vrot.slane %v4487_v15, %v14944_v38  ;;  %v4518_v5 = vcombine.high %v13041_v1, %v13041_v1 }
 0x815   : > { %4830 = vrot.lane.b32.xlu1 %v8896_v6, %s10736_s23  ;;  %v4440_v62 = vcombine.high %v4438_v52, %v4438_v52  ;;  %v4655_v46 = vrot.slane %v13041_v1, %v14922_v49  ;;  %v13069_v63 = vrot.slane %v4438_v52, %v14944_v38  ;;  %v13072_v32 = vrot.slane %v4439_v29, %v14944_v38  ;;  %s10743_s23 = smov 125  }
 0x816   : > { %v9432_v25 = vpop.f32.mrb[66].mxu1  ;;  %v13060_v53 = vrot.slane %v4489_v42, %v14944_v38  ;;  %v4520_v21 = vcombine.high %v13045_v36, %v13045_v36  ;;  %v4519_v4 = vcombine.high %v13048_v27, %v13048_v27  ;;  %v4659_v14 = vrot.slane %v13045_v36, %v14922_v49 }
 0x817   : > { %v4411_v16 = vpop.f32.mrb[67].mxu1  ;;  %v4571_v39 = vcombine.high %v9432_v25, %v9432_v25  ;;  %v4578_v55 = vrot.slane %v9432_v25, %v14944_v38  ;;  %v4663_v35 = vrot.slane %v4518_v5, %v14922_v49  ;;  %v13078_v54 = vrot.slane %v4440_v62, %v14944_v38 }
 0x818   : > { %4784 = vrot.lane.b32.xlu0 %v4411_v16, %s14939_s21  ;;  %v4522_v24 = vcombine.high %v4411_v16, %v4411_v16  ;;  %v4529_v11 = vrot.slane %v4411_v16, %v14944_v38  ;;  %v4671_v18 = vrot.slane %v13048_v27, %v14922_v49  ;;  %v4469_v59 = vcombine.high %v13055_v56, %v13055_v56 }
 0x819   : > { %4786 = vrot.lane.b32.xlu1 %v9432_v25, %s14939_s21  ;;  %v4585_v17 = vrot.slane %v4571_v39, %v14944_v38  ;;  %v4586_v45 = vcombine.high %v4578_v55, %v4578_v55  ;;  %v4667_v25 = vrot.slane %v4520_v21, %v14922_v49  ;;  %v4675_v16 = vrot.slane %v13060_v53, %v14922_v49  ;;  %s10745_s21 = smov 93  }
 0x81a   : > { %v4536_v23 = vrot.slane %v4522_v24, %v14944_v38  ;;  %v4537_v8 = vcombine.high %v4529_v11, %v4529_v11  ;;  %v13090_v48 = vrot.slane %v4578_v55, %v14944_v38  ;;  %v4679_v47 = vrot.slane %v4519_v4, %v14922_v49 }
 0x81b   : > { %v4587_v34 = vcombine.high %v4585_v17, %v4585_v17  ;;  %v13099_v12 = vrot.slane %v4586_v45, %v14944_v38  ;;  %v4470_v60 = vcombine.high %v13069_v63, %v13069_v63  ;;  %v4472_v50 = vcombine.high %v13078_v54, %v13078_v54 }
 0x81c   : > { %9919 = vrot.lane.b32.xlu0 %v9918_v51, %s14940_s10  ;;  %v4538_v7 = vcombine.high %v4536_v23, %v4536_v23  ;;  %v13096_v51 = vrot.slane %v4585_v17, %v14944_v38  ;;  %v13109_v10 = vrot.slane %v4529_v11, %v14944_v38  ;;  %v4623_v26 = vrot.slane %v13055_v56, %v14922_v49 }
 0x81d   : > { %5738 = vrot.lane.b32.xlu1 %v8896_v6, %s10732_s17  ;;  %v4521_v6 = vcombine.high %v13060_v53, %v13060_v53  ;;  %v13106_v15 = vrot.slane %v4587_v34, %v14944_v38  ;;  %v13114_v52 = vrot.slane %v4536_v23, %v14944_v38  ;;  %v13117_v39 = vrot.slane %v4537_v8, %v14944_v38 }
 0x81e   : > { %v13120_v24 = vrot.slane %v4538_v7, %v14944_v38  ;;  %v4627_v36 = vrot.slane %v13072_v32, %v14922_v49  ;;  %v4631_v27 = vrot.slane %v4469_v59, %v14922_v49  ;;  %v4616_v29 = vcombine.high %v13090_v48, %v13090_v48 }
 0x81f   : > { %v4683_v42 = vrot.slane %v4521_v6, %v14922_v49  ;;  %v4639_v5 = vrot.slane %v13069_v63, %v14922_v49  ;;  %v4617_v62 = vcombine.high %v13096_v51, %v13096_v51  ;;  %v4618_v17 = vcombine.high %v13099_v12, %v13099_v12 }
 0x820   : > { %v4643_v56 = vrot.slane %v13078_v54, %v14922_v49  ;;  %v4647_v11 = vrot.slane %v4470_v60, %v14922_v49  ;;  %v4619_v23 = vcombine.high %v13106_v15, %v13106_v15  ;;  %v4567_v53 = vcombine.high %v13109_v10, %v13109_v10 }
 0x821   : > { %9924 = vrot.lane.b32.xlu1 %v9923_v61, %s14940_s10  ;;  %v4471_v61 = vcombine.high %v13072_v32, %v13072_v32  ;;  %v4651_v21 = vrot.slane %v4472_v50, %v14922_v49  ;;  %v4568_v4 = vcombine.high %v13114_v52, %v13114_v52  ;;  %v4569_v63 = vcombine.high %v13117_v39, %v13117_v39 }
 0x822   : > { %v4570_v32 = vcombine.high %v13120_v24, %v13120_v24  ;;  %v4719_v45 = vrot.slane %v13090_v48, %v14922_v49  ;;  %v4723_v54 = vrot.slane %v13099_v12, %v14922_v49  ;;  %v4727_v34 = vrot.slane %v4616_v29, %v14922_v49 }
 0x823   : > { %v4635_v55 = vrot.slane %v4471_v61, %v14922_v49  ;;  %v4735_v59 = vrot.slane %v13096_v51, %v14922_v49  ;;  %v4731_v8 = vrot.slane %v4618_v17, %v14922_v49  ;;  %v4739_v7 = vrot.slane %v13106_v15, %v14922_v49 }
 0x824   : > { %v4743_v6 = vrot.slane %v4617_v62, %v14922_v49  ;;  %v4687_v61 = vrot.slane %v13109_v10, %v14922_v49  ;;  %v4747_v48 = vrot.slane %v4619_v23, %v14922_v49  ;;  %v4691_v12 = vrot.slane %v13117_v39, %v14922_v49 }
 0x825   : > { %v4695_v50 = vrot.slane %v4567_v53, %v14922_v49  ;;  %v4703_v51 = vrot.slane %v13114_v52, %v14922_v49  ;;  %v4699_v17 = vrot.slane %v4569_v63, %v14922_v49  ;;  %v4707_v15 = vrot.slane %v13120_v24, %v14922_v49 }
 0x826   : > { %v4711_v62 = vrot.slane %v4568_v4, %v14922_v49  ;;  %v4715_v10 = vrot.slane %v4570_v32, %v14922_v49 }
 0x827   : > { %v13029_v28 = vpop.f32.mrb[52].mxu0 }
 0x828   : > { %14941 = vst [vmem:[#allocation56_spill] sm:$0xff] %v13029_v28  ;;  %v13031_v37 = vpop.f32.mrb[53].mxu0 }
 0x82b   : > { %v13033_v40 = vpop.f32.mrb[54].mxu0 }
 0x82c   : > { %14942 = vst [vmem:[#allocation32_spill] sm:$0xff] %v13033_v40  ;;  %v13035_v30 = vpop.f32.mrb[55].mxu0 }
 0x82d   : > { %14943 = vst [vmem:[#allocation58_spill] sm:$0xff] %v13035_v30 }
 0x882   : > { %v4783_v60 = vpop.permute.xlu0 %4782 }
 0x883   : > { %v4781_v29 = vpop.permute.xlu1 %4780  ;;  %v4800_v23 = vadd.f32 %v4783_v60, %v4655_v46  ;;  %v4801_v39 = vadd.f32 %v4783_v60, %v4659_v14  ;;  %v4802_v57 = vadd.f32 %v4783_v60, %v4663_v35  ;;  %v4803_v53 = vadd.f32 %v4783_v60, %v4667_v25 }
 0x884   : > { %v4804_v44 = vadd.f32 %v4783_v60, %v4671_v18  ;;  %v4805_v41 = vadd.f32 %v4783_v60, %v4675_v16  ;;  %v13176_v52 = vadd.f32 %v4783_v60, %v4679_v47  ;;  %v4807_v20 = vadd.f32 %v4783_v60, %v4683_v42 }
 0x885   : > { %v13178_v63 = vadd.f32 %v4781_v29, %v4623_v26  ;;  %v4793_v38 = vadd.f32 %v4781_v29, %v4627_v36  ;;  %v13180_v24 = vadd.f32 %v4781_v29, %v4631_v27  ;;  %v13182_v4 = vadd.f32 %v4781_v29, %v4635_v55 }
 0x886   : > { %v13186_v3 = vadd.f32 %v4781_v29, %v4639_v5  ;;  %v13188_v1 = vadd.f32 %v4781_v29, %v4643_v56  ;;  %v13192_v35 = vadd.f32 %v4781_v29, %v4647_v11  ;;  %v13194_v18 = vadd.f32 %v4781_v29, %v4651_v21 }
 0x887   : > { %v13184_v32 = vpop.permute.xlu1 %4830 }
 0x888   : > { %v4841_v46 = vadd.f32 %v13184_v32, %v4800_v23  ;;  %v4842_v14 = vadd.f32 %v13184_v32, %v4801_v39  ;;  %v4846_v25 = vadd.f32 %v13184_v32, %v4805_v41  ;;  %v4843_v16 = vadd.f32 %v13184_v32, %v4802_v57 }
 0x889   : > { %v13199_v26 = vadd.f32 %v13184_v32, %v4807_v20  ;;  %v13202_v42 = vadd.f32 %v13184_v32, %v4803_v53  ;;  %v13205_v36 = vadd.f32 %v13184_v32, %v4793_v38  ;;  %v13208_v27 = vadd.f32 %v13184_v32, %v4804_v44 }
 0x88a   : > { %v4785_v47 = vpop.permute.xlu0 %4784  ;;  %vm4873_vm4 = vcmp.ge.f32.partialorder %v4841_v46, 0.0  ;;  %v4905_v57 = vmul.f32 0.01, %v4841_v46  ;;  %vm4874_vm12 = vcmp.ge.f32.partialorder %v4842_v14, 0.0  ;;  %v4906_v21 = vmul.f32 0.01, %v4842_v14 }
 0x88b   : > { %v4808_v55 = vadd.f32 %v4785_v47, %v4687_v61  ;;  %v4809_v5 = vadd.f32 %v4785_v47, %v4691_v12  ;;  %v4810_v56 = vadd.f32 %v4785_v47, %v4695_v50  ;;  %v4811_v11 = vadd.f32 %v4785_v47, %v4699_v17  ;;  %v4787_v41 = vpop.permute.xlu1 %4786 }
 0x88c   : > { %v4812_v20 = vadd.f32 %v4785_v47, %v4703_v51  ;;  %v4813_v60 = vadd.f32 %v4785_v47, %v4707_v15  ;;  %v4814_v29 = vadd.f32 %v4785_v47, %v4711_v62  ;;  %v4815_v23 = vadd.f32 %v4785_v47, %v4715_v10 }
 0x88d   : > { %v13211_v39 = vadd.f32 %v13184_v32, %v4808_v55  ;;  %v13214_v38 = vadd.f32 %v13184_v32, %v4809_v5  ;;  %v13217_v44 = vadd.f32 %v13184_v32, %v4810_v56  ;;  %v13220_v61 = vadd.f32 %v13184_v32, %v4811_v11 }
 0x88e   : > { %v4816_v12 = vadd.f32 %v4787_v41, %v4719_v45  ;;  %v4817_v50 = vadd.f32 %v4787_v41, %v4723_v54  ;;  %v4818_v17 = vadd.f32 %v4787_v41, %v4727_v34  ;;  %v4819_v53 = vadd.f32 %v4787_v41, %v4731_v8 }
 0x88f   : > { %v4820_v51 = vadd.f32 %v4787_v41, %v4735_v59  ;;  %v4821_v15 = vadd.f32 %v4787_v41, %v4739_v7  ;;  %v4822_v62 = vadd.f32 %v4787_v41, %v4743_v6  ;;  %v4823_v10 = vadd.f32 %v4787_v41, %v4747_v48 }
 0x890   : > { %v13223_v47 = vadd.f32 %v13184_v32, %v4812_v20  ;;  %v13226_v55 = vadd.f32 %v13184_v32, %v4813_v60  ;;  %v13229_v5 = vadd.f32 %v13184_v32, %v4814_v29  ;;  %v13232_v56 = vadd.f32 %v13184_v32, %v4815_v23 }
 0x891   : > { %v13235_v45 = vadd.f32 %v13184_v32, %v4816_v12  ;;  %v13238_v54 = vadd.f32 %v13184_v32, %v4817_v50  ;;  %v13241_v34 = vadd.f32 %v13184_v32, %v4818_v17  ;;  %v13244_v59 = vadd.f32 %v13184_v32, %v4819_v53  ;;  %v14949_v53 = vld [vmem:[#allocation31_spill] sm:$0xff] }
 0x892   : > { %v13247_v8 = vadd.f32 %v13184_v32, %v4820_v51  ;;  %v13250_v7 = vadd.f32 %v13184_v32, %v4821_v15  ;;  %v13253_v6 = vadd.f32 %v13184_v32, %v4822_v62  ;;  %v13256_v48 = vadd.f32 %v13184_v32, %v4823_v10 }
 0x893   : > { %v4937_v11 = vsel %vm4873_vm4, %v4841_v46, %v4905_v57  ;;  %v4938_v41 = vsel %vm4874_vm12, %v4842_v14, %v4906_v21  ;;  %vm4878_vm2 = vcmp.ge.f32.partialorder %v4846_v25, 0.0  ;;  %v4910_v20 = vmul.f32 0.01, %v4846_v25  ;;  %vm14948_vm4 = vmmov %vm14947_vm8 }
 0x894   : > { %v13262_v29 = vsel %vm2242_vm6, %v4937_v11, -1e+30  ;;  %v13266_v12 = vsel %vm2243_vm15, %v4938_v41, -1e+30  ;;  %vm4875_vm11 = vcmp.ge.f32.partialorder %v4843_v16, 0.0  ;;  %vm4880_vm13 = vcmp.ge.f32.partialorder %v13199_v26, 0.0  ;;  %vm14951_vm15 = vmmov %vm14948_vm4 }
 0x895   : > { %v5049_v50 = vsel %vm14947_vm8, %v13262_v29, -inf  ;;  %v5056_v46 = vsel %vm14948_vm4, %v13266_v12, -inf  ;;  %v4942_v14 = vsel %vm4878_vm2, %v4846_v25, %v4910_v20  ;;  %v4907_v57 = vmul.f32 0.01, %v4843_v16  ;;  %v14952_v20 = vld [vmem:[#allocation30_spill] sm:$0xff]  ;;  %vm14954_vm2 = vmmov %vm14948_vm4 }
 0x896   : > { %v5050_v21 = vrot.slane %v5049_v50, 4  ;;  %v5057_v17 = vrot.slane %v5056_v46, 4  ;;  %vm14950_vm6 = vcmp.gt.f32.partialorder %v14949_v53, 0.0  ;;  %v4912_v15 = vmul.f32 0.01, %v13199_v26 }
 0x897   : > { %v13275_v51 = vsel %vm14950_vm6, %v4942_v14, -1e+30  ;;  %v4939_v10 = vsel %vm4875_vm11, %v4843_v16, %v4907_v57  ;;  %vm4876_vm12 = vcmp.ge.f32.partialorder %v13202_v42, 0.0  ;;  %v4908_v11 = vmul.f32 0.01, %v13202_v42 }
 0x898   : > { %v5084_v62 = vsel %vm14951_vm15, %v13275_v51, -inf  ;;  %v5051_v41 = vmax.f32 %v5049_v50, %v5050_v21  ;;  %v5058_v60 = vmax.f32 %v5056_v46, %v5057_v17  ;;  %vm14953_vm8 = vcmp.gt.f32.partialorder %v14952_v20, 0.0  ;;  %v14955_v50 = vld [vmem:[#allocation34_spill] sm:$0xff]  ;;  %v14957_v21 = vld [vmem:[#allocation29_spill] sm:$0xff]  ;;  %vm14960_vm15 = vmmov %vm14954_vm2 }
 0x899   : > { %v5085_v25 = vrot.slane %v5084_v62, 4  ;;  %v4971_v23 = vsel %vm14953_vm8, %v4939_v10, -1e+30  ;;  %v4944_v14 = vsel %vm4880_vm13, %v13199_v26, %v4912_v15  ;;  %v4940_v19 = vsel %vm4876_vm12, %v13202_v42, %v4908_v11  ;;  %vm14959_vm13 = vmmov %vm14954_vm2 }
 0x89a   : > { %v5063_v53 = vsel %vm14954_vm2, %v4971_v23, -inf  ;;  %vm4866_vm11 = vcmp.ge.f32.partialorder %v13205_v36, 0.0  ;;  %v5052_v16 = vrot.slane %v5051_v41, 2  ;;  %v5059_v57 = vrot.slane %v5058_v60, 2 }
 0x89b   : > { %v5086_v58 = vmax.f32 %v5084_v62, %v5085_v25  ;;  %v5064_v22 = vrot.slane %v5063_v53, 4  ;;  %vm14956_vm4 = vcmp.gt.f32.partialorder %v14955_v50, 0.0  ;;  %vm14958_vm6 = vcmp.gt.f32.partialorder %v14957_v21, 0.0 }
 0x89c   : > { %v13292_v46 = vsel %vm14956_vm4, %v4944_v14, -1e+30  ;;  %v13296_v17 = vsel %vm14958_vm6, %v4940_v19, -1e+30  ;;  %v4898_v10 = vmul.f32 0.01, %v13205_v36  ;;  %v13301_v26 = vadd.f32 %v13184_v32, %v13182_v4  ;;  %vm14965_vm4 = vmmov %vm14954_vm2 }
 0x89d   : > { %v5053_v42 = vmax.f32 %v5051_v41, %v5052_v16  ;;  %v5060_v15 = vmax.f32 %v5058_v60, %v5059_v57  ;;  %v5087_v11 = vrot.slane %v5086_v58, 2  ;;  %v5065_v20 = vmax.f32 %v5063_v53, %v5064_v22  ;;  %v14961_v41 = vld [vmem:[#allocation19_spill] sm:$0xff] }
 0x89e   : > { %v5098_v62 = vsel %vm14959_vm13, %v13292_v46, -inf  ;;  %v5070_v25 = vsel %vm14960_vm15, %v13296_v17, -inf  ;;  %v4930_v14 = vsel %vm4866_vm11, %v13205_v36, %v4898_v10  ;;  %vm4877_vm12 = vcmp.ge.f32.partialorder %v13208_v27, 0.0 }
 0x89f   : > { %v5054_v19 = vrot.slane %v5053_v42, 1  ;;  %v5061_v50 = vrot.slane %v5060_v15, 1  ;;  %v5088_v21 = vmax.f32 %v5086_v58, %v5087_v11  ;;  %v5066_v9 = vrot.slane %v5065_v20, 2 }
 0x8a0   : > { %v5099_v4 = vrot.slane %v5098_v62, 4  ;;  %v5071_v0 = vrot.slane %v5070_v25, 4  ;;  %vm14962_vm8 = vcmp.gt.f32.partialorder %v14961_v41, 0.0  ;;  %v4909_v22 = vmul.f32 0.01, %v13208_v27 }
 0x8a1   : > { %v13311_v60 = vsel %vm14962_vm8, %v4930_v14, -1e+30  ;;  %v5055_v53 = vmax.f32 %v5053_v42, %v5054_v19  ;;  %v5062_v16 = vmax.f32 %v5060_v15, %v5061_v50  ;;  %v5089_v57 = vrot.slane %v5088_v21, 1  ;;  %v14963_v19 = vld [vmem:[#allocation33_spill] sm:$0xff] }
 0x8a2   : > { %v5067_v43 = vmax.f32 %v5065_v20, %v5066_v9  ;;  %v5100_v30 = vmax.f32 %v5098_v62, %v5099_v4  ;;  %v5072_v36 = vmax.f32 %v5070_v25, %v5071_v0  ;;  %v5000_v10 = vsel %vm14954_vm2, %v13311_v60, -inf }
 0x8a3   : > { %v4941_v58 = vsel %vm4877_vm12, %v13208_v27, %v4909_v22  ;;  %v5225_v11 = vsub.f32 %v13262_v29, %v5055_v53  ;;  %v5226_v14 = vsub.f32 %v13266_v12, %v5062_v16  ;;  %v5090_v41 = vmax.f32 %v5088_v21, %v5089_v57  ;;  %vm14968_vm12 = vmmov %vm14954_vm2 }
 0x8a4   : > { %v5068_v40 = vrot.slane %v5067_v43, 1  ;;  %v5101_v13 = vrot.slane %v5100_v30, 2  ;;  %v5073_v42 = vrot.slane %v5072_v36, 2  ;;  %v5001_v15 = vrot.slane %v5000_v10, 4 }
 0x8a5   : > { %vm14964_vm11 = vcmp.gt.f32.partialorder %v14963_v19, 0.0  ;;  %v5265_v0 = vmul.f32 1.442695, %v5225_v11  ;;  %v5267_v20 = vmul.f32 1.442695, %v5226_v14  ;;  %v5230_v62 = vsub.f32 %v13275_v51, %v5090_v41  ;;  %v14966_v19 = vld [vmem:[#allocation12_spill] sm:$0xff] }
 0x8a6   : > { %v13323_v9 = vsel %vm14964_vm11, %v4941_v58, -1e+30  ;;  %v5069_v25 = vmax.f32 %v5067_v43, %v5068_v40  ;;  %v5102_v50 = vmax.f32 %v5100_v30, %v5101_v13  ;;  %v5074_v27 = vmax.f32 %v5072_v36, %v5073_v42  ;;  %vm14971_vm11 = vmmov %vm14965_vm4 }
 0x8a7   : > { %v5002_v4 = vmax.f32 %v5000_v10, %v5001_v15  ;;  %v5077_v29 = vsel %vm14965_vm4, %v13323_v9, -inf  ;;  %10304 = vpow2.f32 %v5265_v0  ;;  %v5275_v12 = vmul.f32 1.442695, %v5230_v62 }
 0x8a8   : > { %v5227_v21 = vsub.f32 %v4971_v23, %v5069_v25  ;;  %v5078_v22 = vrot.slane %v5077_v29, 4  ;;  %10306 = vpow2.f32 %v5267_v20  ;;  %v5103_v53 = vrot.slane %v5102_v50, 1 }
 0x8a9   : > { %v5075_v16 = vrot.slane %v5074_v27, 1  ;;  %v5003_v57 = vrot.slane %v5002_v4, 2  ;;  %10308 = vpow2.f32 %v5275_v12  ;;  %vm4868_vm6 = vcmp.ge.f32.partialorder %v13301_v26, 0.0 }
 0x8aa   : > { %v5269_v58 = vmul.f32 1.442695, %v5227_v21  ;;  %v5079_v11 = vmax.f32 %v5077_v29, %v5078_v22  ;;  %v5104_v43 = vmax.f32 %v5102_v50, %v5103_v53  ;;  %v4900_v30 = vmul.f32 0.01, %v13301_v26 }
 0x8ab   : > { %v5076_v13 = vmax.f32 %v5074_v27, %v5075_v16  ;;  %v5004_v40 = vmax.f32 %v5002_v4, %v5003_v57  ;;  %v4847_v23 = vadd.f32 %v13184_v32, %v13176_v52  ;;  %v4837_v36 = vadd.f32 %v13184_v32, %v13186_v3  ;;  %v14969_v27 = vld [vmem:[#allocation35_spill] sm:$0xff]  ;;  %v10613_v57 = vld [vmem:[%s11453_s19 + $0x40] sm:$0xff] }
 0x8ac   : > { %10310 = vpow2.f32 %v5269_v58  ;;  %v5080_v51 = vrot.slane %v5079_v11, 2  ;;  %v5232_v10 = vsub.f32 %v13292_v46, %v5104_v43  ;;  %v4932_v42 = vsel %vm4868_vm6, %v13301_v26, %v4900_v30  ;;  %vm14974_vm6 = vmmov %vm14971_vm11 }
 0x8ad   : > { %v5228_v14 = vsub.f32 %v13296_v17, %v5076_v13  ;;  %v5005_v41 = vrot.slane %v5004_v40, 1  ;;  %vm14967_vm13 = vcmp.gt.f32.partialorder %v14966_v19, 0.0  ;;  %vm4879_vm15 = vcmp.ge.f32.partialorder %v4847_v23, 0.0 }
 0x8ae   : > { %v5081_v15 = vmax.f32 %v5079_v11, %v5080_v51  ;;  %v13339_v0 = vsel %vm14967_vm13, %v4932_v42, -1e+30  ;;  %v4911_v20 = vmul.f32 0.01, %v4847_v23  ;;  %v5279_v62 = vmul.f32 1.442695, %v5232_v10  ;;  %vm14975_vm13 = vmmov %vm14974_vm6 }
 0x8af   : > { %v5271_v25 = vmul.f32 1.442695, %v5228_v14  ;;  %v5006_v52 = vmax.f32 %v5004_v40, %v5005_v41  ;;  %v5014_v3 = vsel %vm14968_vm12, %v13339_v0, -inf  ;;  %vm4869_vm8 = vcmp.ge.f32.partialorder %v4837_v36, 0.0  ;;  %v10614_v40 = vld [vmem:[%s11453_s19 + $0x48] sm:$0xff]  ;;  %v14972_v10 = vld [vmem:[#allocation18_spill] sm:$0xff]  ;;  %vm14977_vm12 = vmmov %vm14974_vm6 }
 0x8b0   : > { %v5082_v46 = vrot.slane %v5081_v15, 1  ;;  %v5015_v50 = vrot.slane %v5014_v3, 4  ;;  %v4943_v17 = vsel %vm4879_vm15, %v4847_v23, %v4911_v20  ;;  %10312 = vpow2.f32 %v5279_v62  ;;  %v10615_v42 = vld [vmem:[%s11453_s19 + $0x68] sm:$0xff]  ;;  %vm14976_vm15 = vmmov %vm14974_vm6 }
 0x8b1   : > { %v5218_v26 = vsub.f32 %v13311_v60, %v5006_v52  ;;  %vm14970_vm2 = vcmp.gt.f32.partialorder %v14969_v27, 0.0  ;;  %v4901_v29 = vmul.f32 0.01, %v4837_v36  ;;  %v10305_v12 = vpop.eup %10304  ;;  %10314 = vpow2.f32 %v5271_v25 }
 0x8b2   : > { %v13346_v4 = vsel %vm14970_vm2, %v4943_v17, -1e+30  ;;  %v5083_v21 = vmax.f32 %v5081_v15, %v5082_v46  ;;  %v5016_v22 = vmax.f32 %v5014_v3, %v5015_v50  ;;  %v10307_v16 = vpop.eup %10306  ;;  %v13351_v58 = vmul.f32 %v10613_v57, %v10305_v12  ;;  %v10616_v46 = vld [vmem:[%s11453_s19 + $0x50] sm:$0xff]  ;;  %vm14979_vm2 = vmmov %vm14974_vm6 }
 0x8b3   : > { %v5091_v53 = vsel %vm14971_vm11, %v13346_v4, -inf  ;;  %v5251_v11 = vmul.f32 1.442695, %v5218_v26  ;;  %v4933_v60 = vsel %vm4869_vm8, %v4837_v36, %v4901_v29  ;;  %v10309_v13 = vpop.eup %10308  ;;  %v13354_v30 = vmul.f32 %v10614_v40, %v10307_v16  ;;  %vm14978_vm8 = vmmov %vm14974_vm6 }
 0x8b4   : > { %v5092_v43 = vrot.slane %v5091_v53, 4  ;;  %v5229_v51 = vsub.f32 %v13323_v9, %v5083_v21  ;;  %v5017_v23 = vrot.slane %v5016_v22, 2  ;;  %vm14973_vm4 = vcmp.gt.f32.partialorder %v14972_v10, 0.0  ;;  %vm14980_vm11 = vmmov %vm14979_vm2 }
 0x8b5   : > { %v13359_v14 = vsel %vm14973_vm4, %v4933_v60, -1e+30  ;;  %v5401_v41 = vsel %vm14974_vm6, %v13351_v58, 0.0  ;;  %v13364_v15 = vmul.f32 %v10615_v42, %v10309_v13  ;;  %10316 = vpow2.f32 %v5251_v11 }
 0x8b6   : > { %v5093_v36 = vmax.f32 %v5091_v53, %v5092_v43  ;;  %v10311_v19 = vpop.eup %10310  ;;  %v5402_v20 = vrot.slane %v5401_v41, 4  ;;  %v5408_v62 = vsel %vm14975_vm13, %v13354_v30, 0.0  ;;  %v5273_v25 = vmul.f32 1.442695, %v5229_v51  ;;  %vm14981_vm13 = vmmov %vm14979_vm2 }
 0x8b7   : > { %v5018_v9 = vmax.f32 %v5016_v22, %v5017_v23  ;;  %v5409_v52 = vrot.slane %v5408_v62, 4  ;;  %v5436_v3 = vsel %vm14976_vm15, %v13364_v15, 0.0  ;;  %v13371_v50 = vmul.f32 %v10616_v46, %v10311_v19  ;;  %v10617_v19 = vld [vmem:[%s11453_s19 + $0x78] sm:$0xff] }
 0x8b8   : > { %v5094_v17 = vrot.slane %v5093_v36, 2  ;;  %v5403_v26 = vadd.f32 %v5402_v20, %v5401_v41  ;;  %v5437_v27 = vrot.slane %v5436_v3, 4  ;;  %10318 = vpow2.f32 %v5273_v25  ;;  %v10618_v25 = vld [vmem:[%s11453_s19 + $0x58] sm:$0xff] }
 0x8b9   : > { %v5019_v29 = vrot.slane %v5018_v9, 1  ;;  %v5410_v12 = vadd.f32 %v5409_v52, %v5408_v62  ;;  %v5415_v21 = vsel %vm14977_vm12, %v13371_v50, 0.0  ;;  %v13377_v22 = vsel %vm14978_vm8, %v13359_v14, -inf  ;;  %vm14982_vm8 = vmmov %vm14979_vm2 }
 0x8ba   : > { %v5095_v53 = vmax.f32 %v5093_v36, %v5094_v17  ;;  %v5404_v16 = vrot.slane %v5403_v26, 2  ;;  %v5438_v57 = vadd.f32 %v5437_v27, %v5436_v3  ;;  %v5416_v11 = vrot.slane %v5415_v21, 4  ;;  %v10313_v60 = vpop.eup %10312 }
 0x8bb   : > { %v5020_v43 = vmax.f32 %v5018_v9, %v5019_v29  ;;  %v5411_v13 = vrot.slane %v5410_v12, 2  ;;  %v5022_v51 = vrot.slane %v13377_v22, 4  ;;  %v13382_v23 = vadd.f32 %v13184_v32, %v13178_v63  ;;  %v10315_v10 = vpop.eup %10314 }
 0x8bc   : > { %v5096_v40 = vrot.slane %v5095_v53, 1  ;;  %v5405_v41 = vadd.f32 %v5404_v16, %v5403_v26  ;;  %v5439_v42 = vrot.slane %v5438_v57, 2  ;;  %v5417_v36 = vadd.f32 %v5416_v11, %v5415_v21 }
 0x8bd   : > { %v13385_v20 = vmul.f32 %v10617_v19, %v10313_v60  ;;  %v5412_v62 = vadd.f32 %v5411_v13, %v5410_v12  ;;  %v13388_v52 = vmul.f32 %v10618_v25, %v10315_v10  ;;  %v5220_v9 = vsub.f32 %v13339_v0, %v5020_v43  ;;  %v10619_v43 = vld [vmem:[%s11453_s19 + $0x8] sm:$0xff] }
 0x8be   : > { %v5097_v3 = vmax.f32 %v5095_v53, %v5096_v40  ;;  %v5406_v46 = vrot.slane %v5405_v41, 1  ;;  %v5440_v17 = vadd.f32 %v5439_v42, %v5438_v57  ;;  %v5418_v27 = vrot.slane %v5417_v36, 2 }
 0x8bf   : > { %v5450_v63 = vsel %vm14979_vm2, %v13385_v20, 0.0  ;;  %v10317_v26 = vpop.eup %10316  ;;  %v5413_v29 = vrot.slane %v5412_v62, 1  ;;  %v5422_v16 = vsel %vm14980_vm11, %v13388_v52, 0.0  ;;  %v5255_v12 = vmul.f32 1.442695, %v5220_v9 }
 0x8c0   : > { %v5451_v21 = vrot.slane %v5450_v63, 4  ;;  %v5407_v11 = vadd.f32 %v5406_v46, %v5405_v41  ;;  %v5441_v60 = vrot.slane %v5440_v17, 1  ;;  %v5419_v13 = vadd.f32 %v5418_v27, %v5417_v36 }
 0x8c1   : > { %v5423_v10 = vrot.slane %v5422_v16, 4  ;;  %v5414_v0 = vadd.f32 %v5413_v29, %v5412_v62  ;;  %v13396_v40 = vmul.f32 %v10619_v43, %v10317_v26  ;;  %10320 = vpow2.f32 %v5255_v12 }
 0x8c2   : > { %v5452_v53 = vadd.f32 %v5451_v21, %v5450_v63  ;;  %v10319_v57 = vpop.eup %10318  ;;  %vm5577_vm4 = vcmp.gt.f32.partialorder %v5407_v11, 0.0  ;;  %v5442_v42 = vadd.f32 %v5441_v60, %v5440_v17  ;;  %v5420_v19 = vrot.slane %v5419_v13, 1  ;;  %v10620_v63 = vld [vmem:[%s11453_s19 + $0x60] sm:$0xff] }
 0x8c3   : > { %v5424_v25 = vadd.f32 %v5423_v10, %v5422_v16  ;;  %v5609_v49 = vsel %vm5577_vm4, %v5407_v11, 1.0  ;;  %vm5578_vm6 = vcmp.gt.f32.partialorder %v5414_v0, 0.0  ;;  %v5352_v41 = vsel %vm14981_vm13, %v13396_v40, 0.0 }
 0x8c4   : > { %v5453_v28 = vrot.slane %v5452_v53, 2  ;;  %10322 = vrcp.f32 %v5609_v49  ;;  %v5610_v36 = vsel %vm5578_vm6, %v5414_v0, 1.0  ;;  %vm5582_vm15 = vcmp.gt.f32.partialorder %v5442_v42, 0.0  ;;  %vm14983_vm6 = vmmov %vm14982_vm8 }
 0x8c5   : > { %v5421_v62 = vadd.f32 %v5420_v19, %v5419_v13  ;;  %10324 = vrcp.f32 %v5610_v36  ;;  %v5614_v9 = vsel %vm5582_vm15, %v5442_v42, 1.0  ;;  %v5425_v27 = vrot.slane %v5424_v25, 2  ;;  %vm14986_vm15 = vmmov %vm14983_vm6 }
 0x8c6   : > { %v5454_v46 = vadd.f32 %v5453_v28, %v5452_v53  ;;  %10326 = vrcp.f32 %v5614_v9  ;;  %v5353_v17 = vrot.slane %v5352_v41, 4  ;;  %v13401_v26 = vmul.f32 %v10620_v63, %v10319_v57 }
 0x8c7   : > { %vm5579_vm12 = vcmp.gt.f32.partialorder %v5421_v62, 0.0  ;;  %v5426_v16 = vadd.f32 %v5425_v27, %v5424_v25  ;;  %v5231_v12 = vsub.f32 %v13346_v4, %v5097_v3  ;;  %v5023_v60 = vmax.f32 %v13377_v22, %v5022_v51 }
 0x8c8   : > { %v5611_v29 = vsel %vm5579_vm12, %v5421_v62, 1.0  ;;  %v5455_v21 = vrot.slane %v5454_v46, 1  ;;  %v5354_v49 = vadd.f32 %v5353_v17, %v5352_v41  ;;  %v5429_v11 = vsel %vm14982_vm8, %v13401_v26, 0.0  ;;  %v10621_v41 = vld [vmem:[%s11453_s19 + $0x18] sm:$0xff] }
 0x8c9   : > { %10328 = vrcp.f32 %v5611_v29  ;;  %v5427_v13 = vrot.slane %v5426_v16, 1  ;;  %v5430_v10 = vrot.slane %v5429_v11, 4  ;;  %v5277_v0 = vmul.f32 1.442695, %v5231_v12 }
 0x8ca   : > { %v5456_v28 = vadd.f32 %v5455_v21, %v5454_v46  ;;  %v5355_v53 = vrot.slane %v5354_v49, 2  ;;  %v5024_v43 = vrot.slane %v5023_v60, 2  ;;  %vm4865_vm2 = vcmp.ge.f32.partialorder %v13382_v23, 0.0 }
 0x8cb   : > { %v4897_v57 = vmul.f32 0.01, %v13382_v23  ;;  %v10321_v42 = vpop.eup %10320  ;;  %v5428_v4 = vadd.f32 %v5427_v13, %v5426_v16  ;;  %v5431_v3 = vadd.f32 %v5430_v10, %v5429_v11  ;;  %10330 = vpow2.f32 %v5277_v0  ;;  %v14984_v13 = vld [vmem:[#allocation24_spill] sm:$0xff] }
 0x8cc   : > { %vm5584_vm11 = vcmp.gt.f32.partialorder %v5456_v28, 0.0  ;;  %v5356_v25 = vadd.f32 %v5355_v53, %v5354_v49  ;;  %v13410_v22 = vmul.f32 %v10621_v41, %v10321_v42  ;;  %v5025_v51 = vmax.f32 %v5023_v60, %v5024_v43 }
 0x8cd   : > { %v5616_v19 = vsel %vm5584_vm11, %v5456_v28, 1.0  ;;  %vm5580_vm4 = vcmp.gt.f32.partialorder %v5428_v4, 0.0  ;;  %v5432_v36 = vrot.slane %v5431_v3, 2  ;;  %v4929_v62 = vsel %vm4865_vm2, %v13382_v23, %v4897_v57 }
 0x8ce   : > { %10332 = vrcp.f32 %v5616_v19  ;;  %v10323_v9 = vpop.eup %10322  ;;  %v5612_v46 = vsel %vm5580_vm4, %v5428_v4, 1.0  ;;  %v5357_v27 = vrot.slane %v5356_v25, 1  ;;  %v5366_v17 = vsel %vm14983_vm6, %v13410_v22, 0.0  ;;  %vm14987_vm4 = vmmov %vm14983_vm6 }
 0x8cf   : > { %v5026_v63 = vrot.slane %v5025_v51, 1  ;;  %v10325_v29 = vpop.eup %10324  ;;  %v5650_v21 = vmul.f32 %v10323_v9, %v13351_v58  ;;  %10334 = vrcp.f32 %v5612_v46  ;;  %v5433_v16 = vadd.f32 %v5432_v36, %v5431_v3  ;;  %v10622_v9 = vld [vmem:[%s11453_s19 + $0x70] sm:$0xff] }
 0x8d0   : > { %v5367_v12 = vrot.slane %v5366_v17, 4  ;;  %v10327_v49 = vpop.eup %10326  ;;  %v5652_v11 = vmul.f32 %v10325_v29, %v13354_v30  ;;  %v5358_v60 = vadd.f32 %v5357_v27, %v5356_v25  ;;  %vm14985_vm13 = vcmp.gt.f32.partialorder %v14984_v13, 0.0 }
 0x8d1   : > { %v5027_v28 = vmax.f32 %v5025_v51, %v5026_v63  ;;  %v13419_v23 = vsel %vm14985_vm13, %v4929_v62, -1e+30  ;;  %5868 = vperm.xlu1 %9857, %v5650_v21   ;;  %v5660_v10 = vmul.f32 %v10327_v49, %v13364_v15  ;;  %v5434_v0 = vrot.slane %v5433_v16, 1  ;;  %vm14990_vm13 = vmmov %vm14987_vm4 }
 0x8d2   : > { %v5368_v53 = vadd.f32 %v5367_v12, %v5366_v17  ;;  %v4993_v58 = vsel %vm14986_vm15, %v13419_v23, -inf  ;;  %5873 = vperm.xlu0 %9856, %v5652_v11   ;;  %vm5570_vm12 = vcmp.gt.f32.partialorder %v5358_v60, 0.0  ;;  %v4838_v42 = vadd.f32 %v13184_v32, %v13188_v1 }
 0x8d3   : > { %v10329_v43 = vpop.eup %10328  ;;  %v5221_v57 = vsub.f32 %v13359_v14, %v5027_v28  ;;  %v4994_v30 = vrot.slane %v4993_v58, 4  ;;  %v5602_v3 = vsel %vm5570_vm12, %v5358_v60, 1.0  ;;  %v5435_v19 = vadd.f32 %v5434_v0, %v5433_v16 }
 0x8d4   : > { %v5654_v4 = vmul.f32 %v10329_v43, %v13371_v50  ;;  %v5369_v15 = vrot.slane %v5368_v53, 2  ;;  %10336 = vrcp.f32 %v5602_v3  ;;  %vm4870_vm8 = vcmp.ge.f32.partialorder %v4838_v42, 0.0  ;;  %v14991_v3 = vld [vmem:[#allocation14_spill] sm:$0xff] }
 0x8d5   : > { %v5257_v25 = vmul.f32 1.442695, %v5221_v57  ;;  %v4995_v41 = vmax.f32 %v4993_v58, %v4994_v30  ;;  %v10331_v51 = vpop.eup %10330  ;;  %5893 = vperm.xlu1 %9857, %v5660_v10   ;;  %vm5581_vm2 = vcmp.gt.f32.partialorder %v5435_v19, 0.0  ;;  %v4902_v62 = vmul.f32 0.01, %v4838_v42 }
 0x8d6   : > { %v5370_v36 = vadd.f32 %v5369_v15, %v5368_v53  ;;  %v4835_v14 = vadd.f32 %v13184_v32, %v13180_v24  ;;  %5878 = vperm.xlu0 %9856, %v5654_v4   ;;  %v5613_v1 = vsel %vm5581_vm2, %v5435_v19, 1.0  ;;  %v13431_v50 = vmul.f32 %v10622_v9, %v10331_v51  ;;  %v14988_v24 = vld [vmem:[#allocation15_spill] sm:$0xff] }
 0x8d7   : > { %10338 = vpow2.f32 %v5257_v25  ;;  %v4996_v46 = vrot.slane %v4995_v41, 2  ;;  %v4934_v63 = vsel %vm4870_vm8, %v4838_v42, %v4902_v62  ;;  %vm14989_vm6 = vcmp.gt.f32.partialorder %v14988_v24, 0.0  ;;  %vm14993_vm8 = vmmov %vm14987_vm4 }
 0x8d8   : > { %v10333_v27 = vpop.eup %10332  ;;  %10340 = vrcp.f32 %v5613_v1  ;;  %v5371_v17 = vrot.slane %v5370_v36, 1  ;;  %vm4867_vm11 = vcmp.ge.f32.partialorder %v4835_v14, 0.0  ;;  %v5443_v21 = vsel %vm14987_vm4, %v13431_v50, 0.0 }
 0x8d9   : > { %v5664_v29 = vmul.f32 %v10333_v27, %v13385_v20  ;;  %v4997_v16 = vmax.f32 %v4995_v41, %v4996_v46  ;;  %v13439_v12 = vsel %vm14989_vm6, %v4934_v63, -1e+30  ;;  %v10335_v49 = vpop.eup %10334  ;;  %v5444_v60 = vrot.slane %v5443_v21, 4  ;;  %vm14996_vm6 = vmmov %vm14993_vm8 }
 0x8da   : > { %v5372_v11 = vadd.f32 %v5371_v17, %v5370_v36  ;;  %v5028_v28 = vsel %vm14990_vm13, %v13439_v12, -inf  ;;  %v4899_v13 = vmul.f32 0.01, %v4835_v14  ;;  %v5656_v10 = vmul.f32 %v10335_v49, %v13388_v52  ;;  %vm14997_vm13 = vmmov %vm14996_vm6 }
 0x8db   : > { %5903 = vperm.xlu1 %9857, %v5664_v29   ;;  %v4998_v0 = vrot.slane %v4997_v16, 1  ;;  %v5029_v20 = vrot.slane %v5028_v28, 4  ;;  %v4840_v53 = vadd.f32 %v13184_v32, %v13194_v18  ;;  %v5445_v58 = vadd.f32 %v5444_v60, %v5443_v21  ;;  %v10623_v29 = vld [vmem:[%s11453_s19 + $0x20] sm:$0xff] }
 0x8dc   : > { %vm5572_vm15 = vcmp.gt.f32.partialorder %v5372_v11, 0.0  ;;  %v4931_v43 = vsel %vm4867_vm11, %v4835_v14, %v4899_v13  ;;  %v4839_v57 = vadd.f32 %v13184_v32, %v13192_v35  ;;  %5883 = vperm.xlu0 %9856, %v5656_v10   ;;  %vm14992_vm12 = vcmp.gt.f32.partialorder %v14991_v3, 0.0  ;;  %v14998_v10 = vld [vmem:[#allocation21_spill] sm:$0xff] }
 0x8dd   : > { %v5604_v30 = vsel %vm5572_vm15, %v5372_v11, 1.0  ;;  %v4999_v42 = vmax.f32 %v4997_v16, %v4998_v0  ;;  %v5030_v4 = vmax.f32 %v5028_v28, %v5029_v20  ;;  %v13451_v19 = vsel %vm14992_vm12, %v4931_v43, -1e+30 }
 0x8de   : > { %10342 = vrcp.f32 %v5604_v30  ;;  %v5446_v52 = vrot.slane %v5445_v58, 2  ;;  %v5007_v18 = vsel %vm14993_vm8, %v13451_v19, -inf  ;;  %vm4872_vm2 = vcmp.ge.f32.partialorder %v4840_v53, 0.0  ;;  %v10337_v15 = vpop.eup %10336  ;;  %vm15000_vm8 = vmmov %vm14996_vm6 }
 0x8df   : > { %v5217_v25 = vsub.f32 %v13419_v23, %v4999_v42  ;;  %v5031_v41 = vrot.slane %v5030_v4, 2  ;;  %v5008_v32 = vrot.slane %v5007_v18, 4  ;;  %v4904_v35 = vmul.f32 0.01, %v4840_v53  ;;  %v14994_v23 = vld [vmem:[#allocation20_spill] sm:$0xff] }
 0x8e0   : > { %v5636_v51 = vmul.f32 %v10337_v15, %v13396_v40  ;;  %v5447_v36 = vadd.f32 %v5446_v52, %v5445_v58  ;;  %vm4871_vm11 = vcmp.ge.f32.partialorder %v4839_v57, 0.0  ;;  %v4903_v62 = vmul.f32 0.01, %v4839_v57 }
 0x8e1   : > { %v10339_v14 = vpop.eup %10338  ;;  %v5249_v1 = vmul.f32 1.442695, %v5217_v25  ;;  %v5032_v9 = vmax.f32 %v5030_v4, %v5031_v41  ;;  %v5009_v46 = vmax.f32 %v5007_v18, %v5008_v32  ;;  %v4936_v27 = vsel %vm4872_vm2, %v4840_v53, %v4904_v35 }
 0x8e2   : > { %v10341_v17 = vpop.eup %10340  ;;  %5833 = vperm.xlu1 %9857, %v5636_v51   ;;  %v5448_v63 = vrot.slane %v5447_v36, 1  ;;  %v13458_v21 = vmul.f32 %v10623_v29, %v10339_v14  ;;  %vm14995_vm4 = vcmp.gt.f32.partialorder %v14994_v23, 0.0  ;;  %v4935_v24 = vsel %vm4871_vm11, %v4839_v57, %v4903_v62  ;;  %v10624_v23 = vld [vmem:[%s11453_s19] sm:$0xff] }
 0x8e3   : > { %v13462_v16 = vsel %vm14995_vm4, %v4936_v27, -1e+30  ;;  %v5658_v40 = vmul.f32 %v10341_v17, %v13401_v26  ;;  %10344 = vpow2.f32 %v5249_v1  ;;  %v5033_v49 = vrot.slane %v5032_v9, 1 }
 0x8e4   : > { %v5010_v11 = vrot.slane %v5009_v46, 2  ;;  %v5449_v60 = vadd.f32 %v5448_v63, %v5447_v36  ;;  %v5373_v28 = vsel %vm14996_vm6, %v13458_v21, 0.0  ;;  %v5042_v13 = vsel %vm14997_vm13, %v13462_v16, -inf }
 0x8e5   : > { %vm14999_vm15 = vcmp.gt.f32.partialorder %v14998_v10, 0.0  ;;  %5888 = vperm.xlu0 %9856, %v5658_v40   ;;  %v5374_v20 = vrot.slane %v5373_v28, 4  ;;  %v5034_v53 = vmax.f32 %v5032_v9, %v5033_v49  ;;  %v5043_v43 = vrot.slane %v5042_v13, 4 }
 0x8e6   : > { %v13471_v0 = vsel %vm14999_vm15, %v4935_v24, -1e+30  ;;  %v5011_v58 = vmax.f32 %v5009_v46, %v5010_v11  ;;  %vm5583_vm12 = vcmp.gt.f32.partialorder %v5449_v60, 0.0  ;;  %vm4889_vm2 = vcmp.ge.f32.partialorder %v13235_v45, 0.0  ;;  %vm15002_vm15 = vmmov %vm14996_vm6 }
 0x8e7   : > { %v5035_v26 = vsel %vm15000_vm8, %v13471_v0, -inf  ;;  %v4921_v57 = vmul.f32 0.01, %v13235_v45  ;;  %v5615_v30 = vsel %vm5583_vm12, %v5449_v60, 1.0  ;;  %v5375_v42 = vadd.f32 %v5374_v20, %v5373_v28 }
 0x8e8   : > { %v5222_v4 = vsub.f32 %v13439_v12, %v5034_v53  ;;  %v5012_v3 = vrot.slane %v5011_v58, 1  ;;  %v10343_v52 = vpop.eup %10342  ;;  %10346 = vrcp.f32 %v5615_v30  ;;  %v5044_v18 = vmax.f32 %v5042_v13, %v5043_v43  ;;  %v15003_v43 = vld [vmem:[#allocation48_spill] sm:$0xff] }
 0x8e9   : > { %v5036_v15 = vrot.slane %v5035_v26, 4  ;;  %v4953_v25 = vsel %vm4889_vm2, %v13235_v45, %v4921_v57  ;;  %v5640_v41 = vmul.f32 %v10343_v52, %v13410_v22  ;;  %v5376_v32 = vrot.slane %v5375_v42, 2  ;;  %v15005_v57 = vld [vmem:[#allocation54_spill] sm:$0xff] }
 0x8ea   : > { %v5259_v35 = vmul.f32 1.442695, %v5222_v4  ;;  %v5013_v51 = vmax.f32 %v5011_v58, %v5012_v3  ;;  %v5045_v36 = vrot.slane %v5044_v18, 2  ;;  %vm15001_vm11 = vcmp.gt.f32.partialorder %v11909_v33, 0.0 }
 0x8eb   : > { %v5037_v62 = vmax.f32 %v5035_v26, %v5036_v15  ;;  %v13482_v14 = vsel %vm15001_vm11, %v4953_v25, -1e+30  ;;  %vm4890_vm4 = vcmp.ge.f32.partialorder %v13238_v54, 0.0  ;;  %5843 = vperm.xlu1 %9857, %v5640_v41   ;;  %v5377_v12 = vadd.f32 %v5376_v32, %v5375_v42  ;;  %vm15007_vm11 = vmmov %vm14996_vm6 }
 0x8ec   : > { %10348 = vpow2.f32 %v5259_v35  ;;  %v5219_v1 = vsub.f32 %v13451_v19, %v5013_v51  ;;  %v5161_v45 = vsel %vm14996_vm6, %v13482_v14, -inf  ;;  %v5046_v22 = vmax.f32 %v5044_v18, %v5045_v36 }
 0x8ed   : > { %v5038_v9 = vrot.slane %v5037_v62, 2  ;;  %v5162_v46 = vrot.slane %v5161_v45, 4  ;;  %v4922_v27 = vmul.f32 0.01, %v13238_v54  ;;  %v10345_v17 = vpop.eup %10344  ;;  %v5378_v33 = vrot.slane %v5377_v12, 1 }
 0x8ee   : > { %v5253_v63 = vmul.f32 1.442695, %v5219_v1  ;;  %vm4892_vm13 = vcmp.ge.f32.partialorder %v13244_v59, 0.0  ;;  %v4924_v29 = vmul.f32 0.01, %v13244_v59  ;;  %v13492_v24 = vmul.f32 %v10624_v23, %v10345_v17 }
 0x8ef   : > { %v5047_v40 = vrot.slane %v5046_v22, 1  ;;  %v5039_v19 = vmax.f32 %v5037_v62, %v5038_v9  ;;  %v5163_v49 = vmax.f32 %v5161_v45, %v5162_v46  ;;  %v5379_v11 = vadd.f32 %v5378_v33, %v5377_v12  ;;  %v10625_v62 = vld [vmem:[%s11453_s19 + $0x28] sm:$0xff] }
 0x8f0   : > { %10350 = vpow2.f32 %v5253_v63  ;;  %v4954_v60 = vsel %vm4890_vm4, %v13238_v54, %v4922_v27  ;;  %v4956_v28 = vsel %vm4892_vm13, %v13244_v59, %v4924_v29  ;;  %v5345_v13 = vsel %vm15002_vm15, %v13492_v24, 0.0  ;;  %vm15008_vm4 = vmmov %vm14996_vm6  ;;  %v15010_v33 = vld [vmem:[#allocation57_spill] sm:$0xff] }
 0x8f1   : > { %v5048_v10 = vmax.f32 %v5046_v22, %v5047_v40  ;;  %v5040_v20 = vrot.slane %v5039_v19, 1  ;;  %v5164_v53 = vrot.slane %v5163_v49, 2  ;;  %vm5573_vm12 = vcmp.gt.f32.partialorder %v5379_v11, 0.0  ;;  %vm15009_vm13 = vmmov %vm15008_vm4 }
 0x8f2   : > { %v5346_v58 = vrot.slane %v5345_v13, 4  ;;  %vm15004_vm8 = vcmp.gt.f32.partialorder %v15003_v43, 0.0  ;;  %vm15006_vm2 = vcmp.gt.f32.partialorder %v15005_v57, 0.0  ;;  %v10347_v42 = vpop.eup %10346  ;;  %v5605_v54 = vsel %vm5573_vm12, %v5379_v11, 1.0  ;;  %v10626_v11 = vld [vmem:[%s11453_s19 + $0x10] sm:$0xff]  ;;  %vm15012_vm12 = vmmov %vm15008_vm4 }
 0x8f3   : > { %v13502_v26 = vsel %vm15004_vm8, %v4954_v60, -1e+30  ;;  %v13506_v30 = vsel %vm15006_vm2, %v4956_v28, -1e+30  ;;  %v5224_v59 = vsub.f32 %v13462_v16, %v5048_v10  ;;  %v5041_v4 = vmax.f32 %v5039_v19, %v5040_v20  ;;  %vm15013_vm2 = vmmov %vm15008_vm4 }
 0x8f4   : > { %v5165_v3 = vmax.f32 %v5163_v49, %v5164_v53  ;;  %v5662_v52 = vmul.f32 %v10347_v42, %v13431_v50  ;;  %10352 = vrcp.f32 %v5605_v54  ;;  %v5347_v18 = vadd.f32 %v5346_v58, %v5345_v13 }
 0x8f5   : > { %v5168_v15 = vsel %vm15007_vm11, %v13502_v26, -inf  ;;  %v5263_v25 = vmul.f32 1.442695, %v5224_v59  ;;  %v5223_v41 = vsub.f32 %v13471_v0, %v5041_v4  ;;  %v5182_v16 = vsel %vm15008_vm4, %v13506_v30, -inf }
 0x8f6   : > { %v5166_v32 = vrot.slane %v5165_v3, 1  ;;  %v5169_v35 = vrot.slane %v5168_v15, 4  ;;  %v10349_v51 = vpop.eup %10348  ;;  %5898 = vperm.xlu0 %9856, %v5662_v52   ;;  %v5348_v36 = vrot.slane %v5347_v18, 2  ;;  %vm4891_vm6 = vcmp.ge.f32.partialorder %v13241_v34, 0.0 }
 0x8f7   : > { %v4923_v50 = vmul.f32 0.01, %v13241_v34  ;;  %v13518_v12 = vmul.f32 %v10625_v62, %v10349_v51  ;;  %10354 = vpow2.f32 %v5263_v25  ;;  %v5261_v1 = vmul.f32 1.442695, %v5223_v41 }
 0x8f8   : > { %v5167_v45 = vmax.f32 %v5165_v3, %v5166_v32  ;;  %v5349_v0 = vadd.f32 %v5348_v36, %v5347_v18  ;;  %v5170_v22 = vmax.f32 %v5168_v15, %v5169_v35  ;;  %v5183_v9 = vrot.slane %v5182_v16, 4 }
 0x8f9   : > { %v4955_v46 = vsel %vm4891_vm6, %v13241_v34, %v4923_v50  ;;  %v5380_v27 = vsel %vm15009_vm13, %v13518_v12, 0.0  ;;  %10356 = vpow2.f32 %v5261_v1  ;;  %vm15011_vm15 = vcmp.gt.f32.partialorder %v15010_v33, 0.0  ;;  %v10627_v50 = vld [vmem:[%s11453_s19 + $0x38] sm:$0xff]  ;;  %vm15016_vm13 = vmmov %vm15013_vm2 }
 0x8fa   : > { %v5241_v17 = vsub.f32 %v13482_v14, %v5167_v45  ;;  %v13526_v63 = vsel %vm15011_vm15, %v4955_v46, -1e+30  ;;  %v10351_v29 = vpop.eup %10350  ;;  %v5350_v23 = vrot.slane %v5349_v0, 1  ;;  %v5381_v40 = vrot.slane %v5380_v27, 4 }
 0x8fb   : > { %v5171_v19 = vrot.slane %v5170_v22, 2  ;;  %v5184_v49 = vmax.f32 %v5182_v16, %v5183_v9  ;;  %v13529_v60 = vmul.f32 %v10626_v11, %v10351_v29  ;;  %v5175_v34 = vsel %vm15012_vm12, %v13526_v63, -inf  ;;  %v15014_v9 = vld [vmem:[#allocation17_spill] sm:$0xff]  ;;  %v10628_v29 = vld [vmem:[%s11453_s19 + $0x30] sm:$0xff]  ;;  %vm15017_vm12 = vmmov %vm15013_vm2 }
 0x8fc   : > { %v5297_v28 = vmul.f32 1.442695, %v5241_v17  ;;  %vm4893_vm8 = vcmp.ge.f32.partialorder %v13247_v8, 0.0  ;;  %v5351_v13 = vadd.f32 %v5350_v23, %v5349_v0  ;;  %v5382_v14 = vadd.f32 %v5381_v40, %v5380_v27 }
 0x8fd   : > { %v5172_v10 = vmax.f32 %v5170_v22, %v5171_v19  ;;  %v5185_v20 = vrot.slane %v5184_v49, 2  ;;  %v5359_v53 = vsel %vm15013_vm2, %v13529_v60, 0.0  ;;  %v5176_v58 = vrot.slane %v5175_v34, 4 }
 0x8fe   : > { %10358 = vpow2.f32 %v5297_v28  ;;  %v4925_v43 = vmul.f32 0.01, %v13247_v8  ;;  %v10353_v57 = vpop.eup %10352  ;;  %vm5569_vm11 = vcmp.gt.f32.partialorder %v5351_v13, 0.0  ;;  %v5383_v42 = vrot.slane %v5382_v14, 2 }
 0x8ff   : > { %v5360_v54 = vrot.slane %v5359_v53, 4  ;;  %v5173_v59 = vrot.slane %v5172_v10, 1  ;;  %v5642_v4 = vmul.f32 %v10353_v57, %v13458_v21  ;;  %v5601_v3 = vsel %vm5569_vm11, %v5351_v13, 1.0 }
 0x900   : > { %v5186_v52 = vmax.f32 %v5184_v49, %v5185_v20  ;;  %v5177_v18 = vmax.f32 %v5175_v34, %v5176_v58  ;;  %10360 = vrcp.f32 %v5601_v3  ;;  %v5384_v15 = vadd.f32 %v5383_v42, %v5382_v14  ;;  %v10629_v58 = vld [vmem:[%s11453_s19 + $0xc0] sm:$0xff] }
 0x901   : > { %v5361_v25 = vadd.f32 %v5360_v54, %v5359_v53  ;;  %v5174_v41 = vmax.f32 %v5172_v10, %v5173_v59  ;;  %v10355_v32 = vpop.eup %10354  ;;  %5848 = vperm.xlu1 %9857, %v5642_v4   ;;  %v4957_v36 = vsel %vm4893_vm8, %v13247_v8, %v4925_v43  ;;  %vm4882_vm4 = vcmp.ge.f32.partialorder %v13214_v38, 0.0  ;;  %vm15018_vm8 = vmmov %vm15013_vm2 }
 0x902   : > { %v5187_v35 = vrot.slane %v5186_v52, 1  ;;  %v5178_v51 = vrot.slane %v5177_v18, 2  ;;  %v5385_v21 = vrot.slane %v5384_v15, 1  ;;  %v13543_v62 = vmul.f32 %v10627_v50, %v10355_v32  ;;  %vm15019_vm11 = vmmov %vm15018_vm8 }
 0x903   : > { %v5362_v16 = vrot.slane %v5361_v25, 2  ;;  %v5242_v1 = vsub.f32 %v13502_v26, %v5174_v41  ;;  %v10357_v45 = vpop.eup %10356  ;;  %vm15015_vm6 = vcmp.gt.f32.partialorder %v15014_v9, 0.0  ;;  %v4914_v27 = vmul.f32 0.01, %v13214_v38 }
 0x904   : > { %v5188_v0 = vmax.f32 %v5186_v52, %v5187_v35  ;;  %v5179_v22 = vmax.f32 %v5177_v18, %v5178_v51  ;;  %v13548_v46 = vsel %vm15015_vm6, %v4957_v36, -1e+30  ;;  %v5386_v17 = vadd.f32 %v5385_v21, %v5384_v15 }
 0x905   : > { %v5363_v8 = vadd.f32 %v5362_v16, %v5361_v25  ;;  %v5394_v33 = vsel %vm15016_vm13, %v13543_v62, 0.0  ;;  %v13554_v23 = vmul.f32 %v10628_v29, %v10357_v45  ;;  %v5299_v26 = vmul.f32 1.442695, %v5242_v1  ;;  %v15020_v16 = vld [vmem:[#allocation36_spill] sm:$0xff] }
 0x906   : > { %v5395_v40 = vrot.slane %v5394_v33, 4  ;;  %v5244_v19 = vsub.f32 %v13506_v30, %v5188_v0  ;;  %v5180_v49 = vrot.slane %v5179_v22, 1  ;;  %vm5574_vm15 = vcmp.gt.f32.partialorder %v5386_v17, 0.0 }
 0x907   : > { %v5364_v11 = vrot.slane %v5363_v8, 1  ;;  %v5387_v28 = vsel %vm15017_vm12, %v13554_v23, 0.0  ;;  %v5189_v34 = vsel %vm15018_vm8, %v13548_v46, -inf  ;;  %v5606_v14 = vsel %vm5574_vm15, %v5386_v17, 1.0 }
 0x908   : > { %v10359_v13 = vpop.eup %10358  ;;  %v5396_v10 = vadd.f32 %v5395_v40, %v5394_v33  ;;  %v5388_v20 = vrot.slane %v5387_v28, 4  ;;  %10362 = vpow2.f32 %v5299_v26  ;;  %v5303_v30 = vmul.f32 1.442695, %v5244_v19 }
 0x909   : > { %10364 = vrcp.f32 %v5606_v14  ;;  %v5365_v53 = vadd.f32 %v5364_v11, %v5363_v8  ;;  %v13562_v43 = vmul.f32 %v10629_v58, %v10359_v13  ;;  %v5181_v54 = vmax.f32 %v5179_v22, %v5180_v49  ;;  %v10630_v11 = vld [vmem:[%s11453_s19 + $0xc8] sm:$0xff] }
 0x90a   : > { %v5397_v57 = vrot.slane %v5396_v10, 2  ;;  %v5389_v42 = vadd.f32 %v5388_v20, %v5387_v28  ;;  %v5190_v59 = vrot.slane %v5189_v34, 4  ;;  %v10361_v4 = vpop.eup %10360  ;;  %10366 = vpow2.f32 %v5303_v30 }
 0x90b   : > { %vm5571_vm2 = vcmp.gt.f32.partialorder %v5365_v53, 0.0  ;;  %v5513_v3 = vsel %vm15019_vm11, %v13562_v43, 0.0  ;;  %v4946_v52 = vsel %vm4882_vm4, %v13214_v38, %v4914_v27  ;;  %v5634_v18 = vmul.f32 %v10361_v4, %v13492_v24  ;;  %vm15022_vm4 = vmmov %vm15018_vm8 }
 0x90c   : > { %v5603_v15 = vsel %vm5571_vm2, %v5365_v53, 1.0  ;;  %v5398_v25 = vadd.f32 %v5397_v57, %v5396_v10  ;;  %v5390_v41 = vrot.slane %v5389_v42, 2  ;;  %v5514_v32 = vrot.slane %v5513_v3, 4  ;;  %vm15023_vm2 = vmmov %vm15022_vm4  ;;  %v10631_v57 = vld [vmem:[%s11453_s19 + $0xd8] sm:$0xff] }
 0x90d   : > { %10368 = vrcp.f32 %v5603_v15  ;;  %v5243_v35 = vsub.f32 %v13526_v63, %v5181_v54  ;;  %v5191_v51 = vmax.f32 %v5189_v34, %v5190_v59  ;;  %5828 = vperm.xlu0 %9856, %v5634_v18   ;;  %vm15021_vm6 = vcmp.gt.f32.partialorder %v15020_v16, 0.0 }
 0x90e   : > { %v5399_v36 = vrot.slane %v5398_v25, 1  ;;  %v5391_v21 = vadd.f32 %v5390_v41, %v5389_v42  ;;  %v13573_v50 = vsel %vm15021_vm6, %v4946_v52, -1e+30  ;;  %vm4894_vm13 = vcmp.ge.f32.partialorder %v13250_v7, 0.0  ;;  %vm15025_vm6 = vmmov %vm15023_vm2 }
 0x90f   : > { %v5515_v38 = vadd.f32 %v5514_v32, %v5513_v3  ;;  %v5301_v1 = vmul.f32 1.442695, %v5243_v35  ;;  %v5192_v24 = vrot.slane %v5191_v51, 2  ;;  %v5112_v45 = vsel %vm15022_vm4, %v13573_v50, -inf  ;;  %vm15026_vm4 = vmmov %vm15023_vm2 }
 0x910   : > { %v5400_v0 = vadd.f32 %v5399_v36, %v5398_v25  ;;  %v5392_v22 = vrot.slane %v5391_v21, 1  ;;  %v5113_v63 = vrot.slane %v5112_v45, 4  ;;  %v4926_v9 = vmul.f32 0.01, %v13250_v7 }
 0x911   : > { %v5516_v27 = vrot.slane %v5515_v38, 2  ;;  %10370 = vpow2.f32 %v5301_v1  ;;  %v5193_v17 = vmax.f32 %v5191_v51, %v5192_v24  ;;  %vm4883_vm15 = vcmp.ge.f32.partialorder %v13217_v44, 0.0  ;;  %v10632_v24 = vld [vmem:[%s11453_s19 + $0xd0] sm:$0xff] }
 0x912   : > { %v10363_v8 = vpop.eup %10362  ;;  %vm5576_vm12 = vcmp.gt.f32.partialorder %v5400_v0, 0.0  ;;  %v5393_v33 = vadd.f32 %v5392_v22, %v5391_v21  ;;  %v5114_v29 = vmax.f32 %v5112_v45, %v5113_v63  ;;  %v4958_v40 = vsel %vm4894_vm13, %v13250_v7, %v4926_v9  ;;  %v15027_v9 = vld [vmem:[#allocation41_spill] sm:$0xff] }
 0x913   : > { %v10365_v26 = vpop.eup %10364  ;;  %v5608_v19 = vsel %vm5576_vm12, %v5400_v0, 1.0  ;;  %v5517_v49 = vadd.f32 %v5516_v27, %v5515_v38  ;;  %v13584_v28 = vmul.f32 %v10630_v11, %v10363_v8  ;;  %v5194_v34 = vrot.slane %v5193_v17, 1 }
 0x914   : > { %v5644_v13 = vmul.f32 %v10365_v26, %v13518_v12  ;;  %10372 = vrcp.f32 %v5608_v19  ;;  %vm5575_vm8 = vcmp.gt.f32.partialorder %v5393_v33, 0.0  ;;  %v5115_v14 = vrot.slane %v5114_v29, 2  ;;  %v10367_v10 = vpop.eup %10366 }
 0x915   : > { %v5607_v20 = vsel %vm5575_vm8, %v5393_v33, 1.0  ;;  %v5518_v53 = vrot.slane %v5517_v49, 1  ;;  %v5520_v58 = vsel %vm15023_vm2, %v13584_v28, 0.0  ;;  %v5195_v7 = vmax.f32 %v5193_v17, %v5194_v34 }
 0x916   : > { %5853 = vperm.xlu1 %9857, %v5644_v13   ;;  %10374 = vrcp.f32 %v5607_v20  ;;  %v5521_v30 = vrot.slane %v5520_v58, 4  ;;  %v13590_v42 = vmul.f32 %v10631_v57, %v10367_v10  ;;  %v5116_v54 = vmax.f32 %v5114_v29, %v5115_v14 }
 0x917   : > { %v10369_v59 = vpop.eup %10368  ;;  %v5519_v4 = vadd.f32 %v5518_v53, %v5517_v49  ;;  %v5245_v12 = vsub.f32 %v13548_v46, %v5195_v7  ;;  %vm15024_vm11 = vcmp.gt.f32.partialorder %v11968_v2, 0.0  ;;  %v4915_v52 = vmul.f32 0.01, %v13217_v44 }
 0x918   : > { %v13595_v3 = vsel %vm15024_vm11, %v4958_v40, -1e+30  ;;  %v5638_v18 = vmul.f32 %v10369_v59, %v13529_v60  ;;  %v5522_v15 = vadd.f32 %v5521_v30, %v5520_v58  ;;  %v5534_v25 = vsel %vm15025_vm6, %v13590_v42, 0.0 }
 0x919   : > { %v5117_v41 = vrot.slane %v5116_v54, 1  ;;  %vm5593_vm13 = vcmp.gt.f32.partialorder %v5519_v4, 0.0  ;;  %v5535_v32 = vrot.slane %v5534_v25, 4  ;;  %v5305_v35 = vmul.f32 1.442695, %v5245_v12 }
 0x91a   : > { %v5196_v46 = vsel %vm15026_vm4, %v13595_v3, -inf  ;;  %5838 = vperm.xlu0 %9856, %v5638_v18   ;;  %v5625_v2 = vsel %vm5593_vm13, %v5519_v4, 1.0  ;;  %v5523_v51 = vrot.slane %v5522_v15, 2  ;;  %v4947_v38 = vsel %vm4883_vm15, %v13217_v44, %v4915_v52  ;;  %vm15029_vm15 = vmmov %vm15023_vm2 }
 0x91b   : > { %v5118_v36 = vmax.f32 %v5116_v54, %v5117_v41  ;;  %v5197_v21 = vrot.slane %v5196_v46, 4  ;;  %v10371_v16 = vpop.eup %10370  ;;  %10376 = vrcp.f32 %v5625_v2  ;;  %v5536_v60 = vadd.f32 %v5535_v32, %v5534_v25  ;;  %vm15032_vm4 = vmmov %vm15023_vm2 }
 0x91c   : > { %vm4881_vm12 = vcmp.ge.f32.partialorder %v13211_v39, 0.0  ;;  %v5524_v1 = vadd.f32 %v5523_v51, %v5522_v15  ;;  %v13608_v45 = vmul.f32 %v10632_v24, %v10371_v16  ;;  %10378 = vpow2.f32 %v5305_v35 }
 0x91d   : > { %v5234_v0 = vsub.f32 %v13573_v50, %v5118_v36  ;;  %v5537_v22 = vrot.slane %v5536_v60, 2  ;;  %v5198_v63 = vmax.f32 %v5196_v46, %v5197_v21  ;;  %vm15028_vm8 = vcmp.gt.f32.partialorder %v15027_v9, 0.0  ;;  %v10633_v36 = vld [vmem:[%s11453_s19 + $0xe0] sm:$0xff] }
 0x91e   : > { %v13613_v27 = vsel %vm15028_vm8, %v4947_v38, -1e+30  ;;  %v4913_v17 = vmul.f32 0.01, %v13211_v39  ;;  %v10373_v8 = vpop.eup %10372  ;;  %v5525_v33 = vrot.slane %v5524_v1, 1  ;;  %v5527_v44 = vsel %vm15029_vm15, %v13608_v45, 0.0 }
 0x91f   : > { %v5283_v29 = vmul.f32 1.442695, %v5234_v0  ;;  %v5119_v40 = vsel %vm15023_vm2, %v13613_v27, -inf  ;;  %v5648_v26 = vmul.f32 %v10373_v8, %v13543_v62  ;;  %v5538_v50 = vadd.f32 %v5537_v22, %v5536_v60  ;;  %v15030_v62 = vld [vmem:[#allocation37_spill] sm:$0xff] }
 0x920   : > { %v5528_v19 = vrot.slane %v5527_v44, 4  ;;  %v5199_v49 = vrot.slane %v5198_v63, 2  ;;  %v10375_v11 = vpop.eup %10374  ;;  %v5526_v34 = vadd.f32 %v5525_v33, %v5524_v1  ;;  %v5120_v13 = vrot.slane %v5119_v40, 4  ;;  %v15033_v1 = vld [vmem:[#allocation62_spill] sm:$0xff]  ;;  %v10634_v33 = vld [vmem:[%s11453_s19 + $0x88] sm:$0xff] }
 0x921   : > { %10380 = vpow2.f32 %v5283_v29  ;;  %v4945_v14 = vsel %vm4881_vm12, %v13211_v39, %v4913_v17  ;;  %5863 = vperm.xlu1 %9857, %v5648_v26   ;;  %v5646_v10 = vmul.f32 %v10375_v11, %v13554_v23  ;;  %v5539_v20 = vrot.slane %v5538_v50, 1 }
 0x922   : > { %v5529_v53 = vadd.f32 %v5528_v19, %v5527_v44  ;;  %v5200_v58 = vmax.f32 %v5198_v63, %v5199_v49  ;;  %vm5594_vm11 = vcmp.gt.f32.partialorder %v5526_v34, 0.0  ;;  %v5121_v7 = vmax.f32 %v5119_v40, %v5120_v13 }
 0x923   : > { %vm15031_vm6 = vcmp.gt.f32.partialorder %v15030_v62, 0.0  ;;  %vm4896_vm13 = vcmp.ge.f32.partialorder %v13256_v48, 0.0  ;;  %5858 = vperm.xlu0 %9856, %v5646_v10   ;;  %v5626_v57 = vsel %vm5594_vm11, %v5526_v34, 1.0  ;;  %v5540_v54 = vadd.f32 %v5539_v20, %v5538_v50  ;;  %vm15035_vm11 = vmmov %vm15023_vm2  ;;  %v15037_v62 = vld [vmem:[#allocation38_spill] sm:$0xff] }
 0x924   : > { %v13627_v30 = vsel %vm15031_vm6, %v4945_v14, -1e+30  ;;  %v5530_v59 = vrot.slane %v5529_v53, 2  ;;  %v5201_v4 = vrot.slane %v5200_v58, 1  ;;  %10382 = vrcp.f32 %v5626_v57 }
 0x925   : > { %v5122_v39 = vrot.slane %v5121_v7, 2  ;;  %v5105_v23 = vsel %vm15032_vm4, %v13627_v30, -inf  ;;  %v4928_v12 = vmul.f32 0.01, %v13256_v48  ;;  %v10377_v52 = vpop.eup %10376  ;;  %vm5596_vm12 = vcmp.gt.f32.partialorder %v5540_v54, 0.0 }
 0x926   : > { %v5531_v18 = vadd.f32 %v5530_v59, %v5529_v53  ;;  %v5202_v15 = vmax.f32 %v5200_v58, %v5201_v4  ;;  %v5106_v25 = vrot.slane %v5105_v23, 4  ;;  %v10379_v41 = vpop.eup %10378  ;;  %v5682_v32 = vmul.f32 %v10377_v52, %v13562_v43 }
 0x927   : > { %v5628_v35 = vsel %vm5596_vm12, %v5540_v54, 1.0  ;;  %v5123_v46 = vmax.f32 %v5121_v7, %v5122_v39  ;;  %v4960_v2 = vsel %vm4896_vm13, %v13256_v48, %v4928_v12  ;;  %v13638_v21 = vmul.f32 %v10633_v36, %v10379_v41  ;;  %vm15036_vm13 = vmmov %vm15023_vm2 }
 0x928   : > { %10384 = vrcp.f32 %v5628_v35  ;;  %v5532_v51 = vrot.slane %v5531_v18, 1  ;;  %v5246_v16 = vsub.f32 %v13595_v3, %v5202_v15  ;;  %5948 = vperm.xlu1 %9857, %v5682_v32   ;;  %v5107_v38 = vmax.f32 %v5105_v23, %v5106_v25 }
 0x929   : > { %v5124_v60 = vrot.slane %v5123_v46, 1  ;;  %vm15034_vm8 = vcmp.gt.f32.partialorder %v15033_v1, 0.0  ;;  %vm4884_vm15 = vcmp.ge.f32.partialorder %v13220_v61, 0.0  ;;  %v5541_v48 = vsel %vm15023_vm2, %v13638_v21, 0.0  ;;  %v10635_v1 = vld [vmem:[%s11453_s19 + $0xe8] sm:$0xff] }
 0x92a   : > { %v13643_v43 = vsel %vm15034_vm8, %v4960_v2, -1e+30  ;;  %v5533_v24 = vadd.f32 %v5532_v51, %v5531_v18  ;;  %v5307_v0 = vmul.f32 1.442695, %v5246_v16  ;;  %v5542_v3 = vrot.slane %v5541_v48, 4  ;;  %vm15039_vm8 = vmmov %vm15023_vm2  ;;  %v15040_v51 = vld [vmem:[#allocation43_spill] sm:$0xff] }
 0x92b   : > { %v5210_v22 = vsel %vm15035_vm11, %v13643_v43, -inf  ;;  %v10381_v63 = vpop.eup %10380  ;;  %v5125_v9 = vmax.f32 %v5123_v46, %v5124_v60  ;;  %v5108_v17 = vrot.slane %v5107_v38, 2  ;;  %v4916_v29 = vmul.f32 0.01, %v13220_v61  ;;  %vm15042_vm11 = vmmov %vm15039_vm8 }
 0x92c   : > { %v5211_v8 = vrot.slane %v5210_v22, 4  ;;  %vm5595_vm6 = vcmp.gt.f32.partialorder %v5533_v24, 0.0  ;;  %v13651_v44 = vmul.f32 %v10634_v33, %v10381_v63  ;;  %10386 = vpow2.f32 %v5307_v0 }
 0x92d   : > { %v5627_v40 = vsel %vm5595_vm6, %v5533_v24, 1.0  ;;  %v5543_v26 = vadd.f32 %v5542_v3, %v5541_v48  ;;  %v5235_v50 = vsub.f32 %v13613_v27, %v5125_v9  ;;  %v5109_v19 = vmax.f32 %v5107_v38, %v5108_v17 }
 0x92e   : > { %10388 = vrcp.f32 %v5627_v40  ;;  %v5464_v49 = vsel %vm15036_vm13, %v13651_v44, 0.0  ;;  %v5212_v11 = vmax.f32 %v5210_v22, %v5211_v8  ;;  %v4948_v34 = vsel %vm4884_vm15, %v13220_v61, %v4916_v29  ;;  %v10383_v13 = vpop.eup %10382  ;;  %vm15043_vm13 = vmmov %vm15039_vm8 }
 0x92f   : > { %v5544_v14 = vrot.slane %v5543_v26, 2  ;;  %v5465_v10 = vrot.slane %v5464_v49, 4  ;;  %v5285_v20 = vmul.f32 1.442695, %v5235_v50  ;;  %v5110_v53 = vrot.slane %v5109_v19, 1 }
 0x930   : > { %v5684_v58 = vmul.f32 %v10383_v13, %v13584_v28  ;;  %v5213_v7 = vrot.slane %v5212_v11, 2  ;;  %vm15038_vm4 = vcmp.gt.f32.partialorder %v15037_v62, 0.0  ;;  %vm4885_vm12 = vcmp.ge.f32.partialorder %v13223_v47, 0.0 }
 0x931   : > { %v13663_v27 = vsel %vm15038_vm4, %v4948_v34, -1e+30  ;;  %v5545_v57 = vadd.f32 %v5544_v14, %v5543_v26  ;;  %v5466_v54 = vadd.f32 %v5465_v10, %v5464_v49  ;;  %10390 = vpow2.f32 %v5285_v20  ;;  %v10636_v49 = vld [vmem:[%s11453_s19 + $0x90] sm:$0xff] }
 0x932   : > { %v5111_v59 = vmax.f32 %v5109_v19, %v5110_v53  ;;  %v10385_v4 = vpop.eup %10384  ;;  %5953 = vperm.xlu0 %9856, %v5684_v58   ;;  %v5214_v61 = vmax.f32 %v5212_v11, %v5213_v7  ;;  %v5126_v39 = vsel %vm15039_vm8, %v13663_v27, -inf  ;;  %v4917_v23 = vmul.f32 0.01, %v13223_v47 }
 0x933   : > { %vm4895_vm15 = vcmp.ge.f32.partialorder %v13253_v6, 0.0  ;;  %v5688_v28 = vmul.f32 %v10385_v4, %v13590_v42  ;;  %v5546_v12 = vrot.slane %v5545_v57, 1  ;;  %v5467_v52 = vrot.slane %v5466_v54, 2 }
 0x934   : > { %v5233_v18 = vsub.f32 %v13627_v30, %v5111_v59  ;;  %v5215_v15 = vrot.slane %v5214_v61, 1  ;;  %v5127_v25 = vrot.slane %v5126_v39, 4  ;;  %v4949_v41 = vsel %vm4885_vm12, %v13223_v47, %v4917_v23 }
 0x935   : > { %v4927_v32 = vmul.f32 0.01, %v13253_v6  ;;  %5963 = vperm.xlu1 %9857, %v5688_v28   ;;  %v5547_v35 = vadd.f32 %v5546_v12, %v5545_v57  ;;  %v5468_v46 = vadd.f32 %v5467_v52, %v5466_v54  ;;  %vm15041_vm2 = vcmp.gt.f32.partialorder %v15040_v51, 0.0  ;;  %v15047_v57 = vld [vmem:[#allocation42_spill] sm:$0xff] }
 0x936   : > { %v5281_v2 = vmul.f32 1.442695, %v5233_v18  ;;  %v13678_v42 = vsel %vm15041_vm2, %v4949_v41, -1e+30  ;;  %v10387_v36 = vpop.eup %10386  ;;  %v5216_v16 = vmax.f32 %v5214_v61, %v5215_v15  ;;  %v5128_v30 = vmax.f32 %v5126_v39, %v5127_v25  ;;  %vm15046_vm2 = vmmov %vm15042_vm11  ;;  %v10637_v18 = vld [vmem:[%s11453_s19 + $0x80] sm:$0xff] }
 0x937   : > { %v5133_v60 = vsel %vm15042_vm11, %v13678_v42, -inf  ;;  %v4959_v47 = vsel %vm4895_vm15, %v13253_v6, %v4927_v32  ;;  %vm5597_vm6 = vcmp.gt.f32.partialorder %v5547_v35, 0.0  ;;  %v5469_v38 = vrot.slane %v5468_v46, 1  ;;  %vm15045_vm15 = vmmov %vm15042_vm11 }
 0x938   : > { %v13686_v24 = vmul.f32 %v10635_v1, %v10387_v36  ;;  %10392 = vpow2.f32 %v5281_v2  ;;  %v10389_v48 = vpop.eup %10388  ;;  %v5629_v0 = vsel %vm5597_vm6, %v5547_v35, 1.0  ;;  %v5248_v22 = vsub.f32 %v13643_v43, %v5216_v16  ;;  %vm15049_vm6 = vmmov %vm15046_vm2 }
 0x939   : > { %v5129_v63 = vrot.slane %v5128_v30, 2  ;;  %v5134_v3 = vrot.slane %v5133_v60, 4  ;;  %v5686_v9 = vmul.f32 %v10389_v48, %v13608_v45  ;;  %10394 = vrcp.f32 %v5629_v0 }
 0x93a   : > { %v5470_v17 = vadd.f32 %v5469_v38, %v5468_v46  ;;  %v5548_v6 = vsel %vm15043_vm13, %v13686_v24, 0.0  ;;  %v5311_v33 = vmul.f32 1.442695, %v5248_v22  ;;  %vm15044_vm12 = vcmp.gt.f32.partialorder %v12054_v31, 0.0 }
 0x93b   : > { %v5549_v8 = vrot.slane %v5548_v6, 4  ;;  %v5130_v29 = vmax.f32 %v5128_v30, %v5129_v63  ;;  %v5135_v40 = vmax.f32 %v5133_v60, %v5134_v3  ;;  %v10391_v26 = vpop.eup %10390  ;;  %5958 = vperm.xlu0 %9856, %v5686_v9   ;;  %v13694_v43 = vsel %vm15044_vm12, %v4959_v47, -1e+30 }
 0x93c   : > { %vm5586_vm4 = vcmp.gt.f32.partialorder %v5470_v17, 0.0  ;;  %vm4886_vm8 = vcmp.ge.f32.partialorder %v13226_v55, 0.0  ;;  %v4918_v45 = vmul.f32 0.01, %v13226_v55  ;;  %v13699_v11 = vmul.f32 %v10636_v49, %v10391_v26 }
 0x93d   : > { %v5618_v50 = vsel %vm5586_vm4, %v5470_v17, 1.0  ;;  %v5550_v19 = vadd.f32 %v5549_v8, %v5548_v6  ;;  %10396 = vpow2.f32 %v5311_v33  ;;  %v5131_v34 = vrot.slane %v5130_v29, 1  ;;  %vm15050_vm4 = vmmov %vm15046_vm2  ;;  %v10638_v17 = vld [vmem:[%s11453_s19 + $0xf8] sm:$0xff] }
 0x93e   : > { %10398 = vrcp.f32 %v5618_v50  ;;  %v5136_v13 = vrot.slane %v5135_v40, 2  ;;  %v5203_v14 = vsel %vm15045_vm15, %v13694_v43, -inf  ;;  %v5471_v31 = vsel %vm15046_vm2, %v13699_v11, 0.0 }
 0x93f   : > { %v5551_v10 = vrot.slane %v5550_v19, 2  ;;  %v5204_v20 = vrot.slane %v5203_v14, 4  ;;  %v4950_v53 = vsel %vm4886_vm8, %v13226_v55, %v4918_v45  ;;  %v5472_v58 = vrot.slane %v5471_v31, 4  ;;  %vm15051_vm8 = vmmov %vm15046_vm2 }
 0x940   : > { %v5132_v7 = vmax.f32 %v5130_v29, %v5131_v34  ;;  %v5137_v62 = vmax.f32 %v5135_v40, %v5136_v13  ;;  %vm15048_vm11 = vcmp.gt.f32.partialorder %v15047_v57, 0.0  ;;  %vm4887_vm13 = vcmp.ge.f32.partialorder %v13229_v5, 0.0 }
 0x941   : > { %v13708_v54 = vsel %vm15048_vm11, %v4950_v53, -1e+30  ;;  %v5552_v59 = vadd.f32 %v5551_v10, %v5550_v19  ;;  %v5205_v4 = vmax.f32 %v5203_v14, %v5204_v20  ;;  %v5473_v23 = vadd.f32 %v5472_v58, %v5471_v31  ;;  %v15052_v19 = vld [vmem:[#allocation46_spill] sm:$0xff]  ;;  %vm15054_vm11 = vmmov %vm15050_vm4 }
 0x942   : > { %v5140_v61 = vsel %vm15049_vm6, %v13708_v54, -inf  ;;  %v10393_v39 = vpop.eup %10392  ;;  %v5236_v28 = vsub.f32 %v13663_v27, %v5132_v7  ;;  %v5138_v12 = vrot.slane %v5137_v62, 1  ;;  %v4919_v41 = vmul.f32 0.01, %v13229_v5 }
 0x943   : > { %v5141_v55 = vrot.slane %v5140_v61, 4  ;;  %v5553_v52 = vrot.slane %v5552_v59, 1  ;;  %v13715_v15 = vmul.f32 %v10637_v18, %v10393_v39  ;;  %v5206_v25 = vrot.slane %v5205_v4, 2  ;;  %v10395_v32 = vpop.eup %10394  ;;  %v10639_v39 = vld [vmem:[%s11453_s19 + $0x98] sm:$0xff] }
 0x944   : > { %v5474_v35 = vrot.slane %v5473_v23, 2  ;;  %v5287_v46 = vmul.f32 1.442695, %v5236_v28  ;;  %v5139_v2 = vmax.f32 %v5137_v62, %v5138_v12  ;;  %v5690_v36 = vmul.f32 %v10395_v32, %v13638_v21 }
 0x945   : > { %v5142_v51 = vmax.f32 %v5140_v61, %v5141_v55  ;;  %v5554_v16 = vadd.f32 %v5553_v52, %v5552_v59  ;;  %v5457_v27 = vsel %vm15050_vm4, %v13715_v15, 0.0  ;;  %v5207_v30 = vmax.f32 %v5205_v4, %v5206_v25  ;;  %v15055_v52 = vld [vmem:[#allocation44_spill] sm:$0xff] }
 0x946   : > { %v5475_v60 = vadd.f32 %v5474_v35, %v5473_v23  ;;  %v5458_v47 = vrot.slane %v5457_v27, 4  ;;  %10400 = vpow2.f32 %v5287_v46  ;;  %v5237_v38 = vsub.f32 %v13678_v42, %v5139_v2  ;;  %5968 = vperm.xlu1 %9857, %v5690_v36  }
 0x947   : > { %v10397_v1 = vpop.eup %10396  ;;  %vm5598_vm12 = vcmp.gt.f32.partialorder %v5554_v16, 0.0  ;;  %v5208_v48 = vrot.slane %v5207_v30, 1  ;;  %v5143_v0 = vrot.slane %v5142_v51, 2  ;;  %v4951_v21 = vsel %vm4887_vm13, %v13229_v5, %v4919_v41 }
 0x948   : > { %v10399_v22 = vpop.eup %10398  ;;  %v5630_v63 = vsel %vm5598_vm12, %v5554_v16, 1.0  ;;  %v5476_v3 = vrot.slane %v5475_v60, 1  ;;  %v5459_v9 = vadd.f32 %v5458_v47, %v5457_v27  ;;  %v13726_v6 = vmul.f32 %v10638_v17, %v10397_v1  ;;  %vm15057_vm12 = vmmov %vm15051_vm8 }
 0x949   : > { %v5668_v8 = vmul.f32 %v10399_v22, %v13651_v44  ;;  %10402 = vrcp.f32 %v5630_v63  ;;  %v5289_v42 = vmul.f32 1.442695, %v5237_v38  ;;  %v5209_v33 = vmax.f32 %v5207_v30, %v5208_v48 }
 0x94a   : > { %v5477_v29 = vadd.f32 %v5476_v3, %v5475_v60  ;;  %v5460_v40 = vrot.slane %v5459_v9, 2  ;;  %v5562_v26 = vsel %vm15051_vm8, %v13726_v6, 0.0  ;;  %v5144_v45 = vmax.f32 %v5142_v51, %v5143_v0  ;;  %v10640_v60 = vld [vmem:[%s11453_s19 + $0xa0] sm:$0xff] }
 0x94b   : > { %5913 = vperm.xlu0 %9856, %v5668_v8   ;;  %v5563_v5 = vrot.slane %v5562_v26, 4  ;;  %10404 = vpow2.f32 %v5289_v42  ;;  %v5247_v50 = vsub.f32 %v13694_v43, %v5209_v33  ;;  %vm15053_vm15 = vcmp.gt.f32.partialorder %v15052_v19, 0.0  ;;  %v10641_v8 = vld [vmem:[%s11453_s19 + $0xf0] sm:$0xff] }
 0x94c   : > { %v13734_v49 = vsel %vm15053_vm15, %v4951_v21, -1e+30  ;;  %vm5587_vm2 = vcmp.gt.f32.partialorder %v5477_v29, 0.0  ;;  %v5461_v44 = vadd.f32 %v5460_v40, %v5459_v9  ;;  %v5145_v34 = vrot.slane %v5144_v45, 1 }
 0x94d   : > { %v5147_v13 = vsel %vm15054_vm11, %v13734_v49, -inf  ;;  %v5619_v14 = vsel %vm5587_vm2, %v5477_v29, 1.0  ;;  %v5564_v10 = vadd.f32 %v5563_v5, %v5562_v26  ;;  %v5309_v31 = vmul.f32 1.442695, %v5247_v50  ;;  %vm15058_vm2 = vmmov %vm15051_vm8 }
 0x94e   : > { %v5148_v20 = vrot.slane %v5147_v13, 4  ;;  %10406 = vrcp.f32 %v5619_v14  ;;  %v5462_v53 = vrot.slane %v5461_v44, 1  ;;  %v5146_v58 = vmax.f32 %v5144_v45, %v5145_v34  ;;  %vm15059_vm11 = vmmov %vm15058_vm2 }
 0x94f   : > { %vm4888_vm6 = vcmp.ge.f32.partialorder %v13232_v56, 0.0  ;;  %v5565_v43 = vrot.slane %v5564_v10, 2  ;;  %10408 = vpow2.f32 %v5309_v31  ;;  %v4920_v62 = vmul.f32 0.01, %v13232_v56 }
 0x950   : > { %v5149_v7 = vmax.f32 %v5147_v13, %v5148_v20  ;;  %v10401_v57 = vpop.eup %10400  ;;  %v5463_v59 = vadd.f32 %v5462_v53, %v5461_v44  ;;  %v5238_v4 = vsub.f32 %v13708_v54, %v5146_v58  ;;  %vm15056_vm4 = vcmp.gt.f32.partialorder %v15055_v52, 0.0  ;;  %v13766_v44 = vpop.permute.xlu1 %5738  ;;  %v10642_v20 = vld [vmem:[%s11453_s19 + $0xa8] sm:$0xff] }
 0x951   : > { %v5566_v61 = vadd.f32 %v5565_v43, %v5564_v10  ;;  %v13742_v23 = vmul.f32 %v10639_v39, %v10401_v57  ;;  %v4952_v12 = vsel %vm4888_vm6, %v13232_v56, %v4920_v62 }
 0x952   : > { %v5150_v28 = vrot.slane %v5149_v7, 2  ;;  %vm5585_vm13 = vcmp.gt.f32.partialorder %v5463_v59, 0.0  ;;  %v5291_v55 = vmul.f32 1.442695, %v5238_v4  ;;  %v13747_v18 = vsel %vm15056_vm4, %v4952_v12, -1e+30 }
 0x953   : > { %v10403_v25 = vpop.eup %10402  ;;  %v5617_v41 = vsel %vm5585_vm13, %v5463_v59, 1.0  ;;  %v5567_v32 = vrot.slane %v5566_v61, 1  ;;  %v5478_v54 = vsel %vm15057_vm12, %v13742_v23, 0.0  ;;  %v5154_v56 = vsel %vm15051_vm8, %v13747_v18, -inf  ;;  %vm15060_vm13 = vmmov %vm15058_vm2 }
 0x954   : > { %v5151_v35 = vmax.f32 %v5149_v7, %v5150_v28  ;;  %v5692_v46 = vmul.f32 %v10403_v25, %v13686_v24  ;;  %10410 = vrcp.f32 %v5617_v41  ;;  %v5479_v2 = vrot.slane %v5478_v54, 4  ;;  %v13775_v4 = vpop.permute.xlu1 %9924  ;;  %vm15061_vm8 = vmmov %vm15058_vm2 }
 0x955   : > { %v10405_v51 = vpop.eup %10404  ;;  %v5568_v36 = vadd.f32 %v5567_v32, %v5566_v61  ;;  %10412 = vpow2.f32 %v5291_v55  ;;  %v5155_v27 = vrot.slane %v5154_v56, 4 }
 0x956   : > { %v5152_v16 = vrot.slane %v5151_v35, 1  ;;  %5973 = vperm.xlu1 %9857, %v5692_v46   ;;  %v5480_v30 = vadd.f32 %v5479_v2, %v5478_v54  ;;  %v13755_v47 = vmul.f32 %v10640_v60, %v10405_v51  ;;  %v10643_v46 = vld [vmem:[%s11453_s19 + $0xb0] sm:$0xff] }
 0x957   : > { %vm5600_vm15 = vcmp.gt.f32.partialorder %v5568_v36, 0.0  ;;  %v5156_v1 = vmax.f32 %v5154_v56, %v5155_v27 }
 0x958   : > { %v5153_v38 = vmax.f32 %v5151_v35, %v5152_v16  ;;  %v10407_v24 = vpop.eup %10406  ;;  %v5632_v48 = vsel %vm5600_vm15, %v5568_v36, 1.0  ;;  %v5481_v0 = vrot.slane %v5480_v30, 2  ;;  %v5485_v21 = vsel %vm15058_vm2, %v13755_v47, 0.0  ;;  %v13778_v32 = vpop.permute.xlu1 %5868 }
 0x959   : > { %v10409_v22 = vpop.eup %10408  ;;  %v5670_v63 = vmul.f32 %v10407_v24, %v13699_v11  ;;  %10414 = vrcp.f32 %v5632_v48  ;;  %v5486_v3 = vrot.slane %v5485_v21, 4  ;;  %v5157_v33 = vrot.slane %v5156_v1, 2  ;;  %v13788_v24 = vpop.permute.xlu0 %9919 }
 0x95a   : > { %v5239_v9 = vsub.f32 %v13734_v49, %v5153_v38  ;;  %v5482_v17 = vadd.f32 %v5481_v0, %v5480_v30  ;;  %v13762_v42 = vmul.f32 %v10641_v8, %v10409_v22 }
 0x95b   : > { %5918 = vperm.xlu0 %9856, %v5670_v63   ;;  %v5487_v29 = vadd.f32 %v5486_v3, %v5485_v21  ;;  %v5158_v5 = vmax.f32 %v5156_v1, %v5157_v33  ;;  %v10644_v3 = vld [vmem:[%s11453_s19 + $0xb8] sm:$0xff]  ;;  %s14197_s19 = scalar_lea.vmem %s14669_s3, %s8988_s13  ;;  %s10740_s13 = smov 60  }
 0x95c   : > { %v5293_v40 = vmul.f32 1.442695, %v5239_v9  ;;  %v5483_v26 = vrot.slane %v5482_v17, 1  ;;  %v5555_v45 = vsel %vm15059_vm11, %v13762_v42, 0.0  ;;  %v13785_v30 = vpop.permute.xlu1 %5893 }
 0x95d   : > { %v5488_v50 = vrot.slane %v5487_v29, 2  ;;  %v5556_v11 = vrot.slane %v5555_v45, 4  ;;  %v5159_v34 = vrot.slane %v5158_v5, 1 }
 0x95e   : > { %10416 = vpow2.f32 %v5293_v40  ;;  %v10411_v19 = vpop.eup %10410  ;;  %v5484_v49 = vadd.f32 %v5483_v26, %v5482_v17  ;;  %v13793_v17 = vpop.permute.xlu0 %5873 }
 0x95f   : > { %v10413_v13 = vpop.eup %10412  ;;  %v5666_v14 = vmul.f32 %v10411_v19, %v13715_v15  ;;  %v5489_v10 = vadd.f32 %v5488_v50, %v5487_v29  ;;  %v5557_v31 = vadd.f32 %v5556_v11, %v5555_v45  ;;  %v5160_v58 = vmax.f32 %v5158_v5, %v5159_v34  ;;  %v6438_v5 = vld [vmem:[%s14672_s6 + $0x90] sm:$0xff]  ;;  %v6439_v50 = vld [vmem:[%s14672_s6 + $0x98] sm:$0xff] }
 0x960   : > { %vm5588_vm6 = vcmp.gt.f32.partialorder %v5484_v49, 0.0  ;;  %v13770_v53 = vmul.f32 %v10642_v20, %v10413_v13  ;;  %v9928_v13 = vpack.i.bf16 %v6439_v50, %v6438_v5 }
 0x961   : > { %5908 = vperm.xlu1 %9857, %v5666_v14   ;;  %v5620_v43 = vsel %vm5588_vm6, %v5484_v49, 1.0  ;;  %v5490_v7 = vrot.slane %v5489_v10, 1  ;;  %v5558_v62 = vrot.slane %v5557_v31, 2  ;;  %v5240_v59 = vsub.f32 %v13747_v18, %v5160_v58 }
 0x962   : > { %10418 = vrcp.f32 %v5620_v43  ;;  %v5492_v57 = vsel %vm15060_vm13, %v13770_v53, 0.0  ;;  %v13807_v19 = vpop.permute.xlu0 %5878  ;;  %v10646_v43 = vld [vmem:[%s14672_s6 + $0x50] sm:$0xff] }
 0x963   : > { %v10415_v15 = vpop.eup %10414  ;;  %v5491_v61 = vadd.f32 %v5490_v7, %v5489_v10  ;;  %v5559_v39 = vadd.f32 %v5558_v62, %v5557_v31  ;;  %v5493_v28 = vrot.slane %v5492_v57, 4  ;;  %v5295_v55 = vmul.f32 1.442695, %v5240_v59 }
 0x964   : > { %v5696_v12 = vmul.f32 %v10415_v15, %v13726_v6 }
 0x965   : > { %vm5589_vm4 = vcmp.gt.f32.partialorder %v5491_v61, 0.0  ;;  %v5560_v52 = vrot.slane %v5559_v39, 1  ;;  %v5494_v25 = vadd.f32 %v5493_v28, %v5492_v57  ;;  %10420 = vpow2.f32 %v5295_v55 }
 0x966   : > { %5983 = vperm.xlu0 %9856, %v5696_v12   ;;  %v5621_v41 = vsel %vm5589_vm4, %v5491_v61, 1.0  ;;  %v13817_v62 = vpop.permute.xlu0 %5883  ;;  %v9927_v61 = vunpack.i.h.bf16 %v13775_v4  ;;  %v9922_v28 = vunpack.i.h.bf16 %v13788_v24  ;;  %v9921_v12 = vunpack.i.l.bf16 %v13788_v24 }
 0x967   : > { %10422 = vrcp.f32 %v5621_v41  ;;  %v5561_v18 = vadd.f32 %v5560_v52, %v5559_v39  ;;  %v5495_v35 = vrot.slane %v5494_v25, 2  ;;  %v9926_v39 = vunpack.i.l.bf16 %v13775_v4 }
 0x968   : > { %v10417_v54 = vpop.eup %10416 }
 0x969   : > { %v13781_v2 = vmul.f32 %v10643_v46, %v10417_v54  ;;  %vm5599_vm12 = vcmp.gt.f32.partialorder %v5561_v18, 0.0  ;;  %v5496_v56 = vadd.f32 %v5495_v35, %v5494_v25  ;;  %v6659_v35 = vsel %vm5729_vm1, %v9926_v39, %v9927_v61 }
 0x96a   : > { %v5631_v51 = vsel %vm5599_vm12, %v5561_v18, 1.0  ;;  %v13829_v25 = vpop.permute.xlu0 %5888  ;;  %v6658_v18 = vsel %vm5729_vm1, %v9921_v12, %v9922_v28 }
 0x96b   : > { %v5499_v6 = vsel %vm15061_vm8, %v13781_v2, 0.0  ;;  %10424 = vrcp.f32 %v5631_v51  ;;  %v5497_v36 = vrot.slane %v5496_v56, 1 }
 0x96c   : > { %v5500_v16 = vrot.slane %v5499_v6, 4  ;;  %v10419_v27 = vpop.eup %10418 }
 0x96d   : > { %v5672_v60 = vmul.f32 %v10419_v27, %v13742_v23  ;;  %v5498_v38 = vadd.f32 %v5497_v36, %v5496_v56  ;;  %v13796_v23 = vpop.permute.xlu1 %5903  ;;  %v9691_v56 = vpack.c.bf16 %v6659_v35, %v6658_v18  ;;  %v6440_v27 = vld [vmem:[%s14672_s6 + $0xd0] sm:$0xff] }
 0x96e   : > { %v5501_v1 = vadd.f32 %v5500_v16, %v5499_v6 }
 0x96f   : > { %5923 = vperm.xlu1 %9857, %v5672_v60   ;;  %vm5590_vm15 = vcmp.gt.f32.partialorder %v5498_v38, 0.0  ;;  %v10421_v0 = vpop.eup %10420  ;;  %9692 = vmatprep.subr.bf16.mxu0 %v9691_v56  ;;  %v6441_v60 = vld [vmem:[%s14672_s6 + $0xd8] sm:$0xff] }
 0x970   : > { %v5502_v48 = vrot.slane %v5501_v1, 2  ;;  %v5622_v21 = vsel %vm5590_vm15, %v5498_v38, 1.0  ;;  %v13791_v9 = vmul.f32 %v10644_v3, %v10421_v0  ;;  %9694 = vmatpush3.bf16.msra.mxu0 %v9691_v56  ;;  %v9933_v0 = vpack.i.bf16 %v6441_v60, %v6440_v27 }
 0x971   : > { %v10423_v22 = vpop.eup %10422  ;;  %10426 = vrcp.f32 %v5622_v21  ;;  %v5834_v14 = vpop.permute.xlu1 %5833 }
 0x972   : > { %v5503_v63 = vadd.f32 %v5502_v48, %v5501_v1  ;;  %v5674_v8 = vmul.f32 %v10423_v22, %v13755_v47  ;;  %v5506_v29 = vsel %vm15058_vm2, %v13791_v9, 0.0 }
 0x973   : > { %v5507_v40 = vrot.slane %v5506_v29, 4 }
 0x974   : > { %v5504_v33 = vrot.slane %v5503_v63, 1  ;;  %5928 = vperm.xlu0 %9856, %v5674_v8  }
 0x975   : > { %v10425_v26 = vpop.eup %10424  ;;  %v5508_v11 = vadd.f32 %v5507_v40, %v5506_v29  ;;  %v5844_v59 = vpop.permute.xlu1 %5843 }
 0x976   : > { %v5505_v45 = vadd.f32 %v5504_v33, %v5503_v63  ;;  %v5694_v47 = vmul.f32 %v10425_v26, %v13762_v42  ;;  %v10645_v42 = vld [vmem:[%s14672_s6 + $0x10] sm:$0xff]  ;;  %v13838_v6 = vpop.permute.xlu0 %5898 }
 0x977   : > { %v5509_v34 = vrot.slane %v5508_v11, 2  ;;  %v9938_v7 = vpack.i.bf16 %v10646_v43, %v10645_v42  ;;  %v10647_v33 = vld [vmem:[%s14672_s6 + $0x90] sm:$0xff] }
 0x978   : > { %vm5591_vm11 = vcmp.gt.f32.partialorder %v5505_v45, 0.0  ;;  %5978 = vperm.xlu1 %9857, %v5694_v47  }
 0x979   : > { %v5623_v49 = vsel %vm5591_vm11, %v5505_v45, 1.0  ;;  %v5510_v10 = vadd.f32 %v5509_v34, %v5508_v11 }
 0x97a   : > { %10428 = vrcp.f32 %v5623_v49 }
 0x97b   : > { %v10427_v31 = vpop.eup %10426  ;;  %v5511_v58 = vrot.slane %v5510_v10, 1 }
 0x97c   : > { %v5676_v20 = vmul.f32 %v10427_v31, %v13770_v53  ;;  %9929 = vrot.lane.b32.xlu1 %v9928_v13, %s14940_s10  ;;  %v13822_v53 = vadd.f32 %v13031_v37, %v13766_v44 }
 0x97d   : > { %v5512_v57 = vadd.f32 %v5511_v58, %v5510_v10 }
 0x97e   : > { %5933 = vperm.xlu0 %9856, %v5676_v20   ;;  %v5987_v52 = vmul.f32 %v5834_v14, %v13822_v53  ;;  %v5989_v37 = vmul.f32 %v5844_v59, %v13822_v53 }
 0x97f   : > { %vm5592_vm6 = vcmp.gt.f32.partialorder %v5512_v57, 0.0 }
 0x980   : > { %9939 = vrot.lane.b32.xlu1 %v9938_v7, %s14785_s18  ;;  %v5624_v15 = vsel %vm5592_vm6, %v5512_v57, 1.0  ;;  %v5849_v54 = vpop.permute.xlu1 %5848  ;;  %v6025_v4 = vsel %vm1202_vm7, %v5987_v52, 0.0  ;;  %v6039_v51 = vsel %vm1202_vm7, %v5989_v37, 0.0 }
 0x981   : > { %10430 = vrcp.f32 %v5624_v15  ;;  %v5990_v46 = vmul.f32 %v5849_v54, %v13822_v53  ;;  %v6026_v36 = vrot.slane %v6025_v4, 4  ;;  %v6040_v38 = vrot.slane %v6039_v51, 4 }
 0x983   : > { %v6027_v24 = vadd.f32 %v6026_v36, %v6025_v4  ;;  %v6041_v22 = vadd.f32 %v6040_v38, %v6039_v51 }
 0x984   : > { %v10429_v55 = vpop.eup %10428 }
 0x985   : > { %v5678_v41 = vmul.f32 %v10429_v55, %v13781_v2  ;;  %v6046_v2 = vsel %vm1202_vm7, %v5990_v46, 0.0  ;;  %v6028_v3 = vrot.slane %v6027_v24, 2  ;;  %v6042_v26 = vrot.slane %v6041_v22, 2 }
 0x986   : > { %v6047_v48 = vrot.slane %v6046_v2, 4 }
 0x987   : > { %5938 = vperm.xlu0 %9856, %v5678_v41   ;;  %v6029_v5 = vadd.f32 %v6028_v3, %v6027_v24  ;;  %v6043_v49 = vadd.f32 %v6042_v26, %v6041_v22 }
 0x988   : > { %v6048_v8 = vadd.f32 %v6047_v48, %v6046_v2 }
 0x989   : > { %v6030_v14 = vrot.slane %v6029_v5, 1  ;;  %v6044_v43 = vrot.slane %v6043_v49, 1 }
 0x98a   : > { %v6049_v50 = vrot.slane %v6048_v8, 2 }
 0x98b   : > { %v10431_v16 = vpop.eup %10430  ;;  %v13861_v15 = vadd.f32 %v6030_v14, %v6029_v5  ;;  %v13866_v52 = vadd.f32 %v6044_v43, %v6043_v49  ;;  %v6443_v43 = vld [vmem:[%s14673_s7 + $0x3] sm:$0x3] }
 0x98c   : > { %v5680_v1 = vmul.f32 %v10431_v16, %v13791_v9  ;;  %v5829_v21 = vpop.permute.xlu0 %5828  ;;  %v10648_v9 = vld [vmem:[%s14672_s6 + $0xd0] sm:$0xff]  ;;  %v6050_v10 = vadd.f32 %v6049_v50, %v6048_v8 }
 0x98d   : > { %v5986_v63 = vmul.f32 %v5829_v21, %v13822_v53  ;;  %v9943_v29 = vpack.i.bf16 %v10648_v9, %v10647_v33  ;;  %v6275_v18 = vmin.f32 %v13861_v15, 0.0  ;;  %v6277_v36 = vmin.f32 %v13866_v52, 0.0 }
 0x98e   : > { %5943 = vperm.xlu0 %9856, %v5680_v1   ;;  %v6051_v61 = vrot.slane %v6050_v10, 1  ;;  %vm6243_vm4 = vcmp.gt.f32.partialorder %v13861_v15, 0.0  ;;  %vm6245_vm8 = vcmp.gt.f32.partialorder %v13866_v52, 0.0 }
 0x98f   : > { %v6018_v40 = vsel %vm1202_vm7, %v5986_v63, 0.0  ;;  %v6308_v24 = vmul.f32 1.442695, %v6275_v18  ;;  %v6312_v63 = vmul.f32 1.442695, %v6277_v36 }
 0x990   : > { %v6019_v45 = vrot.slane %v6018_v40, 4  ;;  %v13870_v35 = vadd.f32 %v6051_v61, %v6050_v10  ;;  %v15064_v61 = vld [vmem:[#allocation53_spill] sm:$0xff] }
 0x992   : > { %9934 = vrot.lane.b32.xlu0 %v9933_v0, %s14940_s10  ;;  %v6020_v47 = vadd.f32 %v6019_v45, %v6018_v40  ;;  %v6278_v48 = vmin.f32 %v13870_v35, 0.0  ;;  %vm6246_vm15 = vcmp.gt.f32.partialorder %v13870_v35, 0.0 }
 0x994   : > { %v6021_v34 = vrot.slane %v6020_v47, 2 }
 0x995   : > { %v5854_v11 = vpop.permute.xlu1 %5853 }
 0x996   : > { %9944 = vrot.lane.b32.xlu0 %v9943_v29, %s14785_s18  ;;  %v5991_v13 = vmul.f32 %v5854_v11, %v13822_v53  ;;  %v6022_v31 = vadd.f32 %v6021_v34, %v6020_v47  ;;  %v6314_v29 = vmul.f32 1.442695, %v6278_v48  ;;  %v15062_v11 = vld [vmem:[#allocation56_spill] sm:$0xff]  ;;  %s10747_s18 = smov 89  }
 0x997   : > { %v13886_v49 = vadd.f32 %v15062_v11, %v13766_v44 }
 0x998   : > { %v6053_v20 = vsel %vm1202_vm7, %v5991_v13, 0.0  ;;  %v6023_v7 = vrot.slane %v6022_v31, 1 }
 0x999   : > { %v6054_v58 = vrot.slane %v6053_v20, 4  ;;  %v5839_v42 = vpop.permute.xlu0 %5838  ;;  %v5994_v14 = vmul.f32 %v13778_v32, %v13886_v49  ;;  %v5995_v32 = vmul.f32 %v13793_v17, %v13886_v49 }
 0x99a   : > { %v5988_v57 = vmul.f32 %v5839_v42, %v13822_v53  ;;  %v13863_v39 = vadd.f32 %v6023_v7, %v6022_v31  ;;  %v6442_v7 = vld [vmem:[%s14673_s7 + $0x2] sm:$0x3] }
 0x99b   : > { %v6055_v59 = vadd.f32 %v6054_v58, %v6053_v20  ;;  %v6081_v36 = vsel %vm1202_vm7, %v5995_v32, 0.0 }
 0x99c   : > { %v6032_v28 = vsel %vm1202_vm7, %v5988_v57, 0.0  ;;  %v6274_v41 = vmin.f32 %v13863_v39, 0.0  ;;  %v15063_v57 = vld [vmem:[#allocation11_spill] sm:$0xff]  ;;  %vm6242_vm13 = vcmp.gt.f32.partialorder %v13863_v39, 0.0 }
 0x99d   : > { %v6056_v12 = vrot.slane %v6055_v59, 2  ;;  %v6033_v55 = vrot.slane %v6032_v28, 4  ;;  %v6448_v18 = vrot.slane %v6442_v7, %v15063_v57 }
 0x99e   : > { %v6306_v2 = vmul.f32 1.442695, %v6274_v41 }
 0x99f   : > { %v6057_v54 = vadd.f32 %v6056_v12, %v6055_v59  ;;  %v6034_v37 = vadd.f32 %v6033_v55, %v6032_v28  ;;  %v6629_v59 = vrot.slane %v6443_v43, %v15063_v57  ;;  %v6633_v28 = vrot.slane %v6443_v43, %v15064_v61 }
 0x9a0   : > { %v5864_v4 = vpop.permute.xlu1 %5863  ;;  %10432 = vpow2.f32 %v6306_v2  ;;  %v6074_v55 = vsel %vm1202_vm7, %v5994_v14, 0.0 }
 0x9a1   : > { %v6058_v46 = vrot.slane %v6057_v54, 1  ;;  %v6035_v56 = vrot.slane %v6034_v37, 2  ;;  %v5993_v51 = vmul.f32 %v5864_v4, %v13822_v53  ;;  %10434 = vpow2.f32 %v6308_v24  ;;  %6666 = vrot.lane.b32.xlu1 %v6629_v59, %s10732_s17  ;;  %6668 = vrot.lane.b32.xlu0 %v6633_v28, %s10732_s17  ;;  %s10738_s17 = smov 62  }
 0x9a2   : > { %v5859_v16 = vpop.permute.xlu0 %5858  ;;  %10436 = vpow2.f32 %v6312_v63  ;;  %v6452_v4 = vrot.slane %v6442_v7, %v15064_v61  ;;  %v6082_v24 = vrot.slane %v6081_v36, 4 }
 0x9a3   : > { %v13874_v27 = vadd.f32 %v6058_v46, %v6057_v54  ;;  %v6036_v60 = vadd.f32 %v6035_v56, %v6034_v37  ;;  %v6067_v38 = vsel %vm1202_vm7, %v5993_v51, 0.0  ;;  %v5992_v1 = vmul.f32 %v5859_v16, %v13822_v53 }
 0x9a4   : > { %v6068_v0 = vrot.slane %v6067_v38, 4  ;;  %10438 = vpow2.f32 %v6314_v29  ;;  %v5996_v46 = vmul.f32 %v13807_v19, %v13886_v49  ;;  %v6075_v51 = vrot.slane %v6074_v55, 4 }
 0x9a5   : > { %v6037_v21 = vrot.slane %v6036_v60, 1  ;;  %v6060_v22 = vsel %vm1202_vm7, %v5992_v1, 0.0  ;;  %v6279_v33 = vmin.f32 %v13874_v27, 0.0  ;;  %6525 = vrot.lane.b32.xlu1 %v6448_v18, %s10738_s17  ;;  %6527 = vrot.lane.b32.xlu0 %v6452_v4, %s10738_s17  ;;  %vm6247_vm2 = vcmp.gt.f32.partialorder %v13874_v27, 0.0 }
 0x9a6   : > { %v6069_v3 = vadd.f32 %v6068_v0, %v6067_v38  ;;  %v6061_v8 = vrot.slane %v6060_v22, 4  ;;  %v6088_v19 = vsel %vm1202_vm7, %v5996_v46, 0.0 }
 0x9a7   : > { %v13881_v9 = vadd.f32 %v6037_v21, %v6036_v60  ;;  %v6316_v50 = vmul.f32 1.442695, %v6279_v33  ;;  %v6076_v21 = vadd.f32 %v6075_v51, %v6074_v55  ;;  %v5999_v33 = vmul.f32 %v13785_v30, %v13886_v49 }
 0x9a8   : > { %v6070_v40 = vrot.slane %v6069_v3, 2  ;;  %v6062_v26 = vadd.f32 %v6061_v8, %v6060_v22  ;;  %v6089_v29 = vrot.slane %v6088_v19, 4 }
 0x9a9   : > { %v6276_v53 = vmin.f32 %v13881_v9, 0.0  ;;  %vm6244_vm12 = vcmp.gt.f32.partialorder %v13881_v9, 0.0 }
 0x9aa   : > { %v6071_v45 = vadd.f32 %v6070_v40, %v6069_v3  ;;  %v6063_v5 = vrot.slane %v6062_v26, 2  ;;  %v10433_v20 = vpop.eup %10432  ;;  %v5997_v3 = vmul.f32 %v13817_v62, %v13886_v49  ;;  %v6090_v30 = vadd.f32 %v6089_v29, %v6088_v19 }
 0x9ab   : > { %v6310_v47 = vmul.f32 1.442695, %v6276_v53  ;;  %v10435_v12 = vpop.eup %10434  ;;  %v8901_v37 = vadd.f32 -1.0, %v10433_v20 }
 0x9ac   : > { %v6072_v34 = vrot.slane %v6071_v45, 1  ;;  %v6064_v13 = vadd.f32 %v6063_v5, %v6062_v26  ;;  %v10437_v17 = vpop.eup %10436  ;;  %v8902_v2 = vadd.f32 -1.0, %v10435_v12  ;;  %v6083_v26 = vadd.f32 %v6082_v24, %v6081_v36 }
 0x9ad   : > { %10440 = vpow2.f32 %v6310_v47  ;;  %v8904_v38 = vadd.f32 -1.0, %v10437_v17  ;;  %v6402_v1 = vsel %vm6242_vm13, %v13863_v39, %v8901_v37  ;;  %v6091_v32 = vrot.slane %v6090_v30, 2 }
 0x9ae   : > { %v13890_v10 = vadd.f32 %v6072_v34, %v6071_v45  ;;  %v6065_v31 = vrot.slane %v6064_v13, 1  ;;  %10442 = vpow2.f32 %v6316_v50  ;;  %v10439_v16 = vpop.eup %10438  ;;  %v6403_v22 = vsel %vm6243_vm4, %v13861_v15, %v8902_v2 }
 0x9af   : > { %v8905_v63 = vadd.f32 -1.0, %v10439_v16  ;;  %v6485_v39 = vsel %vm3902_vm14, %v6403_v22, %v6402_v1  ;;  %v6405_v40 = vsel %vm6245_vm8, %v13866_v52, %v8904_v38  ;;  %v6077_v50 = vrot.slane %v6076_v21, 2  ;;  %v5949_v38 = vpop.permute.xlu1 %5948 }
 0x9b0   : > { %v6281_v58 = vmin.f32 %v13890_v10, 0.0  ;;  %v13893_v42 = vadd.f32 %v6065_v31, %v6064_v13  ;;  %v6084_v34 = vrot.slane %v6083_v26, 2  ;;  %v6109_v13 = vsel %vm1202_vm7, %v5999_v33, 0.0 }
 0x9b1   : > { %v6406_v45 = vsel %vm6246_vm15, %v13870_v35, %v8905_v63  ;;  %vm6249_vm11 = vcmp.gt.f32.partialorder %v13890_v10, 0.0  ;;  %v6110_v7 = vrot.slane %v6109_v13, 4  ;;  %v6001_v12 = vmul.f32 %v13796_v23, %v13886_v49  ;;  %v5954_v33 = vpop.permute.xlu0 %5953 }
 0x9b2   : > { %v6280_v41 = vmin.f32 %v13893_v42, 0.0  ;;  %v6320_v54 = vmul.f32 1.442695, %v6281_v58  ;;  %v6078_v58 = vadd.f32 %v6077_v50, %v6076_v21  ;;  %vm6248_vm6 = vcmp.gt.f32.partialorder %v13893_v42, 0.0 }
 0x9b3   : > { %v6085_v28 = vadd.f32 %v6084_v34, %v6083_v26  ;;  %vm15065_vm13 = vcmask 1047559   ;;  %v5998_v37 = vmul.f32 %v13829_v25, %v13886_v49  ;;  %v6092_v18 = vadd.f32 %v6091_v32, %v6090_v30 }
 0x9b4   : > { %v6318_v56 = vmul.f32 1.442695, %v6280_v41  ;;  %10444 = vpow2.f32 %v6320_v54  ;;  %v6079_v54 = vrot.slane %v6078_v58, 1  ;;  %v6000_v22 = vmul.f32 %v13838_v6, %v13886_v49 }
 0x9b5   : > { %v6086_v4 = vrot.slane %v6085_v28, 1  ;;  %v6102_v23 = vsel %vm1202_vm7, %v5998_v37, 0.0  ;;  %v6093_v51 = vrot.slane %v6092_v18, 1 }
 0x9b6   : > { %10446 = vpow2.f32 %v6318_v56  ;;  %v13950_v46 = vadd.f32 %v6079_v54, %v6078_v58 }
 0x9b7   : > { %v10441_v60 = vpop.eup %10440  ;;  %v13953_v2 = vadd.f32 %v6086_v4, %v6085_v28  ;;  %v13956_v24 = vadd.f32 %v6093_v51, %v6092_v18  ;;  %v15067_v18 = vld [vmem:[#allocation58_spill] sm:$0xff] }
 0x9b8   : > { %v8903_v48 = vadd.f32 -1.0, %v10441_v60  ;;  %v10443_v0 = vpop.eup %10442  ;;  %v6103_v60 = vrot.slane %v6102_v23, 4  ;;  %v6282_v25 = vmin.f32 %v13950_v46, 0.0  ;;  %v13984_v4 = vadd.f32 %v15067_v18, %v13766_v44 }
 0x9b9   : > { %v8906_v53 = vadd.f32 -1.0, %v10443_v0  ;;  %vm6250_vm4 = vcmp.gt.f32.partialorder %v13950_v46, 0.0  ;;  %vm6252_vm8 = vcmp.gt.f32.partialorder %v13956_v24, 0.0 }
 0x9ba   : > { %v6404_v8 = vsel %vm6244_vm12, %v13881_v9, %v8903_v48  ;;  %v6095_v9 = vsel %vm1202_vm7, %v5997_v3, 0.0  ;;  %v6283_v48 = vmin.f32 %v13953_v2, 0.0  ;;  %v6104_v21 = vadd.f32 %v6103_v60, %v6102_v23 }
 0x9bb   : > { %v6486_v15 = vsel %vm3904_vm5, %v6404_v8, %v6485_v39  ;;  %v6407_v14 = vsel %vm6247_vm2, %v13874_v27, %v8906_v53  ;;  %v6096_v31 = vrot.slane %v6095_v9, 4  ;;  %v6322_v63 = vmul.f32 1.442695, %v6282_v25 }
 0x9bc   : > { %v6487_v62 = vsel %vm3906_vm9, %v6405_v40, %v6486_v15  ;;  %v6284_v39 = vmin.f32 %v13956_v24, 0.0  ;;  %v6324_v29 = vmul.f32 1.442695, %v6283_v48  ;;  %v5964_v40 = vpop.permute.xlu1 %5963  ;;  %v15066_v15 = vld [vmem:[#allocation32_spill] sm:$0xff]  ;;  %vm6251_vm12 = vcmp.gt.f32.partialorder %v13953_v2, 0.0 }
 0x9bd   : > { %v6488_v47 = vsel %vm3908_vm3, %v6406_v45, %v6487_v62  ;;  %v6097_v55 = vadd.f32 %v6096_v31, %v6095_v9  ;;  %v13964_v26 = vadd.f32 %v15066_v15, %v13766_v44  ;;  %v6105_v62 = vrot.slane %v6104_v21, 2 }
 0x9be   : > { %v10445_v5 = vpop.eup %10444  ;;  %v6489_v20 = vsel %vm3910_vm10, %v6407_v14, %v6488_v47  ;;  %v6116_v45 = vsel %vm1202_vm7, %v6000_v22, 0.0  ;;  %10448 = vpow2.f32 %v6322_v63  ;;  %v6326_v6 = vmul.f32 1.442695, %v6284_v39 }
 0x9bf   : > { %v8908_v52 = vadd.f32 -1.0, %v10445_v5  ;;  %v6098_v17 = vrot.slane %v6097_v55, 2  ;;  %v6010_v50 = vmul.f32 %v5949_v38, %v13964_v26  ;;  %10450 = vpow2.f32 %v6324_v29 }
 0x9c0   : > { %v10447_v11 = vpop.eup %10446  ;;  %v6117_v9 = vrot.slane %v6116_v45, 4  ;;  %v6106_v30 = vadd.f32 %v6105_v62, %v6104_v21  ;;  %10452 = vpow2.f32 %v6326_v6 }
 0x9c1   : > { %v8907_v35 = vadd.f32 -1.0, %v10447_v11  ;;  %v6409_v43 = vsel %vm6249_vm11, %v13890_v10, %v8908_v52  ;;  %v6111_v10 = vadd.f32 %v6110_v7, %v6109_v13  ;;  %v6099_v16 = vadd.f32 %v6098_v17, %v6097_v55  ;;  %v5959_v52 = vpop.permute.xlu0 %5958 }
 0x9c2   : > { %v6186_v14 = vsel %vm1202_vm7, %v6010_v50, 0.0  ;;  %v6118_v31 = vadd.f32 %v6117_v9, %v6116_v45  ;;  %v6107_v58 = vrot.slane %v6106_v30, 1  ;;  %v6013_v55 = vmul.f32 %v5964_v40, %v13964_v26 }
 0x9c3   : > { %v6408_v59 = vsel %vm6248_vm6, %v13893_v42, %v8907_v35  ;;  %v6123_v42 = vsel %vm1202_vm7, %v6001_v12, 0.0  ;;  %v6112_v56 = vrot.slane %v6111_v10, 2  ;;  %v6100_v0 = vrot.slane %v6099_v16, 1 }
 0x9c4   : > { %v6490_v27 = vsel %vm3912_vm0, %v6408_v59, %v6489_v20  ;;  %v6124_v36 = vrot.slane %v6123_v42, 4  ;;  %v6011_v35 = vmul.f32 %v5954_v33, %v13964_v26  ;;  %v6119_v12 = vrot.slane %v6118_v31, 2 }
 0x9c5   : > { %v6491_v41 = vsel %vm15065_vm13, %v6409_v43, %v6490_v27  ;;  %v6113_v1 = vadd.f32 %v6112_v56, %v6111_v10  ;;  %v13966_v53 = vadd.f32 %v6100_v0, %v6099_v16  ;;  %v5969_v11 = vpop.permute.xlu1 %5968  ;;  %v6187_v43 = vrot.slane %v6186_v14, 4 }
 0x9c6   : > { %9455 = vmatprep.mubr.msk.f32.mxu1 %vm1202_vm7, %v6491_v41  ;;  %v6125_v19 = vadd.f32 %v6124_v36, %v6123_v42  ;;  %v6193_v27 = vsel %vm1202_vm7, %v6011_v35, 0.0  ;;  %v13980_v54 = vadd.f32 %v6107_v58, %v6106_v30  ;;  %v6120_v23 = vadd.f32 %v6119_v12, %v6118_v31 }
 0x9c7   : > { %v6114_v3 = vrot.slane %v6113_v1, 1  ;;  %v6285_v47 = vmin.f32 %v13966_v53, 0.0  ;;  %v6188_v10 = vadd.f32 %v6187_v43, %v6186_v14  ;;  %v6194_v17 = vrot.slane %v6193_v27, 4 }
 0x9c8   : > { %v6126_v8 = vrot.slane %v6125_v19, 2  ;;  %v10449_v28 = vpop.eup %10448  ;;  %v6207_v56 = vsel %vm1202_vm7, %v6013_v55, 0.0  ;;  %v6012_v51 = vmul.f32 %v5959_v52, %v13964_v26  ;;  %v6014_v36 = vmul.f32 %v5969_v11, %v13964_v26 }
 0x9c9   : > { %v13969_v5 = vadd.f32 %v6114_v3, %v6113_v1  ;;  %v6328_v20 = vmul.f32 1.442695, %v6285_v47  ;;  %v10451_v37 = vpop.eup %10450  ;;  %v8909_v60 = vadd.f32 -1.0, %v10449_v28  ;;  %v6286_v38 = vmin.f32 %v13980_v54, 0.0 }
 0x9ca   : > { %v6127_v49 = vadd.f32 %v6126_v8, %v6125_v19  ;;  %v5914_v59 = vpop.permute.xlu0 %5913  ;;  %v10453_v16 = vpop.eup %10452  ;;  %v8910_v25 = vadd.f32 -1.0, %v10451_v37  ;;  %v6189_v44 = vrot.slane %v6188_v10, 2  ;;  %v6195_v21 = vadd.f32 %v6194_v17, %v6193_v27 }
 0x9cb   : > { %v6287_v34 = vmin.f32 %v13969_v5, 0.0  ;;  %10454 = vpow2.f32 %v6328_v20  ;;  %v6003_v19 = vmul.f32 %v5914_v59, %v13984_v4  ;;  %v6208_v22 = vrot.slane %v6207_v56, 4 }
 0x9cc   : > { %v6128_v13 = vrot.slane %v6127_v49, 1  ;;  %v8911_v63 = vadd.f32 -1.0, %v10453_v16  ;;  %v6121_v3 = vrot.slane %v6120_v23, 1  ;;  %v6200_v39 = vsel %vm1202_vm7, %v6012_v51, 0.0 }
 0x9cd   : > { %v6332_v7 = vmul.f32 1.442695, %v6287_v34  ;;  %v6214_v8 = vsel %vm1202_vm7, %v6014_v36, 0.0  ;;  %v6410_v33 = vsel %vm6250_vm4, %v13950_v46, %v8909_v60  ;;  %v6411_v29 = vsel %vm6251_vm12, %v13953_v2, %v8910_v25 }
 0x9ce   : > { %v13976_v32 = vadd.f32 %v6128_v13, %v6127_v49  ;;  %v6330_v40 = vmul.f32 1.442695, %v6286_v38  ;;  %v6190_v62 = vadd.f32 %v6189_v44, %v6188_v10  ;;  %v6137_v45 = vsel %vm1202_vm7, %v6003_v19, 0.0 }
 0x9cf   : > { %10456 = vpow2.f32 %v6332_v7  ;;  %v6196_v9 = vrot.slane %v6195_v21, 2  ;;  %v6209_v47 = vadd.f32 %v6208_v22, %v6207_v56  ;;  %v6201_v30 = vrot.slane %v6200_v39, 4 }
 0x9d0   : > { %v6289_v42 = vmin.f32 %v13976_v32, 0.0  ;;  %v6215_v52 = vrot.slane %v6214_v8, 4  ;;  %v6492_v46 = vsel %vm3902_vm14, %v6411_v29, %v6410_v33  ;;  %v6412_v2 = vsel %vm6252_vm8, %v13956_v24, %v8911_v63 }
 0x9d1   : > { %v14007_v34 = vadd.f32 %v6121_v3, %v6120_v23  ;;  %v6138_v31 = vrot.slane %v6137_v45, 4  ;;  %v6191_v43 = vrot.slane %v6190_v62, 1  ;;  %v6197_v28 = vadd.f32 %v6196_v9, %v6195_v21 }
 0x9d2   : > { %v6336_v0 = vmul.f32 1.442695, %v6289_v42  ;;  %v6210_v12 = vrot.slane %v6209_v47, 2  ;;  %v6202_v24 = vadd.f32 %v6201_v30, %v6200_v39  ;;  %v6216_v27 = vadd.f32 %v6215_v52, %v6214_v8 }
 0x9d3   : > { %vm6253_vm15 = vcmp.gt.f32.partialorder %v13966_v53, 0.0  ;;  %v6139_v10 = vadd.f32 %v6138_v31, %v6137_v45  ;;  %v6288_v51 = vmin.f32 %v14007_v34, 0.0  ;;  %v14020_v36 = vadd.f32 %v6191_v43, %v6190_v62 }
 0x9d4   : > { %10458 = vpow2.f32 %v6336_v0  ;;  %v6198_v60 = vrot.slane %v6197_v28, 1  ;;  %v6211_v25 = vadd.f32 %v6210_v12, %v6209_v47  ;;  %v6203_v38 = vrot.slane %v6202_v24, 2 }
 0x9d5   : > { %v5974_v41 = vpop.permute.xlu1 %5973  ;;  %v10455_v50 = vpop.eup %10454  ;;  %10460 = vpow2.f32 %v6330_v40  ;;  %v6334_v8 = vmul.f32 1.442695, %v6288_v51  ;;  %v6298_v33 = vmin.f32 %v14020_v36, 0.0  ;;  %vm6254_vm2 = vcmp.gt.f32.partialorder %v13980_v54, 0.0 }
 0x9d6   : > { %v6015_v6 = vmul.f32 %v5974_v41, %v13964_v26  ;;  %v8912_v58 = vadd.f32 -1.0, %v10455_v50  ;;  %v6493_v41 = vsel %vm3904_vm5, %v6412_v2, %v6492_v46  ;;  %v14032_v62 = vadd.f32 %v6198_v60, %v6197_v28 }
 0x9d7   : > { %v6212_v45 = vrot.slane %v6211_v25, 1  ;;  %10462 = vpow2.f32 %v6334_v8  ;;  %vm6256_vm11 = vcmp.gt.f32.partialorder %v14007_v34, 0.0  ;;  %vm6255_vm6 = vcmp.gt.f32.partialorder %v13969_v5, 0.0 }
 0x9d8   : > { %v6221_v7 = vsel %vm1202_vm7, %v6015_v6, 0.0  ;;  %v6413_v56 = vsel %vm6253_vm15, %v13966_v53, %v8912_v58  ;;  %v6140_v53 = vrot.slane %v6139_v10, 2  ;;  %v6204_v6 = vadd.f32 %v6203_v38, %v6202_v24 }
 0x9d9   : > { %v10457_v14 = vpop.eup %10456  ;;  %v6222_v18 = vrot.slane %v6221_v7, 4  ;;  %v14026_v21 = vsel %vm3906_vm9, %v6413_v56, %v6493_v41  ;;  %vm6257_vm13 = vcmp.gt.f32.partialorder %v13976_v32, 0.0  ;;  %vm15071_vm4 = vcmask 1047559  }
 0x9da   : > { %v5919_v1 = vpop.permute.xlu0 %5918  ;;  %v14013_v55 = vadd.f32 -1.0, %v10457_v14  ;;  %v6141_v52 = vadd.f32 %v6140_v53, %v6139_v10  ;;  %vm6266_vm12 = vcmp.gt.f32.partialorder %v14020_v36, 0.0  ;;  %vm6267_vm8 = vcmp.gt.f32.partialorder %v14032_v62, 0.0 }
 0x9db   : > { %v6004_v49 = vmul.f32 %v5919_v1, %v13984_v4  ;;  %v6217_v1 = vrot.slane %v6216_v27, 2  ;;  %v6223_v22 = vadd.f32 %v6222_v18, %v6221_v7 }
 0x9dc   : > { %v6142_v41 = vrot.slane %v6141_v52, 1 }
 0x9dd   : > { %v6144_v59 = vsel %vm1202_vm7, %v6004_v49, 0.0  ;;  %v6218_v49 = vadd.f32 %v6217_v1, %v6216_v27  ;;  %v14042_v27 = vadd.f32 %v6212_v45, %v6211_v25 }
 0x9de   : > { %v6145_v42 = vrot.slane %v6144_v59, 4  ;;  %v14028_v39 = vpop.eup %10458  ;;  %v14051_v53 = vadd.f32 %v6142_v41, %v6141_v52 }
 0x9e0   : > { %v5909_v48 = vpop.permute.xlu1 %5908  ;;  %v6146_v63 = vadd.f32 %v6145_v42, %v6144_v59  ;;  %v6219_v59 = vrot.slane %v6218_v49, 1  ;;  %v6291_v52 = vmin.f32 %v14051_v53, 0.0 }
 0x9e1   : > { %v6002_v15 = vmul.f32 %v5909_v48, %v13984_v4 }
 0x9e2   : > { %v6147_v46 = vrot.slane %v6146_v63, 2  ;;  %v14048_v1 = vadd.f32 %v6219_v59, %v6218_v49 }
 0x9e3   : > { %v6130_v35 = vsel %vm1202_vm7, %v6002_v15, 0.0  ;;  %v10461_v15 = vpop.eup %10460 }
 0x9e4   : > { %v6131_v37 = vrot.slane %v6130_v35, 4  ;;  %v14038_v14 = vadd.f32 -1.0, %v10461_v15  ;;  %v6148_v10 = vadd.f32 %v6147_v46, %v6146_v63  ;;  %v6302_v49 = vmin.f32 %v14048_v1, 0.0 }
 0x9e5   : > { %v5984_v11 = vpop.permute.xlu0 %5983 }
 0x9e6   : > { %v6132_v44 = vadd.f32 %v6131_v37, %v6130_v35  ;;  %v6017_v19 = vmul.f32 %v5984_v11, %v13964_v26  ;;  %v6224_v11 = vrot.slane %v6223_v22, 2  ;;  %v6299_v35 = vmin.f32 %v14032_v62, 0.0 }
 0x9e8   : > { %v6133_v50 = vrot.slane %v6132_v44, 2  ;;  %v6235_v9 = vsel %vm1202_vm7, %v6017_v19, 0.0  ;;  %v6225_v37 = vadd.f32 %v6224_v11, %v6223_v22 }
 0x9e9   : > { %v6236_v58 = vrot.slane %v6235_v9, 4 }
 0x9ea   : > { %v6134_v28 = vadd.f32 %v6133_v50, %v6132_v44  ;;  %v6226_v63 = vrot.slane %v6225_v37, 1 }
 0x9ec   : > { %v6135_v25 = vrot.slane %v6134_v28, 1  ;;  %v14059_v46 = vadd.f32 %v6226_v63, %v6225_v37 }
 0x9ee   : > { %v5924_v13 = vpop.permute.xlu1 %5923  ;;  %v14055_v50 = vadd.f32 %v6135_v25, %v6134_v28 }
 0x9ef   : > { %v6005_v20 = vmul.f32 %v5924_v13, %v13984_v4 }
 0x9f0   : > { %v6290_v59 = vmin.f32 %v14055_v50, 0.0  ;;  %vm6258_vm15 = vcmp.gt.f32.partialorder %v14055_v50, 0.0 }
 0x9f1   : > { %v6151_v17 = vsel %vm1202_vm7, %v6005_v20, 0.0  ;;  %v6205_v20 = vrot.slane %v6204_v6, 1 }
 0x9f2   : > { %v6152_v48 = vrot.slane %v6151_v17, 4 }
 0x9f3   : > { %v5929_v23 = vpop.permute.xlu0 %5928  ;;  %v14045_v51 = vadd.f32 %v6205_v20, %v6204_v6  ;;  %v10463_v6 = vpop.eup %10462 }
 0x9f4   : > { %v6006_v16 = vmul.f32 %v5929_v23, %v13984_v4  ;;  %v6153_v47 = vadd.f32 %v6152_v48, %v6151_v17  ;;  %v6356_v48 = vmul.f32 1.442695, %v6299_v35  ;;  %v14071_v41 = vadd.f32 -1.0, %v10463_v6 }
 0x9f6   : > { %v6158_v0 = vsel %vm1202_vm7, %v6006_v16, 0.0  ;;  %v6154_v12 = vrot.slane %v6153_v47, 2  ;;  %v6237_v16 = vadd.f32 %v6236_v58, %v6235_v9 }
 0x9f7   : > { %v5979_v3 = vpop.permute.xlu1 %5978  ;;  %v6159_v29 = vrot.slane %v6158_v0, 4 }
 0x9f8   : > { %v6016_v40 = vmul.f32 %v5979_v3, %v13964_v26  ;;  %v6354_v26 = vmul.f32 1.442695, %v6298_v33  ;;  %v6155_v44 = vadd.f32 %v6154_v12, %v6153_v47  ;;  %v6149_v3 = vrot.slane %v6148_v10, 1 }
 0x9f9   : > { %v6160_v31 = vadd.f32 %v6159_v29, %v6158_v0  ;;  %v6301_v0 = vmin.f32 %v14042_v27, 0.0  ;;  %v6300_v33 = vmin.f32 %v14045_v51, 0.0  ;;  %v6238_v29 = vrot.slane %v6237_v16, 2 }
 0x9fa   : > { %v6228_v30 = vsel %vm1202_vm7, %v6016_v40, 0.0  ;;  %10464 = vpow2.f32 %v6354_v26  ;;  %v6156_v9 = vrot.slane %v6155_v44, 1 }
 0x9fb   : > { %v6229_v2 = vrot.slane %v6228_v30, 4  ;;  %v14036_v13 = vpop.permute.xlu1 %9929  ;;  %v6161_v42 = vrot.slane %v6160_v31, 2  ;;  %10466 = vpow2.f32 %v6356_v48  ;;  %v6358_v35 = vmul.f32 1.442695, %v6300_v33 }
 0x9fc   : > { %v6239_v20 = vadd.f32 %v6238_v29, %v6237_v16  ;;  %v14065_v28 = vadd.f32 %v6156_v9, %v6155_v44  ;;  %v9931_v48 = vunpack.i.l.bf16 %v14036_v13 }
 0x9fd   : > { %v6230_v43 = vadd.f32 %v6229_v2, %v6228_v30  ;;  %v5934_v7 = vpop.permute.xlu0 %5933  ;;  %v6162_v8 = vadd.f32 %v6161_v42, %v6160_v31  ;;  %v6360_v30 = vmul.f32 1.442695, %v6301_v0  ;;  %v14061_v2 = vadd.f32 %v6149_v3, %v6148_v10 }
 0x9fe   : > { %v6007_v24 = vmul.f32 %v5934_v7, %v13984_v4  ;;  %v6362_v7 = vmul.f32 1.442695, %v6302_v49  ;;  %v6340_v10 = vmul.f32 1.442695, %v6291_v52 }
 0x9ff   : > { %v9940_v18 = vpop.permute.xlu1 %9939  ;;  %v6231_v60 = vrot.slane %v6230_v43, 2  ;;  %v6163_v26 = vrot.slane %v6162_v8, 1  ;;  %10468 = vpow2.f32 %v6360_v30  ;;  %v6292_v42 = vmin.f32 %v14061_v2, 0.0 }
 0xa00   : > { %v6165_v17 = vsel %vm1202_vm7, %v6007_v24, 0.0  ;;  %v9942_v23 = vunpack.i.h.bf16 %v9940_v18  ;;  %v9941_v56 = vunpack.i.l.bf16 %v9940_v18  ;;  %v6414_v24 = vsel %vm6254_vm2, %v13980_v54, %v14038_v14 }
 0xa01   : > { %v6166_v38 = vrot.slane %v6165_v17, 4  ;;  %v6232_v40 = vadd.f32 %v6231_v60, %v6230_v43  ;;  %v6303_v18 = vmin.f32 %v14059_v46, 0.0  ;;  %10470 = vpow2.f32 %v6358_v35 }
 0xa02   : > { %v9683_v19 = vpack.c.bf16 %v9942_v23, %v9941_v56  ;;  %v6240_v23 = vrot.slane %v6239_v20, 1  ;;  %10472 = vpow2.f32 %v6362_v7  ;;  %v6338_v54 = vmul.f32 1.442695, %v6290_v59 }
 0xa03   : > { %v6167_v22 = vadd.f32 %v6166_v38, %v6165_v17  ;;  %v6233_v58 = vrot.slane %v6232_v40, 1  ;;  %v14075_v17 = vadd.f32 %v6163_v26, %v6162_v8  ;;  %v6293_v14 = vmin.f32 %v14065_v28, 0.0 }
 0xa04   : > { %9684 = vmatprep.subr.bf16.mxu1 %v9683_v19  ;;  %v14079_v60 = vpop.eup %10464  ;;  %10474 = vpow2.f32 %v6340_v10  ;;  %v6342_v63 = vmul.f32 1.442695, %v6292_v42  ;;  %v14089_v33 = vadd.f32 %v6240_v23, %v6239_v20  ;;  %v6495_v26 = vsel %vm3908_vm3, %v6414_v24, %v14026_v21 }
 0xa05   : > { %v6168_v15 = vrot.slane %v6167_v22, 2  ;;  %9686 = vmatpush3.bf16.msra.mxu1 %v9683_v19  ;;  %v14077_v56 = vadd.f32 %v6233_v58, %v6232_v40  ;;  %v9932_v19 = vunpack.i.h.bf16 %v14036_v13  ;;  %v6294_v3 = vmin.f32 %v14075_v17, 0.0  ;;  %v10467_v8 = vpop.eup %10466 }
 0xa06   : > { %v5939_v45 = vpop.permute.xlu0 %5938  ;;  %10476 = vpow2.f32 %v6338_v54  ;;  %v6305_v10 = vmin.f32 %v14089_v33, 0.0  ;;  %v6416_v24 = vsel %vm6256_vm11, %v14007_v34, %v14071_v41  ;;  %v6415_v54 = vsel %vm6255_vm6, %v13969_v5, %v14013_v55  ;;  %v15068_v5 = vld [vmem:[#allocation50_spill] sm:$0xff]  ;;  %v15069_v41 = vld [vmem:[#allocation51_spill] sm:$0xff] }
 0xa07   : > { %v6008_v47 = vmul.f32 %v5939_v45, %v13984_v4  ;;  %v6169_v11 = vadd.f32 %v6168_v15, %v6167_v22  ;;  %v6364_v22 = vmul.f32 1.442695, %v6303_v18  ;;  %v6304_v29 = vmin.f32 %v14077_v56, 0.0 }
 0xa08   : > { %v6344_v45 = vmul.f32 1.442695, %v6293_v14  ;;  %v6660_v30 = vsel %vm5729_vm1, %v9931_v48, %v9932_v19  ;;  %v6346_v52 = vmul.f32 1.442695, %v6294_v3  ;;  %v6496_v48 = vsel %vm3910_vm10, %v6415_v54, %v6495_v26 }
 0xa09   : > { %v6172_v31 = vsel %vm1202_vm7, %v6008_v47, 0.0  ;;  %v6170_v12 = vrot.slane %v6169_v11, 1  ;;  %10478 = vpow2.f32 %v6364_v22  ;;  %v6366_v35 = vmul.f32 1.442695, %v6304_v29 }
 0xa0a   : > { %v6173_v43 = vrot.slane %v6172_v31, 4  ;;  %10480 = vpow2.f32 %v6342_v63  ;;  %v6497_v22 = vsel %vm3912_vm0, %v6416_v24, %v6496_v48  ;;  %v8925_v55 = vadd.f32 -1.0, %v14079_v60 }
 0xa0b   : > { %v14082_v38 = vadd.f32 %v6170_v12, %v6169_v11  ;;  %10482 = vpow2.f32 %v6344_v45  ;;  %v15070_v29 = vmov 0.0|0.0   ;;  %vm6269_vm2 = vcmp.gt.f32.partialorder %v14042_v27, 0.0 }
 0xa0c   : > { %v6174_v37 = vadd.f32 %v6173_v43, %v6172_v31  ;;  %v10469_v31 = vpop.eup %10468  ;;  %10484 = vpow2.f32 %v6346_v52  ;;  %vm6268_vm11 = vcmp.gt.f32.partialorder %v14045_v51, 0.0  ;;  %vm6259_vm6 = vcmp.gt.f32.partialorder %v14051_v53, 0.0 }
 0xa0d   : > { %v5944_v25 = vpop.permute.xlu0 %5943  ;;  %v6295_v6 = vmin.f32 %v14082_v38, 0.0  ;;  %10486 = vpow2.f32 %v6366_v35  ;;  %v8928_v60 = vadd.f32 -1.0, %v10469_v31 }
 0xa0e   : > { %v6175_v16 = vrot.slane %v6174_v37, 2  ;;  %v6009_v0 = vmul.f32 %v5944_v25, %v13984_v4  ;;  %v8916_v25 = vadd.f32 -1.0, %v14028_v39  ;;  %v8926_v39 = vadd.f32 -1.0, %v10467_v8 }
 0xa0f   : > { %v6348_v43 = vmul.f32 1.442695, %v6295_v6 }
 0xa10   : > { %v6176_v44 = vadd.f32 %v6175_v16, %v6174_v37  ;;  %v6179_v15 = vsel %vm1202_vm7, %v6009_v0, 0.0  ;;  %v10471_v37 = vpop.eup %10470  ;;  %v6368_v0 = vmul.f32 1.442695, %v6305_v10  ;;  %v6417_v3 = vsel %vm6257_vm13, %v13976_v32, %v8916_v25  ;;  %v15072_v32 = vld [vmem:[#allocation52_spill] sm:$0xff] }
 0xa11   : > { %v6180_v13 = vrot.slane %v6179_v15, 4  ;;  %v9935_v49 = vpop.permute.xlu0 %9934  ;;  %v10473_v16 = vpop.eup %10472  ;;  %10488 = vpow2.f32 %v6348_v43  ;;  %v6498_v45 = vsel %vm15071_vm4, %v6417_v3, %v6497_v22  ;;  %vm6270_vm13 = vcmp.gt.f32.partialorder %v14048_v1, 0.0 }
 0xa12   : > { %v6177_v40 = vrot.slane %v6176_v44, 1  ;;  %v9937_v9 = vunpack.i.h.bf16 %v9935_v49  ;;  %v9936_v47 = vunpack.i.l.bf16 %v9935_v49  ;;  %vm6261_vm4 = vcmp.gt.f32.partialorder %v14065_v28, 0.0 }
 0xa13   : > { %v6181_v11 = vadd.f32 %v6180_v13, %v6179_v15 }
 0xa14   : > { %v14094_v4 = vadd.f32 %v6177_v40, %v6176_v44  ;;  %v6661_v58 = vsel %vm5729_vm1, %v9936_v47, %v9937_v9  ;;  %v10475_v44 = vpop.eup %10474  ;;  %v6426_v9 = vsel %vm6266_vm12, %v14020_v36, %v8925_v55  ;;  %v6427_v47 = vsel %vm6267_vm8, %v14032_v62, %v8926_v39 }
 0xa15   : > { %v6182_v7 = vrot.slane %v6181_v11, 2  ;;  %v9945_v59 = vpop.permute.xlu0 %9944  ;;  %v9695_v12 = vpack.c.bf16 %v6661_v58, %v6660_v30  ;;  %v10477_v63 = vpop.eup %10476  ;;  %v8927_v30 = vadd.f32 -1.0, %v10471_v37  ;;  %v8918_v52 = vadd.f32 -1.0, %v10475_v44 }
 0xa16   : > { %v6296_v20 = vmin.f32 %v14094_v4, 0.0  ;;  %v9947_v42 = vunpack.i.h.bf16 %v9945_v59  ;;  %v9946_v23 = vunpack.i.l.bf16 %v9945_v59  ;;  %v10479_v40 = vpop.eup %10478  ;;  %v8917_v13 = vadd.f32 -1.0, %v10477_v63 }
 0xa17   : > { %v6183_v21 = vadd.f32 %v6182_v7, %v6181_v11  ;;  %9696 = vmatprep.subr.bf16.mxu0 %v9695_v12  ;;  %v10481_v6 = vpop.eup %10480  ;;  %v6506_v58 = vsel %vm3902_vm14, %v6427_v47, %v6426_v9  ;;  %v6429_v36 = vsel %vm6269_vm2, %v14042_v27, %v8928_v60  ;;  %v6428_v7 = vsel %vm6268_vm11, %v14045_v51, %v8927_v30 }
 0xa18   : > { %v6350_v18 = vmul.f32 1.442695, %v6296_v20  ;;  %v9687_v14 = vpack.c.bf16 %v9947_v42, %v9946_v23  ;;  %9698 = vmatpush3.bf16.msra.mxu0 %v9695_v12  ;;  %v10483_v49 = vpop.eup %10482  ;;  %v6418_v31 = vsel %vm6258_vm15, %v14055_v50, %v8917_v13  ;;  %v8919_v62 = vadd.f32 -1.0, %v10481_v6 }
 0xa19   : > { %v6184_v19 = vrot.slane %v6183_v21, 1  ;;  %v10485_v11 = vpop.eup %10484  ;;  %v8920_v35 = vadd.f32 -1.0, %v10483_v49  ;;  %v8929_v59 = vadd.f32 -1.0, %v10473_v16  ;;  %v6419_v12 = vsel %vm6259_vm6, %v14051_v53, %v8918_v52  ;;  %v6669_v3 = vpop.permute.xlu0 %6668 }
 0xa1a   : > { %10490 = vpow2.f32 %v6350_v18  ;;  %9688 = vmatprep.subr.bf16.mxu1 %v9687_v14  ;;  %v10487_v26 = vpop.eup %10486  ;;  %v8930_v37 = vadd.f32 -1.0, %v10479_v40  ;;  %v6499_v50 = vsel %vm3902_vm14, %v6419_v12, %v6418_v31  ;;  %v8921_v10 = vadd.f32 -1.0, %v10485_v11 }
 0xa1b   : > { %v14112_v34 = vadd.f32 %v6184_v19, %v6183_v21  ;;  %9690 = vmatpush3.bf16.msra.mxu1 %v9687_v14  ;;  %9470 = vmatmul.mubr.msk.f32.vlgmr.msra.gmra.mrb[56].mxu0 %vm1202_vm7, %v15068_v5  ;;  %10492 = vpow2.f32 %v6368_v0  ;;  %v10489_v20 = vpop.eup %10488  ;;  %vm6260_vm12 = vcmp.gt.f32.partialorder %v14061_v2, 0.0  ;;  %v6421_v27 = vsel %vm6261_vm4, %v14065_v28, %v8920_v35 }
 0xa1c   : > { %9472 = vmatprep.mubr.msk.f32.mxu0 %vm1202_vm7, %v15069_v41  ;;  %9699 = vmatprep.subr.bf16.mxu1 %v15070_v29  ;;  %v8922_v18 = vadd.f32 -1.0, %v10489_v20  ;;  %v8931_v42 = vadd.f32 -1.0, %v10487_v26  ;;  %vm6271_vm8 = vcmp.gt.f32.partialorder %v14059_v46, 0.0  ;;  %v6420_v51 = vsel %vm6260_vm12, %v14061_v2, %v8919_v62  ;;  %v6667_v41 = vpop.permute.xlu1 %6666 }
 0xa1d   : > { %v6297_v15 = vmin.f32 %v14112_v34, 0.0  ;;  %v6507_v53 = vsel %vm3904_vm5, %v6428_v7, %v6506_v58  ;;  %v6430_v21 = vsel %vm6270_vm13, %v14048_v1, %v8929_v59  ;;  %vm6262_vm15 = vcmp.gt.f32.partialorder %v14075_v17, 0.0  ;;  %v6528_v52 = vpop.permute.xlu0 %6527 }
 0xa1e   : > { %9456 = vmatmul.mubr.msk.f32.vlgmr.msra.gmra.mrb[68].mxu1 %vm1202_vm7, %v6498_v45  ;;  %v6500_v24 = vsel %vm3904_vm5, %v6420_v51, %v6499_v50  ;;  %v6431_v54 = vsel %vm6271_vm8, %v14059_v46, %v8930_v37  ;;  %v6422_v28 = vsel %vm6262_vm15, %v14075_v17, %v8921_v10  ;;  %vm6263_vm2 = vcmp.gt.f32.partialorder %v14082_v38, 0.0 }
 0xa1f   : > { %v6352_v8 = vmul.f32 1.442695, %v6297_v15  ;;  %9473 = vmatmul.mubr.msk.f32.gmra.mrb[58].mxu0 %vm1202_vm7, %v15072_v32  ;;  %v6501_v14 = vsel %vm3906_vm9, %v6421_v27, %v6500_v24  ;;  %vm6272_vm11 = vcmp.gt.f32.partialorder %v14077_v56, 0.0  ;;  %vm6264_vm6 = vcmp.gt.f32.partialorder %v14094_v4, 0.0 }
 0xa20   : > { %v6423_v2 = vsel %vm6263_vm2, %v14082_v38, %v8922_v18  ;;  %v6432_v1 = vsel %vm6272_vm11, %v14077_v56, %v8931_v42  ;;  %v6508_v25 = vsel %vm3906_vm9, %v6429_v36, %v6507_v53  ;;  %v6502_v0 = vsel %vm3908_vm3, %v6422_v28, %v6501_v14  ;;  %v6526_v30 = vpop.permute.xlu1 %6525 }
 0xa21   : > { %10494 = vpow2.f32 %v6352_v8  ;;  %v6509_v17 = vsel %vm3908_vm3, %v6430_v21, %v6508_v25  ;;  %vm6265_vm13 = vcmp.gt.f32.partialorder %v14112_v34, 0.0  ;;  %v6503_v63 = vsel %vm3910_vm10, %v6423_v2, %v6502_v0 }
 0xa22   : > { %v6510_v22 = vsel %vm3910_vm10, %v6431_v54, %v6509_v17  ;;  %vm6273_vm4 = vcmp.gt.f32.partialorder %v14089_v33, 0.0  ;;  %vm15073_vm12 = vcmask 1047559   ;;  %vm15075_vm10 = vcmask 769024   ;;  %v14203_v17 = vld [vmem:[%s14197_s19] sm:$0xff] }
 0xa23   : > { %v6511_v38 = vsel %vm3912_vm0, %v6432_v1, %v6510_v22  ;;  %vm15074_vm3 = vmmov %vm15073_vm12  ;;  %v6670_v40 = vsel %vm15075_vm10, %v6667_v41, %v6669_v3  ;;  %vm10741_vm8 = vmmov 0   ;;  %vm6893_vm15 = vcmask 523520  }
 0xa24   : > { %v10491_v43 = vpop.eup %10490  ;;  %vm7218_vm2 = vcmp.gt.f32.partialorder %v14203_v17, 0.0  ;;  %vm15087_vm10 = vcmask 7168  }
 0xa25   : > { %v8923_v23 = vadd.f32 -1.0, %v10491_v43  ;;  %v10493_v16 = vpop.eup %10492 }
 0xa26   : > { %v8932_v46 = vadd.f32 -1.0, %v10493_v16 }
 0xa27   : > { %v6424_v19 = vsel %vm6264_vm6, %v14094_v4, %v8923_v23 }
 0xa28   : > { %v6504_v5 = vsel %vm3912_vm0, %v6424_v19, %v6503_v63  ;;  %v6433_v55 = vsel %vm6273_vm4, %v14089_v33, %v8932_v46  ;;  %vm6529_vm0 = vcmask 506880  }
 0xa29   : > { %v6512_v39 = vsel %vm15074_vm3, %v6433_v55, %v6511_v38  ;;  %v6530_v11 = vsel %vm6529_vm0, %v6526_v30, %v6528_v52  ;;  %v10652_v30 = vld [vmem:[%s14672_s6 + $0xd8] sm:$0xff] }
 0xa2b   : > { %v10495_v44 = vpop.eup %10494 }
 0xa2c   : > { %v8924_v48 = vadd.f32 -1.0, %v10495_v44 }
 0xa2e   : > { %v6425_v56 = vsel %vm6265_vm13, %v14112_v34, %v8924_v48  ;;  %v14206_v48 = vld [vmem:[%s14197_s19 + $0x8] sm:$0xff] }
 0xa2f   : > { %v6505_v4 = vsel %vm15073_vm12, %v6425_v56, %v6504_v5  ;;  %vm7219_vm6 = vcmp.gt.f32.partialorder %v14206_v48, 0.0 }
 0xa30   : > { %9458 = vmatprep.mubr.msk.f32.mxu1 %vm1202_vm7, %v6505_v4 }
 0xa31   : > { %9459 = vmatmul.mubr.msk.f32.gmra.mrb[70].mxu1 %vm1202_vm7, %v6512_v39 }
 0xaee   : > { %v9471_v15 = vpop.f32.mrb[56].mxu0 }
 0xaef   : > { %v6744_v34 = vadd.f32 %v9471_v15, %v6670_v40  ;;  %v6738_v45 = vpop.f32.mrb[57].mxu0  ;;  %v14215_v15 = vld [vmem:[%s14197_s19 + $0x18] sm:$0xff] }
 0xaf0   : > { %v6739_v6 = vadd.f32 %v6738_v45, %v6670_v40  ;;  %v14225_v45 = vld [vmem:[%s14672_s6 + $0x58] sm:$0xff]  ;;  %vm7221_vm13 = vcmp.gt.f32.partialorder %v14215_v15, 0.0 }
 0xaf1   : > { %v9457_v13 = vpop.f32.mrb[68].mxu1  ;;  %6791 = vrot.lane.b32.xlu0 %v6744_v34, %s14929_s26 }
 0xaf2   : > { %v6606_v49 = vpop.f32.mrb[69].mxu1  ;;  %v9474_v60 = vpop.f32.mrb[58].mxu0  ;;  %6789 = vrot.lane.b32.xlu1 %v6739_v6, %s14929_s26  ;;  %v6612_v26 = vadd.f32 %v9457_v13, %v6530_v11 }
 0xaf3   : > { %v6754_v33 = vadd.f32 %v9474_v60, %v6670_v40  ;;  %v6748_v8 = vpop.f32.mrb[59].mxu0  ;;  %v6607_v31 = vadd.f32 %v6606_v49, %v6530_v11  ;;  %v14237_v49 = vld [vmem:[%s14672_s6 + $0x98] sm:$0xff] }
 0xaf4   : > { %v6749_v32 = vadd.f32 %v6748_v8, %v6670_v40  ;;  %v6758_v35 = vadd.f32 %v6744_v34, %v6612_v26  ;;  %v14220_v34 = vld [vmem:[%s14672_s6 + $0x18] sm:$0xff] }
 0xaf5   : > { %6795 = vrot.lane.b32.xlu0 %v6754_v33, %s14929_s26  ;;  %v6757_v58 = vadd.f32 %v6739_v6, %v6607_v31  ;;  %v14228_v6 = vld [vmem:[%s14197_s19 + $0x10] sm:$0xff]  ;;  %v9953_v13 = vpack.i.bf16 %v14225_v45, %v14220_v34  ;;  %v14242_v60 = vld [vmem:[%s14672_s6 + $0xd8] sm:$0xff] }
 0xaf6   : > { %6793 = vrot.lane.b32.xlu1 %v6749_v32, %s14929_s26  ;;  %v8942_v62 = vmul.f32 -1.442695, %v6758_v35  ;;  %v10649_v8 = vld [vmem:[%s14672_s6 + $0x58] sm:$0xff]  ;;  %vm7220_vm12 = vcmp.gt.f32.partialorder %v14228_v6, 0.0 }
 0xaf7   : > { %v8941_v7 = vmul.f32 -1.442695, %v6757_v58  ;;  %v15076_v58 = vld [vmem:[#allocation45_spill] sm:$0xff] }
 0xaf8   : > { %10496 = vpow2.f32 %v8942_v62 }
 0xaf9   : > { %10498 = vpow2.f32 %v8941_v7 }
 0xb02   : > { %v10497_v50 = vpop.eup %10496 }
 0xb03   : > { %v10499_v10 = vpop.eup %10498  ;;  %v6774_v27 = vadd.f32 1.0, %v10497_v50 }
 0xb04   : > { %v9460_v9 = vpop.f32.mrb[70].mxu1  ;;  %v6773_v42 = vadd.f32 1.0, %v10499_v10 }
 0xb05   : > { %v6616_v47 = vpop.f32.mrb[71].mxu1  ;;  %v6622_v20 = vadd.f32 %v9460_v9, %v6530_v11 }
 0xb06   : > { %v6617_v36 = vadd.f32 %v6616_v47, %v6530_v11  ;;  %v10651_v47 = vld [vmem:[%s14672_s6 + $0x98] sm:$0xff] }
 0xb07   : > { %v6760_v43 = vadd.f32 %v6754_v33, %v6622_v20  ;;  %v14246_v33 = vpack.i.bf16 %v14242_v60, %v14237_v49  ;;  %v9958_v52 = vpack.i.bf16 %v10652_v30, %v10651_v47 }
 0xb08   : > { %v6759_v59 = vadd.f32 %v6749_v32, %v6617_v36  ;;  %v10650_v32 = vld [vmem:[%s14672_s6 + $0x18] sm:$0xff] }
 0xb09   : > { %v8944_v12 = vmul.f32 -1.442695, %v6760_v43  ;;  %v9948_v9 = vpack.i.bf16 %v10649_v8, %v10650_v32 }
 0xb0a   : > { %v8943_v37 = vmul.f32 -1.442695, %v6759_v59  ;;  %v15078_v59 = vmov 0.0  }
 0xb0b   : > { %10500 = vpow2.f32 %v8944_v12  ;;  %9483 = vmatprep.mubr.msk.f32.mxu1 %vm10741_vm8, %v15078_v59  ;;  %v15079_v12 = vld [vmem:[#allocation47_spill] sm:$0xff] }
 0xb0c   : > { %10502 = vpow2.f32 %v8943_v37  ;;  %v15080_v37 = vmax.f32 %v15079_v12, 0.0 }
 0xb0d   : > { %10504 = vrcp.f32 %v6774_v27 }
 0xb0e   : > { %10506 = vrcp.f32 %v6773_v42 }
 0xb15   : > { %v10501_v18 = vpop.eup %10500 }
 0xb16   : > { %v10503_v51 = vpop.eup %10502  ;;  %v6776_v23 = vadd.f32 1.0, %v10501_v18 }
 0xb17   : > { %v6775_v53 = vadd.f32 1.0, %v10503_v51  ;;  %v14180_v16 = vpop.eup %10504 }
 0xb18   : > { %10508 = vrcp.f32 %v6776_v23  ;;  %v14182_v24 = vpop.eup %10506 }
 0xb19   : > { %10510 = vrcp.f32 %v6775_v53  ;;  %v6853_v50 = vmul.f32 %v14182_v24, %v15080_v37 }
 0xb22   : > { %v14188_v2 = vpop.eup %10508 }
 0xb23   : > { %v14191_v25 = vpop.eup %10510 }
 0xb24   : > { %v6831_v42 = vsub.f32 1.0, %v14191_v25 }
 0xb63   : > { %v6792_v21 = vpop.permute.xlu0 %6791 }
 0xb64   : > { %v6802_v54 = vmul.f32 %v14180_v16, %v6792_v21  ;;  %v6790_v28 = vpop.permute.xlu1 %6789 }
 0xb65   : > { %v6801_v14 = vmul.f32 %v14182_v24, %v6790_v28 }
 0xb66   : > { %6811 = vrot.lane.b32.xlu0 %v6802_v54, %s14929_s26  ;;  %v15081_v54 = vld [vmem:[#allocation55_spill] sm:$0xff] }
 0xb67   : > { %v6796_v1 = vpop.permute.xlu0 %6795  ;;  %6809 = vrot.lane.b32.xlu1 %v6801_v14, %s14929_s26  ;;  %v15082_v28 = vmax.f32 %v15081_v54, 0.0 }
 0xb68   : > { %v6804_v44 = vmul.f32 %v14188_v2, %v6796_v1  ;;  %v6794_v19 = vpop.permute.xlu1 %6793 }
 0xb69   : > { %v6803_v46 = vmul.f32 %v14191_v25, %v6794_v19  ;;  %v6855_v14 = vmul.f32 %v14191_v25, %v15082_v28 }
 0xb6a   : > { %6815 = vrot.lane.b32.xlu0 %v6804_v44, %s14929_s26 }
 0xb6b   : > { %6813 = vrot.lane.b32.xlu1 %v6803_v46, %s14929_s26 }
 0xb6e   : > { %6871 = vperm.xlu0 %9856, %v14203_v17  }
 0xb6f   : > { %6876 = vperm.xlu1 %9857, %v14206_v48  }
 0xbd8   : > { %v6812_v0 = vpop.permute.xlu0 %6811 }
 0xbd9   : > { %v6822_v22 = vadd.f32 %v6812_v0, %v6612_v26  ;;  %v6810_v63 = vpop.permute.xlu1 %6809 }
 0xbda   : > { %v6821_v38 = vadd.f32 %v6810_v63, %v6607_v31  ;;  %v6830_v31 = vsub.f32 1.0, %v14180_v16  ;;  %v15083_v63 = vld [vmem:[#allocation49_spill] sm:$0xff] }
 0xbdb   : > { %10512 = vtanh.f32 %v6822_v22 }
 0xbdc   : > { %10514 = vtanh.f32 %v6821_v38  ;;  %v6816_v56 = vpop.permute.xlu0 %6815  ;;  %v15084_v38 = vmax.f32 %v15083_v63, 0.0 }
 0xbdd   : > { %v6824_v5 = vadd.f32 %v6816_v56, %v6622_v20  ;;  %v6814_v4 = vpop.permute.xlu1 %6813  ;;  %v6829_v20 = vsub.f32 1.0, %v14182_v24 }
 0xbde   : > { %v6823_v55 = vadd.f32 %v6814_v4, %v6617_v36  ;;  %v15077_v36 = vmax.f32 %v15076_v58, 0.0  ;;  %v6856_v56 = vmul.f32 %v14188_v2, %v15084_v38 }
 0xbdf   : > { %10516 = vtanh.f32 %v6824_v5 }
 0xbe0   : > { %10518 = vtanh.f32 %v6823_v55  ;;  %v6854_v62 = vmul.f32 %v14180_v16, %v15077_v36  ;;  %v6832_v16 = vsub.f32 1.0, %v14188_v2 }
 0xbe5   : > { %v10513_v39 = vpop.eup %10512 }
 0xbe6   : > { %v10515_v41 = vpop.eup %10514  ;;  %6839 = vrot.lane.b32.xlu0 %v10513_v39, %s14931_s12 }
 0xbe7   : > { %6837 = vrot.lane.b32.xlu1 %v10515_v41, %s14931_s12 }
 0xbe9   : > { %v10517_v3 = vpop.eup %10516 }
 0xbea   : > { %v10519_v40 = vpop.eup %10518  ;;  %6843 = vrot.lane.b32.xlu0 %v10517_v3, %s14931_s12 }
 0xbeb   : > { %6841 = vrot.lane.b32.xlu1 %v10519_v40, %s14931_s12 }
 0xbed   : > { %v6872_v11 = vpop.permute.xlu0 %6871 }
 0xbee   : > { %6886 = vperm.xlu0 %9856, %v14215_v15   ;;  %v6877_v26 = vpop.permute.xlu1 %6876 }
 0xbef   : > { %6881 = vperm.xlu1 %9857, %v14228_v6  }
 0xbf2   : > { %9954 = vrot.lane.b32.xlu0 %v9953_v13, %s10739_s25 }
 0xbf3   : > { %9949 = vrot.lane.b32.xlu1 %v9948_v9, %s10740_s13 }
 0xbf6   : > { %9964 = vrot.lane.b32.xlu0 %v14246_v33, %s10739_s25  ;;  %s10748_s25 = smov 88  }
 0xbf7   : > { %9959 = vrot.lane.b32.xlu1 %v9958_v52, %s10740_s13 }
 0xc58   : > { %v6840_v35 = vpop.permute.xlu0 %6839 }
 0xc59   : > { %v6850_v43 = vmul.f32 %v6840_v35, %v6830_v31  ;;  %v6838_v7 = vpop.permute.xlu1 %6837 }
 0xc5a   : > { %v6849_v10 = vmul.f32 %v6838_v7, %v6829_v20 }
 0xc5b   : > { %v6858_v27 = vadd.f32 %v6854_v62, %v6850_v43 }
 0xc5c   : > { %v6857_v18 = vadd.f32 %v6853_v50, %v6849_v10  ;;  %v6844_v23 = vpop.permute.xlu0 %6843 }
 0xc5d   : > { %v6862_v51 = vmax.f32 %v6858_v27, 0.0  ;;  %v6842_v53 = vpop.permute.xlu1 %6841  ;;  %v6852_v24 = vmul.f32 %v6844_v23, %v6832_v16 }
 0xc5e   : > { %v6861_v21 = vmax.f32 %v6857_v18, 0.0  ;;  %v6851_v1 = vmul.f32 %v6842_v53, %v6831_v42 }
 0xc5f   : > { %v14276_v44 = vmax.f32 %v6862_v51, 0.0  ;;  %v6860_v25 = vadd.f32 %v6856_v56, %v6852_v24 }
 0xc60   : > { %v6865_v19 = vmax.f32 %v6861_v21, 0.0  ;;  %v6859_v46 = vadd.f32 %v6855_v14, %v6851_v1 }
 0xc61   : > { %v6890_v0 = vmul.f32 %v6877_v26, %v14276_v44  ;;  %v6864_v32 = vmax.f32 %v6860_v25, 0.0 }
 0xc62   : > { %v6889_v22 = vmul.f32 %v6872_v11, %v6865_v19  ;;  %v6863_v5 = vmax.f32 %v6859_v46, 0.0  ;;  %7052 = vrot.lane.b32.xlu0 %v6865_v19, %s14931_s12 }
 0xc63   : > { %v6901_v4 = vsel %vm6893_vm15, %v6890_v0, 0.0  ;;  %v6868_v52 = vmax.f32 %v6864_v32, 0.0 }
 0xc64   : > { %v6867_v55 = vmax.f32 %v6863_v5, 0.0  ;;  %v6894_v39 = vsel %vm6893_vm15, %v6889_v22, 0.0  ;;  %v6902_v41 = vrot.slane %v6901_v4, 4 }
 0xc65   : > { %v6895_v3 = vrot.slane %v6894_v39, 4 }
 0xc66   : > { %7056 = vrot.lane.b32.xlu0 %v6867_v55, %s14931_s12  ;;  %v6903_v40 = vadd.f32 %v6902_v41, %v6901_v4 }
 0xc67   : > { %v6896_v8 = vadd.f32 %v6895_v3, %v6894_v39 }
 0xc68   : > { %v6904_v9 = vrot.slane %v6903_v40, 2 }
 0xc69   : > { %v6897_v47 = vrot.slane %v6896_v8, 2 }
 0xc6a   : > { %v6905_v30 = vadd.f32 %v6904_v9, %v6903_v40  ;;  %9969 = vrot.lane.b32.xlu0 %v9953_v13, %s10742_s0 }
 0xc6b   : > { %v6898_v2 = vadd.f32 %v6897_v47, %v6896_v8 }
 0xc6c   : > { %v6906_v11 = vrot.slane %v6905_v30, 1 }
 0xc6d   : > { %v6887_v26 = vpop.permute.xlu0 %6886  ;;  %v6899_v31 = vrot.slane %v6898_v2, 1 }
 0xc6e   : > { %v6892_v35 = vmul.f32 %v6887_v26, %v6868_v52  ;;  %v6882_v20 = vpop.permute.xlu1 %6881  ;;  %v6907_v58 = vadd.f32 %v6906_v11, %v6905_v30 }
 0xc6f   : > { %v6891_v36 = vmul.f32 %v6882_v20, %v6867_v55  ;;  %v6900_v62 = vadd.f32 %v6899_v31, %v6898_v2  ;;  %v8950_v2 = vld [vmem:[%s14673_s7 + $0x4] ss:$0 sm:$0xff] }
 0xc70   : > { %v6915_v43 = vsel %vm6893_vm15, %v6892_v35, 0.0  ;;  %v6923_v39 = vmax.f32 %v6907_v58, 0.0  ;;  %7199 = vrot.lane.b32.xlu0 %v8950_v2, %s15085_s20  ;;  %s10749_s20 = smov 29  }
 0xc71   : > { %v6916_v7 = vrot.slane %v6915_v43, 4  ;;  %v6908_v12 = vsel %vm6893_vm15, %v6891_v36, 0.0  ;;  %v9955_v37 = vpop.permute.xlu0 %9954  ;;  %v7645_v50 = vsel %vm3902_vm14, %v6907_v58, %v6900_v62  ;;  %v6922_v55 = vmax.f32 %v6900_v62, 0.0  ;;  %vm15088_vm15 = vmmov %vm15087_vm10 }
 0xc72   : > { %v6909_v10 = vrot.slane %v6908_v12, 4  ;;  %v9957_v13 = vunpack.i.h.bf16 %v9955_v37  ;;  %v9956_v27 = vunpack.i.l.bf16 %v9955_v37  ;;  %v9950_v18 = vpop.permute.xlu1 %9949  ;;  %v15086_v37 = vld [vmem:[#allocation10_spill] sm:$0xff] }
 0xc73   : > { %v6917_v42 = vadd.f32 %v6916_v7, %v6915_v43  ;;  %v9952_v51 = vunpack.i.h.bf16 %v9950_v18  ;;  %v9951_v23 = vunpack.i.l.bf16 %v9950_v18  ;;  %v6930_v32 = vsel %vm3902_vm14, %v6923_v39, %v6922_v55 }
 0xc74   : > { %v6910_v53 = vadd.f32 %v6909_v10, %v6908_v12  ;;  %v9705_v21 = vpack.c.bf16 %v9957_v13, %v9956_v27 }
 0xc75   : > { %v6918_v16 = vrot.slane %v6917_v42, 2  ;;  %v9965_v54 = vpop.permute.xlu0 %9964  ;;  %v9700_v28 = vpack.c.bf16 %v9952_v51, %v9951_v23 }
 0xc76   : > { %v6911_v14 = vrot.slane %v6910_v53, 2  ;;  %v9967_v1 = vunpack.i.h.bf16 %v9965_v54  ;;  %v9966_v19 = vunpack.i.l.bf16 %v9965_v54  ;;  %v9960_v24 = vpop.permute.xlu1 %9959  ;;  %9706 = vmatprep.subr.bf16.mxu0 %v9705_v21 }
 0xc77   : > { %v6919_v46 = vadd.f32 %v6918_v16, %v6917_v42  ;;  %v9962_v0 = vunpack.i.h.bf16 %v9960_v24  ;;  %v9961_v22 = vunpack.i.l.bf16 %v9960_v24  ;;  %9701 = vmatpush3.bf16.msra.mxu1 %v9700_v28  ;;  %9708 = vmatpush3.bf16.msra.mxu0 %v9705_v21 }
 0xc78   : > { %v6912_v63 = vadd.f32 %v6911_v14, %v6910_v53  ;;  %v9709_v38 = vpack.c.bf16 %v9967_v1, %v9966_v19  ;;  %9702 = vmatprep.subr.bf16.mxu1 %v15070_v29 }
 0xc79   : > { %v6920_v56 = vrot.slane %v6919_v46, 1  ;;  %v9703_v5 = vpack.c.bf16 %v9962_v0, %v9961_v22 }
 0xc7a   : > { %v6913_v4 = vrot.slane %v6912_v63, 1  ;;  %9710 = vmatprep.subr.bf16.mxu0 %v9709_v38 }
 0xc7b   : > { %v6921_v25 = vadd.f32 %v6920_v56, %v6919_v46  ;;  %9704 = vmatpush3.bf16.msra.mxu1 %v9703_v5  ;;  %9712 = vmatpush3.bf16.msra.mxu0 %v9709_v38 }
 0xc7c   : > { %v6914_v41 = vadd.f32 %v6913_v4, %v6912_v63  ;;  %9721 = vmatprep.subr.bf16.mxu0 %v15070_v29 }
 0xc7d   : > { %v6925_v8 = vmax.f32 %v6921_v25, 0.0 }
 0xc7e   : > { %v6924_v3 = vmax.f32 %v6914_v41, 0.0  ;;  %v7646_v40 = vsel %vm3904_vm5, %v6914_v41, %v7645_v50 }
 0xc7f   : > { %v14295_v9 = vsel %vm3906_vm9, %v6921_v25, %v7646_v40 }
 0xc80   : > { %v6931_v47 = vsel %vm3904_vm5, %v6924_v3, %v6930_v32 }
 0xc81   : > { %v6932_v30 = vsel %vm3906_vm9, %v6925_v8, %v6931_v47 }
 0xc82   : > { %6933 = vrot.lane.b32.xlu1 %v6932_v30, %s14931_s12 }
 0xc86   : > { %7054 = vrot.lane.b32.xlu1 %v14276_v44, %s14931_s12 }
 0xc8a   : > { %7058 = vrot.lane.b32.xlu1 %v6868_v52, %s14931_s12 }
 0xc8e   : > { %9974 = vrot.lane.b32.xlu1 %v14246_v33, %s10742_s0 }
 0xc92   : > { %7326 = vrot.lane.b32.xlu1 %v8950_v2, %s10743_s23 }
 0xcd4   : > { %v14310_v11 = vpop.permute.xlu0 %7052 }
 0xcd5   : > { %9494 = vmatprep.mubr.msk.f32.mxu0 %vm1202_vm7, %v14310_v11 }
 0xcd8   : > { %v14314_v44 = vpop.permute.xlu0 %7056 }
 0xcdc   : > { %v9970_v52 = vpop.permute.xlu0 %9969 }
 0xcdd   : > { %v9972_v26 = vunpack.i.h.bf16 %v9970_v52  ;;  %v9971_v31 = vunpack.i.l.bf16 %v9970_v52 }
 0xcdf   : > { %v9713_v35 = vpack.c.bf16 %v9972_v26, %v9971_v31 }
 0xce1   : > { %9714 = vmatprep.subr.bf16.mxu1 %v9713_v35 }
 0xce2   : > { %v7200_v21 = vpop.permute.xlu0 %7199 }
 0xcf4   : > { %v6934_v20 = vpop.permute.xlu1 %6933 }
 0xcf5   : > { %9484 = vmatmul.mubr.msk.f32.vlgmr.msra.gmra.mrb[72].mxu1 %vm1202_vm7, %v6934_v20 }
 0xcf6   : > { %9508 = vmatprep.mubr.msk.f32.mxu1 %vm1202_vm7, %v14310_v11  ;;  %9716 = vmatpush3.bf16.msra.mxu1 %v9713_v35 }
 0xcf8   : > { %v14319_v33 = vpop.permute.xlu1 %7054 }
 0xcf9   : > { %9495 = vmatmul.mubr.msk.f32.vlgmr.msra.gmra.mrb[60].mxu0 %vm1202_vm7, %v14319_v33 }
 0xcfa   : > { %9497 = vmatprep.mubr.msk.f32.mxu0 %vm1202_vm7, %v14314_v44 }
 0xcfc   : > { %v14325_v58 = vpop.permute.xlu1 %7058 }
 0xcfd   : > { %9498 = vmatmul.mubr.msk.f32.gmra.mrb[62].mxu0 %vm1202_vm7, %v14325_v58 }
 0xcfe   : > { %9522 = vmatprep.mubr.msk.f32.mxu0 %vm10741_vm8, %v15078_v59 }
 0xd00   : > { %v9975_v36 = vpop.permute.xlu1 %9974 }
 0xd01   : > { %v9977_v62 = vunpack.i.h.bf16 %v9975_v36  ;;  %v9976_v43 = vunpack.i.l.bf16 %v9975_v36 }
 0xd03   : > { %v9717_v7 = vpack.c.bf16 %v9977_v62, %v9976_v43 }
 0xd05   : > { %9718 = vmatprep.subr.bf16.mxu1 %v9717_v7 }
 0xd06   : > { %9720 = vmatpush3.bf16.msra.mxu1 %v9717_v7 }
 0xd07   : > { %9727 = vmatprep.subr.bf16.mxu1 %v15070_v29 }
 0xd09   : > { %9509 = vmatmul.mubr.msk.f32.vlgmr.msra.gmra.mrb[74].mxu1 %vm1202_vm7, %v14319_v33 }
 0xd0a   : > { %9511 = vmatprep.mubr.msk.f32.mxu1 %vm1202_vm7, %v14314_v44 }
 0xd0d   : > { %9512 = vmatmul.mubr.msk.f32.gmra.mrb[76].mxu1 %vm1202_vm7, %v14325_v58 }
 0xd0e   : > { %9533 = vmatprep.mubr.msk.f32.mxu1 %vm10741_vm8, %v15078_v59 }
 0xdc8   : > { %v7015_v12 = vpop.f32.mrb[72].mxu1 }
 0xdc9   : > { %v7026_v50 = vrot.slane %v7015_v12, %v15086_v37  ;;  %v9485_v10 = vpop.f32.mrb[73].mxu1 }
 0xdcb   : > { %v7027_v13 = vcombine.high %v7026_v50, %v7026_v50  ;;  %v7034_v27 = vrot.slane %v7026_v50, %v15086_v37 }
 0xdcc   : > { %v9496_v18 = vpop.f32.mrb[60].mxu0 }
 0xdcd   : > { %v7041_v42 = vrot.slane %v7027_v13, %v15086_v37  ;;  %v7150_v51 = vpop.f32.mrb[61].mxu0  ;;  %v7172_v23 = vrot.slane %v7034_v27, %v15063_v57  ;;  %v7042_v53 = vcombine.high %v7034_v27, %v7034_v27 }
 0xdcf   : > { %v7176_v16 = vrot.slane %v7041_v42, %v15063_v57  ;;  %v7189_v54 = vadd.f32 %v7172_v23, %v7150_v51  ;;  %v7043_v28 = vcombine.high %v7041_v42, %v7041_v42  ;;  %v7180_v14 = vrot.slane %v7042_v53, %v15063_v57 }
 0xdd0   : > { %v9499_v1 = vpop.f32.mrb[62].mxu0 }
 0xdd1   : > { %v7190_v19 = vadd.f32 %v9496_v18, %v7176_v16  ;;  %v7202_v24 = vadd.f32 %v7200_v21, %v7189_v54  ;;  %v7184_v46 = vrot.slane %v7043_v28, %v15063_v57  ;;  %v7160_v0 = vpop.f32.mrb[63].mxu0 }
 0xdd2   : > { %v7191_v22 = vadd.f32 %v7180_v14, %v7160_v0 }
 0xdd3   : > { %v7203_v63 = vadd.f32 %v7200_v21, %v7190_v19  ;;  %vm7206_vm11 = vcmp.ge.f32.partialorder %v7202_v24, 0.0  ;;  %v7210_v38 = vmul.f32 0.01, %v7202_v24  ;;  %v7192_v56 = vadd.f32 %v9499_v1, %v7184_v46 }
 0xdd4   : > { %v7204_v5 = vadd.f32 %v7200_v21, %v7191_v22 }
 0xdd5   : > { %vm7207_vm4 = vcmp.ge.f32.partialorder %v7203_v63, 0.0  ;;  %v7211_v4 = vmul.f32 0.01, %v7203_v63  ;;  %v7214_v25 = vsel %vm7206_vm11, %v7202_v24, %v7210_v38  ;;  %v7205_v55 = vadd.f32 %v7200_v21, %v7192_v56  ;;  %vm15089_vm11 = vmmov %vm15087_vm10 }
 0xdd6   : > { %v7222_v39 = vsel %vm7218_vm2, %v7214_v25, -1e+30  ;;  %vm7208_vm3 = vcmp.ge.f32.partialorder %v7204_v5, 0.0  ;;  %v7212_v41 = vmul.f32 0.01, %v7204_v5 }
 0xdd7   : > { %v7215_v3 = vsel %vm7207_vm4, %v7203_v63, %v7211_v4  ;;  %v7226_v40 = vsel %vm15087_vm10, %v7222_v39, -inf  ;;  %vm7209_vm0 = vcmp.ge.f32.partialorder %v7205_v55, 0.0  ;;  %v7213_v8 = vmul.f32 0.01, %v7205_v55  ;;  %vm15090_vm4 = vmmov %vm15087_vm10 }
 0xdd8   : > { %v7223_v32 = vsel %vm7219_vm6, %v7215_v3, -1e+30  ;;  %v7227_v47 = vrot.slane %v7226_v40, 4  ;;  %v7216_v30 = vsel %vm7208_vm3, %v7204_v5, %v7212_v41  ;;  %vm15091_vm3 = vmmov %vm15090_vm4 }
 0xdd9   : > { %v7233_v2 = vsel %vm15088_vm15, %v7223_v32, -inf  ;;  %v7217_v52 = vsel %vm7209_vm0, %v7205_v55, %v7213_v8  ;;  %v7224_v26 = vsel %vm7220_vm12, %v7216_v30, -1e+30  ;;  %vm15092_vm10 = vmmov %vm15091_vm3 }
 0xdda   : > { %v7228_v31 = vmax.f32 %v7226_v40, %v7227_v47  ;;  %v7234_v35 = vrot.slane %v7233_v2, 4  ;;  %v7225_v20 = vsel %vm7221_vm13, %v7217_v52, -1e+30  ;;  %v7240_v36 = vsel %vm15089_vm11, %v7224_v26, -inf  ;;  %vm15093_vm0 = vmmov %vm15091_vm3 }
 0xddb   : > { %v7247_v62 = vsel %vm15090_vm4, %v7225_v20, -inf  ;;  %v7241_v43 = vrot.slane %v7240_v36, 4  ;;  %vm15094_vm15 = vmmov %vm15093_vm0 }
 0xddc   : > { %v7229_v7 = vrot.slane %v7228_v31, 2  ;;  %v7235_v12 = vmax.f32 %v7233_v2, %v7234_v35  ;;  %v7248_v50 = vrot.slane %v7247_v62, 4  ;;  %v14363_v10 = vpop.f32.mrb[74].mxu1 }
 0xddd   : > { %v7242_v13 = vmax.f32 %v7240_v36, %v7241_v43  ;;  %v14365_v27 = vpop.f32.mrb[75].mxu1 }
 0xdde   : > { %v7230_v18 = vmax.f32 %v7228_v31, %v7229_v7  ;;  %v7236_v42 = vrot.slane %v7235_v12, 2  ;;  %v7249_v51 = vmax.f32 %v7247_v62, %v7248_v50 }
 0xddf   : > { %v7243_v23 = vrot.slane %v7242_v13, 2 }
 0xde0   : > { %v7231_v53 = vrot.slane %v7230_v18, 1  ;;  %v7237_v21 = vmax.f32 %v7235_v12, %v7236_v42  ;;  %v7250_v16 = vrot.slane %v7249_v51, 2  ;;  %v14367_v54 = vpop.f32.mrb[76].mxu1 }
 0xde1   : > { %v7244_v28 = vmax.f32 %v7242_v13, %v7243_v23  ;;  %v14369_v14 = vpop.f32.mrb[77].mxu1 }
 0xde2   : > { %v7232_v1 = vmax.f32 %v7230_v18, %v7231_v53  ;;  %v7238_v19 = vrot.slane %v7237_v21, 1  ;;  %v7251_v24 = vmax.f32 %v7249_v51, %v7250_v16 }
 0xde3   : > { %v7245_v46 = vrot.slane %v7244_v28, 1 }
 0xde4   : > { %v7239_v0 = vmax.f32 %v7237_v21, %v7238_v19  ;;  %v7254_v22 = vsub.f32 %v7222_v39, %v7232_v1  ;;  %v7252_v63 = vrot.slane %v7251_v24, 1 }
 0xde5   : > { %v7246_v38 = vmax.f32 %v7244_v28, %v7245_v46 }
 0xde6   : > { %v7255_v56 = vsub.f32 %v7223_v32, %v7239_v0  ;;  %v7258_v5 = vmul.f32 1.442695, %v7254_v22  ;;  %v7253_v4 = vmax.f32 %v7251_v24, %v7252_v63 }
 0xde7   : > { %v7256_v25 = vsub.f32 %v7224_v26, %v7246_v38 }
 0xde8   : > { %10520 = vpow2.f32 %v7258_v5  ;;  %v7260_v55 = vmul.f32 1.442695, %v7255_v56  ;;  %v7257_v41 = vsub.f32 %v7225_v20, %v7253_v4 }
 0xde9   : > { %v7262_v3 = vmul.f32 1.442695, %v7256_v25 }
 0xdea   : > { %10522 = vpow2.f32 %v7260_v55  ;;  %v7264_v40 = vmul.f32 1.442695, %v7257_v41 }
 0xdeb   : > { %10524 = vpow2.f32 %v7262_v3 }
 0xdec   : > { %10526 = vpow2.f32 %v7264_v40 }
 0xdf2   : > { %v10521_v8 = vpop.eup %10520 }
 0xdf3   : > { %v7266_v47 = vmul.f32 %v10521_v8, %v14203_v17 }
 0xdf4   : > { %v10523_v30 = vpop.eup %10522 }
 0xdf5   : > { %v10525_v2 = vpop.eup %10524  ;;  %v7270_v39 = vsel %vm15091_vm3, %v7266_v47, 0.0  ;;  %v7267_v32 = vmul.f32 %v10523_v30, %v14206_v48 }
 0xdf6   : > { %v10527_v52 = vpop.eup %10526  ;;  %v7271_v31 = vrot.slane %v7270_v39, 4  ;;  %v7268_v26 = vmul.f32 %v10525_v2, %v14228_v6 }
 0xdf7   : > { %v7277_v35 = vsel %vm15092_vm10, %v7267_v32, 0.0  ;;  %v7269_v20 = vmul.f32 %v10527_v52, %v14215_v15 }
 0xdf8   : > { %v7272_v36 = vadd.f32 %v7271_v31, %v7270_v39  ;;  %v7278_v62 = vrot.slane %v7277_v35, 4  ;;  %v7284_v43 = vsel %vm15093_vm0, %v7268_v26, 0.0  ;;  %v7497_v31 = vld [vmem:[%s14672_s6 + $0x60] sm:$0xff]  ;;  %vm7670_vm0 = vcmask 474112  }
 0xdf9   : > { %v7285_v7 = vrot.slane %v7284_v43, 4  ;;  %v7291_v12 = vsel %vm15094_vm15, %v7269_v20, 0.0  ;;  %vm7548_vm15 = vcmask 211968  }
 0xdfa   : > { %v7273_v50 = vrot.slane %v7272_v36, 2  ;;  %v7279_v13 = vadd.f32 %v7278_v62, %v7277_v35  ;;  %v7292_v18 = vrot.slane %v7291_v12, 4  ;;  %v14385_v35 = vld [vmem:[%s14672_s6 + $0x68] sm:$0xff]  ;;  %v7501_v62 = vld [vmem:[%s14672_s6 + $0xe0] sm:$0xff] }
 0xdfb   : > { %v7286_v42 = vadd.f32 %v7285_v7, %v7284_v43  ;;  %v14402_v43 = vld [vmem:[%s14672_s6 + $0xe8] sm:$0xff] }
 0xdfc   : > { %v7274_v51 = vadd.f32 %v7273_v50, %v7272_v36  ;;  %v7280_v23 = vrot.slane %v7279_v13, 2  ;;  %v7293_v53 = vadd.f32 %v7292_v18, %v7291_v12  ;;  %v9983_v36 = vpack.i.bf16 %v14385_v35, %v7497_v31  ;;  %v7499_v12 = vld [vmem:[%s14672_s6 + $0xa0] sm:$0xff] }
 0xdfd   : > { %v7287_v21 = vrot.slane %v7286_v42, 2  ;;  %v9993_v50 = vpack.i.bf16 %v14402_v43, %v7501_v62 }
 0xdfe   : > { %v7275_v16 = vrot.slane %v7274_v51, 1  ;;  %v7281_v28 = vadd.f32 %v7280_v23, %v7279_v13  ;;  %v7294_v1 = vrot.slane %v7293_v53, 2  ;;  %v10013_v23 = vpack.i.bf16 %v7501_v62, %v14242_v60  ;;  %v7327_v60 = vpop.permute.xlu1 %7326 }
 0xdff   : > { %v7288_v19 = vadd.f32 %v7287_v21, %v7286_v42  ;;  %v10008_v42 = vpack.i.bf16 %v7499_v12, %v14237_v49  ;;  %v7396_v21 = vadd.f32 %v14365_v27, %v7327_v60 }
 0xe00   : > { %v7276_v24 = vadd.f32 %v7275_v16, %v7274_v51  ;;  %v7282_v46 = vrot.slane %v7281_v28, 1  ;;  %v7295_v0 = vadd.f32 %v7294_v1, %v7293_v53  ;;  %v10003_v51 = vpack.i.bf16 %v7497_v31, %v14225_v45  ;;  %v7506_v53 = vld [vmem:[%s14673_s7 + $0x4] sm:$0x3] }
 0xe01   : > { %v7289_v22 = vrot.slane %v7288_v19, 1  ;;  %v7516_v49 = vrot.slane %v7506_v53, %v15064_v61  ;;  %v7512_v45 = vrot.slane %v7506_v53, %v15063_v57 }
 0xe02   : > { %vm7298_vm11 = vcmp.gt.f32.partialorder %v7276_v24, 0.0  ;;  %v7283_v63 = vadd.f32 %v7282_v46, %v7281_v28  ;;  %v7296_v38 = vrot.slane %v7295_v0, 1  ;;  %v7401_v28 = vadd.f32 %v14363_v10, %v7327_v60 }
 0xe03   : > { %v7302_v56 = vsel %vm7298_vm11, %v7276_v24, 1.0  ;;  %v7290_v5 = vadd.f32 %v7289_v22, %v7288_v19  ;;  %v7406_v24 = vadd.f32 %v14369_v14, %v7327_v60 }
 0xe04   : > { %10528 = vrcp.f32 %v7302_v56  ;;  %vm7299_vm4 = vcmp.gt.f32.partialorder %v7283_v63, 0.0  ;;  %v7297_v4 = vadd.f32 %v7296_v38, %v7295_v0  ;;  %v7411_v38 = vadd.f32 %v14367_v54, %v7327_v60 }
 0xe05   : > { %v7303_v25 = vsel %vm7299_vm4, %v7283_v63, 1.0  ;;  %vm7300_vm3 = vcmp.gt.f32.partialorder %v7290_v5, 0.0 }
 0xe06   : > { %10530 = vrcp.f32 %v7303_v25  ;;  %v7304_v55 = vsel %vm7300_vm3, %v7290_v5, 1.0  ;;  %vm7301_vm10 = vcmp.gt.f32.partialorder %v7297_v4, 0.0 }
 0xe07   : > { %10532 = vrcp.f32 %v7304_v55  ;;  %v7305_v41 = vsel %vm7301_vm10, %v7297_v4, 1.0 }
 0xe08   : > { %10534 = vrcp.f32 %v7305_v41 }
 0xe0e   : > { %v10529_v3 = vpop.eup %10528 }
 0xe0f   : > { %v7307_v40 = vmul.f32 %v10529_v3, %v7266_v47  ;;  %v7495_v47 = vld [vmem:[%s14672_s6 + $0x20] sm:$0xff] }
 0xe10   : > { %v10531_v8 = vpop.eup %10530  ;;  %v9998_v18 = vpack.i.bf16 %v7495_v47, %v14220_v34  ;;  %v14428_v34 = vld [vmem:[%s14673_s7 + $0x5] ss:$0 sm:$0xff] }
 0xe11   : > { %v10533_v30 = vpop.eup %10532  ;;  %7416 = vperm.xlu1 %9857, %v7307_v40   ;;  %v7309_v2 = vmul.f32 %v10531_v8, %v7267_v32  ;;  %v14393_v32 = vld [vmem:[%s14672_s6 + $0x28] sm:$0xff] }
 0xe12   : > { %v10535_v39 = vpop.eup %10534  ;;  %v7311_v52 = vmul.f32 %v10533_v30, %v7268_v26  ;;  %v9978_v7 = vpack.i.bf16 %v14393_v32, %v7495_v47 }
 0xe13   : > { %7421 = vperm.xlu0 %9856, %v7309_v2   ;;  %v7313_v26 = vmul.f32 %v10535_v39, %v7269_v20  ;;  %v14411_v20 = vld [vmem:[%s14672_s6 + $0xa8] sm:$0xff] }
 0xe14   : > { %v9988_v13 = vpack.i.bf16 %v14411_v20, %v7499_v12 }
 0xe15   : > { %7426 = vperm.xlu1 %9857, %v7311_v52  }
 0xe17   : > { %7431 = vperm.xlu0 %9856, %v7313_v26  }
 0xe19   : > { %9984 = vrot.lane.b32.xlu1 %v9983_v36, %s10742_s0 }
 0xe1b   : > { %9979 = vrot.lane.b32.xlu0 %v9978_v7, %s10742_s0 }
 0xe1d   : > { %9994 = vrot.lane.b32.xlu1 %v9993_v50, %s10742_s0 }
 0xe1f   : > { %9989 = vrot.lane.b32.xlu0 %v9988_v13, %s10742_s0  ;;  %s8982_s0 = sshll.u32 %s10818_s9, 6  ;;  %s10751_s9 = smov [#allocation2]  }
 0xe21   : > { %9999 = vrot.lane.b32.xlu1 %v9998_v18, %s10744_s22 }
 0xe23   : > { %7648 = vrot.lane.b32.xlu0 %v14295_v9, %s14931_s12 }
 0xe25   : > { %10009 = vrot.lane.b32.xlu1 %v10008_v42, %s10744_s22 }
 0xe27   : > { %10004 = vrot.lane.b32.xlu0 %v10003_v51, %s10744_s22 }
 0xe29   : > { %7679 = vrot.lane.b32.xlu1 %v14428_v34, %s10743_s23  ;;  %s10746_s23 = smov 90  }
 0xe2b   : > { %10014 = vrot.lane.b32.xlu0 %v10013_v23, %s10744_s22  ;;  %s10661_s22 = sshll.u32 %s10751_s9, 4  ;;  %s10662_s22 = int_to_ptr.vmem [resolvable:$false] %s10661_s22 }
 0xe2d   : > { %7559 = vrot.lane.b32.xlu1 %v7516_v49, %s10745_s21 }
 0xe2f   : > { %7557 = vrot.lane.b32.xlu0 %v7512_v45, %s10745_s21 }
 0xe90   : > { %v7417_v16 = vpop.permute.xlu1 %7416 }
 0xe91   : > { %v7434_v1 = vmul.f32 %v7417_v16, %v7396_v21 }
 0xe92   : > { %v7422_v19 = vpop.permute.xlu0 %7421 }
 0xe93   : > { %v7438_v46 = vsel %vm1202_vm7, %v7434_v1, 0.0  ;;  %v7435_v0 = vmul.f32 %v7422_v19, %v7401_v28 }
 0xe94   : > { %v7439_v22 = vrot.slane %v7438_v46, 4  ;;  %v7427_v63 = vpop.permute.xlu1 %7426 }
 0xe95   : > { %v7445_v56 = vsel %vm1202_vm7, %v7435_v0, 0.0  ;;  %v7436_v5 = vmul.f32 %v7427_v63, %v7406_v24 }
 0xe96   : > { %v7440_v4 = vadd.f32 %v7439_v22, %v7438_v46  ;;  %v7446_v25 = vrot.slane %v7445_v56, 4  ;;  %v7432_v27 = vpop.permute.xlu0 %7431 }
 0xe97   : > { %v7452_v55 = vsel %vm1202_vm7, %v7436_v5, 0.0  ;;  %v7437_v10 = vmul.f32 %v7432_v27, %v7411_v38 }
 0xe98   : > { %v7441_v41 = vrot.slane %v7440_v4, 2  ;;  %v7447_v3 = vadd.f32 %v7446_v25, %v7445_v56  ;;  %v7453_v40 = vrot.slane %v7452_v55, 4  ;;  %v9985_v14 = vpop.permute.xlu1 %9984 }
 0xe99   : > { %v7459_v8 = vsel %vm1202_vm7, %v7437_v10, 0.0  ;;  %v9987_v30 = vunpack.i.h.bf16 %v9985_v14  ;;  %v9986_v2 = vunpack.i.l.bf16 %v9985_v14 }
 0xe9a   : > { %v7442_v39 = vadd.f32 %v7441_v41, %v7440_v4  ;;  %v7448_v54 = vrot.slane %v7447_v3, 2  ;;  %v7454_v52 = vadd.f32 %v7453_v40, %v7452_v55  ;;  %v7460_v31 = vrot.slane %v7459_v8, 4  ;;  %v9980_v47 = vpop.permute.xlu0 %9979 }
 0xe9b   : > { %v7672_v26 = vsel %vm7670_vm0, %v9986_v2, %v9987_v30  ;;  %v9982_v36 = vunpack.i.h.bf16 %v9980_v47  ;;  %v9981_v62 = vunpack.i.l.bf16 %v9980_v47 }
 0xe9c   : > { %v7443_v7 = vrot.slane %v7442_v39, 1  ;;  %v7449_v12 = vadd.f32 %v7448_v54, %v7447_v3  ;;  %v7455_v50 = vrot.slane %v7454_v52, 2  ;;  %v7461_v13 = vadd.f32 %v7460_v31, %v7459_v8  ;;  %v9995_v18 = vpop.permute.xlu1 %9994 }
 0xe9d   : > { %v7671_v42 = vsel %vm7670_vm0, %v9981_v62, %v9982_v36  ;;  %v9997_v51 = vunpack.i.h.bf16 %v9995_v18  ;;  %v9996_v23 = vunpack.i.l.bf16 %v9995_v18 }
 0xe9e   : > { %v7444_v53 = vadd.f32 %v7443_v7, %v7442_v39  ;;  %v7450_v49 = vrot.slane %v7449_v12, 1  ;;  %v7456_v45 = vadd.f32 %v7455_v50, %v7454_v52  ;;  %v7462_v60 = vrot.slane %v7461_v13, 2  ;;  %v9990_v21 = vpop.permute.xlu0 %9989 }
 0xe9f   : > { %v9728_v16 = vpack.c.bf16 %v7672_v26, %v7671_v42  ;;  %v9992_v28 = vunpack.i.h.bf16 %v9990_v21  ;;  %v9991_v1 = vunpack.i.l.bf16 %v9990_v21  ;;  %v7674_v0 = vsel %vm7670_vm0, %v9996_v23, %v9997_v51 }
 0xea0   : > { %v7470_v19 = vmin.f32 %v7444_v53, 0.0  ;;  %v7451_v24 = vadd.f32 %v7450_v49, %v7449_v12  ;;  %v7457_v46 = vrot.slane %v7456_v45, 1  ;;  %v10000_v22 = vpop.permute.xlu1 %9999  ;;  %v7463_v63 = vadd.f32 %v7462_v60, %v7461_v13 }
 0xea1   : > { %v7673_v38 = vsel %vm7670_vm0, %v9991_v1, %v9992_v28  ;;  %9729 = vmatpush3.bf16.msra.mxu1 %v9728_v16  ;;  %v10002_v56 = vunpack.i.h.bf16 %v10000_v22  ;;  %v10001_v55 = vunpack.i.l.bf16 %v10000_v22  ;;  %vm7466_vm11 = vcmp.gt.f32.partialorder %v7444_v53, 0.0 }
 0xea2   : > { %v7474_v5 = vmul.f32 1.442695, %v7470_v19  ;;  %v7471_v4 = vmin.f32 %v7451_v24, 0.0  ;;  %v7458_v25 = vadd.f32 %v7457_v46, %v7456_v45  ;;  %v7649_v27 = vpop.permute.xlu0 %7648  ;;  %9730 = vmatprep.subr.bf16.mxu1 %v15070_v29  ;;  %v7464_v10 = vrot.slane %v7463_v63, 1 }
 0xea3   : > { %v9731_v41 = vpack.c.bf16 %v7674_v0, %v7673_v38  ;;  %v7549_v2 = vsel %vm7548_vm15, %v10001_v55, %v10002_v56  ;;  %vm7467_vm4 = vcmp.gt.f32.partialorder %v7451_v24, 0.0  ;;  %vm7561_vm0 = vcmask 760832  }
 0xea4   : > { %10536 = vpow2.f32 %v7474_v5  ;;  %v7476_v3 = vmul.f32 1.442695, %v7471_v4  ;;  %v7472_v40 = vmin.f32 %v7458_v25, 0.0  ;;  %v10010_v14 = vpop.permute.xlu1 %10009  ;;  %v7465_v8 = vadd.f32 %v7464_v10, %v7463_v63 }
 0xea5   : > { %9732 = vmatpush3.bf16.msra.mxu1 %v9731_v41  ;;  %v10012_v54 = vunpack.i.h.bf16 %v10010_v14  ;;  %v10011_v26 = vunpack.i.l.bf16 %v10010_v14  ;;  %vm7468_vm3 = vcmp.gt.f32.partialorder %v7458_v25, 0.0 }
 0xea6   : > { %10538 = vpow2.f32 %v7476_v3  ;;  %v7478_v30 = vmul.f32 1.442695, %v7472_v40  ;;  %v10005_v39 = vpop.permute.xlu0 %10004  ;;  %v7473_v52 = vmin.f32 %v7465_v8, 0.0  ;;  %vm7469_vm10 = vcmp.gt.f32.partialorder %v7465_v8, 0.0 }
 0xea7   : > { %v10007_v31 = vunpack.i.h.bf16 %v10005_v39  ;;  %v10006_v47 = vunpack.i.l.bf16 %v10005_v39  ;;  %v7551_v50 = vsel %vm7548_vm15, %v10011_v26, %v10012_v54 }
 0xea8   : > { %10540 = vpow2.f32 %v7478_v30  ;;  %9534 = vmatmul.mubr.msk.f32.vlgmr.msra.gmra.mrb[78].mxu1 %vm1202_vm7, %v7649_v27  ;;  %v7480_v36 = vmul.f32 1.442695, %v7473_v52 }
 0xea9   : > { %9555 = vmatprep.mubr.msk.f32.mxu1 %vm1202_vm7, %v14310_v11  ;;  %v7550_v62 = vsel %vm7548_vm15, %v10006_v47, %v10007_v31 }
 0xeaa   : > { %v9722_v7 = vpack.c.bf16 %v7550_v62, %v7549_v2  ;;  %v10015_v12 = vpop.permute.xlu0 %10014  ;;  %10542 = vpow2.f32 %v7480_v36  ;;  %v10023_v36 = vpack.i.bf16 %v14385_v35, %v14393_v32  ;;  %v10033_v62 = vpack.i.bf16 %v14402_v43, %v14411_v20 }
 0xeab   : > { %v10017_v13 = vunpack.i.h.bf16 %v10015_v12  ;;  %v10016_v18 = vunpack.i.l.bf16 %v10015_v12 }
 0xeac   : > { %9723 = vmatpush3.bf16.msra.mxu0 %v9722_v7 }
 0xead   : > { %v7552_v42 = vsel %vm7548_vm15, %v10016_v18, %v10017_v13  ;;  %9724 = vmatprep.subr.bf16.mxu0 %v15070_v29 }
 0xeae   : > { %v10537_v51 = vpop.eup %10536  ;;  %v9725_v23 = vpack.c.bf16 %v7552_v42, %v7551_v50  ;;  %v7558_v14 = vpop.permute.xlu0 %7557 }
 0xeaf   : > { %v8955_v49 = vadd.f32 -1.0, %v10537_v51 }
 0xeb0   : > { %v10539_v45 = vpop.eup %10538  ;;  %9726 = vmatpush3.bf16.msra.mxu0 %v9725_v23 }
 0xeb1   : > { %v7486_v60 = vsel %vm7466_vm11, %v7444_v53, %v8955_v49  ;;  %v8956_v21 = vadd.f32 -1.0, %v10539_v45  ;;  %9733 = vmatprep.subr.bf16.mxu0 %v15070_v29 }
 0xeb2   : > { %v10541_v16 = vpop.eup %10540  ;;  %v7490_v19 = vmax.f32 %v7486_v60, 0.0 }
 0xeb3   : > { %v7487_v28 = vsel %vm7467_vm4, %v7451_v24, %v8956_v21  ;;  %v8957_v1 = vadd.f32 -1.0, %v10541_v16  ;;  %v7680_v24 = vpop.permute.xlu1 %7679 }
 0xeb4   : > { %v7491_v46 = vmax.f32 %v7487_v28, 0.0  ;;  %v10543_v0 = vpop.eup %10542 }
 0xeb5   : > { %v7488_v22 = vsel %vm7468_vm3, %v7458_v25, %v8957_v1  ;;  %v8958_v38 = vadd.f32 -1.0, %v10543_v0  ;;  %vm15095_vm3 = vcmask 7168  }
 0xeb6   : > { %v7492_v63 = vmax.f32 %v7488_v22, 0.0  ;;  %v7521_v56 = vsel %vm3902_vm14, %v7491_v46, %v7490_v19 }
 0xeb7   : > { %v7489_v5 = vsel %vm7469_vm10, %v7465_v8, %v8958_v38  ;;  %v7560_v40 = vpop.permute.xlu1 %7559  ;;  %vm15096_vm10 = vmmov %vm15095_vm3 }
 0xeb8   : > { %v7522_v53 = vsel %vm3904_vm5, %v7492_v63, %v7521_v56  ;;  %v7493_v4 = vmax.f32 %v7489_v5, 0.0  ;;  %v7562_v8 = vsel %vm7561_vm0, %v7558_v14, %v7560_v40 }
 0xeba   : > { %v7523_v27 = vsel %vm3906_vm9, %v7493_v4, %v7522_v53 }
 0xebb   : > { %9523 = vmatmul.mubr.msk.f32.vlgmr.msra.gmra.mrb[64].mxu0 %vm1202_vm7, %v7523_v27 }
 0xebc   : > { %9544 = vmatprep.mubr.msk.f32.mxu0 %vm10741_vm8, %v15078_v59 }
 0xf7b   : > { %v7750_v55 = vpop.f32.mrb[78].mxu1 }
 0xf7c   : > { %v7751_v10 = vadd.f32 %v7750_v55, %v7680_v24  ;;  %v9535_v25 = vpop.f32.mrb[79].mxu1 }
 0xf7e   : > { %7762 = vrot.lane.b32.xlu0 %v7751_v10, %s14929_s26 }
 0xf8e   : > { %v7632_v41 = vpop.f32.mrb[64].mxu0 }
 0xf8f   : > { %v9524_v3 = vpop.f32.mrb[65].mxu0  ;;  %v7633_v30 = vadd.f32 %v7632_v41, %v7562_v8 }
 0xf91   : > { %v7754_v2 = vadd.f32 %v7751_v10, %v7633_v30 }
 0xf93   : > { %v8962_v39 = vmul.f32 -1.442695, %v7754_v2 }
 0xf95   : > { %10544 = vpow2.f32 %v8962_v39 }
 0xf9f   : > { %v10545_v54 = vpop.eup %10544 }
 0xfa0   : > { %v7758_v52 = vadd.f32 1.0, %v10545_v54 }
 0xfa2   : > { %10546 = vrcp.f32 %v7758_v52 }
 0xfac   : > { %v10547_v31 = vpop.eup %10546 }
 0xfad   : > { %v7772_v21 = vsub.f32 1.0, %v10547_v31  ;;  %v7779_v28 = vmul.f32 %v10547_v31, %v14295_v9 }
 0xff0   : > { %v7763_v47 = vpop.permute.xlu0 %7762 }
 0xff1   : > { %v7765_v26 = vmul.f32 %v10547_v31, %v7763_v47 }
 0xff3   : > { %7767 = vrot.lane.b32.xlu1 %v7765_v26, %s14929_s26 }
 0xff7   : > { %10019 = vrot.lane.b32.xlu1 %v10023_v36, %s10746_s23 }
 0xffb   : > { %10029 = vrot.lane.b32.xlu1 %v10033_v62, %s10746_s23 }
0x1065   : > { %v7768_v7 = vpop.permute.xlu1 %7767 }
0x1066   : > { %v7770_v12 = vadd.f32 %v7768_v7, %v7633_v30 }
0x1068   : > { %10548 = vtanh.f32 %v7770_v12 }
0x1069   : > { %v10020_v13 = vpop.permute.xlu1 %10019 }
0x106a   : > { %v10022_v18 = vunpack.i.h.bf16 %v10020_v13  ;;  %v10021_v42 = vunpack.i.l.bf16 %v10020_v13 }
0x106c   : > { %v9734_v51 = vpack.c.bf16 %v10022_v18, %v10021_v42 }
0x106d   : > { %v10030_v23 = vpop.permute.xlu1 %10029 }
0x106e   : > { %v10032_v49 = vunpack.i.h.bf16 %v10030_v23  ;;  %v10031_v45 = vunpack.i.l.bf16 %v10030_v23  ;;  %9735 = vmatpush3.bf16.msra.mxu0 %v9734_v51 }
0x106f   : > { %9736 = vmatprep.subr.bf16.mxu0 %v15070_v29 }
0x1070   : > { %v9737_v60 = vpack.c.bf16 %v10032_v49, %v10031_v45 }
0x1072   : > { %v10549_v50 = vpop.eup %10548  ;;  %9738 = vmatpush3.bf16.msra.mxu0 %v9737_v60 }
0x1073   : > { %7774 = vrot.lane.b32.xlu0 %v10549_v50, %s14931_s12 }
0x1077   : > { %10024 = vrot.lane.b32.xlu0 %v10023_v36, %s10747_s18 }
0x107b   : > { %10034 = vrot.lane.b32.xlu0 %v10033_v62, %s10747_s18  ;;  %s10750_s18 = smov 56  }
0x107f   : > { %10039 = vrot.lane.b32.xlu0 %v10023_v36, %s10748_s25 }
0x1083   : > { %8029 = vrot.lane.b32.xlu0 %v14428_v34, %s10749_s20  ;;  %v8140_v34 = vld [vmem:[%s14673_s7 + $0x5] sm:$0x3] }
0x1084   : > { %v8149_v10 = vrot.slane %v8140_v34, %v15064_v61  ;;  %v8145_v25 = vrot.slane %v8140_v34, %v15063_v57 }
0x1087   : > { %8164 = vrot.lane.b32.xlu0 %v8149_v10, %s14940_s10 }
0x10e5   : > { %v7775_v16 = vpop.permute.xlu0 %7774 }
0x10e6   : > { %v7777_v1 = vmul.f32 %v7775_v16, %v7772_v21 }
0x10e8   : > { %v14475_v19 = vadd.f32 %v7779_v28, %v7777_v1 }
0x10e9   : > { %v10025_v46 = vpop.permute.xlu0 %10024 }
0x10ea   : > { %v7781_v0 = vmax.f32 %v14475_v19, 0.0  ;;  %v10027_v22 = vunpack.i.h.bf16 %v10025_v46  ;;  %v10026_v63 = vunpack.i.l.bf16 %v10025_v46 }
0x10ec   : > { %v9739_v38 = vpack.c.bf16 %v10027_v22, %v10026_v63  ;;  %7783 = vrot.lane.b32.xlu1 %v7781_v0, %s14931_s12 }
0x10ed   : > { %v10035_v56 = vpop.permute.xlu0 %10034 }
0x10ee   : > { %v10037_v5 = vunpack.i.h.bf16 %v10035_v56  ;;  %v10036_v53 = vunpack.i.l.bf16 %v10035_v56  ;;  %9740 = vmatprep.subr.bf16.mxu1 %v9739_v38 }
0x10ef   : > { %9742 = vmatpush3.bf16.msra.mxu1 %v9739_v38 }
0x10f0   : > { %v9743_v4 = vpack.c.bf16 %v10037_v5, %v10036_v53  ;;  %10044 = vrot.lane.b32.xlu1 %v10033_v62, %s10748_s25 }
0x10f1   : > { %v10040_v9 = vpop.permute.xlu0 %10039 }
0x10f2   : > { %9744 = vmatprep.subr.bf16.mxu1 %v9743_v4  ;;  %v10042_v27 = vunpack.i.h.bf16 %v10040_v9  ;;  %v10041_v24 = vunpack.i.l.bf16 %v10040_v9 }
0x10f3   : > { %9746 = vmatpush3.bf16.msra.mxu1 %v9743_v4 }
0x10f4   : > { %v9747_v55 = vpack.c.bf16 %v10042_v27, %v10041_v24  ;;  %9755 = vmatprep.subr.bf16.mxu1 %v15070_v29  ;;  %8162 = vrot.lane.b32.xlu1 %v8145_v25, %s14940_s10 }
0x10f6   : > { %9556 = vmatmul.mubr.msk.f32.vlgmr.msra.gmra.mrb[80].mxu1 %vm1202_vm7, %v14319_v33  ;;  %9748 = vmatprep.subr.bf16.mxu0 %v9747_v55 }
0x10f7   : > { %9558 = vmatprep.mubr.msk.f32.mxu1 %vm1202_vm7, %v14314_v44 }
0x10fa   : > { %9559 = vmatmul.mubr.msk.f32.gmra.mrb[82].mxu1 %vm1202_vm7, %v14325_v58 }
0x10fb   : > { %9583 = vmatprep.mubr.msk.f32.mxu1 %vm10741_vm8, %v15078_v59 }
0x115e   : > { %v7784_v41 = vpop.permute.xlu1 %7783 }
0x115f   : > { %9545 = vmatmul.mubr.msk.f32.vlgmr.msra.gmra.mrb[66].mxu0 %vm1202_vm7, %v7784_v41 }
0x1160   : > { %9569 = vmatprep.mubr.msk.f32.mxu0 %vm1202_vm7, %v14310_v11  ;;  %9750 = vmatpush3.bf16.msra.mxu0 %v9747_v55 }
0x1162   : > { %v10045_v3 = vpop.permute.xlu1 %10044 }
0x1163   : > { %v10047_v40 = vunpack.i.h.bf16 %v10045_v3  ;;  %v10046_v14 = vunpack.i.l.bf16 %v10045_v3 }
0x1165   : > { %v9751_v8 = vpack.c.bf16 %v10047_v40, %v10046_v14 }
0x1167   : > { %9752 = vmatprep.subr.bf16.mxu0 %v9751_v8 }
0x1168   : > { %9754 = vmatpush3.bf16.msra.mxu0 %v9751_v8 }
0x1169   : > { %9761 = vmatprep.subr.bf16.mxu0 %v15070_v29 }
0x116b   : > { %9570 = vmatmul.mubr.msk.f32.vlgmr.msra.gmra.mrb[68].mxu0 %vm1202_vm7, %v14319_v33 }
0x116c   : > { %9572 = vmatprep.mubr.msk.f32.mxu0 %vm1202_vm7, %v14314_v44 }
0x116f   : > { %9573 = vmatmul.mubr.msk.f32.gmra.mrb[70].mxu0 %vm1202_vm7, %v14325_v58  ;;  %v8030_v58 = vpop.permute.xlu0 %8029 }
0x1170   : > { %9594 = vmatprep.mubr.msk.f32.mxu0 %vm10741_vm8, %v15078_v59 }
0x11c9   : > { %v9557_v11 = vpop.f32.mrb[80].mxu1 }
0x11ca   : > { %v7980_v30 = vpop.f32.mrb[81].mxu1 }
0x11cd   : > { %v9560_v2 = vpop.f32.mrb[82].mxu1 }
0x11ce   : > { %v7990_v39 = vpop.f32.mrb[83].mxu1 }
0x1232   : > { %v7865_v54 = vpop.f32.mrb[66].mxu0 }
0x1233   : > { %v7876_v52 = vrot.slane %v7865_v54, %v15086_v37  ;;  %v9546_v31 = vpop.f32.mrb[67].mxu0 }
0x1235   : > { %v7877_v47 = vcombine.high %v7876_v52, %v7876_v52  ;;  %v7884_v33 = vrot.slane %v7876_v52, %v15086_v37 }
0x1237   : > { %v7891_v26 = vrot.slane %v7877_v47, %v15086_v37  ;;  %v7892_v44 = vcombine.high %v7884_v33, %v7884_v33  ;;  %v8002_v36 = vrot.slane %v7884_v33, %v15063_v57 }
0x1239   : > { %v7893_v62 = vcombine.high %v7891_v26, %v7891_v26  ;;  %v8006_v59 = vrot.slane %v7891_v26, %v15063_v57  ;;  %v8010_v7 = vrot.slane %v7892_v44, %v15063_v57  ;;  %v8019_v12 = vadd.f32 %v8002_v36, %v7980_v30 }
0x123b   : > { %v8014_v50 = vrot.slane %v7893_v62, %v15063_v57  ;;  %v8020_v13 = vadd.f32 %v9557_v11, %v8006_v59  ;;  %v8021_v18 = vadd.f32 %v8010_v7, %v7990_v39  ;;  %v8032_v42 = vadd.f32 %v8030_v58, %v8019_v12 }
0x123d   : > { %v8022_v51 = vadd.f32 %v9560_v2, %v8014_v50  ;;  %v8033_v23 = vadd.f32 %v8030_v58, %v8020_v13  ;;  %v8034_v49 = vadd.f32 %v8030_v58, %v8021_v18  ;;  %vm8036_vm8 = vcmp.ge.f32.partialorder %v8032_v42, 0.0 }
0x123e   : > { %v8040_v37 = vmul.f32 0.01, %v8032_v42  ;;  %v14516_v45 = vpop.f32.mrb[68].mxu0 }
0x123f   : > { %v8035_v60 = vadd.f32 %v8030_v58, %v8022_v51  ;;  %vm8037_vm15 = vcmp.ge.f32.partialorder %v8033_v23, 0.0  ;;  %vm8038_vm11 = vcmp.ge.f32.partialorder %v8034_v49, 0.0  ;;  %v8041_v21 = vmul.f32 0.01, %v8033_v23  ;;  %v14518_v16 = vpop.f32.mrb[69].mxu0 }
0x1240   : > { %v8042_v28 = vmul.f32 0.01, %v8034_v49  ;;  %v8044_v1 = vsel %vm8036_vm8, %v8032_v42, %v8040_v37 }
0x1241   : > { %vm8039_vm4 = vcmp.ge.f32.partialorder %v8035_v60, 0.0  ;;  %v8043_v46 = vmul.f32 0.01, %v8035_v60  ;;  %v8045_v0 = vsel %vm8037_vm15, %v8033_v23, %v8041_v21  ;;  %v8048_v22 = vsel %vm7218_vm2, %v8044_v1, -1e+30  ;;  %vm15097_vm2 = vmmov %vm15095_vm3  ;;  %v10654_v21 = vld [vmem:[%s14197_s19 + $0x8] sm:$0xff] }
0x1242   : > { %v8046_v63 = vsel %vm8038_vm11, %v8034_v49, %v8042_v28  ;;  %v8049_v38 = vsel %vm7219_vm6, %v8045_v0, -1e+30  ;;  %v8052_v56 = vsel %vm15095_vm3, %v8048_v22, -inf  ;;  %v14525_v5 = vpop.f32.mrb[70].mxu0  ;;  %vm15098_vm6 = vmmov %vm15097_vm2  ;;  %v10653_v49 = vld [vmem:[%s14197_s19] sm:$0xff]  ;;  %v10655_v0 = vld [vmem:[%s14197_s19 + $0x10] sm:$0xff] }
0x1243   : > { %v8047_v53 = vsel %vm8039_vm4, %v8035_v60, %v8043_v46  ;;  %v8050_v4 = vsel %vm7220_vm12, %v8046_v63, -1e+30  ;;  %v8053_v9 = vrot.slane %v8052_v56, 4  ;;  %v8059_v27 = vsel %vm15096_vm10, %v8049_v38, -inf  ;;  %v14530_v24 = vpop.f32.mrb[71].mxu0  ;;  %vm15100_vm12 = vmmov %vm15097_vm2 }
0x1244   : > { %v8051_v17 = vsel %vm7221_vm13, %v8047_v53, -1e+30  ;;  %v8060_v55 = vrot.slane %v8059_v27, 4  ;;  %v8066_v48 = vsel %vm15097_vm2, %v8050_v4, -inf  ;;  %vm15099_vm13 = vmmov %vm15097_vm2  ;;  %vm8499_vm10 = vcmask 719872  }
0x1245   : > { %v8054_v34 = vmax.f32 %v8052_v56, %v8053_v9  ;;  %v8067_v10 = vrot.slane %v8066_v48, 4  ;;  %v8073_v25 = vsel %vm15098_vm6, %v8051_v17, -inf  ;;  %v10656_v56 = vld [vmem:[%s14197_s19 + $0x18] sm:$0xff]  ;;  %vm15101_vm0 = vmmov %vm15097_vm2  ;;  %s15103_s19 = smov 124   ;;  %vm8383_vm2 = vcmask 457728  }
0x1246   : > { %v8061_v41 = vmax.f32 %v8059_v27, %v8060_v55  ;;  %v8074_v3 = vrot.slane %v8073_v25, 4  ;;  %vm15102_vm8 = vmmov %vm15101_vm0 }
0x1247   : > { %v8055_v40 = vrot.slane %v8054_v34, 2  ;;  %v8068_v6 = vmax.f32 %v8066_v48, %v8067_v10 }
0x1248   : > { %v8062_v14 = vrot.slane %v8061_v41, 2  ;;  %v8075_v8 = vmax.f32 %v8073_v25, %v8074_v3 }
0x1249   : > { %v8056_v11 = vmax.f32 %v8054_v34, %v8055_v40  ;;  %v8069_v30 = vrot.slane %v8068_v6, 2 }
0x124a   : > { %v8063_v2 = vmax.f32 %v8061_v41, %v8062_v14  ;;  %v8076_v39 = vrot.slane %v8075_v8, 2 }
0x124b   : > { %v8057_v54 = vrot.slane %v8056_v11, 1  ;;  %v8070_v15 = vmax.f32 %v8068_v6, %v8069_v30 }
0x124c   : > { %v8064_v52 = vrot.slane %v8063_v2, 1  ;;  %v8077_v31 = vmax.f32 %v8075_v8, %v8076_v39 }
0x124d   : > { %v8058_v47 = vmax.f32 %v8056_v11, %v8057_v54  ;;  %v8071_v33 = vrot.slane %v8070_v15, 1 }
0x124e   : > { %v8065_v26 = vmax.f32 %v8063_v2, %v8064_v52  ;;  %v8078_v44 = vrot.slane %v8077_v31, 1 }
0x124f   : > { %v8072_v36 = vmax.f32 %v8070_v15, %v8071_v33  ;;  %v8080_v58 = vsub.f32 %v8048_v22, %v8058_v47 }
0x1250   : > { %v8079_v62 = vmax.f32 %v8077_v31, %v8078_v44  ;;  %v8081_v59 = vsub.f32 %v8049_v38, %v8065_v26 }
0x1251   : > { %v8082_v7 = vsub.f32 %v8050_v4, %v8072_v36  ;;  %v8084_v12 = vmul.f32 1.442695, %v8080_v58 }
0x1252   : > { %v8083_v50 = vsub.f32 %v8051_v17, %v8079_v62  ;;  %v8086_v13 = vmul.f32 1.442695, %v8081_v59 }
0x1253   : > { %10550 = vpow2.f32 %v8084_v12  ;;  %v8088_v18 = vmul.f32 1.442695, %v8082_v7  ;;  %v8336_v12 = vld [vmem:[%s14672_s6 + $0x70] sm:$0xff] }
0x1254   : > { %10552 = vpow2.f32 %v8086_v13  ;;  %v8090_v42 = vmul.f32 1.442695, %v8083_v50  ;;  %v8342_v50 = vld [vmem:[%s14672_s6 + $0x78] sm:$0xff] }
0x1255   : > { %10554 = vpow2.f32 %v8088_v18 }
0x1256   : > { %10556 = vpow2.f32 %v8090_v42  ;;  %v10053_v42 = vpack.i.bf16 %v8342_v50, %v8336_v12 }
0x125d   : > { %v10551_v51 = vpop.eup %10550 }
0x125e   : > { %v10553_v23 = vpop.eup %10552  ;;  %v8092_v37 = vmul.f32 %v10653_v49, %v10551_v51  ;;  %v8334_v51 = vld [vmem:[%s14672_s6 + $0x30] sm:$0xff] }
0x125f   : > { %v10555_v60 = vpop.eup %10554  ;;  %v8093_v28 = vmul.f32 %v10654_v21, %v10553_v23  ;;  %v8341_v23 = vld [vmem:[%s14672_s6 + $0x38] sm:$0xff]  ;;  %v8338_v21 = vld [vmem:[%s14672_s6 + $0xb0] sm:$0xff] }
0x1260   : > { %v10557_v1 = vpop.eup %10556  ;;  %v8096_v46 = vsel %vm15099_vm13, %v8092_v37, 0.0  ;;  %v8094_v22 = vmul.f32 %v10655_v0, %v10555_v60  ;;  %v10048_v60 = vpack.i.bf16 %v8341_v23, %v8334_v51 }
0x1261   : > { %v8097_v63 = vrot.slane %v8096_v46, 4  ;;  %v8103_v38 = vsel %vm15100_vm12, %v8093_v28, 0.0  ;;  %v8095_v53 = vmul.f32 %v10656_v56, %v10557_v1  ;;  %v8340_v1 = vld [vmem:[%s14672_s6 + $0xf0] sm:$0xff]  ;;  %v10073_v56 = vpack.i.bf16 %v8336_v12, %v14385_v35  ;;  %v8977_v35 = vld [vmem:[%s14673_s7 + $0x6] ss:$0 sm:$0xff] }
0x1262   : > { %v8104_v4 = vrot.slane %v8103_v38, 4  ;;  %v8110_v9 = vsel %vm15101_vm0, %v8094_v22, 0.0 }
0x1263   : > { %v8098_v27 = vadd.f32 %v8097_v63, %v8096_v46  ;;  %v8111_v17 = vrot.slane %v8110_v9, 4  ;;  %v8117_v55 = vsel %vm15102_vm8, %v8095_v53, 0.0  ;;  %v8344_v46 = vld [vmem:[%s14672_s6 + $0xf8] sm:$0xff] }
0x1264   : > { %v8105_v48 = vadd.f32 %v8104_v4, %v8103_v38  ;;  %v8118_v34 = vrot.slane %v8117_v55, 4  ;;  %v10063_v63 = vpack.i.bf16 %v8344_v46, %v8340_v1  ;;  %v10068_v38 = vpack.i.bf16 %v8334_v51, %v14393_v32 }
0x1265   : > { %v8099_v10 = vrot.slane %v8098_v27, 2  ;;  %v8112_v25 = vadd.f32 %v8111_v17, %v8110_v9  ;;  %v10083_v4 = vpack.i.bf16 %v8340_v1, %v14402_v43  ;;  %v8346_v9 = vld [vmem:[%s14673_s7 + $0x6] sm:$0x3]  ;;  %v8165_v43 = vpop.permute.xlu0 %8164 }
0x1266   : > { %v8106_v41 = vrot.slane %v8105_v48, 2  ;;  %v8119_v3 = vadd.f32 %v8118_v34, %v8117_v55  ;;  %v8475_v32 = vrot.slane %v8346_v9, %v15064_v61 }
0x1267   : > { %v8100_v40 = vadd.f32 %v8099_v10, %v8098_v27  ;;  %v8113_v6 = vrot.slane %v8112_v25, 2  ;;  %v8471_v27 = vrot.slane %v8346_v9, %v15063_v57 }
0x1268   : > { %v8107_v14 = vadd.f32 %v8106_v41, %v8105_v48  ;;  %v8120_v8 = vrot.slane %v8119_v3, 2 }
0x1269   : > { %v8101_v11 = vrot.slane %v8100_v40, 1  ;;  %v8114_v30 = vadd.f32 %v8113_v6, %v8112_v25 }
0x126a   : > { %v8108_v2 = vrot.slane %v8107_v14, 1  ;;  %v8121_v39 = vadd.f32 %v8120_v8, %v8119_v3 }
0x126b   : > { %v8102_v54 = vadd.f32 %v8101_v11, %v8100_v40  ;;  %v8115_v15 = vrot.slane %v8114_v30, 1 }
0x126c   : > { %v8109_v52 = vadd.f32 %v8108_v2, %v8107_v14  ;;  %v8122_v31 = vrot.slane %v8121_v39, 1 }
0x126d   : > { %vm8124_vm15 = vcmp.gt.f32.partialorder %v8102_v54, 0.0  ;;  %v8116_v47 = vadd.f32 %v8115_v15, %v8114_v30 }
0x126e   : > { %v8128_v33 = vsel %vm8124_vm15, %v8102_v54, 1.0  ;;  %vm8125_vm11 = vcmp.gt.f32.partialorder %v8109_v52, 0.0  ;;  %v8123_v26 = vadd.f32 %v8122_v31, %v8121_v39 }
0x126f   : > { %10558 = vrcp.f32 %v8128_v33  ;;  %v8129_v44 = vsel %vm8125_vm11, %v8109_v52, 1.0  ;;  %vm8126_vm4 = vcmp.gt.f32.partialorder %v8116_v47, 0.0 }
0x1270   : > { %10560 = vrcp.f32 %v8129_v44  ;;  %v8130_v36 = vsel %vm8126_vm4, %v8116_v47, 1.0  ;;  %vm8127_vm3 = vcmp.gt.f32.partialorder %v8123_v26, 0.0 }
0x1271   : > { %10562 = vrcp.f32 %v8130_v36  ;;  %v8131_v58 = vsel %vm8127_vm3, %v8123_v26, 1.0 }
0x1272   : > { %10564 = vrcp.f32 %v8131_v58 }
0x1279   : > { %v10559_v62 = vpop.eup %10558 }
0x127a   : > { %v10561_v59 = vpop.eup %10560  ;;  %v8133_v7 = vmul.f32 %v10559_v62, %v8092_v37 }
0x127b   : > { %v10563_v13 = vpop.eup %10562  ;;  %v8135_v18 = vmul.f32 %v10561_v59, %v8093_v28  ;;  %v8343_v28 = vld [vmem:[%s14672_s6 + $0xb8] sm:$0xff] }
0x127c   : > { %8255 = vperm.xlu1 %9857, %v8133_v7   ;;  %v8137_v49 = vmul.f32 %v10563_v13, %v8094_v22  ;;  %v10565_v37 = vpop.eup %10564  ;;  %v10058_v22 = vpack.i.bf16 %v8343_v28, %v8338_v21 }
0x127d   : > { %8260 = vperm.xlu0 %9856, %v8135_v18   ;;  %v8139_v0 = vmul.f32 %v10565_v37, %v8095_v53  ;;  %v10078_v53 = vpack.i.bf16 %v8338_v21, %v14411_v20  ;;  %v8163_v20 = vpop.permute.xlu1 %8162 }
0x127e   : > { %v8166_v17 = vsel %vm5729_vm1, %v8163_v20, %v8165_v43 }
0x127f   : > { %v8235_v55 = vadd.f32 %v14518_v16, %v8166_v17  ;;  %v8240_v61 = vadd.f32 %v14516_v45, %v8166_v17  ;;  %v8245_v25 = vadd.f32 %v14530_v24, %v8166_v17  ;;  %v8250_v54 = vadd.f32 %v14525_v5, %v8166_v17 }
0x1280   : > { %8265 = vperm.xlu1 %9857, %v8137_v49  }
0x1281   : > { %10054 = vrot.lane.b32.xlu0 %v10053_v42, %s10748_s25 }
0x1284   : > { %10049 = vrot.lane.b32.xlu1 %v10048_v60, %s10748_s25 }
0x1285   : > { %8270 = vperm.xlu0 %9856, %v8139_v0  }
0x1288   : > { %10059 = vrot.lane.b32.xlu1 %v10058_v22, %s10748_s25 }
0x1289   : > { %10064 = vrot.lane.b32.xlu0 %v10063_v63, %s10748_s25  ;;  %s10663_s25 = scalar_lea.vmem %s10662_s22, 128 }
0x128c   : > { %8477 = vrot.lane.b32.xlu1 %v14475_v19, %s14931_s12 }
0x128d   : > { %10069 = vrot.lane.b32.xlu0 %v10068_v38, %s10750_s18 }
0x1290   : > { %10074 = vrot.lane.b32.xlu1 %v10073_v56, %s10750_s18 }
0x1291   : > { %10079 = vrot.lane.b32.xlu0 %v10078_v53, %s10750_s18 }
0x1294   : > { %10084 = vrot.lane.b32.xlu1 %v10083_v4, %s10750_s18  ;;  %s14624_s18 = scalar_lea.hbm %s14674_s8, %s8982_s0 }
0x1295   : > { %8508 = vrot.lane.b32.xlu0 %v8471_v27, %s14940_s10 }
0x1298   : > { %8510 = vrot.lane.b32.xlu1 %v8475_v32, %s14940_s10  ;;  %s341_s10 = sand.u32 1, %s10711_s28  }
0x1299   : > { %8392 = vrot.lane.b32.xlu0 %v8977_v35, %s15103_s19  ;;  %s8731_s13 = sshll.u32 %s341_s10, 2  ;;  %s8619_s20 = scalar_lea.sflag [#allocation3], %s341_s10 }
0x129a   : > { %s343_s24 = scalar_lea.vmem [#allocation2], %s8731_s13 }
0x12fb   : > { %v8256_v48 = vpop.permute.xlu1 %8255 }
0x12fc   : > { %v8273_v57 = vmul.f32 %v8256_v48, %v8235_v55  ;;  %v8261_v34 = vpop.permute.xlu0 %8260 }
0x12fd   : > { %v8274_v10 = vmul.f32 %v8261_v34, %v8240_v61 }
0x12fe   : > { %v8277_v41 = vsel %vm1202_vm7, %v8273_v57, 0.0 }
0x12ff   : > { %v8278_v3 = vrot.slane %v8277_v41, 4  ;;  %v8284_v40 = vsel %vm1202_vm7, %v8274_v10, 0.0  ;;  %v8266_v6 = vpop.permute.xlu1 %8265 }
0x1300   : > { %v8285_v14 = vrot.slane %v8284_v40, 4  ;;  %v8275_v8 = vmul.f32 %v8266_v6, %v8245_v25  ;;  %v10055_v11 = vpop.permute.xlu0 %10054 }
0x1301   : > { %v8279_v30 = vadd.f32 %v8278_v3, %v8277_v41  ;;  %v10057_v45 = vunpack.i.h.bf16 %v10055_v11  ;;  %v10056_v39 = vunpack.i.l.bf16 %v10055_v11 }
0x1302   : > { %v8286_v2 = vadd.f32 %v8285_v14, %v8284_v40  ;;  %v8291_v16 = vsel %vm1202_vm7, %v8275_v8, 0.0 }
0x1303   : > { %v8280_v15 = vrot.slane %v8279_v30, 2  ;;  %v8292_v52 = vrot.slane %v8291_v16, 4  ;;  %v10050_v24 = vpop.permute.xlu1 %10049  ;;  %v8501_v59 = vsel %vm8499_vm10, %v10056_v39, %v10057_v45 }
0x1304   : > { %v8287_v31 = vrot.slane %v8286_v2, 2  ;;  %v10052_v47 = vunpack.i.h.bf16 %v10050_v24  ;;  %v10051_v33 = vunpack.i.l.bf16 %v10050_v24  ;;  %v8271_v26 = vpop.permute.xlu0 %8270 }
0x1305   : > { %v8281_v44 = vadd.f32 %v8280_v15, %v8279_v30  ;;  %v8293_v36 = vadd.f32 %v8292_v52, %v8291_v16  ;;  %v8276_v58 = vmul.f32 %v8271_v26, %v8250_v54 }
0x1306   : > { %v8288_v62 = vadd.f32 %v8287_v31, %v8286_v2  ;;  %v8500_v7 = vsel %vm8499_vm10, %v10051_v33, %v10052_v47 }
0x1307   : > { %v8282_v12 = vrot.slane %v8281_v44, 1  ;;  %v8294_v50 = vrot.slane %v8293_v36, 2  ;;  %v9762_v13 = vpack.c.bf16 %v8501_v59, %v8500_v7  ;;  %v8298_v5 = vsel %vm1202_vm7, %v8276_v58, 0.0  ;;  %v10060_v18 = vpop.permute.xlu1 %10059 }
0x1308   : > { %v8289_v42 = vrot.slane %v8288_v62, 1  ;;  %v8299_v51 = vrot.slane %v8298_v5, 4  ;;  %v10062_v23 = vunpack.i.h.bf16 %v10060_v18  ;;  %v10061_v49 = vunpack.i.l.bf16 %v10060_v18  ;;  %v10065_v37 = vpop.permute.xlu0 %10064 }
0x1309   : > { %v8283_v60 = vadd.f32 %v8282_v12, %v8281_v44  ;;  %v8295_v21 = vadd.f32 %v8294_v50, %v8293_v36  ;;  %v10067_v28 = vunpack.i.h.bf16 %v10065_v37  ;;  %v10066_v1 = vunpack.i.l.bf16 %v10065_v37  ;;  %9763 = vmatpush3.bf16.msra.mxu0 %v9762_v13 }
0x130a   : > { %v8290_v46 = vadd.f32 %v8289_v42, %v8288_v62  ;;  %v8300_v0 = vadd.f32 %v8299_v51, %v8298_v5  ;;  %v8502_v22 = vsel %vm8499_vm10, %v10061_v49, %v10062_v23  ;;  %9764 = vmatprep.subr.bf16.mxu0 %v15070_v29 }
0x130b   : > { %v8309_v63 = vmin.f32 %v8283_v60, 0.0  ;;  %v8296_v38 = vrot.slane %v8295_v21, 1  ;;  %v8503_v56 = vsel %vm8499_vm10, %v10066_v1, %v10067_v28  ;;  %v8478_v53 = vpop.permute.xlu1 %8477  ;;  %vm8305_vm6 = vcmp.gt.f32.partialorder %v8283_v60, 0.0 }
0x130c   : > { %v8310_v4 = vmin.f32 %v8290_v46, 0.0  ;;  %v8301_v9 = vrot.slane %v8300_v0, 2  ;;  %v9765_v32 = vpack.c.bf16 %v8503_v56, %v8502_v22  ;;  %v10070_v27 = vpop.permute.xlu0 %10069  ;;  %vm8306_vm13 = vcmp.gt.f32.partialorder %v8290_v46, 0.0 }
0x130d   : > { %v8313_v35 = vmul.f32 1.442695, %v8309_v63  ;;  %v8297_v43 = vadd.f32 %v8296_v38, %v8295_v21  ;;  %v10072_v20 = vunpack.i.h.bf16 %v10070_v27  ;;  %v10071_v17 = vunpack.i.l.bf16 %v10070_v27 }
0x130e   : > { %v8315_v55 = vmul.f32 1.442695, %v8310_v4  ;;  %v8302_v61 = vadd.f32 %v8301_v9, %v8300_v0  ;;  %9766 = vmatpush3.bf16.msra.mxu0 %v9765_v32 }
0x130f   : > { %10566 = vpow2.f32 %v8313_v35  ;;  %v8311_v48 = vmin.f32 %v8297_v43, 0.0  ;;  %v10075_v57 = vpop.permute.xlu1 %10074  ;;  %v8384_v34 = vsel %vm8383_vm2, %v10071_v17, %v10072_v20  ;;  %vm8307_vm12 = vcmp.gt.f32.partialorder %v8297_v43, 0.0 }
0x1310   : > { %10568 = vpow2.f32 %v8315_v55  ;;  %v8303_v10 = vrot.slane %v8302_v61, 1  ;;  %v10077_v25 = vunpack.i.h.bf16 %v10075_v57  ;;  %v10076_v41 = vunpack.i.l.bf16 %v10075_v57  ;;  %v10080_v3 = vpop.permute.xlu0 %10079 }
0x1311   : > { %v8317_v40 = vmul.f32 1.442695, %v8311_v48  ;;  %9595 = vmatmul.mubr.msk.f32.vlgmr.msra.gmra.mrb[72].mxu0 %vm1202_vm7, %v8478_v53  ;;  %v10082_v6 = vunpack.i.h.bf16 %v10080_v3  ;;  %v10081_v14 = vunpack.i.l.bf16 %v10080_v3 }
0x1312   : > { %v8304_v8 = vadd.f32 %v8303_v10, %v8302_v61  ;;  %v8385_v11 = vsel %vm8383_vm2, %v10076_v41, %v10077_v25 }
0x1313   : > { %10570 = vpow2.f32 %v8317_v40  ;;  %v9756_v30 = vpack.c.bf16 %v8385_v11, %v8384_v34  ;;  %v10085_v2 = vpop.permute.xlu1 %10084  ;;  %v8386_v54 = vsel %vm8383_vm2, %v10081_v14, %v10082_v6 }
0x1314   : > { %v8312_v16 = vmin.f32 %v8304_v8, 0.0  ;;  %v10087_v45 = vunpack.i.h.bf16 %v10085_v2  ;;  %v10086_v39 = vunpack.i.l.bf16 %v10085_v2  ;;  %vm8308_vm0 = vcmp.gt.f32.partialorder %v8304_v8, 0.0  ;;  %v8509_v37 = vpop.permute.xlu0 %8508 }
0x1315   : > { %9757 = vmatpush3.bf16.msra.mxu1 %v9756_v30 }
0x1316   : > { %v8319_v15 = vmul.f32 1.442695, %v8312_v16  ;;  %v8387_v52 = vsel %vm8383_vm2, %v10086_v39, %v10087_v45  ;;  %9758 = vmatprep.subr.bf16.mxu1 %v15070_v29 }
0x1317   : > { %v9759_v24 = vpack.c.bf16 %v8387_v52, %v8386_v54  ;;  %v8511_v49 = vpop.permute.xlu1 %8510 }
0x1318   : > { %10572 = vpow2.f32 %v8319_v15  ;;  %v8393_v22 = vpop.permute.xlu0 %8392 }
0x1319   : > { %v10567_v31 = vpop.eup %10566  ;;  %9760 = vmatpush3.bf16.msra.mxu1 %v9759_v24 }
0x131a   : > { %v10569_v47 = vpop.eup %10568  ;;  %v8973_v33 = vadd.f32 -1.0, %v10567_v31 }
0x131b   : > { %v8974_v26 = vadd.f32 -1.0, %v10569_v47 }
0x131c   : > { %v8325_v44 = vsel %vm8305_vm6, %v8283_v60, %v8973_v33  ;;  %v8512_v60 = vsel %vm5729_vm1, %v8509_v37, %v8511_v49 }
0x131d   : > { %v10571_v36 = vpop.eup %10570  ;;  %v8326_v58 = vsel %vm8306_vm13, %v8290_v46, %v8974_v26  ;;  %v8329_v62 = vmax.f32 %v8325_v44, 0.0 }
0x131e   : > { %v8330_v59 = vmax.f32 %v8326_v58, 0.0  ;;  %v8975_v7 = vadd.f32 -1.0, %v10571_v36 }
0x1320   : > { %v8327_v12 = vsel %vm8307_vm12, %v8297_v43, %v8975_v7  ;;  %v8356_v50 = vsel %vm3902_vm14, %v8330_v59, %v8329_v62 }
0x1321   : > { %v8331_v29 = vmax.f32 %v8327_v12, 0.0 }
0x1322   : > { %v10573_v13 = vpop.eup %10572 }
0x1323   : > { %v8976_v5 = vadd.f32 -1.0, %v10573_v13  ;;  %v8357_v18 = vsel %vm3904_vm5, %v8331_v29, %v8356_v50 }
0x1325   : > { %v8328_v42 = vsel %vm8308_vm0, %v8304_v8, %v8976_v5 }
0x1326   : > { %v8332_v51 = vmax.f32 %v8328_v42, 0.0 }
0x1328   : > { %v8358_v23 = vsel %vm3906_vm9, %v8332_v51, %v8357_v18 }
0x1329   : > { %9584 = vmatmul.mubr.msk.f32.vlgmr.msra.gmra.mrb[84].mxu1 %vm1202_vm7, %v8358_v23  ;;  %vm8616_vm7 = vcmask 257024  }
0x13e4   : > { %v8582_v21 = vpop.f32.mrb[72].mxu0 }
0x13e5   : > { %v8583_v28 = vadd.f32 %v8582_v21, %v8512_v60  ;;  %v9596_v1 = vpop.f32.mrb[73].mxu0 }
0x13e7   : > { %8594 = vrot.lane.b32.xlu1 %v8583_v28, %s14929_s26 }
0x13fc   : > { %v8463_v46 = vpop.f32.mrb[84].mxu1 }
0x13fd   : > { %v9585_v0 = vpop.f32.mrb[85].mxu1  ;;  %v8464_v63 = vadd.f32 %v8463_v46, %v8393_v22 }
0x13ff   : > { %v8586_v38 = vadd.f32 %v8583_v28, %v8464_v63 }
0x1401   : > { %v8980_v56 = vmul.f32 -1.442695, %v8586_v38 }
0x1403   : > { %10574 = vpow2.f32 %v8980_v56 }
0x140d   : > { %v10575_v53 = vpop.eup %10574 }
0x140e   : > { %v8590_v4 = vadd.f32 1.0, %v10575_v53 }
0x1410   : > { %10576 = vrcp.f32 %v8590_v4 }
0x141a   : > { %v10577_v9 = vpop.eup %10576 }
0x141b   : > { %v8604_v17 = vsub.f32 1.0, %v10577_v9  ;;  %v8610_v61 = vmul.f32 %v10577_v9, %v14475_v19 }
0x1459   : > { %v8595_v32 = vpop.permute.xlu1 %8594 }
0x145a   : > { %v8597_v27 = vmul.f32 %v10577_v9, %v8595_v32 }
0x145c   : > { %8599 = vrot.lane.b32.xlu0 %v8597_v27, %s14929_s26  ;;  %s8632_s26 = sshll.u32 %s343_s24, 4  ;;  %s14626_s26 = int_to_ptr.vmem [resolvable:$true] %s8632_s26 }
0x145d   : > { %p10664_p0 = scmp.lt.s32.totalorder %s14626_s26, %s10662_s22 }
0x14ce   : > { %v8600_v35 = vpop.permute.xlu0 %8599 }
0x14cf   : > { %v8602_v43 = vadd.f32 %v8600_v35, %v8464_v63 }
0x14d1   : > { %10578 = vtanh.f32 %v8602_v43 }
0x14db   : > { %v10579_v20 = vpop.eup %10578 }
0x14dc   : > { %8606 = vrot.lane.b32.xlu1 %v10579_v20, %s14931_s12 }
0x154e   : > { %v8607_v55 = vpop.permute.xlu1 %8606 }
0x154f   : > { %v8609_v48 = vmul.f32 %v8607_v55, %v8604_v17 }
0x1551   : > { %v8611_v57 = vadd.f32 %v8610_v61, %v8609_v48 }
0x1553   : > { %8613 = vrot.lane.b32.xlu0 %v8611_v57, %s14931_s12  ;;  %s10657_s12 = scalar_lea.vmem %s14626_s26, 64 }
0x1554   : > { %p10658_p11 = scmp.ne.s32.totalorder %s14626_s26, %s10657_s12  ;;  %p10665_p1 = scmp.lt.s32.totalorder %s10663_s25, %s10657_s12 }
0x1556   : > { %p10659_p12 = pnand %p10658_p11, %p10835_p5  ;;  %p10666_p2 = por %p10665_p1, %p10664_p0 }
0x1558   : > { %p10660_p13 = pneg %p10659_p12 }
0x155a   : > { %p10667_p3 = pnand %p10666_p2, %p10660_p13 }
0x15c5   : > { %v8614_v19 = vpop.permute.xlu0 %8613 }
0x15c6   : > { %8617 = vst.msk [vmem:[%s343_s24] sm:$0xf] %vm8616_vm7, %v8614_v19 }
0x15c7   : > { %10670 = shalt.err (!%p10667_p3)
}
0x15c8   : > { %s10671_s17 = scalar_lea.hbm %s14624_s18, 64  ;;  %s10675_s13 = scalar_lea.hbm %s14674_s8, 128 }
0x15c9   : > { %p10672_p4 = scmp.ne.s32.totalorder %s14624_s18, %s10671_s17  ;;  %p10676_p9 = scmp.lt.u32.totalorder %s14624_s18, %s14674_s8 }
0x15ca   : > { %p10677_p10 = scmp.lt.u32.totalorder %s10675_s13, %s10671_s17  ;;  %p10679_p12 = scmp.lt.u32.totalorder %s10671_s17, %s14624_s18 }
0x15cb   : > { %p10673_p7 = pnand %p10672_p4, %p10835_p5 }
0x15cc   : > { %p10678_p11 = por %p10677_p10, %p10676_p9 }
0x15cd   : > { %p10674_p8 = pneg %p10673_p7 }
0x15ce   : > { %p10680_p13 = por %p10679_p12, %p10678_p11 }
0x15d0   : > { %p10681_p0 = pnand %p10680_p13, %p10674_p8 }
0x15d2   : > { %10684 = shalt.err (!%p10681_p0)
}
0x15d3   : > { %9767 = dma.vmem_to_hbm [thread:$0]  (%p10835_p5), %s14626_s26, 64, %s14624_s18, %s8619_s20  }
0x15d4 PF: > { %p9773_p1 = scmp.ge.s32.totalorder %s10719_s30, 2  ;;  %s8644_s21 = sand.u32 1, %s10707_s27  }
0x15d5   : > { %s8645_s23 = scalar_lea.sflag [#allocation3], %s8644_s21 }
0x15d6   : > { %p9770_p2 = pnand %p9773_p1, %p10839_p6 }
0x15d8   : > { %10702 = dma.done.wait (!%p9770_p2), %s8645_s23, 64  }
0x15d9   : > { %10704 = vsyncadd (!%p9770_p2), %s8645_s23, 4294967232  ;;  %p18_p3 = scmp.ge.s32.totalorder %s10822_s11, 4   ;;  %s15104_s27 = smov %s10711_s28 }
0x15da   : > { %s15105_s28 = smov %s10715_s29  ;;  %s15106_s29 = smov %s10833_s14 }
0x15db   : > { %s15107_s30 = smov %s10822_s11  ;;  %20 = sbr.rel (!%p18_p3) target bundleno = 5 (0x5), region = 96 }
0x15e2   :  { %8650 = vsyncpa [#allocation3], 1 }
0x15e3   :  { %8652 = vsyncpa [#allocation3 + $0x1], 1 }

</bundles_post_ra>
